<compile_context>
chip_gen: v7x
topology: tpu7x:2x2x1
jax: 0.10.0
libtpu: 0.0.40
codegen_flags: <defaults>
</compile_context>

<pallas_src>
import functools

import numpy as np
import jax
import jax.numpy as jnp
from jax.experimental import pallas as pl
from jax.experimental.pallas import tpu as pltpu

K = 5  # conv kernel size

_COMPILER_PARAMS = pltpu.CompilerParams(
    dimension_semantics=("parallel",),      # batch tiles shard across TCs (v7x)
    vmem_limit_bytes=32 * 1024 * 1024,      # explicit budget; actual use << this
)


def _batch_tile(b):
    """Conv/FC batch tile: 32-64 for big batches, >=2 grid steps when possible."""
    for tb in (64, 32, 16, 8):
        if b >= 2 * tb:
            return tb
    return 8


# ----------------------------------------------------------------------------
# Pallas kernels
# ----------------------------------------------------------------------------
def conv1_pool_kernel(lhs_e_ref, lhs_o_ref, a_ref, scale_ref, shift_ref, o_ref):
    """conv1 + BN(eval) + ReLU + maxpool2x2 for one batch tile.

    lhs_e_ref / lhs_o_ref : (tb*14, 160)  h-im2col rows (even / odd conv rows)
    a_ref                 : (160, 576)    K-stacked banded lane-conv weights
    scale_ref / shift_ref : (1, 576)      folded conv-bias + BN (zero pad cols)
    o_ref                 : (tb*14, 288)  pooled output in layer-2's padded
                                          (18 w-blocks x 16 ch) lane layout
    """
    nhalf = o_ref.shape[-1]
    a = a_ref[...]
    scale = scale_ref[...]
    shift = shift_ref[...]

    def conv_half(lhs_ref):
        y = jnp.dot(lhs_ref[...], a, preferred_element_type=jnp.float32)
        y = jnp.maximum(y * scale + shift, 0.0)          # BN(eval) + ReLU
        return jnp.maximum(y[:, :nhalf], y[:, nhalf:])   # maxpool over w pairs

    pe = conv_half(lhs_e_ref)                    # even conv rows (fully first,
    po = conv_half(lhs_o_ref)                    # then odd: limits live f32)
    o_ref[...] = jnp.maximum(pe, po).astype(o_ref.dtype)   # maxpool over h


def conv2_fc_kernel(lhs_e_ref, lhs_o_ref, a_ref, scale_ref, shift_ref,
                    fcw_ref, fcb_ref, fc2w_ref, fc2b_ref,
                    logits_ref, emb_ref):
    """conv2 + BN + ReLU + maxpool + fc + L2-normalize + fc2 for one batch tile.

    lhs_e_ref / lhs_o_ref : (7, tb, 1440)  layer-2 h-im2col, pooled-row major
    a_ref                 : (1440, 448)
    scale_ref / shift_ref : (1, 448)
    fcw_ref               : (7, 224, 128)  fc weights split by pooled row
    fcb_ref               : (1, 128)
    fc2w_ref / fc2b_ref   : (128, 128) / (1, 128)   (classes padded to 128)
    logits_ref / emb_ref  : (tb, 128) f32
    """
    jb, tb, kdim = lhs_e_ref.shape
    nfull = a_ref.shape[1]
    nhalf = nfull // 2
    f32 = jnp.float32

    a = a_ref[...]
    scale = scale_ref[...]
    shift = shift_ref[...]

    def conv_half(lhs_ref):
        y = jnp.dot(lhs_ref[...].reshape(jb * tb, kdim), a,
                    preferred_element_type=f32)
        y = jnp.maximum(y * scale + shift, 0.0)
        return jnp.maximum(y[:, :nhalf], y[:, nhalf:])

    pe = conv_half(lhs_e_ref)
    po = conv_half(lhs_o_ref)
    pooled = jnp.maximum(pe, po)         # (7*tb, 224) f32, row = j*tb + b

    # fc over the 7 pooled rows: each row block is an aligned contiguous slice.
    h = jnp.dot(pooled[0:tb].astype(jnp.bfloat16), fcw_ref[0],
                preferred_element_type=f32)
    for j in range(1, jb):
        h = h + jnp.dot(pooled[j * tb:(j + 1) * tb].astype(jnp.bfloat16),
                        fcw_ref[j], preferred_element_type=f32)
    h = h + fcb_ref[...]

    # F.normalize: x / max(||x||, 1e-12)  ==  x * rsqrt(max(||x||^2, 1e-24))
    ss = jnp.sum(h * h, axis=1, keepdims=True)
    emb_ref[...] = h * jax.lax.rsqrt(jnp.maximum(ss, 1e-24))
    logits_ref[...] = (jnp.dot(h.astype(fc2w_ref.dtype), fc2w_ref[...],
                               preferred_element_type=f32) + fc2b_ref[...])


# ----------------------------------------------------------------------------
# pallas_call wrappers
# ----------------------------------------------------------------------------
def _conv1_pool(lhs_e, lhs_o, a1, scale1, shift1, *, tb):
    m, kdim = lhs_e.shape              # (Bp*14, 160)
    nfull = a1.shape[1]                # 576
    nhalf = nfull // 2                 # 288
    rows = tb * 14
    return pl.pallas_call(
        conv1_pool_kernel,
        out_shape=jax.ShapeDtypeStruct((m, nhalf), jnp.bfloat16),
        grid_spec=pltpu.PrefetchScalarGridSpec(
            num_scalar_prefetch=0,
            grid=(m // rows,),
            in_specs=[
                pl.BlockSpec((rows, kdim), lambda i: (i, 0)),
                pl.BlockSpec((rows, kdim), lambda i: (i, 0)),
                pl.BlockSpec((kdim, nfull), lambda i: (0, 0)),   # resident
                pl.BlockSpec((1, nfull), lambda i: (0, 0)),
                pl.BlockSpec((1, nfull), lambda i: (0, 0)),
            ],
            out_specs=pl.BlockSpec((rows, nhalf), lambda i: (i, 0)),
        ),
        compiler_params=_COMPILER_PARAMS,
    )(lhs_e, lhs_o, a1, scale1, shift1)


def _conv2_fc(lhs_e, lhs_o, a2, scale2, shift2, fcw, fcb, fc2w, fc2b, *, tb):
    jb, bp, kdim = lhs_e.shape         # (7, Bp, 1440)
    nfull = a2.shape[1]                # 448
    nr, nh, ne = fcw.shape             # (7, 224, 128)
    nc = fc2w.shape[1]                 # 128 (padded classes)
    return pl.pallas_call(
        conv2_fc_kernel,
        out_shape=(jax.ShapeDtypeStruct((bp, nc), jnp.float32),
                   jax.ShapeDtypeStruct((bp, ne), jnp.float32)),
        grid_spec=pltpu.PrefetchScalarGridSpec(
            num_scalar_prefetch=0,
            grid=(bp // tb,),
            in_specs=[
                pl.BlockSpec((jb, tb, kdim), lambda i: (0, i, 0)),
                pl.BlockSpec((jb, tb, kdim), lambda i: (0, i, 0)),
                pl.BlockSpec((kdim, nfull), lambda i: (0, 0)),     # resident
                pl.BlockSpec((1, nfull), lambda i: (0, 0)),
                pl.BlockSpec((1, nfull), lambda i: (0, 0)),
                pl.BlockSpec((nr, nh, ne), lambda i: (0, 0, 0)),   # resident
                pl.BlockSpec((1, ne), lambda i: (0, 0)),
                pl.BlockSpec((ne, nc), lambda i: (0, 0)),
                pl.BlockSpec((1, nc), lambda i: (0, 0)),
            ],
            out_specs=(pl.BlockSpec((tb, nc), lambda i: (i, 0)),
                       pl.BlockSpec((tb, ne), lambda i: (i, 0))),
        ),
        compiler_params=_COMPILER_PARAMS,
    )(lhs_e, lhs_o, a2, scale2, shift2, fcw, fcb, fc2w, fc2b)


# ----------------------------------------------------------------------------
# One-time parameter preparation (host side, outside the jitted forward)
# ----------------------------------------------------------------------------
def _build_lane_conv(w_oihw, *, w_out, w_pad, out_blocks, out_off):
    """Expand (Cout,Cin,5,5) conv weights into a K-stacked banded lane-conv
    matrix A of shape (5*w_pad*Cin, 2*out_blocks*Cout) with

      A[di*w_pad*Cin + wp*Cin + ci, (half*out_blocks + out_off + u)*Cout + co]
        = W[co, ci, di, dj]   with wo = 2u + half, wp = wo + dj, 0 <= dj < 5.

    Columns: first half = even conv-w outputs, second half = odd, so the
    w-direction maxpool is a lane-half maximum; columns outside
    [out_off, out_off+w_out/2) stay zero (padding blocks for the next layer).
    """
    c_out, c_in, k, _ = w_oihw.shape
    u_cnt = w_out // 2
    a = np.zeros((k, w_pad * c_in, 2 * out_blocks * c_out), np.float32)
    for di in range(k):
        for half in range(2):
            for u in range(u_cnt):
                wo = 2 * u + half
                n0 = (half * out_blocks + out_off + u) * c_out
                for dj in range(k):
                    wp = wo + dj
                    a[di, wp * c_in:(wp + 1) * c_in, n0:n0 + c_out] = \
                        w_oihw[:, :, di, dj].T
    return a.reshape(k * w_pad * c_in, 2 * out_blocks * c_out)


def prepare_params(params, eps=1e-5):
    p = {k: np.asarray(v, np.float32) for k, v in params.items()}

    def fold_bn(bias, gamma, beta, mean, var):
        scale = gamma / np.sqrt(var + eps)
        return scale, beta + (bias - mean) * scale

    s1, t1 = fold_bn(p["conv1_b"], p["bn1_gamma"], p["bn1_beta"],
                     p["bn1_mean"], p["bn1_var"])
    s2, t2 = fold_bn(p["conv2_b"], p["bn2_gamma"], p["bn2_beta"],
                     p["bn2_mean"], p["bn2_var"])

    # layer 1: Cin=1; output columns emitted in layer-2's padded 18-block
    # layout (blocks 0,1,16,17 are zero pad) -> (160, 576)
    a1 = _build_lane_conv(p["conv1_w"], w_out=28, w_pad=32,
                          out_blocks=18, out_off=2)
    # layer 2: Cin=16 -> (1440, 448)
    a2 = _build_lane_conv(p["conv2_w"], w_out=14, w_pad=18,
                          out_blocks=7, out_off=0)

    def spread(v, blocks, off, u_cnt):
        out = np.zeros((2, blocks, v.shape[0]), np.float32)
        out[:, off:off + u_cnt, :] = v[None, None, :]
        return out.reshape(1, -1)

    # Fold the PyTorch NCHW flatten (index c*49+h*7+w) into the natural
    # (h, w*32+c) order and split by pooled row h -> (7, 224, 128).
    w_fc = (p["fc_w"].reshape(-1, 32, 7, 7)
            .transpose(2, 3, 1, 0).reshape(7, 7 * 32, -1))

    nc = p["fc2_w"].shape[0]
    fc2_w = np.zeros((p["fc2_w"].shape[1], 128), np.float32)
    fc2_w[:, :nc] = p["fc2_w"].T
    fc2_b = np.zeros((1, 128), np.float32)
    fc2_b[0, :nc] = p["fc2_b"]

    bf16, f32 = jnp.bfloat16, jnp.float32
    return {
        "a1": jnp.asarray(a1, bf16),
        "scale1": jnp.asarray(spread(s1, 18, 2, 14), f32),
        "shift1": jnp.asarray(spread(t1, 18, 2, 14), f32),
        "a2": jnp.asarray(a2, bf16),
        "scale2": jnp.asarray(spread(s2, 7, 0, 7), f32),
        "shift2": jnp.asarray(spread(t2, 7, 0, 7), f32),
        "fc_w": jnp.asarray(w_fc, bf16),
        "fc_b": jnp.asarray(p["fc_b"][None, :], f32),
        "fc2_w": jnp.asarray(fc2_w, bf16),
        "fc2_b": jnp.asarray(fc2_b, f32),
    }


# ----------------------------------------------------------------------------
# Forward pass
# ----------------------------------------------------------------------------
def _im2col_h(xpad, start, nwin):
    """(B, Hp, L) -> (B, nwin, 5*L): window j = padded rows start+2j..start+2j+4."""
    stop = start + 2 * (nwin - 1) + 1
    cols = [xpad[:, start + d:stop + d:2, :] for d in range(K)]
    return jnp.concatenate(cols, axis=-1)


@functools.partial(jax.jit, static_argnames=("num_classes",))
def cnn_fmnist_sup_forward(x_nchw, prep, num_classes=10):
    b = x_nchw.shape[0]
    tb = _batch_tile(b)
    bp = ((b + tb - 1) // tb) * tb
    bf16 = jnp.bfloat16

    # ---- layer 1: h-only im2col (even / odd conv rows), built by XLA --------
    x = x_nchw[:, 0, :, :].astype(bf16)                        # (B, 28, 28)
    if bp != b:
        x = jnp.pad(x, ((0, bp - b), (0, 0), (0, 0)))
    xpad = jnp.pad(x, ((0, 0), (2, 2), (2, 2)))                # (Bp, 32, 32)
    lhs1_e = _im2col_h(xpad, 0, 14).reshape(bp * 14, K * 32)   # (Bp*14, 160)
    lhs1_o = _im2col_h(xpad, 1, 14).reshape(bp * 14, K * 32)

    p1 = _conv1_pool(lhs1_e, lhs1_o, prep["a1"], prep["scale1"],
                     prep["shift1"], tb=tb)                    # (Bp*14, 288) bf16

    # ---- layer 2: row-pad + h-im2col in pooled-row-major layout -------------
    p1 = p1.reshape(bp, 14, 288)
    zrows = jnp.zeros((bp, 2, 288), bf16)
    p1p = jnp.concatenate([zrows, p1, zrows], axis=1)          # (Bp, 18, 288)
    lhs2_e = _im2col_h(p1p, 0, 7).transpose(1, 0, 2)           # (7, Bp, 1440)
    lhs2_o = _im2col_h(p1p, 1, 7).transpose(1, 0, 2)

    logits, emb = _conv2_fc(lhs2_e, lhs2_o, prep["a2"], prep["scale2"],
                            prep["shift2"], prep["fc_w"], prep["fc_b"],
                            prep["fc2_w"], prep["fc2_b"], tb=tb)
    return logits[:b, :num_classes], emb[:b, :]


# ----------------------------------------------------------------------------
# Pure-JAX reference (f32) + parameter init + demo
# ----------------------------------------------------------------------------
def reference_forward(x_nchw, params, eps=1e-5):
    def layer(x, w, bias, gamma, beta, mean, var):
        y = jax.lax.conv_general_dilated(
            x, w, window_strides=(1, 1), padding=((2, 2), (2, 2)),
            dimension_numbers=("NCHW", "OIHW", "NCHW"))
        y = y + bias[None, :, None, None]
        scale = gamma / jnp.sqrt(var + eps)
        y = ((y - mean[None, :, None, None]) * scale[None, :, None, None]
             + beta[None, :, None, None])
        y = jnp.maximum(y, 0.0)
        bb, cc, hh, ww = y.shape
        return y.reshape(bb, cc, hh // 2, 2, ww // 2, 2).max(axis=(3, 5))

    x = x_nchw.astype(jnp.float32)
    x = layer(x, params["conv1_w"], params["conv1_b"], params["bn1_gamma"],
              params["bn1_beta"], params["bn1_mean"], params["bn1_var"])
    x = layer(x, params["conv2_w"], params["conv2_b"], params["bn2_gamma"],
              params["bn2_beta"], params["bn2_mean"], params["bn2_var"])
    xf = x.reshape(x.shape[0], -1)
    h = xf @ params["fc_w"].T + params["fc_b"]
    nrm = jnp.sqrt(jnp.sum(h * h, axis=1, keepdims=True))
    emb = h / jnp.maximum(nrm, 1e-12)
    logits = h @ params["fc2_w"].T + params["fc2_b"]
    return logits, emb


def init_params(key, num_classes=10, embedding_len=128):
    ks = jax.random.split(key, 8)
    f32 = jnp.float32
    return {
        "conv1_w": 0.10 * jax.random.normal(ks[0], (16, 1, 5, 5), f32),
        "conv1_b": 0.10 * jax.random.normal(ks[1], (16,), f32),
        "bn1_gamma": jnp.ones((16,), f32),
        "bn1_beta": jnp.zeros((16,), f32),
        "bn1_mean": jnp.zeros((16,), f32),
        "bn1_var": jnp.ones((16,), f32),
        "conv2_w": 0.05 * jax.random.normal(ks[2], (32, 16, 5, 5), f32),
        "conv2_b": 0.05 * jax.random.normal(ks[3], (32,), f32),
        "bn2_gamma": jnp.ones((32,), f32),
        "bn2_beta": jnp.zeros((32,), f32),
        "bn2_mean": jnp.zeros((32,), f32),
        "bn2_var": jnp.ones((32,), f32),
        "fc_w": 0.02 * jax.random.normal(ks[4], (embedding_len, 7 * 7 * 32), f32),
        "fc_b": 0.02 * jax.random.normal(ks[5], (embedding_len,), f32),
        "fc2_w": 0.05 * jax.random.normal(ks[6], (num_classes, embedding_len), f32),
        "fc2_b": 0.05 * jax.random.normal(ks[7], (num_classes,), f32),
    }


if __name__ == "__main__":
    key = jax.random.PRNGKey(0)
    pkey, xkey = jax.random.split(key)
    params = init_params(pkey)
    prep = prepare_params(params)

    # FMNIST-shaped input (spatial must be 28 for the 7*7*32 fc): batch=2
    x = jax.random.normal(xkey, (2, 1, 28, 28), jnp.float32)

    logits, embedding = cnn_fmnist_sup_forward(x, prep, num_classes=10)
    logits, embedding = jax.block_until_ready((logits, embedding))

    assert logits.shape == (2, 10), logits.shape
    assert embedding.shape == (2, 128), embedding.shape
    assert bool(jnp.all(jnp.isfinite(logits)))
    assert bool(jnp.all(jnp.isfinite(embedding)))
    norms = jnp.sqrt(jnp.sum(embedding * embedding, axis=1))
    assert bool(jnp.all(jnp.abs(norms - 1.0) < 5e-3)), norms

    # numerical check against a pure-JAX f32 reference (bf16 matmul tolerance)
    ref_logits, ref_emb = reference_forward(x, params)
    np.testing.assert_allclose(np.asarray(embedding), np.asarray(ref_emb),
                               atol=0.05, rtol=0.1)
    np.testing.assert_allclose(np.asarray(logits), np.asarray(ref_logits),
                               atol=0.05, rtol=0.1)

    print("KERNEL_OK")
</pallas_src>

<mosaic_0001>
module attributes {stable_mosaic.version = 11 : i64} {
  func.func @conv1_pool_kernel(%arg0: i32, %arg1: memref<112x160xbf16, #tpu.memory_space<vmem>>, %arg2: memref<112x160xbf16, #tpu.memory_space<vmem>>, %arg3: memref<160x576xbf16, #tpu.memory_space<vmem>>, %arg4: memref<1x576xf32, #tpu.memory_space<vmem>>, %arg5: memref<1x576xf32, #tpu.memory_space<vmem>>, %arg6: memref<112x288xbf16, #tpu.memory_space<vmem>>) attributes {dimension_semantics = [#tpu.dimension_semantics<parallel>], iteration_bounds = array<i64: 1>, scalar_prefetch = 0 : i64, scratch_operands = 0 : i64, tpu.core_type = #tpu.core_type<tc>, window_params = [{transform_indices = @transform_0, window_bounds = array<i64: 112, 160>}, {transform_indices = @transform_1, window_bounds = array<i64: 112, 160>}, {pipeline_mode = #tpu.pipeline_mode<synchronous>, transform_indices = @transform_2, window_bounds = array<i64: 160, 576>}, {pipeline_mode = #tpu.pipeline_mode<synchronous>, transform_indices = @transform_3, window_bounds = array<i64: 1, 576>}, {pipeline_mode = #tpu.pipeline_mode<synchronous>, transform_indices = @transform_4, window_bounds = array<i64: 1, 576>}, {transform_indices = @transform_5, window_bounds = array<i64: 112, 288>}]} {
    %c0 = arith.constant 0 : index
    %c0_0 = arith.constant 0 : index
    %0 = vector.load %arg3[%c0, %c0_0] : memref<160x576xbf16, #tpu.memory_space<vmem>>, vector<160x576xbf16>
    %c0_1 = arith.constant 0 : index
    %c0_2 = arith.constant 0 : index
    %1 = vector.load %arg4[%c0_1, %c0_2] : memref<1x576xf32, #tpu.memory_space<vmem>>, vector<1x576xf32>
    %c0_3 = arith.constant 0 : index
    %c0_4 = arith.constant 0 : index
    %2 = vector.load %arg5[%c0_3, %c0_4] : memref<1x576xf32, #tpu.memory_space<vmem>>, vector<1x576xf32>
    %c0_5 = arith.constant 0 : index
    %c0_6 = arith.constant 0 : index
    %3 = vector.load %arg1[%c0_5, %c0_6] : memref<112x160xbf16, #tpu.memory_space<vmem>>, vector<112x160xbf16>
    %cst = arith.constant dense<0.000000e+00> : vector<112x576xf32>
    %4 = tpu.matmul %3, %0, %cst {dimension_numbers = #tpu.dot_dimension_numbers<[1], [0], [0], [1], [0, 0, 1, 1], [], []>} : vector<112x160xbf16>, vector<160x576xbf16>, vector<112x576xf32> -> vector<112x576xf32>
    %5 = vector.broadcast %1 : vector<1x576xf32> to vector<112x576xf32>
    %6 = arith.mulf %4, %5 : vector<112x576xf32>
    %7 = vector.broadcast %2 : vector<1x576xf32> to vector<112x576xf32>
    %8 = arith.addf %6, %7 : vector<112x576xf32>
    %cst_7 = arith.constant 0.000000e+00 : f32
    %9 = vector.broadcast %cst_7 : f32 to vector<112x576xf32>
    %10 = arith.maximumf %8, %9 : vector<112x576xf32>
    %11 = vector.extract_strided_slice %10 {offsets = [0, 0], sizes = [112, 288], strides = [1, 1]} : vector<112x576xf32> to vector<112x288xf32>
    %12 = vector.extract_strided_slice %10 {offsets = [0, 288], sizes = [112, 288], strides = [1, 1]} : vector<112x576xf32> to vector<112x288xf32>
    %13 = arith.maximumf %11, %12 : vector<112x288xf32>
    %c0_8 = arith.constant 0 : index
    %c0_9 = arith.constant 0 : index
    %14 = vector.load %arg2[%c0_8, %c0_9] : memref<112x160xbf16, #tpu.memory_space<vmem>>, vector<112x160xbf16>
    %cst_10 = arith.constant dense<0.000000e+00> : vector<112x576xf32>
    %15 = tpu.matmul %14, %0, %cst_10 {dimension_numbers = #tpu.dot_dimension_numbers<[1], [0], [0], [1], [0, 0, 1, 1], [], []>} : vector<112x160xbf16>, vector<160x576xbf16>, vector<112x576xf32> -> vector<112x576xf32>
    %16 = vector.broadcast %1 : vector<1x576xf32> to vector<112x576xf32>
    %17 = arith.mulf %15, %16 : vector<112x576xf32>
    %18 = vector.broadcast %2 : vector<1x576xf32> to vector<112x576xf32>
    %19 = arith.addf %17, %18 : vector<112x576xf32>
    %cst_11 = arith.constant 0.000000e+00 : f32
    %20 = vector.broadcast %cst_11 : f32 to vector<112x576xf32>
    %21 = arith.maximumf %19, %20 : vector<112x576xf32>
    %22 = vector.extract_strided_slice %21 {offsets = [0, 0], sizes = [112, 288], strides = [1, 1]} : vector<112x576xf32> to vector<112x288xf32>
    %23 = vector.extract_strided_slice %21 {offsets = [0, 288], sizes = [112, 288], strides = [1, 1]} : vector<112x576xf32> to vector<112x288xf32>
    %24 = arith.maximumf %22, %23 : vector<112x288xf32>
    %25 = arith.maximumf %13, %24 : vector<112x288xf32>
    %26 = arith.truncf %25 : vector<112x288xf32> to vector<112x288xbf16>
    %c0_12 = arith.constant 0 : index
    %c0_13 = arith.constant 0 : index
    %27 = vector.load %arg6[%c0_12, %c0_13] : memref<112x288xbf16, #tpu.memory_space<vmem>>, vector<112x288xbf16>
    tpu.vector_store %arg6[%c0_12, %c0_13], %26 {strides = array<i32>} : memref<112x288xbf16, #tpu.memory_space<vmem>>, vector<112x288xbf16>,
    return
  }
  func.func @transform_0(%arg0: i32) -> (i32, i32) {
    %c0_i32 = arith.constant 0 : i32
    %c0_i32_0 = arith.constant 0 : i32
    return %arg0, %c0_i32 : i32, i32
  }
  func.func @transform_1(%arg0: i32) -> (i32, i32) {
    %c0_i32 = arith.constant 0 : i32
    %c0_i32_0 = arith.constant 0 : i32
    return %arg0, %c0_i32 : i32, i32
  }
  func.func @transform_2(%arg0: i32) -> (i32, i32) {
    %c0_i32 = arith.constant 0 : i32
    %c0_i32_0 = arith.constant 0 : i32
    %c0_i32_1 = arith.constant 0 : i32
    return %c0_i32, %c0_i32_0 : i32, i32
  }
  func.func @transform_3(%arg0: i32) -> (i32, i32) {
    %c0_i32 = arith.constant 0 : i32
    %c0_i32_0 = arith.constant 0 : i32
    %c0_i32_1 = arith.constant 0 : i32
    return %c0_i32, %c0_i32_0 : i32, i32
  }
  func.func @transform_4(%arg0: i32) -> (i32, i32) {
    %c0_i32 = arith.constant 0 : i32
    %c0_i32_0 = arith.constant 0 : i32
    %c0_i32_1 = arith.constant 0 : i32
    return %c0_i32, %c0_i32_0 : i32, i32
  }
  func.func @transform_5(%arg0: i32) -> (i32, i32) {
    %c0_i32 = arith.constant 0 : i32
    %c0_i32_0 = arith.constant 0 : i32
    return %arg0, %c0_i32 : i32, i32
  }
}

module attributes {stable_mosaic.version = 11 : i64} {
  func.func @conv2_fc_kernel(%arg0: i32, %arg1: memref<7x8x1440xbf16, #tpu.memory_space<vmem>>, %arg2: memref<7x8x1440xbf16, #tpu.memory_space<vmem>>, %arg3: memref<1440x448xbf16, #tpu.memory_space<vmem>>, %arg4: memref<1x448xf32, #tpu.memory_space<vmem>>, %arg5: memref<1x448xf32, #tpu.memory_space<vmem>>, %arg6: memref<7x224x128xbf16, #tpu.memory_space<vmem>>, %arg7: memref<1x128xf32, #tpu.memory_space<vmem>>, %arg8: memref<128x128xbf16, #tpu.memory_space<vmem>>, %arg9: memref<1x128xf32, #tpu.memory_space<vmem>>, %arg10: memref<8x128xf32, #tpu.memory_space<vmem>>, %arg11: memref<8x128xf32, #tpu.memory_space<vmem>>) attributes {dimension_semantics = [#tpu.dimension_semantics<parallel>], iteration_bounds = array<i64: 1>, scalar_prefetch = 0 : i64, scratch_operands = 0 : i64, tpu.core_type = #tpu.core_type<tc>, window_params = [{transform_indices = @transform_0, window_bounds = array<i64: 7, 8, 1440>}, {transform_indices = @transform_1, window_bounds = array<i64: 7, 8, 1440>}, {pipeline_mode = #tpu.pipeline_mode<synchronous>, transform_indices = @transform_2, window_bounds = array<i64: 1440, 448>}, {pipeline_mode = #tpu.pipeline_mode<synchronous>, transform_indices = @transform_3, window_bounds = array<i64: 1, 448>}, {pipeline_mode = #tpu.pipeline_mode<synchronous>, transform_indices = @transform_4, window_bounds = array<i64: 1, 448>}, {pipeline_mode = #tpu.pipeline_mode<synchronous>, transform_indices = @transform_5, window_bounds = array<i64: 7, 224, 128>}, {pipeline_mode = #tpu.pipeline_mode<synchronous>, transform_indices = @transform_6, window_bounds = array<i64: 1, 128>}, {pipeline_mode = #tpu.pipeline_mode<synchronous>, transform_indices = @transform_7, window_bounds = array<i64: 128, 128>}, {pipeline_mode = #tpu.pipeline_mode<synchronous>, transform_indices = @transform_8, window_bounds = array<i64: 1, 128>}, {transform_indices = @transform_9, window_bounds = array<i64: 8, 128>}, {transform_indices = @transform_10, window_bounds = array<i64: 8, 128>}]} {
    %c0 = arith.constant 0 : index
    %c0_0 = arith.constant 0 : index
    %0 = vector.load %arg3[%c0, %c0_0] : memref<1440x448xbf16, #tpu.memory_space<vmem>>, vector<1440x448xbf16>
    %c0_1 = arith.constant 0 : index
    %c0_2 = arith.constant 0 : index
    %1 = vector.load %arg4[%c0_1, %c0_2] : memref<1x448xf32, #tpu.memory_space<vmem>>, vector<1x448xf32>
    %c0_3 = arith.constant 0 : index
    %c0_4 = arith.constant 0 : index
    %2 = vector.load %arg5[%c0_3, %c0_4] : memref<1x448xf32, #tpu.memory_space<vmem>>, vector<1x448xf32>
    %c0_5 = arith.constant 0 : index
    %c0_6 = arith.constant 0 : index
    %c0_7 = arith.constant 0 : index
    %3 = vector.load %arg1[%c0_5, %c0_6, %c0_7] : memref<7x8x1440xbf16, #tpu.memory_space<vmem>>, vector<7x8x1440xbf16>
    %4 = vector.shape_cast %3 : vector<7x8x1440xbf16> to vector<56x1440xbf16>
    %cst = arith.constant dense<0.000000e+00> : vector<56x448xf32>
    %5 = tpu.matmul %4, %0, %cst {dimension_numbers = #tpu.dot_dimension_numbers<[1], [0], [0], [1], [0, 0, 1, 1], [], []>} : vector<56x1440xbf16>, vector<1440x448xbf16>, vector<56x448xf32> -> vector<56x448xf32>
    %6 = vector.broadcast %1 : vector<1x448xf32> to vector<56x448xf32>
    %7 = arith.mulf %5, %6 : vector<56x448xf32>
    %8 = vector.broadcast %2 : vector<1x448xf32> to vector<56x448xf32>
    %9 = arith.addf %7, %8 : vector<56x448xf32>
    %cst_8 = arith.constant 0.000000e+00 : f32
    %10 = vector.broadcast %cst_8 : f32 to vector<56x448xf32>
    %11 = arith.maximumf %9, %10 : vector<56x448xf32>
    %12 = vector.extract_strided_slice %11 {offsets = [0, 0], sizes = [56, 224], strides = [1, 1]} : vector<56x448xf32> to vector<56x224xf32>
    %13 = vector.extract_strided_slice %11 {offsets = [0, 224], sizes = [56, 224], strides = [1, 1]} : vector<56x448xf32> to vector<56x224xf32>
    %14 = arith.maximumf %12, %13 : vector<56x224xf32>
    %c0_9 = arith.constant 0 : index
    %c0_10 = arith.constant 0 : index
    %c0_11 = arith.constant 0 : index
    %15 = vector.load %arg2[%c0_9, %c0_10, %c0_11] : memref<7x8x1440xbf16, #tpu.memory_space<vmem>>, vector<7x8x1440xbf16>
    %16 = vector.shape_cast %15 : vector<7x8x1440xbf16> to vector<56x1440xbf16>
    %cst_12 = arith.constant dense<0.000000e+00> : vector<56x448xf32>
    %17 = tpu.matmul %16, %0, %cst_12 {dimension_numbers = #tpu.dot_dimension_numbers<[1], [0], [0], [1], [0, 0, 1, 1], [], []>} : vector<56x1440xbf16>, vector<1440x448xbf16>, vector<56x448xf32> -> vector<56x448xf32>
    %18 = vector.broadcast %1 : vector<1x448xf32> to vector<56x448xf32>
    %19 = arith.mulf %17, %18 : vector<56x448xf32>
    %20 = vector.broadcast %2 : vector<1x448xf32> to vector<56x448xf32>
    %21 = arith.addf %19, %20 : vector<56x448xf32>
    %cst_13 = arith.constant 0.000000e+00 : f32
    %22 = vector.broadcast %cst_13 : f32 to vector<56x448xf32>
    %23 = arith.maximumf %21, %22 : vector<56x448xf32>
    %24 = vector.extract_strided_slice %23 {offsets = [0, 0], sizes = [56, 224], strides = [1, 1]} : vector<56x448xf32> to vector<56x224xf32>
    %25 = vector.extract_strided_slice %23 {offsets = [0, 224], sizes = [56, 224], strides = [1, 1]} : vector<56x448xf32> to vector<56x224xf32>
    %26 = arith.maximumf %24, %25 : vector<56x224xf32>
    %27 = arith.maximumf %14, %26 : vector<56x224xf32>
    %28 = vector.extract_strided_slice %27 {offsets = [0, 0], sizes = [8, 224], strides = [1, 1]} : vector<56x224xf32> to vector<8x224xf32>
    %29 = arith.truncf %28 : vector<8x224xf32> to vector<8x224xbf16>
    %c0_14 = arith.constant 0 : index
    %c0_15 = arith.constant 0 : index
    %c0_16 = arith.constant 0 : index
    %30 = vector.load %arg6[%c0_14, %c0_15, %c0_16] : memref<7x224x128xbf16, #tpu.memory_space<vmem>>, vector<1x224x128xbf16>
    %31 = vector.shape_cast %30 : vector<1x224x128xbf16> to vector<224x128xbf16>
    %cst_17 = arith.constant dense<0.000000e+00> : vector<8x128xf32>
    %32 = tpu.matmul %29, %31, %cst_17 {dimension_numbers = #tpu.dot_dimension_numbers<[1], [0], [0], [1], [0, 0, 1, 1], [], []>} : vector<8x224xbf16>, vector<224x128xbf16>, vector<8x128xf32> -> vector<8x128xf32>
    %33 = vector.extract_strided_slice %27 {offsets = [8, 0], sizes = [8, 224], strides = [1, 1]} : vector<56x224xf32> to vector<8x224xf32>
    %34 = arith.truncf %33 : vector<8x224xf32> to vector<8x224xbf16>
    %c1 = arith.constant 1 : index
    %c0_18 = arith.constant 0 : index
    %c0_19 = arith.constant 0 : index
    %35 = vector.load %arg6[%c1, %c0_18, %c0_19] : memref<7x224x128xbf16, #tpu.memory_space<vmem>>, vector<1x224x128xbf16>
    %36 = vector.shape_cast %35 : vector<1x224x128xbf16> to vector<224x128xbf16>
    %cst_20 = arith.constant dense<0.000000e+00> : vector<8x128xf32>
    %37 = tpu.matmul %34, %36, %cst_20 {dimension_numbers = #tpu.dot_dimension_numbers<[1], [0], [0], [1], [0, 0, 1, 1], [], []>} : vector<8x224xbf16>, vector<224x128xbf16>, vector<8x128xf32> -> vector<8x128xf32>
    %38 = arith.addf %32, %37 : vector<8x128xf32>
    %39 = vector.extract_strided_slice %27 {offsets = [16, 0], sizes = [8, 224], strides = [1, 1]} : vector<56x224xf32> to vector<8x224xf32>
    %40 = arith.truncf %39 : vector<8x224xf32> to vector<8x224xbf16>
    %c2 = arith.constant 2 : index
    %c0_21 = arith.constant 0 : index
    %c0_22 = arith.constant 0 : index
    %41 = vector.load %arg6[%c2, %c0_21, %c0_22] : memref<7x224x128xbf16, #tpu.memory_space<vmem>>, vector<1x224x128xbf16>
    %42 = vector.shape_cast %41 : vector<1x224x128xbf16> to vector<224x128xbf16>
    %cst_23 = arith.constant dense<0.000000e+00> : vector<8x128xf32>
    %43 = tpu.matmul %40, %42, %cst_23 {dimension_numbers = #tpu.dot_dimension_numbers<[1], [0], [0], [1], [0, 0, 1, 1], [], []>} : vector<8x224xbf16>, vector<224x128xbf16>, vector<8x128xf32> -> vector<8x128xf32>
    %44 = arith.addf %38, %43 : vector<8x128xf32>
    %45 = vector.extract_strided_slice %27 {offsets = [24, 0], sizes = [8, 224], strides = [1, 1]} : vector<56x224xf32> to vector<8x224xf32>
    %46 = arith.truncf %45 : vector<8x224xf32> to vector<8x224xbf16>
    %c3 = arith.constant 3 : index
    %c0_24 = arith.constant 0 : index
    %c0_25 = arith.constant 0 : index
    %47 = vector.load %arg6[%c3, %c0_24, %c0_25] : memref<7x224x128xbf16, #tpu.memory_space<vmem>>, vector<1x224x128xbf16>
    %48 = vector.shape_cast %47 : vector<1x224x128xbf16> to vector<224x128xbf16>
    %cst_26 = arith.constant dense<0.000000e+00> : vector<8x128xf32>
    %49 = tpu.matmul %46, %48, %cst_26 {dimension_numbers = #tpu.dot_dimension_numbers<[1], [0], [0], [1], [0, 0, 1, 1], [], []>} : vector<8x224xbf16>, vector<224x128xbf16>, vector<8x128xf32> -> vector<8x128xf32>
    %50 = arith.addf %44, %49 : vector<8x128xf32>
    %51 = vector.extract_strided_slice %27 {offsets = [32, 0], sizes = [8, 224], strides = [1, 1]} : vector<56x224xf32> to vector<8x224xf32>
    %52 = arith.truncf %51 : vector<8x224xf32> to vector<8x224xbf16>
    %c4 = arith.constant 4 : index
    %c0_27 = arith.constant 0 : index
    %c0_28 = arith.constant 0 : index
    %53 = vector.load %arg6[%c4, %c0_27, %c0_28] : memref<7x224x128xbf16, #tpu.memory_space<vmem>>, vector<1x224x128xbf16>
    %54 = vector.shape_cast %53 : vector<1x224x128xbf16> to vector<224x128xbf16>
    %cst_29 = arith.constant dense<0.000000e+00> : vector<8x128xf32>
    %55 = tpu.matmul %52, %54, %cst_29 {dimension_numbers = #tpu.dot_dimension_numbers<[1], [0], [0], [1], [0, 0, 1, 1], [], []>} : vector<8x224xbf16>, vector<224x128xbf16>, vector<8x128xf32> -> vector<8x128xf32>
    %56 = arith.addf %50, %55 : vector<8x128xf32>
    %57 = vector.extract_strided_slice %27 {offsets = [40, 0], sizes = [8, 224], strides = [1, 1]} : vector<56x224xf32> to vector<8x224xf32>
    %58 = arith.truncf %57 : vector<8x224xf32> to vector<8x224xbf16>
    %c5 = arith.constant 5 : index
    %c0_30 = arith.constant 0 : index
    %c0_31 = arith.constant 0 : index
    %59 = vector.load %arg6[%c5, %c0_30, %c0_31] : memref<7x224x128xbf16, #tpu.memory_space<vmem>>, vector<1x224x128xbf16>
    %60 = vector.shape_cast %59 : vector<1x224x128xbf16> to vector<224x128xbf16>
    %cst_32 = arith.constant dense<0.000000e+00> : vector<8x128xf32>
    %61 = tpu.matmul %58, %60, %cst_32 {dimension_numbers = #tpu.dot_dimension_numbers<[1], [0], [0], [1], [0, 0, 1, 1], [], []>} : vector<8x224xbf16>, vector<224x128xbf16>, vector<8x128xf32> -> vector<8x128xf32>
    %62 = arith.addf %56, %61 : vector<8x128xf32>
    %63 = vector.extract_strided_slice %27 {offsets = [48, 0], sizes = [8, 224], strides = [1, 1]} : vector<56x224xf32> to vector<8x224xf32>
    %64 = arith.truncf %63 : vector<8x224xf32> to vector<8x224xbf16>
    %c6 = arith.constant 6 : index
    %c0_33 = arith.constant 0 : index
    %c0_34 = arith.constant 0 : index
    %65 = vector.load %arg6[%c6, %c0_33, %c0_34] : memref<7x224x128xbf16, #tpu.memory_space<vmem>>, vector<1x224x128xbf16>
    %66 = vector.shape_cast %65 : vector<1x224x128xbf16> to vector<224x128xbf16>
    %cst_35 = arith.constant dense<0.000000e+00> : vector<8x128xf32>
    %67 = tpu.matmul %64, %66, %cst_35 {dimension_numbers = #tpu.dot_dimension_numbers<[1], [0], [0], [1], [0, 0, 1, 1], [], []>} : vector<8x224xbf16>, vector<224x128xbf16>, vector<8x128xf32> -> vector<8x128xf32>
    %68 = arith.addf %62, %67 : vector<8x128xf32>
    %c0_36 = arith.constant 0 : index
    %c0_37 = arith.constant 0 : index
    %69 = vector.load %arg7[%c0_36, %c0_37] : memref<1x128xf32, #tpu.memory_space<vmem>>, vector<1x128xf32>
    %70 = vector.broadcast %69 : vector<1x128xf32> to vector<8x128xf32>
    %71 = arith.addf %68, %70 : vector<8x128xf32>
    %72 = arith.mulf %71, %71 : vector<8x128xf32>
    %cst_38 = arith.constant dense<0.000000e+00> : vector<8xf32>
    %73 = vector.multi_reduction <add>, %72, %cst_38 [1] : vector<8x128xf32> to vector<8xf32>
    %74 = vector.shape_cast %73 : vector<8xf32> to vector<8x1xf32>
    %cst_39 = arith.constant 1.000000e-24 : f32
    %75 = vector.broadcast %cst_39 : f32 to vector<8x1xf32>
    %76 = arith.maximumf %74, %75 : vector<8x1xf32>
    %77 = math.rsqrt %76 : vector<8x1xf32>
    %78 = vector.broadcast %77 : vector<8x1xf32> to vector<8x128xf32>
    %79 = arith.mulf %71, %78 : vector<8x128xf32>
    %c0_40 = arith.constant 0 : index
    %c0_41 = arith.constant 0 : index
    %80 = vector.load %arg11[%c0_40, %c0_41] : memref<8x128xf32, #tpu.memory_space<vmem>>, vector<8x128xf32>
    tpu.vector_store %arg11[%c0_40, %c0_41], %79 {strides = array<i32>} : memref<8x128xf32, #tpu.memory_space<vmem>>, vector<8x128xf32>,
    %81 = arith.truncf %71 : vector<8x128xf32> to vector<8x128xbf16>
    %c0_42 = arith.constant 0 : index
    %c0_43 = arith.constant 0 : index
    %82 = vector.load %arg8[%c0_42, %c0_43] : memref<128x128xbf16, #tpu.memory_space<vmem>>, vector<128x128xbf16>
    %cst_44 = arith.constant dense<0.000000e+00> : vector<8x128xf32>
    %83 = tpu.matmul %81, %82, %cst_44 {dimension_numbers = #tpu.dot_dimension_numbers<[1], [0], [0], [1], [0, 0, 1, 1], [], []>} : vector<8x128xbf16>, vector<128x128xbf16>, vector<8x128xf32> -> vector<8x128xf32>
    %c0_45 = arith.constant 0 : index
    %c0_46 = arith.constant 0 : index
    %84 = vector.load %arg9[%c0_45, %c0_46] : memref<1x128xf32, #tpu.memory_space<vmem>>, vector<1x128xf32>
    %85 = vector.broadcast %84 : vector<1x128xf32> to vector<8x128xf32>
    %86 = arith.addf %83, %85 : vector<8x128xf32>
    %c0_47 = arith.constant 0 : index
    %c0_48 = arith.constant 0 : index
    %87 = vector.load %arg10[%c0_47, %c0_48] : memref<8x128xf32, #tpu.memory_space<vmem>>, vector<8x128xf32>
    tpu.vector_store %arg10[%c0_47, %c0_48], %86 {strides = array<i32>} : memref<8x128xf32, #tpu.memory_space<vmem>>, vector<8x128xf32>,
    return
  }
  func.func @transform_0(%arg0: i32) -> (i32, i32, i32) {
    %c0_i32 = arith.constant 0 : i32
    %c0_i32_0 = arith.constant 0 : i32
    %c0_i32_1 = arith.constant 0 : i32
    return %c0_i32, %arg0, %c0_i32_0 : i32, i32, i32
  }
  func.func @transform_1(%arg0: i32) -> (i32, i32, i32) {
    %c0_i32 = arith.constant 0 : i32
    %c0_i32_0 = arith.constant 0 : i32
    %c0_i32_1 = arith.constant 0 : i32
    return %c0_i32, %arg0, %c0_i32_0 : i32, i32, i32
  }
  func.func @transform_2(%arg0: i32) -> (i32, i32) {
    %c0_i32 = arith.constant 0 : i32
    %c0_i32_0 = arith.constant 0 : i32
    %c0_i32_1 = arith.constant 0 : i32
    return %c0_i32, %c0_i32_0 : i32, i32
  }
  func.func @transform_3(%arg0: i32) -> (i32, i32) {
    %c0_i32 = arith.constant 0 : i32
    %c0_i32_0 = arith.constant 0 : i32
    %c0_i32_1 = arith.constant 0 : i32
    return %c0_i32, %c0_i32_0 : i32, i32
  }
  func.func @transform_4(%arg0: i32) -> (i32, i32) {
    %c0_i32 = arith.constant 0 : i32
    %c0_i32_0 = arith.constant 0 : i32
    %c0_i32_1 = arith.constant 0 : i32
    return %c0_i32, %c0_i32_0 : i32, i32
  }
  func.func @transform_5(%arg0: i32) -> (i32, i32, i32) {
    %c0_i32 = arith.constant 0 : i32
    %c0_i32_0 = arith.constant 0 : i32
    %c0_i32_1 = arith.constant 0 : i32
    %c0_i32_2 = arith.constant 0 : i32
    return %c0_i32, %c0_i32_0, %c0_i32_1 : i32, i32, i32
  }
  func.func @transform_6(%arg0: i32) -> (i32, i32) {
    %c0_i32 = arith.constant 0 : i32
    %c0_i32_0 = arith.constant 0 : i32
    %c0_i32_1 = arith.constant 0 : i32
    return %c0_i32, %c0_i32_0 : i32, i32
  }
  func.func @transform_7(%arg0: i32) -> (i32, i32) {
    %c0_i32 = arith.constant 0 : i32
    %c0_i32_0 = arith.constant 0 : i32
    %c0_i32_1 = arith.constant 0 : i32
    return %c0_i32, %c0_i32_0 : i32, i32
  }
  func.func @transform_8(%arg0: i32) -> (i32, i32) {
    %c0_i32 = arith.constant 0 : i32
    %c0_i32_0 = arith.constant 0 : i32
    %c0_i32_1 = arith.constant 0 : i32
    return %c0_i32, %c0_i32_0 : i32, i32
  }
  func.func @transform_9(%arg0: i32) -> (i32, i32) {
    %c0_i32 = arith.constant 0 : i32
    %c0_i32_0 = arith.constant 0 : i32
    return %arg0, %c0_i32 : i32, i32
  }
  func.func @transform_10(%arg0: i32) -> (i32, i32) {
    %c0_i32 = arith.constant 0 : i32
    %c0_i32_0 = arith.constant 0 : i32
    return %arg0, %c0_i32 : i32, i32
  }
}

</mosaic_0001>

<bundles_post_ra>
// kernel: cnn_fmnist_sup_forward.2
= control target key start
LH: loop header
LB: loop body
LE: loop exit
PB: predicated region body
PF: predicated region fallthrough
CT: control target
= control target key end

     0   :  { %10 = vsyncpa [#allocation3], 0  ;;  %s4665_s0 = inlined_call_operand.vmem [shape: bf16[112,160], index: 0, kind: input, shape index: {}]   ;;  %s4666_s1 = inlined_call_operand.vmem [shape: bf16[112,160], index: 1, kind: input, shape index: {}]   ;;  %s4667_s2 = inlined_call_operand.hbm [shape: bf16[160,576], index: 2, kind: input, shape index: {}]   ;;  %s4668_s3 = inlined_call_operand.hbm [shape: f32[1,576], index: 3, kind: input, shape index: {}]   ;;  %s4669_s4 = inlined_call_operand.hbm [shape: f32[1,576], index: 4, kind: input, shape index: {}]   ;;  %s4670_s5 = inlined_call_operand.vmem [shape: bf16[112,288], index: 5, kind: output, shape index: {}]  }
   0x1   :  { %11 = vsyncpa [#allocation5], 0  ;;  %s2908_s18 = smov [#allocation4]   ;;  %s2909_s20 = smov [#allocation2]  }
   0x2   :  { %s34_s19 = sshll.u32 %s2908_s18, 4  ;;  %s21_s21 = sshll.u32 %s2909_s20, 4  ;;  %s35_s19 = int_to_ptr.vmem [resolvable:$true] %s34_s19  ;;  %s2945_s21 = int_to_ptr.vmem [resolvable:$true] %s21_s21 }
   0x3   :  { %s2838_s24 = scalar_lea.hbm %s4668_s3, 80 }
   0x4   :  { %p2839_p0 = scmp.ne.s32.totalorder %s4668_s3, %s2838_s24  ;;  %p2842_p1 = scmp.lt.u32.totalorder %s2838_s24, %s4668_s3 }
   0x6   :  { %p2844_p2 = pnand %p2842_p1, %p2839_p0 }
   0x8   :  { %2847 = shalt.err (!%p2844_p2)
}
   0x9   :  { %s2848_s29 = scalar_lea.vmem %s35_s19, 80  ;;  %s2852_s30 = scalar_lea.vmem %s35_s19, 96 }
   0xa   :  { %p2849_p3 = scmp.ne.s32.totalorder %s35_s19, %s2848_s29  ;;  %p2853_p4 = scmp.lt.s32.totalorder %s35_s19, %s35_s19 }
   0xb   :  { %p2854_p5 = scmp.lt.s32.totalorder %s2852_s30, %s2848_s29 }
   0xd   :  { %p2855_p6 = por %p2854_p5, %p2853_p4 }
   0xf   :  { %p2856_p7 = pnand %p2855_p6, %p2849_p3 }
  0x11   :  { %2859 = shalt.err (!%p2856_p7)
}
  0x12   :  { %37 = dma.hbm_to_vmem [thread:$0]  %s4668_s3, 80, %s35_s19, [#allocation5]  }
  0x13   :  { %s2860_s10 = scalar_lea.hbm %s4667_s2, 6400 }
  0x14   :  { %p2861_p8 = scmp.ne.s32.totalorder %s4667_s2, %s2860_s10  ;;  %p2864_p9 = scmp.lt.u32.totalorder %s2860_s10, %s4667_s2 }
  0x16   :  { %p2866_p10 = pnand %p2864_p9, %p2861_p8 }
  0x18   :  { %2869 = shalt.err (!%p2866_p10)
}
  0x19   :  { %s2870_s15 = scalar_lea.vmem %s2945_s21, 6400  ;;  %p2875_p12 = scmp.lt.s32.totalorder %s2945_s21, %s2945_s21 }
  0x1a   :  { %p2871_p11 = scmp.ne.s32.totalorder %s2945_s21, %s2870_s15  ;;  %p2876_p13 = scmp.lt.s32.totalorder %s2870_s15, %s2870_s15 }
  0x1c   :  { %p2877_p0 = por %p2876_p13, %p2875_p12 }
  0x1e   :  { %p2878_p1 = pnand %p2877_p0, %p2871_p11 }
  0x20   :  { %2881 = shalt.err (!%p2878_p1)
}
  0x21   :  { %s2910_s3 = smov 320   ;;  %s2911_s16 = smov 20  }
  0x22   :  { %27 = dma.hbm_to_vmem [thread:$0]  %s4667_s2, 6400, %s2945_s21, [#allocation3], %s2910_s3, %s2910_s3, %s2911_s16  }
  0x23   :  { %s2912_s19 = smov [#allocation6]   ;;  %s2882_s24 = scalar_lea.hbm %s4669_s4, 80 }
  0x24   :  { %s44_s20 = sshll.u32 %s2912_s19, 4  ;;  %p2883_p2 = scmp.ne.s32.totalorder %s4669_s4, %s2882_s24  ;;  %s45_s20 = int_to_ptr.vmem [resolvable:$true] %s44_s20 }
  0x25   :  { %p2886_p3 = scmp.lt.u32.totalorder %s2882_s24, %s4669_s4 }
  0x27   :  { %p2888_p4 = pnand %p2886_p3, %p2883_p2 }
  0x29   :  { %2891 = shalt.err (!%p2888_p4)
}
  0x2a   :  { %s2892_s29 = scalar_lea.vmem %s45_s20, 80  ;;  %s2896_s2 = scalar_lea.vmem %s45_s20, 96 }
  0x2b   :  { %p2893_p5 = scmp.ne.s32.totalorder %s45_s20, %s2892_s29  ;;  %p2897_p6 = scmp.lt.s32.totalorder %s45_s20, %s45_s20 }
  0x2c   :  { %p2898_p7 = scmp.lt.s32.totalorder %s2896_s2, %s2892_s29 }
  0x2e   :  { %p2899_p8 = por %p2898_p7, %p2897_p6 }
  0x30   :  { %p2900_p9 = pnand %p2899_p8, %p2893_p5 }
  0x32   :  { %2903 = shalt.err (!%p2900_p9)
}
  0x33   :  { %47 = dma.hbm_to_vmem [thread:$0]  %s4669_s4, 80, %s45_s20, [#allocation5]  }
  0x34   :  { %2904 = dma.done.wait [#allocation3], 6400  }
  0x35   :  { %2905 = vsyncadd [#allocation3], 4294960896 }
  0x36   :  { %2906 = dma.done.wait [#allocation5], 160  }
  0x37   :  { %2907 = vsyncadd [#allocation5], 4294967136  ;;  %v2988_v0 = vld [vmem:[#allocation2 + $0x4] ss:$20 sps:$4 sm:$0xff]   ;;  %v2990_v1 = vld [vmem:[#allocation2 + $0xc] ss:$20 sps:$4 sm:$0xff]  }
  0x38   :  { %479 = vmatprep.subr.bf16.mxu0 %v2988_v0  ;;  %v2993_v2 = vld [vmem:[#allocation2] ss:$20 sps:$4 sm:$0xff]   ;;  %v2995_v3 = vld [vmem:[#allocation2 + $0x8] ss:$20 sps:$4 sm:$0xff]   ;;  %582 = vmatprep.subr.bf16.mxu1 %v2990_v1  ;;  %v3007_v7 = vld [vmem:[#allocation2 + $0x30] ss:$20 sps:$4 sm:$0xff]  }
  0x39   :  { %v2998_v4 = vld [vmem:[#allocation2 + $0x2c] ss:$20 sps:$4 sm:$0xff]   ;;  %480 = vmatpush1.bf16.msra.mxu0 %v2993_v2  ;;  %583 = vmatpush1.bf16.msra.mxu1 %v2995_v3  ;;  %v3002_v5 = vld [vmem:[#allocation2 + $0x34] ss:$20 sps:$4 sm:$0xff]   ;;  %v3012_v9 = vld [vmem:[#allocation2 + $0x5c] ss:$20 sps:$4 sm:$0xff]  }
  0x3a   :  { %v3004_v6 = vld [vmem:[#allocation2 + $0x28] ss:$20 sps:$4 sm:$0xff]   ;;  %481 = vmatprep.subr.bf16.mxu0 %v2998_v4  ;;  %584 = vmatprep.subr.bf16.mxu1 %v3002_v5  ;;  %v3014_v10 = vld [vmem:[#allocation2 + $0x50] ss:$20 sps:$4 sm:$0xff]   ;;  %v3016_v11 = vld [vmem:[#allocation2 + $0x58] ss:$20 sps:$4 sm:$0xff]  }
  0x3b   :  { %v3010_v8 = vld [vmem:[#allocation2 + $0x54] ss:$20 sps:$4 sm:$0xff]   ;;  %v3020_v12 = vld [vmem:[#allocation2 + $0x7c] ss:$20 sps:$4 sm:$0xff]   ;;  %v3024_v13 = vld [vmem:[#allocation2 + $0x84] ss:$20 sps:$4 sm:$0xff]  }
  0x3c   :  { %v3026_v14 = vld [vmem:[#allocation2 + $0x78] ss:$20 sps:$4 sm:$0xff]   ;;  %v3030_v15 = vld [vmem:[#allocation2 + $0x80] ss:$20 sps:$4 sm:$0xff]   ;;  %v3040_v19 = vld [vmem:[#allocation2 + $0xa8] ss:$20 sps:$4 sm:$0xff]  }
  0x3d   :  { %482 = vmatpush1.bf16.msra.mxu0 %v3004_v6  ;;  %585 = vmatpush1.bf16.msra.mxu1 %v3007_v7  ;;  %v3032_v16 = vld [vmem:[#allocation2 + $0xa4] ss:$20 sps:$4 sm:$0xff]   ;;  %v3036_v17 = vld [vmem:[#allocation2 + $0xac] ss:$20 sps:$4 sm:$0xff]   ;;  %v3048_v21 = vld [vmem:[#allocation2 + $0xd4] ss:$20 sps:$4 sm:$0xff]  }
  0x3e   :  { %483 = vmatprep.subr.bf16.mxu0 %v3010_v8  ;;  %586 = vmatprep.subr.bf16.mxu1 %v3012_v9  ;;  %v3038_v18 = vld [vmem:[#allocation2 + $0xa0] ss:$20 sps:$4 sm:$0xff]   ;;  %v3050_v22 = vld [vmem:[#allocation2 + $0xc8] ss:$20 sps:$4 sm:$0xff]   ;;  %v3054_v23 = vld [vmem:[#allocation2 + $0xd0] ss:$20 sps:$4 sm:$0xff]  }
  0x3f   :  { %v3044_v20 = vld [vmem:[#allocation2 + $0xcc] ss:$20 sps:$4 sm:$0xff]   ;;  %v3056_v24 = vld [vmem:[#allocation2 + $0xf4] ss:$20 sps:$4 sm:$0xff]   ;;  %v3060_v25 = vld [vmem:[#allocation2 + $0xfc] ss:$20 sps:$4 sm:$0xff]  }
  0x40   :  { %v3062_v26 = vld [vmem:[#allocation2 + $0xf0] ss:$20 sps:$4 sm:$0xff]   ;;  %v3064_v27 = vld [vmem:[#allocation2 + $0xf8] ss:$20 sps:$4 sm:$0xff]   ;;  %v3076_v31 = vld [vmem:[#allocation2 + $0x120] ss:$20 sps:$4 sm:$0xff]  }
  0x41   :  { %484 = vmatpush1.bf16.msra.mxu0 %v3014_v10  ;;  %587 = vmatpush1.bf16.msra.mxu1 %v3016_v11  ;;  %v3068_v28 = vld [vmem:[#allocation2 + $0x11c] ss:$20 sps:$4 sm:$0xff]   ;;  %v3072_v29 = vld [vmem:[#allocation2 + $0x124] ss:$20 sps:$4 sm:$0xff]   ;;  %vm457_vm0 = vcmask 261120   ;;  %v2913_v43 = vmov 0  }
  0x42   :  { %485 = vmatprep.subr.bf16.mxu0 %v3020_v12  ;;  %588 = vmatprep.subr.bf16.mxu1 %v3024_v13  ;;  %v3074_v30 = vld [vmem:[#allocation2 + $0x118] ss:$20 sps:$4 sm:$0xff]   ;;  %v3095_v35 = vld [vmem:[#allocation2 + $0x140] ss:$20 sps:$4 sm:$0xff]   ;;  %v3099_v36 = vld [vmem:[#allocation2 + $0x148] ss:$20 sps:$4 sm:$0xff]  }
  0x43   :  { %v3081_v32 = vld [vmem:[%s4665_s0 + $0x4] ss:$8 sps:$4 sm:$0xff]   ;;  %v3105_v38 = vld [vmem:[#allocation2 + $0x174] ss:$20 sps:$4 sm:$0xff]   ;;  %v3146_v46 = vld [vmem:[%s4665_s0 + $0x10] ss:$8 sps:$4 sm:$0xff]  }
  0x44   :  { %v3085_v33 = vld [vmem:[#allocation2 + $0x144] ss:$20 sps:$4 sm:$0xff]   ;;  %v3089_v34 = vld [vmem:[#allocation2 + $0x14c] ss:$20 sps:$4 sm:$0xff]   ;;  %2397 = vmatprep.mubr.msk.bf16.mxu0 %vm457_vm0, %v3081_v32  ;;  %2404 = vmatprep.mubr.msk.bf16.mxu1 %vm457_vm0, %v3081_v32  ;;  %v3107_v39 = vld [vmem:[#allocation2 + $0x168] ss:$20 sps:$4 sm:$0xff]  }
  0x45   :  { %486 = vmatpush1.bf16.msra.mxu0 %v3026_v14  ;;  %589 = vmatpush1.bf16.msra.mxu1 %v3030_v15  ;;  %v3103_v37 = vld [vmem:[#allocation2 + $0x16c] ss:$20 sps:$4 sm:$0xff]   ;;  %v3111_v40 = vld [vmem:[#allocation2 + $0x170] ss:$20 sps:$4 sm:$0xff]   ;;  %v3129_v44 = vld [vmem:[%s4665_s0 + $0x14] ss:$8 sps:$4 sm:$0xff]  }
  0x46   :  { %487 = vmatprep.subr.bf16.mxu0 %v3032_v16  ;;  %590 = vmatprep.subr.bf16.mxu1 %v3036_v17  ;;  %v3118_v41 = vld [vmem:[%s4665_s0] ss:$8 sps:$4 sm:$0xff]   ;;  %v3122_v42 = vld [vmem:[#allocation2 + $0x10] ss:$20 sps:$4 sm:$0xff]   ;;  %v3135_v45 = vld [vmem:[#allocation2 + $0x38] ss:$20 sps:$4 sm:$0xff]  }
  0x47   :  { %v3150_v47 = vld [vmem:[#allocation2 + $0x60] ss:$20 sps:$4 sm:$0xff]   ;;  %v3155_v48 = vld [vmem:[%s4665_s0 + $0x24] ss:$8 sps:$4 sm:$0xff]   ;;  %v3164_v49 = vld [vmem:[#allocation2 + $0x88] ss:$20 sps:$4 sm:$0xff]  }
  0x48   :  { %v3174_v50 = vld [vmem:[%s4665_s0 + $0x20] ss:$8 sps:$4 sm:$0xff]   ;;  %v3180_v51 = vld [vmem:[%s4665_s0 + $0x34] ss:$8 sps:$4 sm:$0xff]   ;;  %v3184_v52 = vld [vmem:[#allocation2 + $0xb0] ss:$20 sps:$4 sm:$0xff]  }
  0x49   :  { %488 = vmatpush1.bf16.msra.mxu0 %v3038_v18  ;;  %591 = vmatpush1.bf16.msra.mxu1 %v3040_v19  ;;  %v3195_v53 = vld [vmem:[#allocation2 + $0xd8] ss:$20 sps:$4 sm:$0xff]   ;;  %v3211_v56 = vld [vmem:[#allocation2 + $0x100] ss:$20 sps:$4 sm:$0xff]   ;;  %v3223_v57 = vld [vmem:[#allocation2 + $0x128] ss:$20 sps:$4 sm:$0xff]  }
  0x4a   :  { %489 = vmatprep.subr.bf16.mxu0 %v3044_v20  ;;  %592 = vmatprep.subr.bf16.mxu1 %v3048_v21  ;;  %v3202_v54 = vld [vmem:[%s4665_s0 + $0x30] ss:$8 sps:$4 sm:$0xff]   ;;  %v3207_v55 = vld [vmem:[%s4665_s0 + $0x44] ss:$8 sps:$4 sm:$0xff]   ;;  %v3230_v58 = vld [vmem:[%s4665_s0 + $0x40] ss:$8 sps:$4 sm:$0xff]  }
  0x4b   :  { %v3235_v59 = vld [vmem:[%s4665_s0 + $0x54] ss:$8 sps:$4 sm:$0xff]   ;;  %v3239_v60 = vld [vmem:[#allocation2 + $0x150] ss:$20 sps:$4 sm:$0xff]   ;;  %v3251_v61 = vld [vmem:[#allocation2 + $0x178] ss:$20 sps:$4 sm:$0xff]  }
  0x4c   :  { %v3258_v62 = vld [vmem:[%s4665_s0 + $0x50] ss:$8 sps:$4 sm:$0xff]   ;;  %v3263_v63 = vld [vmem:[%s4665_s0 + $0x64] ss:$8 sps:$4 sm:$0xff]   ;;  %vm1162_vm1 = vcmask 785408   ;;  %vm2299_vm2 = vcmask 257024  }
  0x4d   :  { %490 = vmatpush1.bf16.msra.mxu0 %v3050_v22  ;;  %593 = vmatpush1.bf16.msra.mxu1 %v3054_v23 }
  0x4e   :  { %491 = vmatprep.subr.bf16.mxu0 %v3056_v24  ;;  %594 = vmatprep.subr.bf16.mxu1 %v3060_v25 }
  0x51   :  { %492 = vmatpush1.bf16.msra.mxu0 %v3062_v26  ;;  %595 = vmatpush1.bf16.msra.mxu1 %v3064_v27 }
  0x52   :  { %493 = vmatprep.subr.bf16.mxu0 %v3068_v28  ;;  %596 = vmatprep.subr.bf16.mxu1 %v3072_v29 }
  0x55   :  { %494 = vmatpush1.bf16.msra.mxu0 %v3074_v30  ;;  %597 = vmatpush1.bf16.msra.mxu1 %v3076_v31 }
  0x56   :  { %495 = vmatprep.subr.bf16.mxu0 %v3085_v33  ;;  %598 = vmatprep.subr.bf16.mxu1 %v3089_v34 }
  0x59   :  { %496 = vmatpush1.bf16.msra.mxu0 %v3095_v35  ;;  %599 = vmatpush1.bf16.msra.mxu1 %v3099_v36 }
  0x5a   :  { %497 = vmatprep.subr.bf16.mxu0 %v3103_v37  ;;  %600 = vmatprep.subr.bf16.mxu1 %v3105_v38 }
  0x5d   :  { %498 = vmatpush1.bf16.msra.mxu0 %v3107_v39  ;;  %601 = vmatpush1.bf16.msra.mxu1 %v3111_v40 }
  0x5e   :  { %685 = vmatprep.subr.bf16.mxu0 %v2913_v43  ;;  %1373 = vmatprep.subr.bf16.mxu1 %v2988_v0  ;;  %v3278_v0 = vld [vmem:[%s4665_s0 + $0x60] ss:$8 sps:$4 sm:$0xff]  }
  0x60   :  { %512 = vmatmul.mubr.bf16.vlgmr.msra.gmra.mrb[0].mxu0 %v3118_v41  ;;  %615 = vmatmul.mubr.bf16.vlgmr.msra.gmra.mrb[0].mxu1 %v3118_v41 }
  0x61   :  { %686 = vmatpush1.bf16.msra.mxu0 %v3122_v42  ;;  %1374 = vmatpush1.bf16.msra.mxu1 %v2993_v2  ;;  %v3294_v2 = vld [vmem:[%s4666_s1] ss:$8 sps:$4 sm:$0xff]  }
  0x62   :  { %687 = vmatprep.subr.bf16.mxu0 %v2913_v43  ;;  %2398 = vmatprep.mubr.msk.bf16.mxu0 %vm457_vm0, %v3129_v44 }
  0x63   :  { %2405 = vmatprep.mubr.msk.bf16.mxu1 %vm457_vm0, %v3129_v44  ;;  %1375 = vmatprep.subr.bf16.mxu1 %v2998_v4  ;;  %v3299_v4 = vld [vmem:[%s4666_s1 + $0x14] ss:$8 sps:$4 sm:$0xff]  }
  0x65   :  { %688 = vmatpush1.bf16.msra.mxu0 %v3135_v45  ;;  %1376 = vmatpush1.bf16.msra.mxu1 %v3004_v6  ;;  %v3314_v6 = vld [vmem:[%s4666_s1 + $0x10] ss:$8 sps:$4 sm:$0xff]  }
  0x66   :  { %689 = vmatprep.subr.bf16.mxu0 %v2913_v43  ;;  %1377 = vmatprep.subr.bf16.mxu1 %v3010_v8  ;;  %v3362_v8 = vld [vmem:[%s4666_s1 + $0x30] ss:$8 sps:$4 sm:$0xff]  }
  0x68   :  { %522 = vmatmul.mubr.bf16.gmra.mrb[4].mxu0 %v3146_v46  ;;  %625 = vmatmul.mubr.bf16.gmra.mrb[4].mxu1 %v3146_v46 }
  0x69   :  { %690 = vmatpush1.bf16.msra.mxu0 %v3150_v47  ;;  %2399 = vmatprep.mubr.msk.bf16.mxu0 %vm457_vm0, %v3155_v48 }
  0x6a   :  { %2406 = vmatprep.mubr.msk.bf16.mxu1 %vm457_vm0, %v3155_v48  ;;  %1378 = vmatpush1.bf16.msra.mxu1 %v3014_v10  ;;  %v3367_v10 = vld [vmem:[%s4666_s1 + $0x44] ss:$8 sps:$4 sm:$0xff]  }
  0x6b   :  { %691 = vmatprep.subr.bf16.mxu0 %v2913_v43  ;;  %1379 = vmatprep.subr.bf16.mxu1 %v3020_v12  ;;  %v3375_v12 = vld [vmem:[#allocation4] sm:$0x1f] }
  0x6d   :  { %692 = vmatpush1.bf16.msra.mxu0 %v3164_v49 }
  0x6e   :  { %1380 = vmatpush1.bf16.msra.mxu1 %v3026_v14  ;;  %693 = vmatprep.subr.bf16.mxu0 %v2913_v43  ;;  %v3384_v14 = vld [vmem:[#allocation6] sm:$0x1f] }
  0x6f   :  { %1381 = vmatprep.subr.bf16.mxu1 %v3032_v16 }
  0x70   :  { %532 = vmatmul.mubr.bf16.gmra.mrb[8].mxu0 %v3174_v50  ;;  %635 = vmatmul.mubr.bf16.gmra.mrb[8].mxu1 %v3174_v50 }
  0x71   :  { %2400 = vmatprep.mubr.msk.bf16.mxu0 %vm457_vm0, %v3180_v51  ;;  %2407 = vmatprep.mubr.msk.bf16.mxu1 %vm457_vm0, %v3180_v51 }
  0x72   :  { %694 = vmatpush1.bf16.msra.mxu0 %v3184_v52  ;;  %1382 = vmatpush1.bf16.msra.mxu1 %v3038_v18  ;;  %v2831_v18 = vld [vmem:[%s4666_s1 + $0x40] ss:$8 sps:$4 sm:$0xff]  }
  0x73   :  { %695 = vmatprep.subr.bf16.mxu0 %v2913_v43  ;;  %1383 = vmatprep.subr.bf16.mxu1 %v3044_v20  ;;  %v2832_v20 = vld [vmem:[%s4666_s1 + $0x54] ss:$8 sps:$4 sm:$0xff]  }
  0x76   :  { %696 = vmatpush1.bf16.msra.mxu0 %v3195_v53  ;;  %1384 = vmatpush1.bf16.msra.mxu1 %v3050_v22  ;;  %v2834_v22 = vld [vmem:[%s4666_s1 + $0x50] ss:$8 sps:$4 sm:$0xff]  }
  0x77   :  { %697 = vmatprep.subr.bf16.mxu0 %v2913_v43  ;;  %1385 = vmatprep.subr.bf16.mxu1 %v3056_v24  ;;  %v2837_v24 = vld [vmem:[%s4666_s1 + $0x60] ss:$8 sps:$4 sm:$0xff]  }
  0x78   :  { %542 = vmatmul.mubr.bf16.gmra.mrb[12].mxu0 %v3202_v54  ;;  %645 = vmatmul.mubr.bf16.gmra.mrb[12].mxu1 %v3202_v54 }
  0x79   :  { %2401 = vmatprep.mubr.msk.bf16.mxu0 %vm457_vm0, %v3207_v55  ;;  %2408 = vmatprep.mubr.msk.bf16.mxu1 %vm457_vm0, %v3207_v55 }
  0x7a   :  { %698 = vmatpush1.bf16.msra.mxu0 %v3211_v56  ;;  %1386 = vmatpush1.bf16.msra.mxu1 %v3062_v26 }
  0x7b   :  { %699 = vmatprep.subr.bf16.mxu0 %v2913_v43  ;;  %1387 = vmatprep.subr.bf16.mxu1 %v3068_v28 }
  0x7e   :  { %700 = vmatpush1.bf16.msra.mxu0 %v3223_v57  ;;  %1388 = vmatpush1.bf16.msra.mxu1 %v3074_v30 }
  0x7f   :  { %701 = vmatprep.subr.bf16.mxu0 %v2913_v43  ;;  %1389 = vmatprep.subr.bf16.mxu1 %v3085_v33 }
  0x80   :  { %552 = vmatmul.mubr.bf16.gmra.mrb[16].mxu0 %v3230_v58  ;;  %655 = vmatmul.mubr.bf16.gmra.mrb[16].mxu1 %v3230_v58 }
  0x81   :  { %2402 = vmatprep.mubr.msk.bf16.mxu0 %vm457_vm0, %v3235_v59  ;;  %2409 = vmatprep.mubr.msk.bf16.mxu1 %vm457_vm0, %v3235_v59 }
  0x82   :  { %702 = vmatpush1.bf16.msra.mxu0 %v3239_v60  ;;  %1390 = vmatpush1.bf16.msra.mxu1 %v3095_v35 }
  0x83   :  { %703 = vmatprep.subr.bf16.mxu0 %v2913_v43  ;;  %1391 = vmatprep.subr.bf16.mxu1 %v3103_v37 }
  0x86   :  { %704 = vmatpush1.bf16.msra.mxu0 %v3251_v61  ;;  %1392 = vmatpush1.bf16.msra.mxu1 %v3107_v39 }
  0x87   :  { %1476 = vmatprep.subr.bf16.mxu0 %v2990_v1  ;;  %1579 = vmatprep.subr.bf16.mxu1 %v2913_v43  ;;  %v3283_v1 = vld [vmem:[%s4666_s1 + $0x4] ss:$8 sps:$4 sm:$0xff]  }
  0x88   :  { %562 = vmatmul.mubr.bf16.gmra.mrb[20].mxu0 %v3258_v62  ;;  %665 = vmatmul.mubr.bf16.gmra.mrb[20].mxu1 %v3258_v62 }
  0x89   :  { %2403 = vmatprep.mubr.msk.bf16.mxu0 %vm457_vm0, %v3263_v63  ;;  %2410 = vmatprep.mubr.msk.bf16.mxu1 %vm457_vm0, %v3263_v63 }
  0x90   :  { %572 = vmatmul.mubr.bf16.gmra.mrb[24].mxu0 %v3278_v0  ;;  %675 = vmatmul.mubr.bf16.gmra.mrb[24].mxu1 %v3278_v0 }
  0x91   :  { %2411 = vmatprep.mubr.msk.bf16.mxu0 %vm457_vm0, %v3081_v32  ;;  %2432 = vmatprep.mubr.msk.bf16.mxu1 %vm457_vm0, %v3283_v1 }
  0x98   :  { %718 = vmatmul.mubr.bf16.vlgmr.msra.gmra.mrb[28].mxu0 %v3118_v41  ;;  %1406 = vmatmul.mubr.bf16.vlgmr.msra.gmra.mrb[28].mxu1 %v3294_v2 }
  0x99   :  { %1477 = vmatpush1.bf16.msra.mxu0 %v2995_v3  ;;  %1580 = vmatpush1.bf16.msra.mxu1 %v3122_v42  ;;  %v3323_v3 = vld [vmem:[%s4666_s1 + $0x24] ss:$8 sps:$4 sm:$0xff]  }
  0x9a   :  { %1478 = vmatprep.subr.bf16.mxu0 %v3002_v5  ;;  %2412 = vmatprep.mubr.msk.bf16.mxu0 %vm457_vm0, %v3129_v44  ;;  %v3338_v5 = vld [vmem:[%s4666_s1 + $0x20] ss:$8 sps:$4 sm:$0xff]  }
  0x9b   :  { %2433 = vmatprep.mubr.msk.bf16.mxu1 %vm457_vm0, %v3299_v4  ;;  %1581 = vmatprep.subr.bf16.mxu1 %v2913_v43 }
  0x9d   :  { %1479 = vmatpush1.bf16.msra.mxu0 %v3007_v7  ;;  %1582 = vmatpush1.bf16.msra.mxu1 %v3135_v45  ;;  %v3344_v7 = vld [vmem:[%s4666_s1 + $0x34] ss:$8 sps:$4 sm:$0xff]  }
  0x9e   :  { %1480 = vmatprep.subr.bf16.mxu0 %v3012_v9  ;;  %1583 = vmatprep.subr.bf16.mxu1 %v2913_v43  ;;  %v775_v9 = vlaneseq }
  0xa0   :  { %726 = vmatmul.mubr.bf16.gmra.mrb[32].mxu0 %v3146_v46  ;;  %1416 = vmatmul.mubr.bf16.gmra.mrb[32].mxu1 %v3314_v6 }
  0xa1   :  { %1481 = vmatpush1.bf16.msra.mxu0 %v3016_v11  ;;  %2413 = vmatprep.mubr.msk.bf16.mxu0 %vm457_vm0, %v3155_v48  ;;  %v3371_v11 = vshrl.u32 %v775_v9, 7 }
  0xa2   :  { %2434 = vmatprep.mubr.msk.bf16.mxu1 %vm457_vm0, %v3323_v3  ;;  %1584 = vmatpush1.bf16.msra.mxu1 %v3150_v47 }
  0xa3   :  { %1482 = vmatprep.subr.bf16.mxu0 %v3024_v13  ;;  %1585 = vmatprep.subr.bf16.mxu1 %v2913_v43  ;;  %v777_v13 = vsub.s32 0, %v3371_v11  ;;  %v789_v26 = vsub.s32 3, %v3371_v11 }
  0xa5   :  { %1483 = vmatpush1.bf16.msra.mxu0 %v3030_v15  ;;  %v781_v15 = vsub.s32 1, %v3371_v11  ;;  %v3390_v16 = vrot.slane %v3375_v12, %v777_v13  ;;  %v3475_v28 = vrot.slane %v3375_v12, %v789_v26  ;;  %v3481_v32 = vrot.slane %v3384_v14, %v789_v26 }
  0xa6   :  { %1586 = vmatpush1.bf16.msra.mxu1 %v3164_v49  ;;  %1484 = vmatprep.subr.bf16.mxu0 %v3036_v17 }
  0xa7   :  { %1587 = vmatprep.subr.bf16.mxu1 %v2913_v43  ;;  %v3395_v17 = vrot.slane %v3375_v12, %v781_v15 }
  0xa8   :  { %734 = vmatmul.mubr.bf16.gmra.mrb[36].mxu0 %v3174_v50  ;;  %1426 = vmatmul.mubr.bf16.gmra.mrb[36].mxu1 %v3338_v5 }
  0xa9   :  { %2414 = vmatprep.mubr.msk.bf16.mxu0 %vm457_vm0, %v3180_v51  ;;  %2435 = vmatprep.mubr.msk.bf16.mxu1 %vm457_vm0, %v3344_v7 }
  0xaa   :  { %1485 = vmatpush1.bf16.msra.mxu0 %v3040_v19  ;;  %1588 = vmatpush1.bf16.msra.mxu1 %v3184_v52  ;;  %v3401_v19 = vrot.slane %v3384_v14, %v777_v13 }
  0xab   :  { %1486 = vmatprep.subr.bf16.mxu0 %v3048_v21  ;;  %1589 = vmatprep.subr.bf16.mxu1 %v2913_v43  ;;  %v3407_v21 = vrot.slane %v3384_v14, %v781_v15 }
  0xae   :  { %1487 = vmatpush1.bf16.msra.mxu0 %v3054_v23  ;;  %1590 = vmatpush1.bf16.msra.mxu1 %v3195_v53  ;;  %v2835_v23 = vld [vmem:[%s4666_s1 + $0x64] ss:$8 sps:$4 sm:$0xff]   ;;  %s2914_s1 = smov 96  }
  0xaf   :  { %1488 = vmatprep.subr.bf16.mxu0 %v3060_v25  ;;  %1591 = vmatprep.subr.bf16.mxu1 %v2913_v43  ;;  %v785_v25 = vsub.s32 2, %v3371_v11 }
  0xb0   :  { %742 = vmatmul.mubr.bf16.gmra.mrb[40].mxu0 %v3202_v54  ;;  %1436 = vmatmul.mubr.bf16.gmra.mrb[40].mxu1 %v3362_v8 }
  0xb1   :  { %2415 = vmatprep.mubr.msk.bf16.mxu0 %vm457_vm0, %v3207_v55  ;;  %2436 = vmatprep.mubr.msk.bf16.mxu1 %vm457_vm0, %v3367_v10 }
  0xb2   :  { %1489 = vmatpush1.bf16.msra.mxu0 %v3064_v27  ;;  %1592 = vmatpush1.bf16.msra.mxu1 %v3211_v56  ;;  %v3472_v27 = vrot.slane %v3375_v12, %v785_v25 }
  0xb3   :  { %1490 = vmatprep.subr.bf16.mxu0 %v3072_v29  ;;  %1593 = vmatprep.subr.bf16.mxu1 %v2913_v43  ;;  %v3478_v29 = vrot.slane %v3384_v14, %v785_v25 }
  0xb6   :  { %1491 = vmatpush1.bf16.msra.mxu0 %v3076_v31  ;;  %1594 = vmatpush1.bf16.msra.mxu1 %v3223_v57 }
  0xb7   :  { %1492 = vmatprep.subr.bf16.mxu0 %v3089_v34  ;;  %1595 = vmatprep.subr.bf16.mxu1 %v2913_v43 }
  0xb8   :  { %750 = vmatmul.mubr.bf16.gmra.mrb[44].mxu0 %v3230_v58  ;;  %1446 = vmatmul.mubr.bf16.gmra.mrb[44].mxu1 %v2831_v18 }
  0xb9   :  { %2416 = vmatprep.mubr.msk.bf16.mxu0 %vm457_vm0, %v3235_v59  ;;  %2437 = vmatprep.mubr.msk.bf16.mxu1 %vm457_vm0, %v2832_v20 }
  0xba   :  { %1493 = vmatpush1.bf16.msra.mxu0 %v3099_v36  ;;  %1596 = vmatpush1.bf16.msra.mxu1 %v3239_v60 }
  0xbb   :  { %1494 = vmatprep.subr.bf16.mxu0 %v3105_v38  ;;  %1597 = vmatprep.subr.bf16.mxu1 %v2913_v43 }
  0xbe   :  { %1495 = vmatpush1.bf16.msra.mxu0 %v3111_v40  ;;  %1598 = vmatpush1.bf16.msra.mxu1 %v3251_v61 }
  0xc0   :  { %758 = vmatmul.mubr.bf16.gmra.mrb[48].mxu0 %v3258_v62  ;;  %1456 = vmatmul.mubr.bf16.gmra.mrb[48].mxu1 %v2834_v22 }
  0xc1   :  { %2417 = vmatprep.mubr.msk.bf16.mxu0 %vm457_vm0, %v3263_v63  ;;  %2438 = vmatprep.mubr.msk.bf16.mxu1 %vm457_vm0, %v2835_v23 }
  0xc8   :  { %766 = vmatmul.mubr.bf16.gmra.mrb[52].mxu0 %v3278_v0  ;;  %1466 = vmatmul.mubr.bf16.gmra.mrb[52].mxu1 %v2837_v24 }
  0xc9   :  { %2439 = vmatprep.mubr.msk.bf16.mxu0 %vm457_vm0, %v3283_v1  ;;  %2446 = vmatprep.mubr.msk.bf16.mxu1 %vm457_vm0, %v3283_v1 }
  0xd0   :  { %1509 = vmatmul.mubr.bf16.vlgmr.msra.gmra.mrb[56].mxu0 %v3294_v2  ;;  %1612 = vmatmul.mubr.bf16.vlgmr.msra.gmra.mrb[56].mxu1 %v3294_v2 }
  0xd1   :  { %2440 = vmatprep.mubr.msk.bf16.mxu0 %vm457_vm0, %v3299_v4  ;;  %2447 = vmatprep.mubr.msk.bf16.mxu1 %vm457_vm0, %v3299_v4 }
  0xd8   :  { %1519 = vmatmul.mubr.bf16.gmra.mrb[60].mxu0 %v3314_v6  ;;  %1620 = vmatmul.mubr.bf16.gmra.mrb[60].mxu1 %v3314_v6 }
  0xd9   :  { %2441 = vmatprep.mubr.msk.bf16.mxu0 %vm457_vm0, %v3323_v3  ;;  %2448 = vmatprep.mubr.msk.bf16.mxu1 %vm457_vm0, %v3323_v3 }
  0xe0   :  { %1529 = vmatmul.mubr.bf16.gmra.mrb[64].mxu0 %v3338_v5  ;;  %1628 = vmatmul.mubr.bf16.gmra.mrb[64].mxu1 %v3338_v5 }
  0xe1   :  { %2442 = vmatprep.mubr.msk.bf16.mxu0 %vm457_vm0, %v3344_v7  ;;  %2449 = vmatprep.mubr.msk.bf16.mxu1 %vm457_vm0, %v3344_v7 }
  0xe8   :  { %1539 = vmatmul.mubr.bf16.gmra.mrb[68].mxu0 %v3362_v8  ;;  %1636 = vmatmul.mubr.bf16.gmra.mrb[68].mxu1 %v3362_v8 }
  0xe9   :  { %2443 = vmatprep.mubr.msk.bf16.mxu0 %vm457_vm0, %v3367_v10  ;;  %2450 = vmatprep.mubr.msk.bf16.mxu1 %vm457_vm0, %v3367_v10 }
  0xf0   :  { %1549 = vmatmul.mubr.bf16.gmra.mrb[72].mxu0 %v2831_v18  ;;  %1644 = vmatmul.mubr.bf16.gmra.mrb[72].mxu1 %v2831_v18 }
  0xf1   :  { %2444 = vmatprep.mubr.msk.bf16.mxu0 %vm457_vm0, %v2832_v20  ;;  %2451 = vmatprep.mubr.msk.bf16.mxu1 %vm457_vm0, %v2832_v20 }
  0xf8   :  { %1559 = vmatmul.mubr.bf16.gmra.mrb[76].mxu0 %v2834_v22  ;;  %1652 = vmatmul.mubr.bf16.gmra.mrb[76].mxu1 %v2834_v22 }
  0xf9   :  { %2445 = vmatprep.mubr.msk.bf16.mxu0 %vm457_vm0, %v2835_v23  ;;  %2452 = vmatprep.mubr.msk.bf16.mxu1 %vm457_vm0, %v2835_v23 }
 0x100   :  { %1569 = vmatmul.mubr.bf16.gmra.mrb[80].mxu0 %v2837_v24  ;;  %1660 = vmatmul.mubr.bf16.gmra.mrb[80].mxu1 %v2837_v24 }
 0x133   :  { %v513_v30 = vpop.f32.mrb[0].mxu0  ;;  %v616_v31 = vpop.f32.mrb[0].mxu1 }
 0x134   :  { %v800_v33 = vmul.f32 %v3390_v16, %v513_v30  ;;  %v802_v34 = vmul.f32 %v3472_v27, %v616_v31  ;;  %v515_v35 = vpop.f32.mrb[1].mxu0  ;;  %v618_v36 = vpop.f32.mrb[1].mxu1 }
 0x135   :  { %v801_v37 = vmul.f32 %v3395_v17, %v515_v35  ;;  %v803_v38 = vmul.f32 %v3475_v28, %v618_v36  ;;  %v517_v39 = vpop.f32.mrb[2].mxu0  ;;  %v3487_v40 = vpop.f32.mrb[2].mxu1 }
 0x136   :  { %v3490_v41 = vadd.f32 %v3401_v19, %v800_v33  ;;  %v3493_v42 = vadd.f32 %v3478_v29, %v802_v34  ;;  %v805_v43 = vmul.f32 %v3390_v16, %v517_v39  ;;  %v519_v44 = vpop.f32.mrb[3].mxu0  ;;  %v3496_v45 = vpop.f32.mrb[3].mxu1 }
 0x137   :  { %v3499_v46 = vadd.f32 %v3407_v21, %v801_v37  ;;  %v899_v47 = vadd.f32 %v3481_v32, %v803_v38  ;;  %v806_v48 = vmul.f32 %v3395_v17, %v519_v44 }
 0x138   :  { %4768 = vst [vmem:[#allocation9_spill] sm:$0xff] %v3493_v42  ;;  %v4675_v49 = vmax.f32 %v3493_v42, 0.0  ;;  %v3505_v50 = vadd.f32 %v3401_v19, %v805_v43 }
 0x139   :  { %v969_v51 = vmax.f32 %v899_v47, 0.0  ;;  %v3508_v52 = vadd.f32 %v3407_v21, %v806_v48 }
 0x13b   :  { %v523_v53 = vpop.f32.mrb[4].mxu0  ;;  %v626_v54 = vpop.f32.mrb[4].mxu1  ;;  %v2516_v55 = vpack.i.bf16 %v969_v51, %v4675_v49 }
 0x13c   :  { %v810_v56 = vmul.f32 %v3390_v16, %v523_v53  ;;  %v812_v57 = vmul.f32 %v3472_v27, %v626_v54  ;;  %v525_v58 = vpop.f32.mrb[5].mxu0  ;;  %v628_v59 = vpop.f32.mrb[5].mxu1 }
 0x13d   :  { %v811_v60 = vmul.f32 %v3395_v17, %v525_v58  ;;  %v813_v61 = vmul.f32 %v3475_v28, %v628_v59  ;;  %2517 = vrot.lane.b32.xlu0 %v2516_v55, %s2914_s1  ;;  %v527_v62 = vpop.f32.mrb[6].mxu0  ;;  %v3517_v63 = vpop.f32.mrb[6].mxu1 }
 0x13e   :  { %v3520_v0 = vadd.f32 %v3401_v19, %v810_v56  ;;  %v3523_v1 = vadd.f32 %v3478_v29, %v812_v57  ;;  %v815_v2 = vmul.f32 %v3390_v16, %v527_v62  ;;  %v529_v4 = vpop.f32.mrb[7].mxu0  ;;  %v3526_v6 = vpop.f32.mrb[7].mxu1 }
 0x13f   :  { %v3529_v3 = vadd.f32 %v3407_v21, %v811_v60  ;;  %v909_v5 = vadd.f32 %v3481_v32, %v813_v61  ;;  %v816_v7 = vmul.f32 %v3395_v17, %v529_v4 }
 0x140   :  { %4769 = vst [vmem:[#allocation10_spill] sm:$0xff] %v3523_v1  ;;  %v4674_v8 = vmax.f32 %v3523_v1, 0.0  ;;  %v3535_v9 = vadd.f32 %v3401_v19, %v815_v2  ;;  %v808_v1 = vmul.f32 %v3475_v28, %v3496_v45 }
 0x141   :  { %v979_v10 = vmax.f32 %v909_v5, 0.0  ;;  %v3538_v13 = vadd.f32 %v3407_v21, %v816_v7 }
 0x143   :  { %v533_v15 = vpop.f32.mrb[8].mxu0  ;;  %v636_v18 = vpop.f32.mrb[8].mxu1  ;;  %v2521_v20 = vpack.i.bf16 %v979_v10, %v4674_v8 }
 0x144   :  { %v820_v22 = vmul.f32 %v3390_v16, %v533_v15  ;;  %v822_v23 = vmul.f32 %v3472_v27, %v636_v18  ;;  %v535_v24 = vpop.f32.mrb[9].mxu0  ;;  %v638_v25 = vpop.f32.mrb[9].mxu1 }
 0x145   :  { %v821_v26 = vmul.f32 %v3395_v17, %v535_v24  ;;  %v823_v30 = vmul.f32 %v3475_v28, %v638_v25  ;;  %2522 = vrot.lane.b32.xlu1 %v2521_v20, %s2914_s1  ;;  %v537_v31 = vpop.f32.mrb[10].mxu0  ;;  %v3547_v33 = vpop.f32.mrb[10].mxu1 }
 0x146   :  { %v3550_v34 = vadd.f32 %v3401_v19, %v820_v22  ;;  %v3553_v35 = vadd.f32 %v3478_v29, %v822_v23  ;;  %v825_v36 = vmul.f32 %v3390_v16, %v537_v31  ;;  %v539_v37 = vpop.f32.mrb[11].mxu0  ;;  %v3556_v38 = vpop.f32.mrb[11].mxu1 }
 0x147   :  { %v3559_v39 = vadd.f32 %v3407_v21, %v821_v26  ;;  %v919_v43 = vadd.f32 %v3481_v32, %v823_v30  ;;  %v826_v44 = vmul.f32 %v3395_v17, %v539_v37 }
 0x148   :  { %4770 = vst [vmem:[#allocation11_spill] sm:$0xff] %v3553_v35  ;;  %v4673_v47 = vmax.f32 %v3553_v35, 0.0  ;;  %v3565_v48 = vadd.f32 %v3401_v19, %v825_v36 }
 0x149   :  { %v989_v51 = vmax.f32 %v919_v43, 0.0  ;;  %v3568_v53 = vadd.f32 %v3407_v21, %v826_v44 }
 0x14b   :  { %v543_v54 = vpop.f32.mrb[12].mxu0  ;;  %v646_v55 = vpop.f32.mrb[12].mxu1  ;;  %v2526_v56 = vpack.i.bf16 %v989_v51, %v4673_v47 }
 0x14c   :  { %v830_v57 = vmul.f32 %v3390_v16, %v543_v54  ;;  %v832_v58 = vmul.f32 %v3472_v27, %v646_v55  ;;  %v545_v59 = vpop.f32.mrb[13].mxu0  ;;  %v648_v60 = vpop.f32.mrb[13].mxu1 }
 0x14d   :  { %v831_v61 = vmul.f32 %v3395_v17, %v545_v59  ;;  %v833_v62 = vmul.f32 %v3475_v28, %v648_v60  ;;  %2527 = vrot.lane.b32.xlu0 %v2526_v56, %s2914_s1  ;;  %v547_v2 = vpop.f32.mrb[14].mxu0  ;;  %v3577_v4 = vpop.f32.mrb[14].mxu1 }
 0x14e   :  { %v3580_v5 = vadd.f32 %v3401_v19, %v830_v57  ;;  %v3583_v7 = vadd.f32 %v3478_v29, %v832_v58  ;;  %v835_v10 = vmul.f32 %v3390_v16, %v547_v2  ;;  %v549_v15 = vpop.f32.mrb[15].mxu0  ;;  %v3586_v18 = vpop.f32.mrb[15].mxu1 }
 0x14f   :  { %v3589_v20 = vadd.f32 %v3407_v21, %v831_v61  ;;  %v929_v22 = vadd.f32 %v3481_v32, %v833_v62  ;;  %v836_v23 = vmul.f32 %v3395_v17, %v549_v15 }
 0x150   :  { %4771 = vst [vmem:[#allocation12_spill] sm:$0xff] %v3583_v7  ;;  %v4672_v24 = vmax.f32 %v3583_v7, 0.0  ;;  %v3595_v25 = vadd.f32 %v3401_v19, %v835_v10  ;;  %v793_v7 = vsub.s32 4, %v3371_v11 }
 0x151   :  { %v999_v26 = vmax.f32 %v929_v22, 0.0  ;;  %v3598_v30 = vadd.f32 %v3407_v21, %v836_v23 }
 0x153   :  { %v553_v31 = vpop.f32.mrb[16].mxu0  ;;  %v656_v36 = vpop.f32.mrb[16].mxu1  ;;  %v2531_v37 = vpack.i.bf16 %v999_v26, %v4672_v24 }
 0x154   :  { %v840_v43 = vmul.f32 %v3390_v16, %v553_v31  ;;  %v842_v44 = vmul.f32 %v3472_v27, %v656_v36  ;;  %v555_v51 = vpop.f32.mrb[17].mxu0  ;;  %v658_v54 = vpop.f32.mrb[17].mxu1 }
 0x155   :  { %v841_v55 = vmul.f32 %v3395_v17, %v555_v51  ;;  %v843_v56 = vmul.f32 %v3475_v28, %v658_v54  ;;  %2532 = vrot.lane.b32.xlu1 %v2531_v37, %s2914_s1  ;;  %v557_v57 = vpop.f32.mrb[18].mxu0  ;;  %v3607_v58 = vpop.f32.mrb[18].mxu1 }
 0x156   :  { %v3610_v59 = vadd.f32 %v3401_v19, %v840_v43  ;;  %v3613_v60 = vadd.f32 %v3478_v29, %v842_v44  ;;  %v845_v61 = vmul.f32 %v3390_v16, %v557_v57  ;;  %v559_v62 = vpop.f32.mrb[19].mxu0  ;;  %v3616_v2 = vpop.f32.mrb[19].mxu1 }
 0x157   :  { %v3619_v10 = vadd.f32 %v3407_v21, %v841_v55  ;;  %v939_v15 = vadd.f32 %v3481_v32, %v843_v56  ;;  %v846_v22 = vmul.f32 %v3395_v17, %v559_v62 }
 0x158   :  { %4772 = vst [vmem:[#allocation13_spill] sm:$0xff] %v3613_v60  ;;  %v4671_v23 = vmax.f32 %v3613_v60, 0.0  ;;  %v3625_v26 = vadd.f32 %v3401_v19, %v845_v61 }
 0x159   :  { %v1009_v31 = vmax.f32 %v939_v15, 0.0  ;;  %v3628_v36 = vadd.f32 %v3407_v21, %v846_v22 }
 0x15a   :  { %4773 = vst [vmem:[#allocation14_spill] sm:$0xff] %v3625_v26 }
 0x15b   :  { %4774 = vst [vmem:[#allocation15_spill] sm:$0xff] %v3628_v36  ;;  %v563_v37 = vpop.f32.mrb[20].mxu0  ;;  %v666_v43 = vpop.f32.mrb[20].mxu1  ;;  %v2536_v44 = vpack.i.bf16 %v1009_v31, %v4671_v23 }
 0x15c   :  { %v850_v51 = vmul.f32 %v3390_v16, %v563_v37  ;;  %v852_v54 = vmul.f32 %v3472_v27, %v666_v43  ;;  %v565_v55 = vpop.f32.mrb[21].mxu0  ;;  %v668_v56 = vpop.f32.mrb[21].mxu1 }
 0x15d   :  { %v851_v57 = vmul.f32 %v3395_v17, %v565_v55  ;;  %v853_v61 = vmul.f32 %v3475_v28, %v668_v56  ;;  %2537 = vrot.lane.b32.xlu0 %v2536_v44, %s2914_s1  ;;  %v567_v62 = vpop.f32.mrb[22].mxu0  ;;  %v3637_v15 = vpop.f32.mrb[22].mxu1 }
 0x15e   :  { %v3640_v22 = vadd.f32 %v3401_v19, %v850_v51  ;;  %v3643_v31 = vadd.f32 %v3478_v29, %v852_v54  ;;  %v855_v37 = vmul.f32 %v3390_v16, %v567_v62  ;;  %v569_v43 = vpop.f32.mrb[23].mxu0  ;;  %v3646_v23 = vpop.f32.mrb[23].mxu1 }
 0x15f   :  { %v3649_v55 = vadd.f32 %v3407_v21, %v851_v57  ;;  %v949_v56 = vadd.f32 %v3481_v32, %v853_v61  ;;  %v856_v44 = vmul.f32 %v3395_v17, %v569_v43 }
 0x160   :  { %4775 = vst [vmem:[#allocation16_spill] sm:$0xff] %v3643_v31  ;;  %v4680_v24 = vmax.f32 %v3643_v31, 0.0  ;;  %v3655_v51 = vadd.f32 %v3401_v19, %v855_v37 }
 0x161   :  { %v1019_v47 = vmax.f32 %v949_v56, 0.0  ;;  %v3658_v54 = vadd.f32 %v3407_v21, %v856_v44 }
 0x162   :  { %4776 = vst [vmem:[#allocation17_spill] sm:$0xff] %v3655_v51 }
 0x163   :  { %4777 = vst [vmem:[#allocation18_spill] sm:$0xff] %v3658_v54  ;;  %v573_v62 = vpop.f32.mrb[24].mxu0  ;;  %v676_v8 = vpop.f32.mrb[24].mxu1  ;;  %v2541_v49 = vpack.i.bf16 %v1019_v47, %v4680_v24 }
 0x164   :  { %v860_v57 = vmul.f32 %v3390_v16, %v573_v62  ;;  %v862_v61 = vmul.f32 %v3472_v27, %v676_v8  ;;  %v575_v60 = vpop.f32.mrb[25].mxu0  ;;  %v678_v43 = vpop.f32.mrb[25].mxu1 }
 0x165   :  { %v861_v37 = vmul.f32 %v3395_v17, %v575_v60  ;;  %v863_v56 = vmul.f32 %v3475_v28, %v678_v43  ;;  %2542 = vrot.lane.b32.xlu1 %v2541_v49, %s2914_s1  ;;  %v577_v44 = vpop.f32.mrb[26].mxu0  ;;  %v3668_v35 = vpop.f32.mrb[26].mxu1  ;;  %v807_v43 = vmul.f32 %v3472_v27, %v3487_v40 }
 0x166   :  { %v3671_v31 = vadd.f32 %v3401_v19, %v860_v57  ;;  %v3674_v47 = vadd.f32 %v3478_v29, %v862_v61  ;;  %v865_v8 = vmul.f32 %v3390_v16, %v577_v44  ;;  %v579_v62 = vpop.f32.mrb[27].mxu0  ;;  %v3677_v24 = vpop.f32.mrb[27].mxu1  ;;  %v3691_v44 = vrot.slane %v3375_v12, %v793_v7 }
 0x167   :  { %v3680_v11 = vadd.f32 %v3407_v21, %v861_v37  ;;  %v959_v60 = vadd.f32 %v3481_v32, %v863_v56  ;;  %v866_v49 = vmul.f32 %v3395_v17, %v579_v62  ;;  %v3699_v56 = vrot.slane %v3384_v14, %v793_v7 }
 0x168   :  { %4778 = vst [vmem:[#allocation19_spill] sm:$0xff] %v3674_v47  ;;  %v4686_v57 = vmax.f32 %v3674_v47, 0.0  ;;  %v3688_v61 = vadd.f32 %v3401_v19, %v865_v8  ;;  %v3704_v8 = vadd.f32 %v3478_v29, %v807_v43 }
 0x169   :  { %4779 = vst [vmem:[#allocation20_spill] sm:$0xff] %v3680_v11  ;;  %v1029_v37 = vmax.f32 %v959_v60, 0.0  ;;  %v3696_v42 = vadd.f32 %v3407_v21, %v866_v49  ;;  %v904_v49 = vadd.f32 %v3481_v32, %v808_v1  ;;  %v817_v1 = vmul.f32 %v3472_v27, %v3517_v63 }
 0x16a   :  { %4780 = vst [vmem:[#allocation21_spill] sm:$0xff] %v3688_v61  ;;  %4782 = vst [vmem:[#allocation23_spill] sm:$0xff] %v3704_v8 }
 0x16b   :  { %4781 = vst [vmem:[#allocation22_spill] sm:$0xff] %v3696_v42  ;;  %v719_v62 = vpop.f32.mrb[28].mxu0  ;;  %v1407_v40 = vpop.f32.mrb[28].mxu1  ;;  %v2546_v11 = vpack.i.bf16 %v1029_v37, %v4686_v57  ;;  %v4691_v57 = vmax.f32 %v3704_v8, 0.0  ;;  %v974_v63 = vmax.f32 %v904_v49, 0.0 }
 0x16c   :  { %v804_v12 = vmul.f32 %v3691_v44, %v719_v62  ;;  %v721_v61 = vpop.f32.mrb[29].mxu0  ;;  %v1668_v45 = vmul.f32 %v1407_v40, %v3390_v16  ;;  %v1409_v60 = vpop.f32.mrb[29].mxu1 }
 0x16d   :  { %2547 = vrot.lane.b32.xlu0 %v2546_v11, %s2914_s1  ;;  %v722_v14 = vpop.f32.mrb[30].mxu0  ;;  %v1669_v7 = vmul.f32 %v1409_v60, %v3395_v17  ;;  %v1411_v42 = vpop.f32.mrb[30].mxu1 }
 0x16e   :  { %v900_v47 = vadd.f32 %v3699_v56, %v804_v12  ;;  %v3713_v37 = vadd.f32 %v1668_v45, %v3401_v19  ;;  %v809_v43 = vmul.f32 %v3691_v44, %v722_v14  ;;  %v724_v62 = vpop.f32.mrb[31].mxu0  ;;  %v1673_v61 = vmul.f32 %v1411_v42, %v3390_v16  ;;  %v1413_v40 = vpop.f32.mrb[31].mxu1 }
 0x16f   :  { %v3720_v11 = vadd.f32 %v1669_v7, %v3407_v21  ;;  %v1674_v60 = vmul.f32 %v1413_v40, %v3395_v17  ;;  %v818_v42 = vmul.f32 %v3475_v28, %v3526_v6  ;;  %v3736_v40 = vadd.f32 %v3478_v29, %v817_v1 }
 0x170   :  { %4783 = vst [vmem:[#allocation24_spill] sm:$0xff] %v3713_v37  ;;  %v970_v12 = vmax.f32 %v900_v47, 0.0  ;;  %v905_v45 = vadd.f32 %v3699_v56, %v809_v43  ;;  %v3726_v37 = vadd.f32 %v1673_v61, %v3401_v19 }
 0x171   :  { %4784 = vst [vmem:[#allocation25_spill] sm:$0xff] %v3720_v11  ;;  %v3731_v14 = vadd.f32 %v1674_v60, %v3407_v21  ;;  %4786 = vst [vmem:[#allocation27_spill] sm:$0xff] %v3736_v40  ;;  %v914_v49 = vadd.f32 %v3481_v32, %v818_v42 }
 0x172   :  { %4785 = vst [vmem:[#allocation26_spill] sm:$0xff] %v3726_v37  ;;  %v975_v62 = vmax.f32 %v905_v45, 0.0  ;;  %v2551_v7 = vpack.i.bf16 %v4691_v57, %v970_v12 }
 0x173   :  { %v727_v47 = vpop.f32.mrb[32].mxu0  ;;  %v1417_v11 = vpop.f32.mrb[32].mxu1 }
 0x174   :  { %v814_v43 = vmul.f32 %v3691_v44, %v727_v47  ;;  %v1678_v61 = vmul.f32 %v1417_v11, %v3390_v16  ;;  %2552 = vrot.lane.b32.xlu0 %v2551_v7, %s2914_s1  ;;  %v729_v6 = vpop.f32.mrb[33].mxu0  ;;  %v1419_v37 = vpop.f32.mrb[33].mxu1  ;;  %v2556_v60 = vpack.i.bf16 %v975_v62, %v974_v63  ;;  %v4695_v63 = vmax.f32 %v3736_v40, 0.0 }
 0x175   :  { %v730_v45 = vpop.f32.mrb[34].mxu0  ;;  %v1679_v8 = vmul.f32 %v1419_v37, %v3395_v17  ;;  %v1421_v12 = vpop.f32.mrb[34].mxu1  ;;  %v827_v62 = vmul.f32 %v3472_v27, %v3547_v33 }
 0x176   :  { %v910_v1 = vadd.f32 %v3699_v56, %v814_v43  ;;  %v3745_v57 = vadd.f32 %v1678_v61, %v3401_v19  ;;  %v819_v47 = vmul.f32 %v3691_v44, %v730_v45  ;;  %v1683_v11 = vmul.f32 %v1421_v12, %v3390_v16  ;;  %2557 = vrot.lane.b32.xlu1 %v2556_v60, %s2914_s1  ;;  %v732_v7 = vpop.f32.mrb[35].mxu0  ;;  %v1423_v6 = vpop.f32.mrb[35].mxu1 }
 0x177   :  { %v3752_v42 = vadd.f32 %v1679_v8, %v3407_v21  ;;  %v1684_v37 = vmul.f32 %v1423_v6, %v3395_v17  ;;  %v828_v60 = vmul.f32 %v3475_v28, %v3556_v38  ;;  %v984_v7 = vmax.f32 %v914_v49, 0.0 }
 0x178   :  { %4787 = vst [vmem:[#allocation28_spill] sm:$0xff] %v3745_v57  ;;  %v980_v43 = vmax.f32 %v910_v1, 0.0  ;;  %v915_v61 = vadd.f32 %v3699_v56, %v819_v47  ;;  %v3759_v45 = vadd.f32 %v1683_v11, %v3401_v19  ;;  %v3769_v33 = vadd.f32 %v3478_v29, %v827_v62 }
 0x179   :  { %4788 = vst [vmem:[#allocation29_spill] sm:$0xff] %v3752_v42  ;;  %v3764_v12 = vadd.f32 %v1684_v37, %v3407_v21  ;;  %v924_v49 = vadd.f32 %v3481_v32, %v828_v60  ;;  %v837_v60 = vmul.f32 %v3472_v27, %v3577_v4 }
 0x17a   :  { %v985_v8 = vmax.f32 %v915_v61, 0.0  ;;  %v2561_v6 = vpack.i.bf16 %v4695_v63, %v980_v43  ;;  %4789 = vst [vmem:[#allocation30_spill] sm:$0xff] %v3769_v33 }
 0x17b   :  { %v735_v42 = vpop.f32.mrb[36].mxu0  ;;  %v1427_v57 = vpop.f32.mrb[36].mxu1  ;;  %v994_v4 = vmax.f32 %v924_v49, 0.0 }
 0x17c   :  { %v824_v1 = vmul.f32 %v3691_v44, %v735_v42  ;;  %v1688_v47 = vmul.f32 %v1427_v57, %v3390_v16  ;;  %2562 = vrot.lane.b32.xlu0 %v2561_v6, %s2914_s1  ;;  %v737_v38 = vpop.f32.mrb[37].mxu0  ;;  %v1429_v11 = vpop.f32.mrb[37].mxu1  ;;  %v2566_v37 = vpack.i.bf16 %v985_v8, %v984_v7 }
 0x17d   :  { %v738_v61 = vpop.f32.mrb[38].mxu0  ;;  %v1689_v40 = vmul.f32 %v1429_v11, %v3395_v17  ;;  %v1431_v43 = vpop.f32.mrb[38].mxu1 }
 0x17e   :  { %v920_v63 = vadd.f32 %v3699_v56, %v824_v1  ;;  %v3778_v62 = vadd.f32 %v1688_v47, %v3401_v19  ;;  %v829_v42 = vmul.f32 %v3691_v44, %v738_v61  ;;  %v1693_v57 = vmul.f32 %v1431_v43, %v3390_v16  ;;  %2567 = vrot.lane.b32.xlu1 %v2566_v37, %s2914_s1  ;;  %v740_v6 = vpop.f32.mrb[39].mxu0  ;;  %v1433_v38 = vpop.f32.mrb[39].mxu1 }
 0x17f   :  { %v3786_v7 = vadd.f32 %v1689_v40, %v3407_v21  ;;  %v1694_v8 = vmul.f32 %v1433_v38, %v3395_v17  ;;  %v4699_v1 = vmax.f32 %v3769_v33, 0.0  ;;  %v838_v37 = vmul.f32 %v3475_v28, %v3586_v18 }
 0x180   :  { %v990_v47 = vmax.f32 %v920_v63, 0.0  ;;  %v925_v11 = vadd.f32 %v3699_v56, %v829_v42  ;;  %v3792_v61 = vadd.f32 %v1693_v57, %v3401_v19  ;;  %v3802_v38 = vadd.f32 %v3478_v29, %v837_v60 }
 0x181   :  { %4790 = vst [vmem:[#allocation31_spill] sm:$0xff] %v3786_v7  ;;  %v3797_v43 = vadd.f32 %v1694_v8, %v3407_v21  ;;  %v934_v49 = vadd.f32 %v3481_v32, %v838_v37 }
 0x182   :  { %4791 = vst [vmem:[#allocation32_spill] sm:$0xff] %v3792_v61  ;;  %v995_v6 = vmax.f32 %v925_v11, 0.0  ;;  %v2571_v40 = vpack.i.bf16 %v4699_v1, %v990_v47  ;;  %4793 = vst [vmem:[#allocation34_spill] sm:$0xff] %v3802_v38 }
 0x183   :  { %4792 = vst [vmem:[#allocation33_spill] sm:$0xff] %v3797_v43  ;;  %v743_v63 = vpop.f32.mrb[40].mxu0  ;;  %v1437_v7 = vpop.f32.mrb[40].mxu1 }
 0x184   :  { %v834_v42 = vmul.f32 %v3691_v44, %v743_v63  ;;  %v1698_v57 = vmul.f32 %v1437_v7, %v3390_v16  ;;  %2572 = vrot.lane.b32.xlu1 %v2571_v40, %s2914_s1  ;;  %v745_v18 = vpop.f32.mrb[41].mxu0  ;;  %v1439_v61 = vpop.f32.mrb[41].mxu1  ;;  %v2576_v8 = vpack.i.bf16 %v995_v6, %v994_v4  ;;  %v4703_v4 = vmax.f32 %v3802_v38, 0.0 }
 0x185   :  { %v746_v11 = vpop.f32.mrb[42].mxu0  ;;  %v1699_v33 = vmul.f32 %v1439_v61, %v3395_v17  ;;  %v1441_v47 = vpop.f32.mrb[42].mxu1  ;;  %v847_v6 = vmul.f32 %v3472_v27, %v3607_v58 }
 0x186   :  { %v930_v60 = vadd.f32 %v3699_v56, %v834_v42  ;;  %v3811_v1 = vadd.f32 %v1698_v57, %v3401_v19  ;;  %v839_v63 = vmul.f32 %v3691_v44, %v746_v11  ;;  %v1703_v7 = vmul.f32 %v1441_v47, %v3390_v16  ;;  %2577 = vrot.lane.b32.xlu0 %v2576_v8, %s2914_s1  ;;  %v748_v40 = vpop.f32.mrb[43].mxu0  ;;  %v1443_v18 = vpop.f32.mrb[43].mxu1 }
 0x187   :  { %v3818_v37 = vadd.f32 %v1699_v33, %v3407_v21  ;;  %v1704_v61 = vmul.f32 %v1443_v18, %v3395_v17  ;;  %v848_v8 = vmul.f32 %v3475_v28, %v3616_v2  ;;  %v1004_v40 = vmax.f32 %v934_v49, 0.0 }
 0x188   :  { %4794 = vst [vmem:[#allocation35_spill] sm:$0xff] %v3811_v1  ;;  %v1000_v42 = vmax.f32 %v930_v60, 0.0  ;;  %v935_v57 = vadd.f32 %v3699_v56, %v839_v63  ;;  %v3825_v11 = vadd.f32 %v1703_v7, %v3401_v19  ;;  %v3835_v58 = vadd.f32 %v3478_v29, %v847_v6 }
 0x189   :  { %4795 = vst [vmem:[#allocation36_spill] sm:$0xff] %v3818_v37  ;;  %v3830_v47 = vadd.f32 %v1704_v61, %v3407_v21  ;;  %v944_v49 = vadd.f32 %v3481_v32, %v848_v8  ;;  %v857_v8 = vmul.f32 %v3472_v27, %v3637_v15 }
 0x18a   :  { %4796 = vst [vmem:[#allocation37_spill] sm:$0xff] %v3825_v11  ;;  %v1005_v33 = vmax.f32 %v935_v57, 0.0  ;;  %v2581_v18 = vpack.i.bf16 %v4703_v4, %v1000_v42  ;;  %4797 = vst [vmem:[#allocation38_spill] sm:$0xff] %v3835_v58 }
 0x18b   :  { %v751_v37 = vpop.f32.mrb[44].mxu0  ;;  %v1447_v1 = vpop.f32.mrb[44].mxu1  ;;  %v1014_v15 = vmax.f32 %v944_v49, 0.0 }
 0x18c   :  { %v844_v60 = vmul.f32 %v3691_v44, %v751_v37  ;;  %v1708_v63 = vmul.f32 %v1447_v1, %v3390_v16  ;;  %2582 = vrot.lane.b32.xlu0 %v2581_v18, %s2914_s1  ;;  %v753_v2 = vpop.f32.mrb[45].mxu0  ;;  %v1449_v7 = vpop.f32.mrb[45].mxu1  ;;  %v2586_v61 = vpack.i.bf16 %v1005_v33, %v1004_v40 }
 0x18d   :  { %v754_v57 = vpop.f32.mrb[46].mxu0  ;;  %v1709_v38 = vmul.f32 %v1449_v7, %v3395_v17  ;;  %v1451_v42 = vpop.f32.mrb[46].mxu1 }
 0x18e   :  { %v940_v4 = vadd.f32 %v3699_v56, %v844_v60  ;;  %v3844_v6 = vadd.f32 %v1708_v63, %v3401_v19  ;;  %v849_v37 = vmul.f32 %v3691_v44, %v754_v57  ;;  %v1713_v1 = vmul.f32 %v1451_v42, %v3390_v16  ;;  %2587 = vrot.lane.b32.xlu1 %v2586_v61, %s2914_s1  ;;  %v756_v18 = vpop.f32.mrb[47].mxu0  ;;  %v1453_v2 = vpop.f32.mrb[47].mxu1 }
 0x18f   :  { %v3852_v40 = vadd.f32 %v1709_v38, %v3407_v21  ;;  %v1714_v33 = vmul.f32 %v1453_v2, %v3395_v17  ;;  %v4707_v60 = vmax.f32 %v3835_v58, 0.0  ;;  %v858_v61 = vmul.f32 %v3475_v28, %v3646_v23 }
 0x190   :  { %4798 = vst [vmem:[#allocation39_spill] sm:$0xff] %v3844_v6  ;;  %v1010_v63 = vmax.f32 %v940_v4, 0.0  ;;  %v945_v7 = vadd.f32 %v3699_v56, %v849_v37  ;;  %v3858_v57 = vadd.f32 %v1713_v1, %v3401_v19  ;;  %v3868_v2 = vadd.f32 %v3478_v29, %v857_v8 }
 0x191   :  { %4799 = vst [vmem:[#allocation40_spill] sm:$0xff] %v3852_v40  ;;  %v3863_v42 = vadd.f32 %v1714_v33, %v3407_v21  ;;  %v954_v49 = vadd.f32 %v3481_v32, %v858_v61 }
 0x192   :  { %4800 = vst [vmem:[#allocation41_spill] sm:$0xff] %v3858_v57  ;;  %v1015_v18 = vmax.f32 %v945_v7, 0.0  ;;  %v2591_v38 = vpack.i.bf16 %v4707_v60, %v1010_v63  ;;  %4802 = vst [vmem:[#allocation43_spill] sm:$0xff] %v3868_v2 }
 0x193   :  { %4801 = vst [vmem:[#allocation42_spill] sm:$0xff] %v3863_v42  ;;  %v759_v4 = vpop.f32.mrb[48].mxu0  ;;  %v1457_v40 = vpop.f32.mrb[48].mxu1 }
 0x194   :  { %v854_v37 = vmul.f32 %v3691_v44, %v759_v4  ;;  %v1718_v1 = vmul.f32 %v1457_v40, %v3390_v16  ;;  %2592 = vrot.lane.b32.xlu1 %v2591_v38, %s2914_s1  ;;  %v761_v23 = vpop.f32.mrb[49].mxu0  ;;  %v1459_v57 = vpop.f32.mrb[49].mxu1  ;;  %v2596_v33 = vpack.i.bf16 %v1015_v18, %v1014_v15  ;;  %v4711_v15 = vmax.f32 %v3868_v2, 0.0 }
 0x195   :  { %v762_v7 = vpop.f32.mrb[50].mxu0  ;;  %v1719_v58 = vmul.f32 %v1459_v57, %v3395_v17  ;;  %v1461_v63 = vpop.f32.mrb[50].mxu1  ;;  %v867_v18 = vmul.f32 %v3472_v27, %v3668_v35 }
 0x196   :  { %v950_v8 = vadd.f32 %v3699_v56, %v854_v37  ;;  %v3877_v60 = vadd.f32 %v1718_v1, %v3401_v19  ;;  %v859_v4 = vmul.f32 %v3691_v44, %v762_v7  ;;  %v1723_v40 = vmul.f32 %v1461_v63, %v3390_v16  ;;  %2597 = vrot.lane.b32.xlu0 %v2596_v33, %s2914_s1  ;;  %v764_v38 = vpop.f32.mrb[51].mxu0  ;;  %v1463_v23 = vpop.f32.mrb[51].mxu1 }
 0x197   :  { %v3884_v61 = vadd.f32 %v1719_v58, %v3407_v21  ;;  %v1724_v57 = vmul.f32 %v1463_v23, %v3395_v17  ;;  %v868_v33 = vmul.f32 %v3475_v28, %v3677_v24  ;;  %v1024_v38 = vmax.f32 %v954_v49, 0.0 }
 0x198   :  { %4803 = vst [vmem:[#allocation44_spill] sm:$0xff] %v3877_v60  ;;  %v1020_v37 = vmax.f32 %v950_v8, 0.0  ;;  %v955_v1 = vadd.f32 %v3699_v56, %v859_v4  ;;  %v3891_v7 = vadd.f32 %v1723_v40, %v3401_v19  ;;  %v3901_v35 = vadd.f32 %v3478_v29, %v867_v18 }
 0x199   :  { %4804 = vst [vmem:[#allocation45_spill] sm:$0xff] %v3884_v61  ;;  %v3896_v63 = vadd.f32 %v1724_v57, %v3407_v21  ;;  %v964_v49 = vadd.f32 %v3481_v32, %v868_v33 }
 0x19a   :  { %4805 = vst [vmem:[#allocation46_spill] sm:$0xff] %v3891_v7  ;;  %v1025_v58 = vmax.f32 %v955_v1, 0.0  ;;  %v2601_v23 = vpack.i.bf16 %v4711_v15, %v1020_v37  ;;  %4807 = vst [vmem:[#allocation48_spill] sm:$0xff] %v3901_v35 }
 0x19b   :  { %4806 = vst [vmem:[#allocation47_spill] sm:$0xff] %v3896_v63  ;;  %v767_v61 = vpop.f32.mrb[52].mxu0  ;;  %v1467_v60 = vpop.f32.mrb[52].mxu1 }
 0x19c   :  { %v864_v8 = vmul.f32 %v3691_v44, %v767_v61  ;;  %v1728_v4 = vmul.f32 %v1467_v60, %v3390_v16  ;;  %2602 = vrot.lane.b32.xlu0 %v2601_v23, %s2914_s1  ;;  %v769_v24 = vpop.f32.mrb[53].mxu0  ;;  %v1469_v40 = vpop.f32.mrb[53].mxu1  ;;  %v2606_v57 = vpack.i.bf16 %v1025_v58, %v1024_v38  ;;  %v4712_v58 = vmax.f32 %v3901_v35, 0.0 }
 0x19d   :  { %v770_v1 = vpop.f32.mrb[54].mxu0  ;;  %v1729_v2 = vmul.f32 %v1469_v40, %v3395_v17  ;;  %v1471_v37 = vpop.f32.mrb[54].mxu1 }
 0x19e   :  { %v960_v15 = vadd.f32 %v3699_v56, %v864_v8  ;;  %v3910_v18 = vadd.f32 %v1728_v4, %v3401_v19  ;;  %v869_v61 = vmul.f32 %v3691_v44, %v770_v1  ;;  %v1733_v60 = vmul.f32 %v1471_v37, %v3390_v16  ;;  %2607 = vrot.lane.b32.xlu1 %v2606_v57, %s2914_s1  ;;  %v772_v23 = vpop.f32.mrb[55].mxu0  ;;  %v1473_v24 = vpop.f32.mrb[55].mxu1 }
 0x19f   :  { %v3916_v38 = vadd.f32 %v1729_v2, %v3407_v21  ;;  %v1734_v33 = vmul.f32 %v1473_v24, %v3395_v17  ;;  %v1034_v16 = vmax.f32 %v964_v49, 0.0 }
 0x1a0   :  { %4808 = vst [vmem:[#allocation49_spill] sm:$0xff] %v3910_v18  ;;  %v1030_v40 = vmax.f32 %v960_v15, 0.0  ;;  %v965_v8 = vadd.f32 %v3699_v56, %v869_v61  ;;  %v3922_v4 = vadd.f32 %v1733_v60, %v3401_v19 }
 0x1a1   :  { %4809 = vst [vmem:[#allocation50_spill] sm:$0xff] %v3916_v38  ;;  %v3925_v1 = vadd.f32 %v1734_v33, %v3407_v21 }
 0x1a2   :  { %4810 = vst [vmem:[#allocation51_spill] sm:$0xff] %v3922_v4  ;;  %v1035_v57 = vmax.f32 %v965_v8, 0.0  ;;  %v2611_v37 = vpack.i.bf16 %v4712_v58, %v1030_v40 }
 0x1a3   :  { %4811 = vst [vmem:[#allocation52_spill] sm:$0xff] %v3925_v1  ;;  %v1510_v2 = vpop.f32.mrb[56].mxu0  ;;  %v1613_v23 = vpop.f32.mrb[56].mxu1 }
 0x1a4   :  { %v1670_v17 = vmul.f32 %v1510_v2, %v3472_v27  ;;  %v1672_v24 = vmul.f32 %v1613_v23, %v3691_v44  ;;  %2612 = vrot.lane.b32.xlu1 %v2611_v37, %s2914_s1  ;;  %v1512_v15 = vpop.f32.mrb[57].mxu0  ;;  %v1615_v61 = vpop.f32.mrb[57].mxu1  ;;  %v2616_v19 = vpack.i.bf16 %v1035_v57, %v1034_v16 }
 0x1a5   :  { %v1671_v60 = vmul.f32 %v1512_v15, %v3475_v28  ;;  %v1514_v21 = vpop.f32.mrb[58].mxu0  ;;  %v1616_v33 = vpop.f32.mrb[58].mxu1 }
 0x1a6   :  { %v3934_v49 = vadd.f32 %v1670_v17, %v3478_v29  ;;  %v1742_v40 = vadd.f32 %v1672_v24, %v3699_v56  ;;  %v1675_v8 = vmul.f32 %v1514_v21, %v3472_v27  ;;  %v1677_v2 = vmul.f32 %v1616_v33, %v3691_v44  ;;  %2617 = vrot.lane.b32.xlu0 %v2616_v19, %s2914_s1  ;;  %v1516_v23 = vpop.f32.mrb[59].mxu0  ;;  %v1618_v37 = vpop.f32.mrb[59].mxu1 }
 0x1a7   :  { %v1741_v61 = vadd.f32 %v1671_v60, %v3481_v32  ;;  %v1676_v16 = vmul.f32 %v1516_v23, %v3475_v28 }
 0x1a8   :  { %4812 = vst [vmem:[#allocation53_spill] sm:$0xff] %v3934_v49  ;;  %v4718_v57 = vmax.f32 %v3934_v49, 0.0  ;;  %v1812_v15 = vmax.f32 %v1742_v40, 0.0  ;;  %v3944_v17 = vadd.f32 %v1675_v8, %v3478_v29  ;;  %v1747_v24 = vadd.f32 %v1677_v2, %v3699_v56 }
 0x1a9   :  { %v1811_v58 = vmax.f32 %v1741_v61, 0.0  ;;  %v1746_v21 = vadd.f32 %v1676_v16, %v3481_v32 }
 0x1aa   :  { %4813 = vst [vmem:[#allocation54_spill] sm:$0xff] %v3944_v17  ;;  %v4717_v33 = vmax.f32 %v3944_v17, 0.0  ;;  %v1817_v19 = vmax.f32 %v1747_v24, 0.0 }
 0x1ab   :  { %v1816_v35 = vmax.f32 %v1746_v21, 0.0  ;;  %v1520_v37 = vpop.f32.mrb[60].mxu0  ;;  %v1621_v1 = vpop.f32.mrb[60].mxu1  ;;  %v2621_v60 = vpack.i.bf16 %v1811_v58, %v4718_v57 }
 0x1ac   :  { %v1680_v23 = vmul.f32 %v1520_v37, %v3472_v27  ;;  %v1522_v40 = vpop.f32.mrb[61].mxu0  ;;  %v1682_v8 = vmul.f32 %v1621_v1, %v3691_v44  ;;  %v1623_v4 = vpop.f32.mrb[61].mxu1  ;;  %v2626_v2 = vpack.i.bf16 %v4717_v33, %v1812_v15 }
 0x1ad   :  { %v1681_v61 = vmul.f32 %v1522_v40, %v3475_v28  ;;  %2622 = vrot.lane.b32.xlu1 %v2621_v60, %s2914_s1  ;;  %v1524_v16 = vpop.f32.mrb[62].mxu0  ;;  %v1624_v24 = vpop.f32.mrb[62].mxu1  ;;  %v2631_v21 = vpack.i.bf16 %v1817_v19, %v1816_v35 }
 0x1ae   :  { %v3958_v38 = vadd.f32 %v1680_v23, %v3478_v29  ;;  %v1752_v58 = vadd.f32 %v1682_v8, %v3699_v56  ;;  %v1685_v37 = vmul.f32 %v1524_v16, %v3472_v27  ;;  %v1687_v1 = vmul.f32 %v1624_v24, %v3691_v44  ;;  %2627 = vrot.lane.b32.xlu0 %v2626_v2, %s2914_s1  ;;  %v1526_v4 = vpop.f32.mrb[63].mxu0  ;;  %v1626_v15 = vpop.f32.mrb[63].mxu1 }
 0x1af   :  { %v1751_v40 = vadd.f32 %v1681_v61, %v3481_v32  ;;  %v1686_v60 = vmul.f32 %v1526_v4, %v3475_v28 }
 0x1b0   :  { %4814 = vst [vmem:[#allocation55_spill] sm:$0xff] %v3958_v38  ;;  %v4722_v33 = vmax.f32 %v3958_v38, 0.0  ;;  %v1822_v35 = vmax.f32 %v1752_v58, 0.0  ;;  %v3968_v19 = vadd.f32 %v1685_v37, %v3478_v29  ;;  %v1757_v23 = vadd.f32 %v1687_v1, %v3699_v56 }
 0x1b1   :  { %v1821_v8 = vmax.f32 %v1751_v40, 0.0  ;;  %v1756_v16 = vadd.f32 %v1686_v60, %v3481_v32  ;;  %2632 = vrot.lane.b32.xlu1 %v2631_v21, %s2914_s1 }
 0x1b2   :  { %4815 = vst [vmem:[#allocation56_spill] sm:$0xff] %v3968_v19  ;;  %v4721_v2 = vmax.f32 %v3968_v19, 0.0  ;;  %v1827_v24 = vmax.f32 %v1757_v23, 0.0 }
 0x1b3   :  { %v1826_v15 = vmax.f32 %v1756_v16, 0.0  ;;  %v1530_v61 = vpop.f32.mrb[64].mxu0  ;;  %v1629_v57 = vpop.f32.mrb[64].mxu1  ;;  %v2636_v4 = vpack.i.bf16 %v1821_v8, %v4722_v33 }
 0x1b4   :  { %v1690_v58 = vmul.f32 %v1530_v61, %v3472_v27  ;;  %v1532_v37 = vpop.f32.mrb[65].mxu0  ;;  %v1692_v17 = vmul.f32 %v1629_v57, %v3691_v44  ;;  %v1631_v1 = vpop.f32.mrb[65].mxu1  ;;  %v2641_v40 = vpack.i.bf16 %v4721_v2, %v1822_v35 }
 0x1b5   :  { %v1691_v21 = vmul.f32 %v1532_v37, %v3475_v28  ;;  %2637 = vrot.lane.b32.xlu0 %v2636_v4, %s2914_s1  ;;  %v1534_v60 = vpop.f32.mrb[66].mxu0  ;;  %v1632_v23 = vpop.f32.mrb[66].mxu1  ;;  %v2646_v16 = vpack.i.bf16 %v1827_v24, %v1826_v15 }
 0x1b6   :  { %v3983_v49 = vadd.f32 %v1690_v58, %v3478_v29  ;;  %v1762_v8 = vadd.f32 %v1692_v17, %v3699_v56  ;;  %v1695_v61 = vmul.f32 %v1534_v60, %v3472_v27  ;;  %v1697_v57 = vmul.f32 %v1632_v23, %v3691_v44  ;;  %2642 = vrot.lane.b32.xlu1 %v2641_v40, %s2914_s1  ;;  %v1536_v1 = vpop.f32.mrb[67].mxu0  ;;  %v1634_v35 = vpop.f32.mrb[67].mxu1 }
 0x1b7   :  { %v1761_v37 = vadd.f32 %v1691_v21, %v3481_v32  ;;  %v1696_v4 = vmul.f32 %v1536_v1, %v3475_v28 }
 0x1b8   :  { %4816 = vst [vmem:[#allocation57_spill] sm:$0xff] %v3983_v49  ;;  %v4726_v2 = vmax.f32 %v3983_v49, 0.0  ;;  %v1832_v24 = vmax.f32 %v1762_v8, 0.0  ;;  %v3993_v15 = vadd.f32 %v1695_v61, %v3478_v29  ;;  %v1767_v17 = vadd.f32 %v1697_v57, %v3699_v56 }
 0x1b9   :  { %v1831_v58 = vmax.f32 %v1761_v37, 0.0  ;;  %v1766_v60 = vadd.f32 %v1696_v4, %v3481_v32  ;;  %2647 = vrot.lane.b32.xlu0 %v2646_v16, %s2914_s1 }
 0x1ba   :  { %4817 = vst [vmem:[#allocation58_spill] sm:$0xff] %v3993_v15  ;;  %v4725_v40 = vmax.f32 %v3993_v15, 0.0  ;;  %v1837_v23 = vmax.f32 %v1767_v17, 0.0 }
 0x1bb   :  { %v1836_v35 = vmax.f32 %v1766_v60, 0.0  ;;  %v1540_v21 = vpop.f32.mrb[68].mxu0  ;;  %v1637_v33 = vpop.f32.mrb[68].mxu1  ;;  %v2651_v1 = vpack.i.bf16 %v1831_v58, %v4726_v2 }
 0x1bc   :  { %v1700_v8 = vmul.f32 %v1540_v21, %v3472_v27  ;;  %v1542_v61 = vpop.f32.mrb[69].mxu0  ;;  %v1702_v19 = vmul.f32 %v1637_v33, %v3691_v44  ;;  %v1639_v57 = vpop.f32.mrb[69].mxu1  ;;  %v2656_v37 = vpack.i.bf16 %v4725_v40, %v1832_v24 }
 0x1bd   :  { %v1701_v16 = vmul.f32 %v1542_v61, %v3475_v28  ;;  %2652 = vrot.lane.b32.xlu1 %v2651_v1, %s2914_s1  ;;  %v1544_v4 = vpop.f32.mrb[70].mxu0  ;;  %v1640_v17 = vpop.f32.mrb[70].mxu1  ;;  %v2661_v60 = vpack.i.bf16 %v1837_v23, %v1836_v35 }
 0x1be   :  { %v4008_v38 = vadd.f32 %v1700_v8, %v3478_v29  ;;  %v1772_v58 = vadd.f32 %v1702_v19, %v3699_v56  ;;  %v1705_v21 = vmul.f32 %v1544_v4, %v3472_v27  ;;  %v1707_v33 = vmul.f32 %v1640_v17, %v3691_v44  ;;  %2657 = vrot.lane.b32.xlu0 %v2656_v37, %s2914_s1  ;;  %v1546_v57 = vpop.f32.mrb[71].mxu0  ;;  %v1642_v24 = vpop.f32.mrb[71].mxu1 }
 0x1bf   :  { %v1771_v61 = vadd.f32 %v1701_v16, %v3481_v32  ;;  %v1706_v1 = vmul.f32 %v1546_v57, %v3475_v28  ;;  %v4023_v37 = vpop.permute.xlu0 %2517 }
 0x1c0   :  { %4818 = vst [vmem:[#allocation59_spill] sm:$0xff] %v4008_v38  ;;  %v4731_v40 = vmax.f32 %v4008_v38, 0.0  ;;  %v1842_v23 = vmax.f32 %v1772_v58, 0.0  ;;  %v4018_v35 = vadd.f32 %v1705_v21, %v3478_v29  ;;  %v1777_v19 = vadd.f32 %v1707_v33, %v3699_v56 }
 0x1c1   :  { %v1841_v8 = vmax.f32 %v1771_v61, 0.0  ;;  %v1776_v4 = vadd.f32 %v1706_v1, %v3481_v32  ;;  %2662 = vrot.lane.b32.xlu1 %v2661_v60, %s2914_s1 }
 0x1c2   :  { %4819 = vst [vmem:[#allocation60_spill] sm:$0xff] %v4018_v35  ;;  %v4730_v17 = vmax.f32 %v4018_v35, 0.0  ;;  %v1847_v16 = vmax.f32 %v1777_v19, 0.0 }
 0x1c3   :  { %v1846_v24 = vmax.f32 %v1776_v4, 0.0  ;;  %v1550_v57 = vpop.f32.mrb[72].mxu0  ;;  %v1645_v2 = vpop.f32.mrb[72].mxu1  ;;  %v2666_v58 = vpack.i.bf16 %v1841_v8, %v4731_v40 }
 0x1c4   :  { %v1710_v21 = vmul.f32 %v1550_v57, %v3472_v27  ;;  %v1552_v15 = vpop.f32.mrb[73].mxu0  ;;  %v1712_v33 = vmul.f32 %v1645_v2, %v3691_v44  ;;  %v1647_v61 = vpop.f32.mrb[73].mxu1  ;;  %v2671_v60 = vpack.i.bf16 %v4730_v17, %v1842_v23 }
 0x1c5   :  { %v1711_v1 = vmul.f32 %v1552_v15, %v3475_v28  ;;  %2667 = vrot.lane.b32.xlu0 %v2666_v58, %s2914_s1  ;;  %v1554_v19 = vpop.f32.mrb[74].mxu0  ;;  %v1648_v4 = vpop.f32.mrb[74].mxu1  ;;  %v2676_v49 = vpack.i.bf16 %v1847_v16, %v1846_v24 }
 0x1c6   :  { %v4035_v18 = vadd.f32 %v1710_v21, %v3478_v29  ;;  %v1782_v8 = vadd.f32 %v1712_v33, %v3699_v56  ;;  %v1715_v57 = vmul.f32 %v1554_v19, %v3472_v27  ;;  %v1717_v2 = vmul.f32 %v1648_v4, %v3691_v44  ;;  %2672 = vrot.lane.b32.xlu1 %v2671_v60, %s2914_s1  ;;  %v1556_v61 = vpop.f32.mrb[75].mxu0  ;;  %v1650_v23 = vpop.f32.mrb[75].mxu1 }
 0x1c7   :  { %v1781_v15 = vadd.f32 %v1711_v1, %v3481_v32  ;;  %v1716_v58 = vmul.f32 %v1556_v61, %v3475_v28  ;;  %v4050_v60 = vpop.permute.xlu1 %2522  ;;  %v4052_v4 = vpop.permute.xlu0 %2527 }
 0x1c8   :  { %4820 = vst [vmem:[#allocation61_spill] sm:$0xff] %v4035_v18  ;;  %v4737_v17 = vmax.f32 %v4035_v18, 0.0  ;;  %v1852_v16 = vmax.f32 %v1782_v8, 0.0  ;;  %v4045_v24 = vadd.f32 %v1715_v57, %v3478_v29  ;;  %v1787_v21 = vadd.f32 %v1717_v2, %v3699_v56  ;;  %4822 = vst [vmem:[#allocation63_spill] sm:$0xff] %v4052_v4 }
 0x1c9   :  { %v1851_v33 = vmax.f32 %v1781_v15, 0.0  ;;  %v1786_v19 = vadd.f32 %v1716_v58, %v3481_v32  ;;  %2677 = vrot.lane.b32.xlu0 %v2676_v49, %s2914_s1  ;;  %v2525_v51 = vunpack.i.h.bf16 %v4050_v60 }
 0x1ca   :  { %4821 = vst [vmem:[#allocation62_spill] sm:$0xff] %v4045_v24  ;;  %v4736_v1 = vmax.f32 %v4045_v24, 0.0  ;;  %v1857_v61 = vmax.f32 %v1787_v21, 0.0 }
 0x1cb   :  { %v1856_v23 = vmax.f32 %v1786_v19, 0.0  ;;  %v1560_v40 = vpop.f32.mrb[76].mxu0  ;;  %v1653_v8 = vpop.f32.mrb[76].mxu1  ;;  %v2681_v57 = vpack.i.bf16 %v1851_v33, %v4737_v17 }
 0x1cc   :  { %v1720_v2 = vmul.f32 %v1560_v40, %v3472_v27  ;;  %v1562_v15 = vpop.f32.mrb[77].mxu0  ;;  %v1722_v58 = vmul.f32 %v1653_v8, %v3691_v44  ;;  %v1655_v35 = vpop.f32.mrb[77].mxu1  ;;  %v2686_v49 = vpack.i.bf16 %v4736_v1, %v1852_v16 }
 0x1cd   :  { %v1721_v38 = vmul.f32 %v1562_v15, %v3475_v28  ;;  %2682 = vrot.lane.b32.xlu1 %v2681_v57, %s2914_s1  ;;  %v1564_v21 = vpop.f32.mrb[78].mxu0  ;;  %v1656_v19 = vpop.f32.mrb[78].mxu1  ;;  %v2691_v63 = vpack.i.bf16 %v1857_v61, %v1856_v23 }
 0x1ce   :  { %v4064_v4 = vadd.f32 %v1720_v2, %v3478_v29  ;;  %v1792_v33 = vadd.f32 %v1722_v58, %v3699_v56  ;;  %v1725_v40 = vmul.f32 %v1564_v21, %v3472_v27  ;;  %v1727_v8 = vmul.f32 %v1656_v19, %v3691_v44  ;;  %2687 = vrot.lane.b32.xlu0 %v2686_v49, %s2914_s1  ;;  %v1566_v35 = vpop.f32.mrb[79].mxu0  ;;  %v1658_v16 = vpop.f32.mrb[79].mxu1 }
 0x1cf   :  { %v1791_v15 = vadd.f32 %v1721_v38, %v3481_v32  ;;  %v1726_v57 = vmul.f32 %v1566_v35, %v3475_v28  ;;  %v4072_v1 = vpop.permute.xlu0 %2537  ;;  %v1006_v38 = vmax.f32 %v3610_v59, 0.0  ;;  %v4084_v35 = vpop.permute.xlu1 %2532 }
 0x1d0   :  { %4823 = vst [vmem:[#allocation64_spill] sm:$0xff] %v4064_v4  ;;  %v4747_v61 = vmax.f32 %v4064_v4, 0.0  ;;  %v1862_v23 = vmax.f32 %v1792_v33, 0.0  ;;  %v4076_v2 = vadd.f32 %v1725_v40, %v3478_v29  ;;  %v1797_v58 = vadd.f32 %v1727_v8, %v3699_v56  ;;  %4825 = vst [vmem:[#allocation66_spill] sm:$0xff] %v4084_v35 }
 0x1d1   :  { %v1861_v21 = vmax.f32 %v1791_v15, 0.0  ;;  %v1796_v19 = vadd.f32 %v1726_v57, %v3481_v32  ;;  %v4742_v49 = vunpack.i.h.bf16 %v4072_v1  ;;  %v2539_v16 = vunpack.i.l.bf16 %v4072_v1  ;;  %2692 = vrot.lane.b32.xlu1 %v2691_v63, %s2914_s1 }
 0x1d2   :  { %4824 = vst [vmem:[#allocation65_spill] sm:$0xff] %v4076_v2  ;;  %v4746_v33 = vmax.f32 %v4076_v2, 0.0  ;;  %v1867_v40 = vmax.f32 %v1797_v58, 0.0  ;;  %v4839_v2 = vld [vmem:[#allocation28_spill] sm:$0xff] }
 0x1d3   :  { %v1866_v17 = vmax.f32 %v1796_v19, 0.0  ;;  %v1179_v8 = vsel %vm1162_vm1, %v2539_v16, %v4742_v49  ;;  %v1570_v15 = vpop.f32.mrb[80].mxu0  ;;  %v1661_v57 = vpop.f32.mrb[80].mxu1  ;;  %v2696_v24 = vpack.i.bf16 %v1861_v21, %v4747_v61  ;;  %v4842_v61 = vld [vmem:[#allocation31_spill] sm:$0xff] }
 0x1d4   :  { %v4092_v18 = vmax.f32 %v1006_v38, %v1179_v8  ;;  %v1730_v59 = vmul.f32 %v1570_v15, %v3472_v27  ;;  %v1572_v63 = vpop.f32.mrb[81].mxu0  ;;  %v1732_v35 = vmul.f32 %v1661_v57, %v3691_v44  ;;  %v1663_v7 = vpop.f32.mrb[81].mxu1  ;;  %v2701_v58 = vpack.i.bf16 %v4746_v33, %v1862_v23 }
 0x1d5   :  { %v1731_v19 = vmul.f32 %v1572_v63, %v3475_v28  ;;  %2697 = vrot.lane.b32.xlu0 %v2696_v24, %s2914_s1  ;;  %v1574_v16 = vpop.f32.mrb[82].mxu0  ;;  %v1664_v49 = vpop.f32.mrb[82].mxu1  ;;  %v2706_v42 = vpack.i.bf16 %v1867_v40, %v1866_v17 }
 0x1d6   :  { %4826 = vst [vmem:[#allocation67_spill] sm:$0xff] %v4092_v18  ;;  %v4101_v21 = vadd.f32 %v1730_v59, %v3478_v29  ;;  %v1802_v38 = vadd.f32 %v1732_v35, %v3699_v56  ;;  %v1735_v8 = vmul.f32 %v1574_v16, %v3472_v27  ;;  %v1737_v15 = vmul.f32 %v1664_v49, %v3691_v44  ;;  %v1576_v7 = vpop.f32.mrb[83].mxu0  ;;  %v1666_v23 = vpop.f32.mrb[83].mxu1 }
 0x1d7   :  { %2702 = vrot.lane.b32.xlu1 %v2701_v58, %s2914_s1  ;;  %v1801_v57 = vadd.f32 %v1731_v19, %v3481_v32  ;;  %v1736_v24 = vmul.f32 %v1576_v7, %v3475_v28  ;;  %v4109_v63 = vpop.permute.xlu1 %2542  ;;  %v1016_v28 = vmax.f32 %v3640_v22, 0.0  ;;  %v1026_v23 = vmax.f32 %v3671_v31, 0.0 }
 0x1d8   :  { %4827 = vst [vmem:[#allocation68_spill] sm:$0xff] %v4101_v21  ;;  %v4745_v17 = vmax.f32 %v4101_v21, 0.0  ;;  %v1872_v40 = vmax.f32 %v1802_v38, 0.0  ;;  %v4113_v59 = vadd.f32 %v1735_v8, %v3478_v29  ;;  %v1807_v27 = vadd.f32 %v1737_v15, %v3699_v56 }
 0x1d9   :  { %v1871_v35 = vmax.f32 %v1801_v57, 0.0  ;;  %v1806_v44 = vadd.f32 %v1736_v24, %v3481_v32  ;;  %v4750_v49 = vunpack.i.h.bf16 %v4109_v63  ;;  %v2544_v58 = vunpack.i.l.bf16 %v4109_v63  ;;  %2707 = vrot.lane.b32.xlu0 %v2706_v42, %s2914_s1 }
 0x1da   :  { %4828 = vst [vmem:[#allocation69_spill] sm:$0xff] %v4113_v59  ;;  %v4744_v19 = vmax.f32 %v4113_v59, 0.0  ;;  %v1877_v16 = vmax.f32 %v1807_v27, 0.0  ;;  %v4836_v59 = vld [vmem:[#allocation24_spill] sm:$0xff]  ;;  %v4846_v21 = vunpack.i.h.bf16 %v4109_v63 }
 0x1db   :  { %v1876_v38 = vmax.f32 %v1806_v44, 0.0  ;;  %v1183_v29 = vsel %vm1162_vm1, %v2544_v58, %v4750_v49  ;;  %v2711_v56 = vpack.i.bf16 %v1871_v35, %v4745_v17  ;;  %v4843_v49 = vld [vmem:[#allocation32_spill] sm:$0xff] }
 0x1dc   :  { %v4127_v32 = vmax.f32 %v1016_v28, %v1183_v29  ;;  %v2716_v8 = vpack.i.bf16 %v4744_v19, %v1872_v40  ;;  %v1007_v29 = vmax.f32 %v3619_v10, 0.0  ;;  %v4831_v19 = vunpack.i.h.bf16 %v4072_v1 }
 0x1dd   :  { %2712 = vrot.lane.b32.xlu1 %v2711_v56, %s2914_s1  ;;  %v2721_v42 = vpack.i.bf16 %v1877_v16, %v1876_v38  ;;  %v4833_v16 = vld [vmem:[#allocation20_spill] sm:$0xff]  ;;  %v2520_v1 = vunpack.i.h.bf16 %v4023_v37  ;;  %v2524_v56 = vunpack.i.l.bf16 %v4050_v60 }
 0x1de   :  { %4829 = vst [vmem:[#allocation70_spill] sm:$0xff] %v4127_v32  ;;  %2717 = vrot.lane.b32.xlu0 %v2716_v8, %s2914_s1  ;;  %v4840_v32 = vld [vmem:[#allocation29_spill] sm:$0xff] }
 0x1df   :  { %v4133_v22 = vpop.permute.xlu0 %2547 }
 0x1e0   :  { %v4748_v15 = vunpack.i.h.bf16 %v4133_v22  ;;  %v2549_v7 = vunpack.i.l.bf16 %v4133_v22 }
 0x1e1   :  { %2722 = vrot.lane.b32.xlu1 %v2721_v42, %s2914_s1 }
 0x1e2   :  { %v1187_v57 = vsel %vm1162_vm1, %v2549_v7, %v4748_v15 }
 0x1e3   :  { %v4142_v24 = vmax.f32 %v1026_v23, %v1187_v57  ;;  %v1017_v23 = vmax.f32 %v3649_v55, 0.0  ;;  %v4854_v55 = vld [vmem:[#allocation63_spill] sm:$0xff] }
 0x1e4   :  { %v2530_v15 = vunpack.i.h.bf16 %v4854_v55  ;;  %v2529_v18 = vunpack.i.l.bf16 %v4854_v55 }
 0x1e5   :  { %4830 = vst [vmem:[#allocation71_spill] sm:$0xff] %v4142_v24  ;;  %v4838_v24 = vld [vmem:[#allocation26_spill] sm:$0xff] }
 0x1e6   :  { %v4146_v27 = vpop.permute.xlu0 %2552 }
 0x1e8   :  { %v4144_v40 = vpop.permute.xlu1 %2557 }
 0x1e9   :  { %v2560_v63 = vunpack.i.h.bf16 %v4144_v40 }
 0x1ee   :  { %v4150_v44 = vpop.permute.xlu0 %2562 }
 0x1ef   :  { %v2564_v4 = vunpack.i.l.bf16 %v4150_v44  ;;  %v2565_v54 = vunpack.i.h.bf16 %v4150_v44 }
 0x1f0   :  { %v4148_v35 = vpop.permute.xlu1 %2567 }
 0x1f6   :  { %v4152_v58 = vpop.permute.xlu1 %2572 }
 0x1f8   :  { %v4154_v28 = vpop.permute.xlu0 %2577 }
 0x1fe   :  { %v4163_v42 = vpop.permute.xlu0 %2582 }
 0x200   :  { %v4156_v31 = vpop.permute.xlu1 %2587 }
 0x206   :  { %v4165_v7 = vpop.permute.xlu1 %2592 }
 0x207   :  { %v4749_v17 = vunpack.i.l.bf16 %v4165_v7 }
 0x208   :  { %v4188_v10 = vpop.permute.xlu0 %2597 }
 0x209   :  { %v1180_v57 = vsel %vm1162_vm1, %v4831_v19, %v4749_v17  ;;  %v1027_v19 = vmax.f32 %v4833_v16, 0.0  ;;  %v2519_v16 = vunpack.i.l.bf16 %v4023_v37 }
 0x20a   :  { %v4186_v8 = vmax.f32 %v1007_v29, %v1180_v57  ;;  %v4837_v29 = vld [vmem:[#allocation25_spill] sm:$0xff] }
 0x20c   :  { %4832 = vst [vmem:[#allocation72_spill] sm:$0xff] %v4186_v8  ;;  %v4856_v8 = vld [vmem:[#allocation66_spill] sm:$0xff] }
 0x20d   :  { %v2534_v60 = vunpack.i.l.bf16 %v4856_v8  ;;  %v4864_v55 = vunpack.i.h.bf16 %v4856_v8 }
 0x20e   :  { %v4206_v17 = vpop.permute.xlu0 %2602 }
 0x20f   :  { %4841 = vst [vmem:[#allocation20_spill] sm:$0xff] %v4206_v17  ;;  %v4763_v38 = vunpack.i.l.bf16 %v4206_v17  ;;  %v4863_v17 = vmax.f32 %v3520_v0, 0.0  ;;  %v4865_v0 = vunpack.i.h.bf16 %v4133_v22  ;;  %v2579_v22 = vunpack.i.l.bf16 %v4154_v28 }
 0x210   :  { %v4229_v37 = vpop.permute.xlu1 %2607 }
 0x211   :  { %v1184_v57 = vsel %vm1162_vm1, %v4846_v21, %v4763_v38  ;;  %v1163_v38 = vsel %vm1162_vm1, %v2519_v16, %v2520_v1  ;;  %v2554_v16 = vunpack.i.l.bf16 %v4146_v27  ;;  %v1171_v21 = vsel %vm1162_vm1, %v2529_v18, %v2530_v15 }
 0x212   :  { %v4227_v36 = vmax.f32 %v1017_v23, %v1184_v57  ;;  %v4862_v57 = vmax.f32 %v3490_v41, 0.0  ;;  %v1175_v41 = vsel %vm1162_vm1, %v2534_v60, %v4864_v55  ;;  %v4867_v60 = vmax.f32 %v3550_v34, 0.0 }
 0x213   :  { %v1164_v18 = vsel %vm1162_vm1, %v2520_v1, %v2554_v16  ;;  %v4869_v1 = vld [vmem:[#allocation9_spill] sm:$0xff] }
 0x214   :  { %4848 = vst [vmem:[#allocation24_spill] sm:$0xff] %v4227_v36  ;;  %v1167_v36 = vsel %vm1162_vm1, %v2524_v56, %v2525_v51  ;;  %v4252_v23 = vmax.f32 %v4862_v57, %v1163_v38  ;;  %v2559_v56 = vunpack.i.l.bf16 %v4144_v40  ;;  %v2555_v38 = vunpack.i.h.bf16 %v4146_v27 }
 0x215   :  { %v4258_v26 = vmax.f32 %v4863_v17, %v1167_v36  ;;  %v2569_v57 = vunpack.i.l.bf16 %v4148_v35  ;;  %v2570_v17 = vunpack.i.h.bf16 %v4148_v35  ;;  %v2574_v40 = vunpack.i.l.bf16 %v4152_v58 }
 0x216   :  { %v4247_v43 = vpop.permute.xlu1 %2612  ;;  %v4280_v55 = vmax.f32 %v4867_v60, %v1171_v21  ;;  %v1165_v27 = vsel %vm1162_vm1, %v2555_v38, %v2559_v56  ;;  %v4870_v35 = vmax.f32 %v4869_v1, 0.0  ;;  %v4871_v21 = vmax.f32 %v3499_v46, 0.0  ;;  %v4872_v60 = vld [vmem:[#allocation23_spill] sm:$0xff] }
 0x217   :  { %4860 = vst [vmem:[#allocation25_spill] sm:$0xff] %v4247_v43  ;;  %v4764_v11 = vunpack.i.l.bf16 %v4247_v43  ;;  %v4873_v44 = vmax.f32 %v4872_v60, 0.0  ;;  %v1169_v6 = vsel %vm1162_vm1, %v2565_v54, %v2569_v57  ;;  %v4875_v46 = vmax.f32 %v3508_v52, 0.0  ;;  %v4877_v54 = vld [vmem:[#allocation10_spill] sm:$0xff] }
 0x218   :  { %v1235_v43 = vmax.f32 %v4870_v35, %v2554_v16  ;;  %v4293_v34 = vpop.permute.xlu0 %2617  ;;  %v1234_v38 = vmax.f32 %v4871_v21, %v1164_v18  ;;  %v1170_v16 = vsel %vm1162_vm1, %v2569_v57, %v2570_v17  ;;  %v4876_v1 = vmax.f32 %v3529_v3, 0.0  ;;  %v4879_v57 = vld [vmem:[#allocation27_spill] sm:$0xff] }
 0x219   :  { %v1188_v36 = vsel %vm1162_vm1, %v4865_v0, %v4764_v11  ;;  %v4868_v0 = vmax.f32 %v3580_v5, 0.0  ;;  %v2575_v5 = vunpack.i.h.bf16 %v4152_v58  ;;  %v4878_v35 = vmax.f32 %v4877_v54, 0.0  ;;  %v4886_v54 = vld [vmem:[#allocation30_spill] sm:$0xff] }
 0x21a   :  { %v4276_v33 = vmax.f32 %v1027_v19, %v1188_v36  ;;  %v1166_v19 = vsel %vm1162_vm1, %v2559_v56, %v2560_v63  ;;  %v1168_v36 = vsel %vm1162_vm1, %v2525_v51, %v2564_v4  ;;  %v1172_v56 = vsel %vm1162_vm1, %v2530_v15, %v2574_v40 }
 0x21b   :  { %v4287_v11 = vmax.f32 %v4868_v0, %v1175_v41  ;;  %v4874_v41 = vmax.f32 %v3505_v50, 0.0  ;;  %v2580_v51 = vunpack.i.h.bf16 %v4154_v28  ;;  %v1237_v18 = vmax.f32 %v4875_v46, %v1166_v19 }
 0x21c   :  { %4866 = vst [vmem:[#allocation26_spill] sm:$0xff] %v4276_v33  ;;  %v1238_v33 = vmax.f32 %v4873_v44, %v2560_v63  ;;  %v4310_v63 = vmax.f32 %v4876_v1, %v1168_v36  ;;  %v4314_v58 = vmax.f32 %v4878_v35, %v2564_v4  ;;  %v1173_v50 = vsel %vm1162_vm1, %v2575_v5, %v2579_v22  ;;  %v4884_v5 = vld [vmem:[#allocation11_spill] sm:$0xff] }
 0x21d   :  { %v1236_v0 = vmax.f32 %v4874_v41, %v1165_v27  ;;  %v4880_v21 = vmax.f32 %v4879_v57, 0.0  ;;  %v4881_v28 = vmax.f32 %v3535_v9, 0.0  ;;  %v4882_v36 = vmax.f32 %v3538_v13, 0.0 }
 0x21e   :  { %v4883_v4 = vmax.f32 %v3559_v39, 0.0  ;;  %v4885_v46 = vmax.f32 %v4884_v5, 0.0  ;;  %v4887_v9 = vmax.f32 %v4886_v54, 0.0  ;;  %v1174_v35 = vsel %vm1162_vm1, %v2579_v22, %v2580_v51 }
 0x21f   :  { %v2623_v27 = vpop.permute.xlu1 %2622  ;;  %v4319_v15 = vmax.f32 %v4880_v21, %v2570_v17  ;;  %v4323_v60 = vmax.f32 %v4881_v28, %v1169_v6  ;;  %v4327_v44 = vmax.f32 %v4882_v36, %v1170_v16  ;;  %v2584_v39 = vunpack.i.l.bf16 %v4163_v42  ;;  %v4890_v21 = vld [vmem:[#allocation53_spill] sm:$0xff] }
 0x220   :  { %v2625_v52 = vunpack.i.h.bf16 %v2623_v27  ;;  %v2624_v19 = vunpack.i.l.bf16 %v2623_v27  ;;  %v2628_v3 = vpop.permute.xlu0 %2627  ;;  %v4331_v41 = vmax.f32 %v4883_v4, %v1172_v56  ;;  %v4335_v1 = vmax.f32 %v4885_v46, %v2574_v40 }
 0x221   :  { %v2629_v17 = vunpack.i.l.bf16 %v2628_v3  ;;  %v4339_v6 = vmax.f32 %v4887_v9, %v2580_v51  ;;  %v4888_v27 = vmax.f32 %v3565_v48, 0.0  ;;  %v4889_v56 = vmax.f32 %v4836_v59, 0.0 }
 0x222   :  { %v2004_v16 = vsel %vm1162_vm1, %v2624_v19, %v2625_v52  ;;  %v4891_v28 = vmax.f32 %v4890_v21, 0.0  ;;  %v2630_v5 = vunpack.i.h.bf16 %v2628_v3  ;;  %v4892_v22 = vmax.f32 %v4837_v29, 0.0 }
 0x223   :  { %v4344_v13 = vmax.f32 %v4888_v27, %v1173_v50  ;;  %v2074_v57 = vmax.f32 %v4889_v56, %v2004_v16  ;;  %v2005_v40 = vsel %vm1162_vm1, %v2625_v52, %v2629_v17  ;;  %v2633_v4 = vpop.permute.xlu1 %2632  ;;  %v4893_v46 = vmax.f32 %v3568_v53, 0.0  ;;  %v4894_v27 = vld [vmem:[#allocation54_spill] sm:$0xff] }
 0x224   :  { %v2076_v36 = vmax.f32 %v4891_v28, %v2629_v17  ;;  %v2075_v51 = vmax.f32 %v4892_v22, %v2005_v40  ;;  %v2635_v48 = vunpack.i.h.bf16 %v2633_v4  ;;  %v2634_v50 = vunpack.i.l.bf16 %v2633_v4 }
 0x225   :  { %v4357_v19 = vmax.f32 %v4893_v46, %v1174_v35  ;;  %v2585_v54 = vunpack.i.h.bf16 %v4163_v42  ;;  %v2116_v59 = vmax.f32 %v4252_v23, %v2074_v57  ;;  %v4895_v16 = vmax.f32 %v4894_v27, 0.0 }
 0x226   :  { %v2118_v9 = vmax.f32 %v1235_v43, %v2076_v36  ;;  %v2117_v52 = vmax.f32 %v1234_v38, %v2075_v51  ;;  %v2006_v3 = vsel %vm1162_vm1, %v2630_v5, %v2634_v50  ;;  %v2007_v29 = vsel %vm1162_vm1, %v2634_v50, %v2635_v48  ;;  %v4899_v51 = vld [vmem:[#allocation12_spill] sm:$0xff] }
 0x227   :  { %v2079_v17 = vmax.f32 %v4895_v16, %v2635_v48  ;;  %v4896_v56 = vunpack.i.h.bf16 %v4856_v8  ;;  %v4897_v35 = vmax.f32 %v4838_v24, 0.0  ;;  %v4898_v42 = vmax.f32 %v3731_v14, 0.0  ;;  %v2638_v43 = vpop.permute.xlu0 %2637 }
 0x228   :  { %v2482_v53 = vpack.c.bf16 %v2118_v9, %v2118_v9  ;;  %v2481_v38 = vpack.c.bf16 %v2117_v52, %v2116_v59  ;;  %v2640_v28 = vunpack.i.h.bf16 %v2638_v43  ;;  %v2639_v36 = vunpack.i.l.bf16 %v2638_v43  ;;  %v2643_v4 = vpop.permute.xlu1 %2642 }
 0x229   :  { %v1176_v40 = vsel %vm1162_vm1, %v4896_v56, %v2584_v39  ;;  %v2077_v21 = vmax.f32 %v4897_v35, %v2006_v3  ;;  %v2078_v23 = vmax.f32 %v4898_v42, %v2007_v29  ;;  %v2121_v57 = vmax.f32 %v1238_v33, %v2079_v17 }
 0x22a   :  { %v2589_v5 = vunpack.i.l.bf16 %v4156_v31  ;;  %2300 = vst.msk [vmem:[%s4670_s5 + $0x8] sm:$0xf] %vm2299_vm2, %v2482_v53  ;;  %v2644_v24 = vunpack.i.l.bf16 %v2643_v4  ;;  %v4900_v48 = vmax.f32 %v4899_v51, 0.0  ;;  %v2590_v50 = vunpack.i.h.bf16 %v4156_v31  ;;  %2298 = vst [vmem:[%s4670_s5] sm:$0xff] %v2481_v38 }
 0x22b   :  { %v2119_v8 = vmax.f32 %v1236_v0, %v2077_v21  ;;  %v2120_v22 = vmax.f32 %v1237_v18, %v2078_v23  ;;  %v2484_v33 = vpack.c.bf16 %v2121_v57, %v2121_v57  ;;  %v2008_v46 = vsel %vm1162_vm1, %v2639_v36, %v2640_v28  ;;  %v4902_v18 = vld [vmem:[#allocation55_spill] sm:$0xff] }
 0x22c   :  { %v4379_v14 = vmax.f32 %v4900_v48, %v2584_v39  ;;  %v4901_v9 = vmax.f32 %v4839_v2, 0.0  ;;  %v2009_v0 = vsel %vm1162_vm1, %v2640_v28, %v2644_v24  ;;  %v4903_v27 = vmax.f32 %v4902_v18, 0.0  ;;  %v2648_v39 = vpop.permute.xlu0 %2647  ;;  %v4910_v48 = vld [vmem:[#allocation34_spill] sm:$0xff] }
 0x22d   :  { %v2483_v59 = vpack.c.bf16 %v2120_v22, %v2119_v8  ;;  %2302 = vst.msk [vmem:[%s4670_s5 + $0x14] sm:$0xf] %vm2299_vm2, %v2484_v33  ;;  %v2645_v31 = vunpack.i.h.bf16 %v2643_v4  ;;  %v4904_v17 = vmax.f32 %v4840_v32, 0.0  ;;  %v2650_v29 = vunpack.i.h.bf16 %v2648_v39  ;;  %v4906_v32 = vld [vmem:[#allocation56_spill] sm:$0xff] }
 0x22e   :  { %v2080_v52 = vmax.f32 %v4901_v9, %v2008_v46  ;;  %v2082_v16 = vmax.f32 %v4903_v27, %v2644_v24  ;;  %v2649_v56 = vunpack.i.l.bf16 %v2648_v39  ;;  %v4905_v2 = vmax.f32 %v3589_v20, 0.0 }
 0x22f   :  { %v2081_v3 = vmax.f32 %v4904_v17, %v2009_v0  ;;  %v1177_v35 = vsel %vm1162_vm1, %v2585_v54, %v2589_v5  ;;  %2301 = vst [vmem:[%s4670_s5 + $0xc] sm:$0xff] %v2483_v59  ;;  %v4907_v43 = vmax.f32 %v4906_v32, 0.0  ;;  %v4908_v28 = vmax.f32 %v3759_v45, 0.0  ;;  %v2653_v8 = vpop.permute.xlu1 %2652 }
 0x230   :  { %v4399_v53 = vmax.f32 %v4905_v2, %v1176_v40  ;;  %v2122_v21 = vmax.f32 %v4258_v26, %v2080_v52  ;;  %v2124_v42 = vmax.f32 %v4314_v58, %v2082_v16  ;;  %v2010_v57 = vsel %vm1162_vm1, %v2645_v31, %v2649_v56  ;;  %v2658_v51 = vpop.permute.xlu0 %2657 }
 0x231   :  { %v2123_v23 = vmax.f32 %v4310_v63, %v2081_v3  ;;  %v2085_v38 = vmax.f32 %v4907_v43, %v2650_v29  ;;  %v2011_v20 = vsel %vm1162_vm1, %v2649_v56, %v2650_v29  ;;  %v1178_v40 = vsel %vm1162_vm1, %v2589_v5, %v2590_v50 }
 0x232   :  { %v2486_v54 = vpack.c.bf16 %v2124_v42, %v2124_v42  ;;  %v2083_v36 = vmax.f32 %v4908_v28, %v2010_v57  ;;  %v4909_v4 = vmax.f32 %v3764_v12, 0.0  ;;  %v2655_v22 = vunpack.i.h.bf16 %v2653_v8 }
 0x233   :  { %v2485_v58 = vpack.c.bf16 %v2123_v23, %v2122_v21  ;;  %v2127_v63 = vmax.f32 %v4319_v15, %v2085_v38  ;;  %v2654_v24 = vunpack.i.l.bf16 %v2653_v8  ;;  %v4911_v33 = vmax.f32 %v4910_v48, 0.0  ;;  %v2663_v31 = vpop.permute.xlu1 %2662  ;;  %v4918_v23 = vld [vmem:[#allocation58_spill] sm:$0xff] }
 0x234   :  { %v2084_v26 = vmax.f32 %v4909_v4, %v2011_v20  ;;  %2304 = vst.msk [vmem:[%s4670_s5 + $0x20] sm:$0xf] %vm2299_vm2, %v2486_v54  ;;  %v2125_v45 = vmax.f32 %v4323_v60, %v2083_v36  ;;  %v2659_v5 = vunpack.i.l.bf16 %v2658_v51  ;;  %v4912_v59 = vmax.f32 %v3595_v25, 0.0  ;;  %v4915_v25 = vld [vmem:[#allocation57_spill] sm:$0xff] }
 0x235   :  { %v4420_v46 = vmax.f32 %v4911_v33, %v2590_v50  ;;  %v4913_v9 = vmax.f32 %v3598_v30, 0.0  ;;  %2303 = vst [vmem:[%s4670_s5 + $0x18] sm:$0xff] %v2485_v58  ;;  %v2488_v50 = vpack.c.bf16 %v2127_v63, %v2127_v63  ;;  %v2012_v0 = vsel %vm1162_vm1, %v2654_v24, %v2655_v22  ;;  %v4921_v54 = vld [vmem:[#allocation33_spill] sm:$0xff] }
 0x236   :  { %v2126_v12 = vmax.f32 %v4327_v44, %v2084_v26  ;;  %v4430_v15 = vmax.f32 %v4912_v59, %v1177_v35  ;;  %v4914_v60 = vmax.f32 %v3778_v62, 0.0  ;;  %v2013_v27 = vsel %vm1162_vm1, %v2655_v22, %v2659_v5  ;;  %v4924_v63 = vld [vmem:[#allocation13_spill] sm:$0xff] }
 0x237   :  { %v4434_v52 = vmax.f32 %v4913_v9, %v1178_v40  ;;  %v4916_v16 = vmax.f32 %v4915_v25, 0.0  ;;  %2306 = vst.msk [vmem:[%s4670_s5 + $0x2c] sm:$0xf] %vm2299_vm2, %v2488_v50  ;;  %v2660_v30 = vunpack.i.h.bf16 %v2658_v51  ;;  %v4917_v17 = vmax.f32 %v4842_v61, 0.0  ;;  %v2668_v36 = vpop.permute.xlu0 %2667  ;;  %v4928_v50 = vld [vmem:[#allocation59_spill] sm:$0xff] }
 0x238   :  { %v2487_v18 = vpack.c.bf16 %v2126_v12, %v2125_v45  ;;  %v2086_v44 = vmax.f32 %v4914_v60, %v2012_v0  ;;  %v2665_v29 = vunpack.i.h.bf16 %v2663_v31  ;;  %v2664_v56 = vunpack.i.l.bf16 %v2663_v31  ;;  %v2673_v8 = vpop.permute.xlu1 %2672  ;;  %v4932_v31 = vld [vmem:[#allocation38_spill] sm:$0xff] }
 0x239   :  { %v2088_v39 = vmax.f32 %v4916_v16, %v2659_v5  ;;  %v2087_v3 = vmax.f32 %v4917_v17, %v2013_v27  ;;  %v2600_v62 = vunpack.i.h.bf16 %v4188_v10  ;;  %v2599_v2 = vunpack.i.l.bf16 %v4188_v10  ;;  %v4926_v5 = vld [vmem:[#allocation35_spill] sm:$0xff] }
 0x23a   :  { %2305 = vst [vmem:[%s4670_s5 + $0x24] sm:$0xff] %v2487_v18  ;;  %v2128_v35 = vmax.f32 %v4280_v55, %v2086_v44  ;;  %v4919_v32 = vmax.f32 %v4918_v23, 0.0  ;;  %v2014_v43 = vsel %vm1162_vm1, %v2660_v30, %v2664_v56  ;;  %v2015_v38 = vsel %vm1162_vm1, %v2664_v56, %v2665_v29  ;;  %v4930_v44 = vld [vmem:[#allocation36_spill] sm:$0xff] }
 0x23b   :  { %v2130_v21 = vmax.f32 %v4335_v1, %v2088_v39  ;;  %v2129_v42 = vmax.f32 %v4331_v41, %v2087_v3  ;;  %v2595_v57 = vunpack.i.h.bf16 %v4165_v7  ;;  %v4920_v20 = vmax.f32 %v4843_v49, 0.0  ;;  %v2678_v18 = vpop.permute.xlu0 %2677  ;;  %v4934_v3 = vld [vmem:[#allocation14_spill] sm:$0xff] }
 0x23c   :  { %v2091_v61 = vmax.f32 %v4919_v32, %v2665_v29  ;;  %v4922_v28 = vmax.f32 %v4921_v54, 0.0  ;;  %v2670_v4 = vunpack.i.h.bf16 %v2668_v36  ;;  %v2669_v26 = vunpack.i.l.bf16 %v2668_v36 }
 0x23d   :  { %v2490_v10 = vpack.c.bf16 %v2130_v21, %v2130_v21  ;;  %v2089_v40 = vmax.f32 %v4920_v20, %v2014_v43  ;;  %v2489_v1 = vpack.c.bf16 %v2129_v42, %v2128_v35  ;;  %v4923_v58 = vunpack.i.l.bf16 %v4165_v7  ;;  %v4936_v42 = vld [vmem:[#allocation60_spill] sm:$0xff]  ;;  %v4938_v43 = vld [vmem:[#allocation15_spill] sm:$0xff]  ;;  %v4940_v20 = vld [vmem:[#allocation37_spill] sm:$0xff] }
 0x23e   :  { %v2090_v55 = vmax.f32 %v4922_v28, %v2015_v38  ;;  %v2133_v41 = vmax.f32 %v4339_v6, %v2091_v61  ;;  %v4925_v22 = vmax.f32 %v4924_v63, 0.0  ;;  %v2674_v48 = vunpack.i.l.bf16 %v2673_v8 }
 0x23f   :  { %2308 = vst.msk [vmem:[%s4670_s5 + $0x38] sm:$0xf] %vm2299_vm2, %v2490_v10  ;;  %v2131_v49 = vmax.f32 %v4344_v13, %v2089_v40  ;;  %v1181_v6 = vsel %vm1162_vm1, %v2595_v57, %v2599_v2  ;;  %v1182_v33 = vsel %vm1162_vm1, %v2599_v2, %v2600_v62  ;;  %2307 = vst [vmem:[%s4670_s5 + $0x30] sm:$0xff] %v2489_v1  ;;  %v4927_v59 = vmax.f32 %v4926_v5, 0.0  ;;  %v4948_v5 = vld [vmem:[#allocation40_spill] sm:$0xff] }
 0x240   :  { %v4473_v24 = vmax.f32 %v4925_v22, %v4923_v58  ;;  %v2132_v51 = vmax.f32 %v4357_v19, %v2090_v55  ;;  %v2492_v7 = vpack.c.bf16 %v2133_v41, %v2133_v41  ;;  %v2016_v45 = vsel %vm1162_vm1, %v2669_v26, %v2670_v4  ;;  %v2688_v41 = vpop.permute.xlu0 %2687  ;;  %v4943_v58 = vld [vmem:[#allocation20_spill] sm:$0xff] }
 0x241   :  { %v2092_v9 = vmax.f32 %v4927_v59, %v2016_v45  ;;  %v2017_v13 = vsel %vm1162_vm1, %v2670_v4, %v2674_v48  ;;  %v4929_v19 = vmax.f32 %v4928_v50, 0.0  ;;  %v2675_v60 = vunpack.i.h.bf16 %v2673_v8 }
 0x242   :  { %v2491_v12 = vpack.c.bf16 %v2132_v51, %v2131_v49  ;;  %2310 = vst.msk [vmem:[%s4670_s5 + $0x44] sm:$0xf] %vm2299_vm2, %v2492_v7  ;;  %v4931_v27 = vmax.f32 %v4930_v44, 0.0  ;;  %v2680_v16 = vunpack.i.h.bf16 %v2678_v18  ;;  %v2679_v39 = vunpack.i.l.bf16 %v2678_v18  ;;  %v4946_v7 = vld [vmem:[#allocation61_spill] sm:$0xff] }
 0x243   :  { %v2094_v0 = vmax.f32 %v4929_v19, %v2674_v48  ;;  %v4933_v30 = vmax.f32 %v4932_v31, 0.0  ;;  %v4935_v29 = vmax.f32 %v4934_v3, 0.0  ;;  %v2134_v2 = vmax.f32 %v4287_v11, %v2092_v9  ;;  %v4944_v48 = vld [vmem:[#allocation39_spill] sm:$0xff] }
 0x244   :  { %v2093_v25 = vmax.f32 %v4931_v27, %v2017_v13  ;;  %2309 = vst [vmem:[%s4670_s5 + $0x3c] sm:$0xff] %v2491_v12  ;;  %v4937_v23 = vmax.f32 %v4936_v42, 0.0  ;;  %v2018_v61 = vsel %vm1162_vm1, %v2675_v60, %v2679_v39  ;;  %v4939_v38 = vmax.f32 %v4938_v43, 0.0  ;;  %v4953_v27 = vld [vmem:[#allocation67_spill] sm:$0xff] }
 0x245   :  { %v1262_v17 = vmax.f32 %v4933_v30, %v2600_v62  ;;  %v4502_v56 = vmax.f32 %v4935_v29, %v1181_v6  ;;  %v2136_v35 = vmax.f32 %v4379_v14, %v2094_v0  ;;  %v2019_v62 = vsel %vm1162_vm1, %v2679_v39, %v2680_v16  ;;  %v2683_v14 = vpop.permute.xlu1 %2682  ;;  %v4951_v0 = vld [vmem:[#allocation16_spill] sm:$0xff]  ;;  %v4955_v30 = vld [vmem:[#allocation62_spill] sm:$0xff] }
 0x246   :  { %v2135_v21 = vmax.f32 %v4399_v53, %v2093_v25  ;;  %v2097_v32 = vmax.f32 %v4937_v23, %v2680_v16  ;;  %v1261_v57 = vmax.f32 %v4939_v38, %v1182_v33  ;;  %v4941_v40 = vmax.f32 %v4940_v20, 0.0  ;;  %v4954_v39 = vld [vmem:[#allocation72_spill] sm:$0xff]  ;;  %v4957_v23 = vld [vmem:[#allocation41_spill] sm:$0xff] }
 0x247   :  { %v2494_v10 = vpack.c.bf16 %v2136_v35, %v2136_v35  ;;  %v4942_v11 = vmax.f32 %v3830_v47, 0.0  ;;  %v2685_v36 = vunpack.i.h.bf16 %v2683_v14  ;;  %v2684_v1 = vunpack.i.l.bf16 %v2683_v14 }
 0x248   :  { %v2095_v54 = vmax.f32 %v4941_v40, %v2018_v61  ;;  %v2493_v55 = vpack.c.bf16 %v2135_v21, %v2134_v2  ;;  %v2139_v53 = vmax.f32 %v4420_v46, %v2097_v32  ;;  %v2609_v4 = vunpack.i.l.bf16 %v4229_v37 }
 0x249   :  { %v2096_v28 = vmax.f32 %v4942_v11, %v2019_v62  ;;  %2312 = vst.msk [vmem:[%s4670_s5 + $0x50] sm:$0xf] %vm2299_vm2, %v2494_v10  ;;  %v2689_v47 = vunpack.i.l.bf16 %v2688_v41  ;;  %v2605_v63 = vunpack.i.h.bf16 %v4943_v58  ;;  %v2610_v22 = vunpack.i.h.bf16 %v4229_v37  ;;  %v2693_v12 = vpop.permute.xlu1 %2692  ;;  %v4959_v62 = vld [vmem:[#allocation42_spill] sm:$0xff]  ;;  %v2698_v10 = vpop.permute.xlu0 %2697 }
 0x24a   :  { %v2137_v26 = vmax.f32 %v4430_v15, %v2095_v54  ;;  %2311 = vst [vmem:[%s4670_s5 + $0x48] sm:$0xff] %v2493_v55  ;;  %v2496_v46 = vpack.c.bf16 %v2139_v53, %v2139_v53  ;;  %v2020_v49 = vsel %vm1162_vm1, %v2684_v1, %v2685_v36  ;;  %v4945_v6 = vmax.f32 %v4944_v48, 0.0 }
 0x24b   :  { %v2138_v8 = vmax.f32 %v4434_v52, %v2096_v28  ;;  %v2021_v15 = vsel %vm1162_vm1, %v2685_v36, %v2689_v47  ;;  %v4947_v52 = vmax.f32 %v4946_v7, 0.0  ;;  %v2690_v37 = vunpack.i.h.bf16 %v2688_v41  ;;  %v4961_v28 = vld [vmem:[#allocation43_spill] sm:$0xff]  ;;  %v4963_v41 = vld [vmem:[#allocation17_spill] sm:$0xff] }
 0x24c   :  { %v2098_v33 = vmax.f32 %v4945_v6, %v2020_v49  ;;  %2314 = vst.msk [vmem:[%s4670_s5 + $0x5c] sm:$0xf] %vm2299_vm2, %v2496_v46  ;;  %v4949_v59 = vmax.f32 %v4948_v5, 0.0  ;;  %v2695_v13 = vunpack.i.h.bf16 %v2693_v12  ;;  %v2694_v50 = vunpack.i.l.bf16 %v2693_v12  ;;  %v4967_v46 = vld [vmem:[#allocation44_spill] sm:$0xff]  ;;  %v4971_v7 = vld [vmem:[#allocation45_spill] sm:$0xff] }
 0x24d   :  { %v2495_v51 = vpack.c.bf16 %v2138_v8, %v2137_v26  ;;  %v2100_v45 = vmax.f32 %v4947_v52, %v2689_v47  ;;  %v4950_v19 = vunpack.i.l.bf16 %v4943_v58  ;;  %v4952_v18 = vmax.f32 %v4951_v0, 0.0  ;;  %v2703_v11 = vpop.permute.xlu1 %2702  ;;  %v4965_v8 = vld [vmem:[#allocation18_spill] sm:$0xff] }
 0x24e   :  { %v2099_v9 = vmax.f32 %v4949_v59, %v2021_v15  ;;  %v1185_v44 = vsel %vm1162_vm1, %v2605_v63, %v2609_v4  ;;  %v2140_v25 = vmax.f32 %v4953_v27, %v2098_v33  ;;  %v4956_v3 = vmax.f32 %v4955_v30, 0.0  ;;  %v2708_v33 = vpop.permute.xlu0 %2707 }
 0x24f   :  { %v1265_v60 = vmax.f32 %v4952_v18, %v4950_v19  ;;  %2313 = vst [vmem:[%s4670_s5 + $0x54] sm:$0xff] %v2495_v51  ;;  %v2142_v16 = vmax.f32 %v4473_v24, %v2100_v45  ;;  %v2022_v2 = vsel %vm1162_vm1, %v2690_v37, %v2694_v50  ;;  %v2023_v35 = vsel %vm1162_vm1, %v2694_v50, %v2695_v13  ;;  %v4974_v19 = vld [vmem:[#allocation24_spill] sm:$0xff]  ;;  %v4975_v18 = vld [vmem:[#allocation65_spill] sm:$0xff] }
 0x250   :  { %v2141_v31 = vmax.f32 %v4954_v39, %v2099_v9  ;;  %v2103_v29 = vmax.f32 %v4956_v3, %v2695_v13  ;;  %v1186_v21 = vsel %vm1162_vm1, %v2609_v4, %v2610_v22  ;;  %v4958_v32 = vmax.f32 %v4957_v23, 0.0  ;;  %v4973_v9 = vld [vmem:[#allocation70_spill] sm:$0xff]  ;;  %v4977_v39 = vld [vmem:[#allocation25_spill] sm:$0xff] }
 0x251   :  { %v2498_v42 = vpack.c.bf16 %v2142_v16, %v2142_v16  ;;  %v4960_v43 = vmax.f32 %v4959_v62, 0.0  ;;  %v2700_v40 = vunpack.i.h.bf16 %v2698_v10  ;;  %v2699_v54 = vunpack.i.l.bf16 %v2698_v10 }
 0x252   :  { %v2101_v61 = vmax.f32 %v4958_v32, %v2022_v2  ;;  %v2497_v24 = vpack.c.bf16 %v2141_v31, %v2140_v25  ;;  %v2145_v20 = vmax.f32 %v1262_v17, %v2103_v29  ;;  %v4962_v14 = vmax.f32 %v4961_v28, 0.0  ;;  %v4980_v2 = vld [vmem:[#allocation47_spill] sm:$0xff]  ;;  %v2718_v62 = vpop.permute.xlu0 %2717 }
 0x253   :  { %v2102_v38 = vmax.f32 %v4960_v43, %v2023_v35  ;;  %2316 = vst.msk [vmem:[%s4670_s5 + $0x68] sm:$0xf] %vm2299_vm2, %v2498_v42  ;;  %v2704_v1 = vunpack.i.l.bf16 %v2703_v11  ;;  %v4964_v4 = vmax.f32 %v4963_v41, 0.0  ;;  %v4966_v17 = vmax.f32 %v4965_v8, 0.0  ;;  %v2713_v42 = vpop.permute.xlu1 %2712 }
 0x254   :  { %v1268_v55 = vmax.f32 %v4962_v14, %v2610_v22  ;;  %v2143_v53 = vmax.f32 %v4502_v56, %v2101_v61  ;;  %2315 = vst [vmem:[%s4670_s5 + $0x60] sm:$0xff] %v2497_v24  ;;  %v2500_v58 = vpack.c.bf16 %v2145_v20, %v2145_v20  ;;  %v2024_v63 = vsel %vm1162_vm1, %v2699_v54, %v2700_v40 }
 0x255   :  { %v2144_v36 = vmax.f32 %v1261_v57, %v2102_v38  ;;  %v1266_v26 = vmax.f32 %v4964_v4, %v1185_v44  ;;  %v1267_v47 = vmax.f32 %v4966_v17, %v1186_v21  ;;  %v4968_v49 = vmax.f32 %v4967_v46, 0.0  ;;  %v4969_v57 = vld [vmem:[#allocation64_spill] sm:$0xff]  ;;  %v4983_v38 = vld [vmem:[#allocation19_spill] sm:$0xff] }
 0x256   :  { %v2025_v56 = vsel %vm1162_vm1, %v2700_v40, %v2704_v1  ;;  %v4970_v48 = vmax.f32 %v4969_v57, 0.0  ;;  %2318 = vst.msk [vmem:[%s4670_s5 + $0x74] sm:$0xf] %vm2299_vm2, %v2500_v58  ;;  %v2705_v15 = vunpack.i.h.bf16 %v2703_v11  ;;  %v4972_v52 = vmax.f32 %v4971_v7, 0.0  ;;  %v4995_v7 = vld [vmem:[#allocation71_spill] sm:$0xff] }
 0x257   :  { %v2499_v22 = vpack.c.bf16 %v2144_v36, %v2143_v53  ;;  %v2104_v51 = vmax.f32 %v4968_v49, %v2024_v63  ;;  %v2710_v12 = vunpack.i.h.bf16 %v2708_v33  ;;  %v2709_v37 = vunpack.i.l.bf16 %v2708_v33  ;;  %v4985_v36 = vld [vmem:[#allocation49_spill] sm:$0xff]  ;;  %v4989_v63 = vld [vmem:[#allocation50_spill] sm:$0xff] }
 0x258   :  { %v2106_v6 = vmax.f32 %v4970_v48, %v2704_v1  ;;  %v2105_v45 = vmax.f32 %v4972_v52, %v2025_v56  ;;  %v2620_v5 = vunpack.i.h.bf16 %v4293_v34  ;;  %v2619_v59 = vunpack.i.l.bf16 %v4293_v34  ;;  %v4978_v34 = vld [vmem:[#allocation46_spill] sm:$0xff]  ;;  %v4991_v56 = vld [vmem:[#allocation48_spill] sm:$0xff] }
 0x259   :  { %2317 = vst [vmem:[%s4670_s5 + $0x6c] sm:$0xff] %v2499_v22  ;;  %v2146_v13 = vmax.f32 %v4973_v9, %v2104_v51  ;;  %v4976_v44 = vmax.f32 %v4975_v18, 0.0  ;;  %v2026_v25 = vsel %vm1162_vm1, %v2705_v15, %v2709_v37  ;;  %v2027_v16 = vsel %vm1162_vm1, %v2709_v37, %v2710_v12 }
 0x25a   :  { %v2148_v50 = vmax.f32 %v1265_v60, %v2106_v6  ;;  %v2147_v0 = vmax.f32 %v4974_v19, %v2105_v45  ;;  %v2615_v31 = vunpack.i.h.bf16 %v4977_v39  ;;  %v4979_v3 = vmax.f32 %v4978_v34, 0.0  ;;  %v4993_v6 = vld [vmem:[#allocation21_spill] sm:$0xff] }
 0x25b   :  { %v2109_v27 = vmax.f32 %v4976_v44, %v2710_v12  ;;  %v4981_v35 = vmax.f32 %v4980_v2, 0.0  ;;  %v2715_v32 = vunpack.i.h.bf16 %v2713_v42  ;;  %v2714_v61 = vunpack.i.l.bf16 %v2713_v42  ;;  %v4996_v12 = vld [vmem:[#allocation26_spill] sm:$0xff] }
 0x25c   :  { %v2502_v30 = vpack.c.bf16 %v2148_v50, %v2148_v50  ;;  %v2107_v29 = vmax.f32 %v4979_v3, %v2026_v25  ;;  %v2501_v60 = vpack.c.bf16 %v2147_v0, %v2146_v13  ;;  %v4982_v43 = vunpack.i.l.bf16 %v4977_v39  ;;  %v5003_v39 = vld [vmem:[#allocation52_spill] sm:$0xff] }
 0x25d   :  { %v2108_v21 = vmax.f32 %v4981_v35, %v2027_v16  ;;  %v2151_v23 = vmax.f32 %v1268_v55, %v2109_v27  ;;  %v4984_v10 = vmax.f32 %v4983_v38, 0.0  ;;  %v2719_v54 = vunpack.i.l.bf16 %v2718_v62  ;;  %v5001_v27 = vld [vmem:[#allocation51_spill] sm:$0xff] }
 0x25e   :  { %2320 = vst.msk [vmem:[%s4670_s5 + $0x80] sm:$0xf] %vm2299_vm2, %v2502_v30  ;;  %v2149_v20 = vmax.f32 %v1266_v26, %v2107_v29  ;;  %v1189_v11 = vsel %vm1162_vm1, %v2615_v31, %v2619_v59  ;;  %v1190_v28 = vsel %vm1162_vm1, %v2619_v59, %v2620_v5  ;;  %2319 = vst [vmem:[%s4670_s5 + $0x78] sm:$0xff] %v2501_v60  ;;  %v4986_v1 = vmax.f32 %v4985_v36, 0.0  ;;  %v4987_v26 = vld [vmem:[#allocation68_spill] sm:$0xff]  ;;  %v4997_v59 = vld [vmem:[#allocation69_spill] sm:$0xff] }
 0x25f   :  { %v1271_v24 = vmax.f32 %v4984_v10, %v4982_v43  ;;  %v2150_v40 = vmax.f32 %v1267_v47, %v2108_v21  ;;  %v2504_v14 = vpack.c.bf16 %v2151_v23, %v2151_v23  ;;  %v2028_v55 = vsel %vm1162_vm1, %v2714_v61, %v2715_v32  ;;  %v2723_v47 = vpop.permute.xlu1 %2722 }
 0x260   :  { %v2110_v41 = vmax.f32 %v4986_v1, %v2028_v55  ;;  %v2029_v4 = vsel %vm1162_vm1, %v2715_v32, %v2719_v54  ;;  %v4988_v8 = vmax.f32 %v4987_v26, 0.0  ;;  %v2720_v58 = vunpack.i.h.bf16 %v2718_v62 }
 0x261   :  { %v2503_v53 = vpack.c.bf16 %v2150_v40, %v2149_v20  ;;  %2322 = vst.msk [vmem:[%s4670_s5 + $0x8c] sm:$0xf] %vm2299_vm2, %v2504_v14  ;;  %v4990_v22 = vmax.f32 %v4989_v63, 0.0  ;;  %v2725_v49 = vunpack.i.h.bf16 %v2723_v47  ;;  %v2724_v51 = vunpack.i.l.bf16 %v2723_v47 }
 0x262   :  { %v2112_v17 = vmax.f32 %v4988_v8, %v2719_v54  ;;  %v4992_v57 = vmax.f32 %v4991_v56, 0.0  ;;  %v4994_v33 = vmax.f32 %v4993_v6, 0.0  ;;  %v2152_v52 = vmax.f32 %v4995_v7, %v2110_v41 }
 0x263   :  { %v2111_v46 = vmax.f32 %v4990_v22, %v2029_v4  ;;  %2321 = vst [vmem:[%s4670_s5 + $0x84] sm:$0xff] %v2503_v53  ;;  %v4998_v9 = vmax.f32 %v4997_v59, 0.0  ;;  %v2030_v50 = vsel %vm1162_vm1, %v2720_v58, %v2724_v51  ;;  %v2031_v19 = vsel %vm1162_vm1, %v2724_v51, %v2725_v49 }
 0x264   :  { %v1274_v48 = vmax.f32 %v4992_v57, %v2620_v5  ;;  %v1272_v15 = vmax.f32 %v4994_v33, %v1189_v11  ;;  %v2154_v45 = vmax.f32 %v1271_v24, %v2112_v17  ;;  %v4999_v5 = vld [vmem:[#allocation22_spill] sm:$0xff]  ;;  %v5002_v25 = vmax.f32 %v5001_v27, 0.0 }
 0x265   :  { %v2153_v37 = vmax.f32 %v4996_v12, %v2111_v46  ;;  %v2115_v13 = vmax.f32 %v4998_v9, %v2725_v49  ;;  %v5000_v0 = vmax.f32 %v4999_v5, 0.0  ;;  %v5004_v31 = vmax.f32 %v5003_v39, 0.0 }
 0x266   :  { %v2506_v44 = vpack.c.bf16 %v2154_v45, %v2154_v45  ;;  %v2113_v16 = vmax.f32 %v5002_v25, %v2030_v50 }
 0x267   :  { %v1273_v18 = vmax.f32 %v5000_v0, %v1190_v28  ;;  %v2114_v30 = vmax.f32 %v5004_v31, %v2031_v19  ;;  %v2505_v34 = vpack.c.bf16 %v2153_v37, %v2152_v52  ;;  %v2157_v3 = vmax.f32 %v1274_v48, %v2115_v13 }
 0x268   :  { %2324 = vst.msk [vmem:[%s4670_s5 + $0x98] sm:$0xf] %vm2299_vm2, %v2506_v44  ;;  %v2155_v29 = vmax.f32 %v1272_v15, %v2113_v16 }
 0x269   :  { %v2156_v2 = vmax.f32 %v1273_v18, %v2114_v30  ;;  %2323 = vst [vmem:[%s4670_s5 + $0x90] sm:$0xff] %v2505_v34  ;;  %v2508_v35 = vpack.c.bf16 %v2157_v3, %v2157_v3 }
 0x26b   :  { %v2507_v21 = vpack.c.bf16 %v2156_v2, %v2155_v29  ;;  %2326 = vst.msk [vmem:[%s4670_s5 + $0xa4] sm:$0xf] %vm2299_vm2, %v2508_v35 }
 0x26d   :  { %2325 = vst [vmem:[%s4670_s5 + $0x9c] sm:$0xff] %v2507_v21 }
 0x26e   :  { %2331 = vsyncpa [#allocation3], 1 }
 0x26f   :  { %2332 = vsyncpa [#allocation5], 1 }

// kernel: cnn_fmnist_sup_forward.3
= control target key start
LH: loop header
LB: loop body
LE: loop exit
PB: predicated region body
PF: predicated region fallthrough
CT: control target
= control target key end

     0   :  { %vm2457_vm0 = vcmask 261120   ;;  %s8480_s26 = smov 32   ;;  %vm5025_vm1 = vcmask 785408   ;;  %vm8483_vm2 = vmmov 0   ;;  %s11835_s2 = inlined_call_operand.vmem [shape: bf16[1440,448], index: 2, kind: input, shape index: {}]   ;;  %s11836_s0 = inlined_call_operand.vmem [shape: bf16[7,8,1440], index: 0, kind: input, shape index: {}]   ;;  %s11837_s1 = inlined_call_operand.vmem [shape: bf16[7,8,1440], index: 1, kind: input, shape index: {}]   ;;  %s11838_s3 = inlined_call_operand.vmem [shape: f32[1,448], index: 3, kind: input, shape index: {}]   ;;  %s11839_s4 = inlined_call_operand.vmem [shape: f32[1,448], index: 4, kind: input, shape index: {}]   ;;  %s11840_s5 = inlined_call_operand.vmem [shape: bf16[7,224,128], index: 5, kind: input, shape index: {}]   ;;  %s11841_s7 = inlined_call_operand.vmem [shape: bf16[128,128], index: 7, kind: input, shape index: {}]   ;;  %s11842_s6 = inlined_call_operand.vmem [shape: f32[1,128], index: 6, kind: input, shape index: {}]   ;;  %s11843_s10 = inlined_call_operand.vmem [shape: f32[8,128], index: 10, kind: output, shape index: {1}]   ;;  %s11844_s8 = inlined_call_operand.vmem [shape: f32[1,128], index: 8, kind: input, shape index: {}]   ;;  %s11845_s9 = inlined_call_operand.vmem [shape: f32[8,128], index: 9, kind: output, shape index: {0}]  }
   0x1   :  { %v7340_v0 = vld [vmem:[%s11835_s2 + $0x4] ss:$16 sps:$4 sm:$0xff]   ;;  %v7342_v1 = vld [vmem:[%s11835_s2 + $0xc] ss:$16 sps:$4 sm:$0xff]   ;;  %v7344_v2 = vld [vmem:[%s11835_s2] ss:$16 sps:$4 sm:$0xff]  }
   0x2   :  { %2470 = vmatprep.subr.bf16.mxu0 %v7340_v0  ;;  %v7345_v3 = vld [vmem:[%s11835_s2 + $0x8] ss:$16 sps:$4 sm:$0xff]   ;;  %2896 = vmatprep.subr.bf16.mxu1 %v7342_v1  ;;  %v7346_v4 = vld [vmem:[%s11835_s2 + $0x24] ss:$16 sps:$4 sm:$0xff]   ;;  %v7348_v5 = vld [vmem:[%s11835_s2 + $0x2c] ss:$16 sps:$4 sm:$0xff]  }
   0x3   :  { %2471 = vmatpush1.bf16.msra.mxu0 %v7344_v2  ;;  %2897 = vmatpush1.bf16.msra.mxu1 %v7345_v3  ;;  %v7350_v6 = vld [vmem:[%s11835_s2 + $0x20] ss:$16 sps:$4 sm:$0xff]   ;;  %v7351_v7 = vld [vmem:[%s11835_s2 + $0x28] ss:$16 sps:$4 sm:$0xff]   ;;  %v7352_v8 = vld [vmem:[%s11835_s2 + $0x44] ss:$16 sps:$4 sm:$0xff]  }
   0x4   :  { %2472 = vmatprep.subr.bf16.mxu0 %v7346_v4  ;;  %2898 = vmatprep.subr.bf16.mxu1 %v7348_v5  ;;  %v7354_v9 = vld [vmem:[%s11835_s2 + $0x4c] ss:$16 sps:$4 sm:$0xff]   ;;  %v7356_v10 = vld [vmem:[%s11835_s2 + $0x40] ss:$16 sps:$4 sm:$0xff]   ;;  %v7357_v11 = vld [vmem:[%s11835_s2 + $0x48] ss:$16 sps:$4 sm:$0xff]  }
   0x5   :  { %v7358_v12 = vld [vmem:[%s11835_s2 + $0x64] ss:$16 sps:$4 sm:$0xff]   ;;  %v7360_v13 = vld [vmem:[%s11835_s2 + $0x6c] ss:$16 sps:$4 sm:$0xff]   ;;  %v7362_v14 = vld [vmem:[%s11835_s2 + $0x60] ss:$16 sps:$4 sm:$0xff]  }
   0x6   :  { %v7363_v15 = vld [vmem:[%s11835_s2 + $0x68] ss:$16 sps:$4 sm:$0xff]   ;;  %v7364_v16 = vld [vmem:[%s11835_s2 + $0x84] ss:$16 sps:$4 sm:$0xff]   ;;  %v7366_v17 = vld [vmem:[%s11835_s2 + $0x8c] ss:$16 sps:$4 sm:$0xff]  }
   0x7   :  { %2473 = vmatpush1.bf16.msra.mxu0 %v7350_v6  ;;  %2899 = vmatpush1.bf16.msra.mxu1 %v7351_v7  ;;  %v7368_v18 = vld [vmem:[%s11835_s2 + $0x80] ss:$16 sps:$4 sm:$0xff]   ;;  %v7369_v19 = vld [vmem:[%s11835_s2 + $0x88] ss:$16 sps:$4 sm:$0xff]   ;;  %v7370_v20 = vld [vmem:[%s11835_s2 + $0xa4] ss:$16 sps:$4 sm:$0xff]  }
   0x8   :  { %2474 = vmatprep.subr.bf16.mxu0 %v7352_v8  ;;  %2900 = vmatprep.subr.bf16.mxu1 %v7354_v9  ;;  %v7372_v21 = vld [vmem:[%s11835_s2 + $0xac] ss:$16 sps:$4 sm:$0xff]   ;;  %v7374_v22 = vld [vmem:[%s11835_s2 + $0xa0] ss:$16 sps:$4 sm:$0xff]   ;;  %v7375_v23 = vld [vmem:[%s11835_s2 + $0xa8] ss:$16 sps:$4 sm:$0xff]  }
   0x9   :  { %v7376_v24 = vld [vmem:[%s11835_s2 + $0xc4] ss:$16 sps:$4 sm:$0xff]   ;;  %v7378_v25 = vld [vmem:[%s11835_s2 + $0xcc] ss:$16 sps:$4 sm:$0xff]   ;;  %v7380_v26 = vld [vmem:[%s11835_s2 + $0xc0] ss:$16 sps:$4 sm:$0xff]  }
   0xa   :  { %v7381_v27 = vld [vmem:[%s11835_s2 + $0xc8] ss:$16 sps:$4 sm:$0xff]   ;;  %v7382_v28 = vld [vmem:[%s11835_s2 + $0xe4] ss:$16 sps:$4 sm:$0xff]   ;;  %v7384_v29 = vld [vmem:[%s11835_s2 + $0xec] ss:$16 sps:$4 sm:$0xff]  }
   0xb   :  { %2475 = vmatpush1.bf16.msra.mxu0 %v7356_v10  ;;  %2901 = vmatpush1.bf16.msra.mxu1 %v7357_v11  ;;  %v7386_v30 = vld [vmem:[%s11835_s2 + $0xe0] ss:$16 sps:$4 sm:$0xff]   ;;  %v7387_v31 = vld [vmem:[%s11835_s2 + $0xe8] ss:$16 sps:$4 sm:$0xff]   ;;  %v7388_v32 = vld [vmem:[%s11835_s2 + $0x104] ss:$16 sps:$4 sm:$0xff]  }
   0xc   :  { %2476 = vmatprep.subr.bf16.mxu0 %v7358_v12  ;;  %2902 = vmatprep.subr.bf16.mxu1 %v7360_v13  ;;  %v7390_v33 = vld [vmem:[%s11835_s2 + $0x10c] ss:$16 sps:$4 sm:$0xff]   ;;  %v7392_v34 = vld [vmem:[%s11835_s2 + $0x100] ss:$16 sps:$4 sm:$0xff]   ;;  %v7393_v35 = vld [vmem:[%s11835_s2 + $0x108] ss:$16 sps:$4 sm:$0xff]  }
   0xd   :  { %v7394_v36 = vld [vmem:[%s11835_s2 + $0x124] ss:$16 sps:$4 sm:$0xff]   ;;  %v7396_v37 = vld [vmem:[%s11835_s2 + $0x12c] ss:$16 sps:$4 sm:$0xff]   ;;  %v7398_v38 = vld [vmem:[%s11835_s2 + $0x120] ss:$16 sps:$4 sm:$0xff]  }
   0xe   :  { %v7399_v39 = vld [vmem:[%s11835_s2 + $0x128] ss:$16 sps:$4 sm:$0xff]   ;;  %v7400_v40 = vld [vmem:[%s11835_s2 + $0x144] ss:$16 sps:$4 sm:$0xff]   ;;  %v7402_v41 = vld [vmem:[%s11835_s2 + $0x14c] ss:$16 sps:$4 sm:$0xff]  }
   0xf   :  { %2477 = vmatpush1.bf16.msra.mxu0 %v7362_v14  ;;  %2903 = vmatpush1.bf16.msra.mxu1 %v7363_v15  ;;  %v7404_v42 = vld [vmem:[%s11835_s2 + $0x140] ss:$16 sps:$4 sm:$0xff]   ;;  %v7405_v43 = vld [vmem:[%s11835_s2 + $0x148] ss:$16 sps:$4 sm:$0xff]   ;;  %v7406_v44 = vld [vmem:[%s11835_s2 + $0x164] ss:$16 sps:$4 sm:$0xff]  }
  0x10   :  { %2478 = vmatprep.subr.bf16.mxu0 %v7364_v16  ;;  %2904 = vmatprep.subr.bf16.mxu1 %v7366_v17  ;;  %v7408_v45 = vld [vmem:[%s11835_s2 + $0x16c] ss:$16 sps:$4 sm:$0xff]   ;;  %v7410_v46 = vld [vmem:[%s11835_s2 + $0x160] ss:$16 sps:$4 sm:$0xff]   ;;  %v7411_v47 = vld [vmem:[%s11835_s2 + $0x168] ss:$16 sps:$4 sm:$0xff]  }
  0x11   :  { %v7438_v48 = vld [vmem:[%s11836_s0 + $0x4] ss:$48 sps:$4 sm:$0xff]   ;;  %v7414_v50 = vld [vmem:[%s11835_s2 + $0x18c] ss:$16 sps:$4 sm:$0xff]   ;;  %v7416_v51 = vld [vmem:[%s11835_s2 + $0x180] ss:$16 sps:$4 sm:$0xff]  }
  0x12   :  { %v7412_v49 = vld [vmem:[%s11835_s2 + $0x184] ss:$16 sps:$4 sm:$0xff]   ;;  %2502 = vmatprep.mubr.bf16.mxu0 %v7438_v48  ;;  %2928 = vmatprep.mubr.bf16.mxu1 %v7438_v48  ;;  %v7417_v52 = vld [vmem:[%s11835_s2 + $0x188] ss:$16 sps:$4 sm:$0xff]   ;;  %v7420_v54 = vld [vmem:[%s11835_s2 + $0x1ac] ss:$16 sps:$4 sm:$0xff]  }
  0x13   :  { %2479 = vmatpush1.bf16.msra.mxu0 %v7368_v18  ;;  %2905 = vmatpush1.bf16.msra.mxu1 %v7369_v19  ;;  %v7418_v53 = vld [vmem:[%s11835_s2 + $0x1a4] ss:$16 sps:$4 sm:$0xff]   ;;  %v7422_v55 = vld [vmem:[%s11835_s2 + $0x1a0] ss:$16 sps:$4 sm:$0xff]   ;;  %v7423_v56 = vld [vmem:[%s11835_s2 + $0x1a8] ss:$16 sps:$4 sm:$0xff]  }
  0x14   :  { %2480 = vmatprep.subr.bf16.mxu0 %v7370_v20  ;;  %2906 = vmatprep.subr.bf16.mxu1 %v7372_v21  ;;  %v7424_v57 = vld [vmem:[%s11835_s2 + $0x1c4] ss:$16 sps:$4 sm:$0xff]   ;;  %v7426_v58 = vld [vmem:[%s11835_s2 + $0x1cc] ss:$16 sps:$4 sm:$0xff]   ;;  %v7428_v59 = vld [vmem:[%s11835_s2 + $0x1c0] ss:$16 sps:$4 sm:$0xff]  }
  0x15   :  { %v7429_v60 = vld [vmem:[%s11835_s2 + $0x1c8] ss:$16 sps:$4 sm:$0xff]   ;;  %v7430_v61 = vld [vmem:[%s11835_s2 + $0x1e4] ss:$16 sps:$4 sm:$0xff]   ;;  %v7432_v62 = vld [vmem:[%s11835_s2 + $0x1ec] ss:$16 sps:$4 sm:$0xff]  }
  0x16   :  { %v7434_v63 = vld [vmem:[%s11835_s2 + $0x1e0] ss:$16 sps:$4 sm:$0xff]   ;;  %v7435_v0 = vld [vmem:[%s11835_s2 + $0x1e8] ss:$16 sps:$4 sm:$0xff]   ;;  %v7441_v1 = vld [vmem:[%s11835_s2 + $0x204] ss:$16 sps:$4 sm:$0xff]  }
  0x17   :  { %2481 = vmatpush1.bf16.msra.mxu0 %v7374_v22  ;;  %2907 = vmatpush1.bf16.msra.mxu1 %v7375_v23  ;;  %v7444_v2 = vld [vmem:[%s11835_s2 + $0x20c] ss:$16 sps:$4 sm:$0xff]   ;;  %v7436_v3 = vld [vmem:[%s11836_s0] ss:$48 sps:$4 sm:$0xff]   ;;  %v7442_v5 = vld [vmem:[%s11835_s2 + $0x208] ss:$16 sps:$4 sm:$0xff]  }
  0x18   :  { %2482 = vmatprep.subr.bf16.mxu0 %v7376_v24  ;;  %2908 = vmatprep.subr.bf16.mxu1 %v7378_v25  ;;  %v7439_v4 = vld [vmem:[%s11835_s2 + $0x200] ss:$16 sps:$4 sm:$0xff]   ;;  %v7447_v6 = vld [vmem:[%s11835_s2 + $0x224] ss:$16 sps:$4 sm:$0xff]   ;;  %v7450_v7 = vld [vmem:[%s11835_s2 + $0x22c] ss:$16 sps:$4 sm:$0xff]  }
  0x19   :  { %v7445_v8 = vld [vmem:[%s11835_s2 + $0x220] ss:$16 sps:$4 sm:$0xff]   ;;  %v7448_v9 = vld [vmem:[%s11835_s2 + $0x228] ss:$16 sps:$4 sm:$0xff]   ;;  %v7453_v10 = vld [vmem:[%s11835_s2 + $0x244] ss:$16 sps:$4 sm:$0xff]  }
  0x1a   :  { %v7456_v11 = vld [vmem:[%s11835_s2 + $0x24c] ss:$16 sps:$4 sm:$0xff]   ;;  %v7451_v12 = vld [vmem:[%s11835_s2 + $0x240] ss:$16 sps:$4 sm:$0xff]   ;;  %v7499_v13 = vld [vmem:[%s11836_s0 + $0x64] ss:$48 sps:$4 sm:$0xff]  }
  0x1b   :  { %2483 = vmatpush1.bf16.msra.mxu0 %v7380_v26  ;;  %2909 = vmatpush1.bf16.msra.mxu1 %v7381_v27  ;;  %v7454_v14 = vld [vmem:[%s11835_s2 + $0x248] ss:$16 sps:$4 sm:$0xff]   ;;  %v7459_v15 = vld [vmem:[%s11835_s2 + $0x264] ss:$16 sps:$4 sm:$0xff]   ;;  %v7462_v16 = vld [vmem:[%s11835_s2 + $0x26c] ss:$16 sps:$4 sm:$0xff]  }
  0x1c   :  { %2484 = vmatprep.subr.bf16.mxu0 %v7382_v28  ;;  %2910 = vmatprep.subr.bf16.mxu1 %v7384_v29  ;;  %v7507_v17 = vld [vmem:[%s11836_s0 + $0x60] ss:$48 sps:$4 sm:$0xff]   ;;  %v7460_v19 = vld [vmem:[%s11835_s2 + $0x268] ss:$16 sps:$4 sm:$0xff]   ;;  %v7465_v20 = vld [vmem:[%s11835_s2 + $0x284] ss:$16 sps:$4 sm:$0xff]  }
  0x1d   :  { %v7457_v18 = vld [vmem:[%s11835_s2 + $0x260] ss:$16 sps:$4 sm:$0xff]   ;;  %v7468_v21 = vld [vmem:[%s11835_s2 + $0x28c] ss:$16 sps:$4 sm:$0xff]   ;;  %v7514_v22 = vld [vmem:[%s11836_s0 + $0xc4] ss:$48 sps:$4 sm:$0xff]  }
  0x1e   :  { %v7463_v23 = vld [vmem:[%s11835_s2 + $0x280] ss:$16 sps:$4 sm:$0xff]   ;;  %v7466_v24 = vld [vmem:[%s11835_s2 + $0x288] ss:$16 sps:$4 sm:$0xff]   ;;  %v7471_v25 = vld [vmem:[%s11835_s2 + $0x2a4] ss:$16 sps:$4 sm:$0xff]  }
  0x1f   :  { %2485 = vmatpush1.bf16.msra.mxu0 %v7386_v30  ;;  %2911 = vmatpush1.bf16.msra.mxu1 %v7387_v31  ;;  %v7474_v26 = vld [vmem:[%s11835_s2 + $0x2ac] ss:$16 sps:$4 sm:$0xff]   ;;  %v7522_v27 = vld [vmem:[%s11836_s0 + $0xc0] ss:$48 sps:$4 sm:$0xff]   ;;  %v7472_v29 = vld [vmem:[%s11835_s2 + $0x2a8] ss:$16 sps:$4 sm:$0xff]  }
  0x20   :  { %2486 = vmatprep.subr.bf16.mxu0 %v7388_v32  ;;  %2912 = vmatprep.subr.bf16.mxu1 %v7390_v33  ;;  %v7469_v28 = vld [vmem:[%s11835_s2 + $0x2a0] ss:$16 sps:$4 sm:$0xff]   ;;  %v7477_v31 = vld [vmem:[%s11835_s2 + $0x2c4] ss:$16 sps:$4 sm:$0xff]   ;;  %v7480_v32 = vld [vmem:[%s11835_s2 + $0x2cc] ss:$16 sps:$4 sm:$0xff]  }
  0x21   :  { %v433_v30 = vld [vmem:[%s11836_s0 + $0x120] sm:$0xff] }
  0x22   :  { %v6164_v33 = vcombine.high %v433_v30, %v433_v30  ;;  %v7493_v48 = vld [vmem:[%s11835_s2 + $0x320] ss:$16 sps:$4 sm:$0xff]  }
  0x23   :  { %2487 = vmatpush1.bf16.msra.mxu0 %v7392_v34  ;;  %2913 = vmatpush1.bf16.msra.mxu1 %v7393_v35  ;;  %v7475_v34 = vld [vmem:[%s11835_s2 + $0x2c0] ss:$16 sps:$4 sm:$0xff]   ;;  %v7478_v35 = vld [vmem:[%s11835_s2 + $0x2c8] ss:$16 sps:$4 sm:$0xff]  }
  0x24   :  { %2488 = vmatprep.subr.bf16.mxu0 %v7394_v36  ;;  %2914 = vmatprep.subr.bf16.mxu1 %v7396_v37  ;;  %v7483_v36 = vld [vmem:[%s11835_s2 + $0x2e4] ss:$16 sps:$4 sm:$0xff]   ;;  %v7486_v37 = vld [vmem:[%s11835_s2 + $0x2ec] ss:$16 sps:$4 sm:$0xff]  }
  0x27   :  { %2489 = vmatpush1.bf16.msra.mxu0 %v7398_v38  ;;  %2915 = vmatpush1.bf16.msra.mxu1 %v7399_v39  ;;  %v7481_v38 = vld [vmem:[%s11835_s2 + $0x2e0] ss:$16 sps:$4 sm:$0xff]   ;;  %v6163_v39 = vcombine.low %v433_v30, %v433_v30  ;;  %v7572_v30 = vld [vmem:[%s11835_s2 + $0x484] ss:$16 sps:$4 sm:$0xff]  }
  0x28   :  { %2490 = vmatprep.subr.bf16.mxu0 %v7400_v40  ;;  %2916 = vmatprep.subr.bf16.mxu1 %v7402_v41  ;;  %v7545_v40 = vld [vmem:[%s11836_s0 + $0xc] ss:$48 sps:$4 sm:$0xff]   ;;  %v7484_v41 = vld [vmem:[%s11835_s2 + $0x2e8] ss:$16 sps:$4 sm:$0xff]  }
  0x2b   :  { %2491 = vmatpush1.bf16.msra.mxu0 %v7404_v42  ;;  %2917 = vmatpush1.bf16.msra.mxu1 %v7405_v43  ;;  %v7489_v42 = vld [vmem:[%s11835_s2 + $0x304] ss:$16 sps:$4 sm:$0xff]   ;;  %v7492_v43 = vld [vmem:[%s11835_s2 + $0x30c] ss:$16 sps:$4 sm:$0xff]  }
  0x2c   :  { %2492 = vmatprep.subr.bf16.mxu0 %v7406_v44  ;;  %2918 = vmatprep.subr.bf16.mxu1 %v7408_v45  ;;  %v7487_v44 = vld [vmem:[%s11835_s2 + $0x300] ss:$16 sps:$4 sm:$0xff]   ;;  %v7490_v45 = vld [vmem:[%s11835_s2 + $0x308] ss:$16 sps:$4 sm:$0xff]  }
  0x2f   :  { %2493 = vmatpush1.bf16.msra.mxu0 %v7410_v46  ;;  %2919 = vmatpush1.bf16.msra.mxu1 %v7411_v47  ;;  %v7495_v46 = vld [vmem:[%s11835_s2 + $0x324] ss:$16 sps:$4 sm:$0xff]   ;;  %v7498_v47 = vld [vmem:[%s11835_s2 + $0x32c] ss:$16 sps:$4 sm:$0xff]  }
  0x30   :  { %2494 = vmatprep.subr.bf16.mxu0 %v7412_v49  ;;  %2920 = vmatprep.subr.bf16.mxu1 %v7414_v50  ;;  %v7496_v49 = vld [vmem:[%s11835_s2 + $0x328] ss:$16 sps:$4 sm:$0xff]   ;;  %v7503_v50 = vld [vmem:[%s11835_s2 + $0x344] ss:$16 sps:$4 sm:$0xff]  }
  0x33   :  { %2495 = vmatpush1.bf16.msra.mxu0 %v7416_v51  ;;  %2921 = vmatpush1.bf16.msra.mxu1 %v7417_v52  ;;  %v7506_v51 = vld [vmem:[%s11835_s2 + $0x34c] ss:$16 sps:$4 sm:$0xff]   ;;  %v7501_v52 = vld [vmem:[%s11835_s2 + $0x340] ss:$16 sps:$4 sm:$0xff]  }
  0x34   :  { %2496 = vmatprep.subr.bf16.mxu0 %v7418_v53  ;;  %2922 = vmatprep.subr.bf16.mxu1 %v7420_v54  ;;  %v7504_v53 = vld [vmem:[%s11835_s2 + $0x348] ss:$16 sps:$4 sm:$0xff]   ;;  %v7510_v54 = vld [vmem:[%s11835_s2 + $0x364] ss:$16 sps:$4 sm:$0xff]  }
  0x37   :  { %2497 = vmatpush1.bf16.msra.mxu0 %v7422_v55  ;;  %2923 = vmatpush1.bf16.msra.mxu1 %v7423_v56  ;;  %v7513_v55 = vld [vmem:[%s11835_s2 + $0x36c] ss:$16 sps:$4 sm:$0xff]   ;;  %v7508_v56 = vld [vmem:[%s11835_s2 + $0x360] ss:$16 sps:$4 sm:$0xff]  }
  0x38   :  { %2498 = vmatprep.subr.bf16.mxu0 %v7424_v57  ;;  %2924 = vmatprep.subr.bf16.mxu1 %v7426_v58  ;;  %v7511_v57 = vld [vmem:[%s11835_s2 + $0x368] ss:$16 sps:$4 sm:$0xff]   ;;  %v7518_v58 = vld [vmem:[%s11835_s2 + $0x384] ss:$16 sps:$4 sm:$0xff]  }
  0x3b   :  { %2499 = vmatpush1.bf16.msra.mxu0 %v7428_v59  ;;  %2925 = vmatpush1.bf16.msra.mxu1 %v7429_v60  ;;  %v7521_v59 = vld [vmem:[%s11835_s2 + $0x38c] ss:$16 sps:$4 sm:$0xff]   ;;  %v7516_v60 = vld [vmem:[%s11835_s2 + $0x380] ss:$16 sps:$4 sm:$0xff]  }
  0x3c   :  { %2500 = vmatprep.subr.bf16.mxu0 %v7430_v61  ;;  %2926 = vmatprep.subr.bf16.mxu1 %v7432_v62  ;;  %v7519_v61 = vld [vmem:[%s11835_s2 + $0x388] ss:$16 sps:$4 sm:$0xff]   ;;  %v7525_v62 = vld [vmem:[%s11835_s2 + $0x3a4] ss:$16 sps:$4 sm:$0xff]  }
  0x3f   :  { %2501 = vmatpush1.bf16.msra.mxu0 %v7434_v63  ;;  %2927 = vmatpush1.bf16.msra.mxu1 %v7435_v0  ;;  %v7528_v63 = vld [vmem:[%s11835_s2 + $0x3ac] ss:$16 sps:$4 sm:$0xff]   ;;  %v7523_v0 = vld [vmem:[%s11835_s2 + $0x3a0] ss:$16 sps:$4 sm:$0xff]  }
  0x40   :  { %2541 = vmatprep.subr.bf16.mxu0 %v7441_v1  ;;  %2967 = vmatprep.subr.bf16.mxu1 %v7444_v2  ;;  %v7526_v1 = vld [vmem:[%s11835_s2 + $0x3a8] ss:$16 sps:$4 sm:$0xff]   ;;  %v7532_v2 = vld [vmem:[%s11835_s2 + $0x3c4] ss:$16 sps:$4 sm:$0xff]  }
  0x42   :  { %2503 = vmatmul.mubr.bf16.vlgmr.msra.gmra.mrb[0].mxu0 %v7436_v3  ;;  %2929 = vmatmul.mubr.bf16.vlgmr.msra.gmra.mrb[0].mxu1 %v7436_v3  ;;  %v7535_v3 = vld [vmem:[%s11835_s2 + $0x3cc] ss:$16 sps:$4 sm:$0xff]  }
  0x43   :  { %2542 = vmatpush1.bf16.msra.mxu0 %v7439_v4  ;;  %2968 = vmatpush1.bf16.msra.mxu1 %v7442_v5  ;;  %v7530_v4 = vld [vmem:[%s11835_s2 + $0x3c0] ss:$16 sps:$4 sm:$0xff]   ;;  %v7533_v5 = vld [vmem:[%s11835_s2 + $0x3c8] ss:$16 sps:$4 sm:$0xff]  }
  0x44   :  { %2543 = vmatprep.subr.bf16.mxu0 %v7447_v6  ;;  %2969 = vmatprep.subr.bf16.mxu1 %v7450_v7  ;;  %v7539_v6 = vld [vmem:[%s11835_s2 + $0x3e4] ss:$16 sps:$4 sm:$0xff]   ;;  %v7542_v7 = vld [vmem:[%s11835_s2 + $0x3ec] ss:$16 sps:$4 sm:$0xff]  }
  0x45   :  { %2512 = vmatprep.mubr.bf16.mxu0 %v7499_v13  ;;  %2938 = vmatprep.mubr.bf16.mxu1 %v7499_v13  ;;  %v7546_v13 = vld [vmem:[%s11835_s2 + $0x400] ss:$16 sps:$4 sm:$0xff]  }
  0x47   :  { %2544 = vmatpush1.bf16.msra.mxu0 %v7445_v8  ;;  %2970 = vmatpush1.bf16.msra.mxu1 %v7448_v9  ;;  %v7537_v8 = vld [vmem:[%s11835_s2 + $0x3e0] ss:$16 sps:$4 sm:$0xff]   ;;  %v7540_v9 = vld [vmem:[%s11835_s2 + $0x3e8] ss:$16 sps:$4 sm:$0xff]  }
  0x48   :  { %2545 = vmatprep.subr.bf16.mxu0 %v7453_v10  ;;  %2971 = vmatprep.subr.bf16.mxu1 %v7456_v11  ;;  %v7548_v10 = vld [vmem:[%s11835_s2 + $0x404] ss:$16 sps:$4 sm:$0xff]   ;;  %v7551_v11 = vld [vmem:[%s11835_s2 + $0x40c] ss:$16 sps:$4 sm:$0xff]  }
  0x4a   :  { %2513 = vmatmul.mubr.bf16.gmra.mrb[4].mxu0 %v7507_v17  ;;  %2939 = vmatmul.mubr.bf16.gmra.mrb[4].mxu1 %v7507_v17  ;;  %v7606_v17 = vld [vmem:[%s11836_s0 + $0x6c] ss:$48 sps:$4 sm:$0xff]  }
  0x4b   :  { %2546 = vmatpush1.bf16.msra.mxu0 %v7451_v12  ;;  %2972 = vmatpush1.bf16.msra.mxu1 %v7454_v14  ;;  %v7543_v12 = vld [vmem:[%s11836_s0 + $0x8] ss:$48 sps:$4 sm:$0xff]  }
  0x4c   :  { %2547 = vmatprep.subr.bf16.mxu0 %v7459_v15  ;;  %2973 = vmatprep.subr.bf16.mxu1 %v7462_v16  ;;  %v7549_v14 = vld [vmem:[%s11835_s2 + $0x408] ss:$16 sps:$4 sm:$0xff]   ;;  %v7554_v15 = vld [vmem:[%s11835_s2 + $0x424] ss:$16 sps:$4 sm:$0xff]   ;;  %v7557_v16 = vld [vmem:[%s11835_s2 + $0x42c] ss:$16 sps:$4 sm:$0xff]  }
  0x4d   :  { %2522 = vmatprep.mubr.bf16.mxu0 %v7514_v22  ;;  %2948 = vmatprep.mubr.bf16.mxu1 %v7514_v22  ;;  %v7614_v22 = vld [vmem:[%s11836_s0 + $0x68] ss:$48 sps:$4 sm:$0xff]  }
  0x4f   :  { %2548 = vmatpush1.bf16.msra.mxu0 %v7457_v18  ;;  %2974 = vmatpush1.bf16.msra.mxu1 %v7460_v19  ;;  %v7552_v18 = vld [vmem:[%s11835_s2 + $0x420] ss:$16 sps:$4 sm:$0xff]   ;;  %v7555_v19 = vld [vmem:[%s11835_s2 + $0x428] ss:$16 sps:$4 sm:$0xff]  }
  0x50   :  { %2549 = vmatprep.subr.bf16.mxu0 %v7465_v20  ;;  %2975 = vmatprep.subr.bf16.mxu1 %v7468_v21  ;;  %v7560_v20 = vld [vmem:[%s11835_s2 + $0x444] ss:$16 sps:$4 sm:$0xff]   ;;  %v7563_v21 = vld [vmem:[%s11835_s2 + $0x44c] ss:$16 sps:$4 sm:$0xff]  }
  0x52   :  { %2523 = vmatmul.mubr.bf16.gmra.mrb[8].mxu0 %v7522_v27  ;;  %2949 = vmatmul.mubr.bf16.gmra.mrb[8].mxu1 %v7522_v27  ;;  %v7621_v27 = vld [vmem:[%s11836_s0 + $0xcc] ss:$48 sps:$4 sm:$0xff]  }
  0x53   :  { %2550 = vmatpush1.bf16.msra.mxu0 %v7463_v23  ;;  %2976 = vmatpush1.bf16.msra.mxu1 %v7466_v24  ;;  %v7558_v23 = vld [vmem:[%s11835_s2 + $0x440] ss:$16 sps:$4 sm:$0xff]   ;;  %v7561_v24 = vld [vmem:[%s11835_s2 + $0x448] ss:$16 sps:$4 sm:$0xff]  }
  0x54   :  { %2551 = vmatprep.subr.bf16.mxu0 %v7471_v25  ;;  %2977 = vmatprep.subr.bf16.mxu1 %v7474_v26  ;;  %v7566_v25 = vld [vmem:[%s11835_s2 + $0x464] ss:$16 sps:$4 sm:$0xff]   ;;  %v7569_v26 = vld [vmem:[%s11835_s2 + $0x46c] ss:$16 sps:$4 sm:$0xff]  }
  0x55   :  { %2532 = vmatprep.mubr.bf16.mxu0 %v6164_v33  ;;  %2958 = vmatprep.mubr.bf16.mxu1 %v6164_v33  ;;  %v434_v33 = vld [vmem:[%s11836_s0 + $0x128] sm:$0xff] }
  0x57   :  { %2552 = vmatpush1.bf16.msra.mxu0 %v7469_v28  ;;  %2978 = vmatpush1.bf16.msra.mxu1 %v7472_v29  ;;  %v7564_v28 = vld [vmem:[%s11835_s2 + $0x460] ss:$16 sps:$4 sm:$0xff]   ;;  %v7567_v29 = vld [vmem:[%s11835_s2 + $0x468] ss:$16 sps:$4 sm:$0xff]  }
  0x58   :  { %2553 = vmatprep.subr.bf16.mxu0 %v7477_v31  ;;  %2979 = vmatprep.subr.bf16.mxu1 %v7480_v32  ;;  %v7575_v31 = vld [vmem:[%s11835_s2 + $0x48c] ss:$16 sps:$4 sm:$0xff]   ;;  %v7629_v32 = vld [vmem:[%s11836_s0 + $0xc8] ss:$48 sps:$4 sm:$0xff]  }
  0x5a   :  { %2533 = vmatmul.mubr.bf16.gmra.mrb[12].mxu0 %v6163_v39  ;;  %2959 = vmatmul.mubr.bf16.gmra.mrb[12].mxu1 %v6163_v39  ;;  %v7576_v39 = vld [vmem:[%s11835_s2 + $0x4a0] ss:$16 sps:$4 sm:$0xff]  }
  0x5b   :  { %2554 = vmatpush1.bf16.msra.mxu0 %v7475_v34  ;;  %2980 = vmatpush1.bf16.msra.mxu1 %v7478_v35  ;;  %v7570_v34 = vld [vmem:[%s11835_s2 + $0x480] ss:$16 sps:$4 sm:$0xff]   ;;  %v7573_v35 = vld [vmem:[%s11835_s2 + $0x488] ss:$16 sps:$4 sm:$0xff]  }
  0x5c   :  { %2555 = vmatprep.subr.bf16.mxu0 %v7483_v36  ;;  %2981 = vmatprep.subr.bf16.mxu1 %v7486_v37  ;;  %v7578_v36 = vld [vmem:[%s11835_s2 + $0x4a4] ss:$16 sps:$4 sm:$0xff]   ;;  %v7581_v37 = vld [vmem:[%s11835_s2 + $0x4ac] ss:$16 sps:$4 sm:$0xff]  }
  0x5d   :  { %2573 = vmatprep.mubr.bf16.mxu0 %v7545_v40  ;;  %2999 = vmatprep.mubr.bf16.mxu1 %v7545_v40  ;;  %v7579_v40 = vld [vmem:[%s11835_s2 + $0x4a8] ss:$16 sps:$4 sm:$0xff]  }
  0x5f   :  { %2556 = vmatpush1.bf16.msra.mxu0 %v7481_v38  ;;  %2982 = vmatpush1.bf16.msra.mxu1 %v7484_v41  ;;  %v6166_v38 = vcombine.high %v434_v33, %v434_v33  ;;  %v7584_v41 = vld [vmem:[%s11835_s2 + $0x4c4] ss:$16 sps:$4 sm:$0xff]  }
  0x60   :  { %2557 = vmatprep.subr.bf16.mxu0 %v7489_v42  ;;  %2983 = vmatprep.subr.bf16.mxu1 %v7492_v43  ;;  %v7587_v42 = vld [vmem:[%s11835_s2 + $0x4cc] ss:$16 sps:$4 sm:$0xff]   ;;  %v6165_v43 = vcombine.low %v434_v33, %v434_v33  ;;  %v7668_v33 = vld [vmem:[%s11835_s2 + $0x648] ss:$16 sps:$4 sm:$0xff]  }
  0x63   :  { %2558 = vmatpush1.bf16.msra.mxu0 %v7487_v44  ;;  %2984 = vmatpush1.bf16.msra.mxu1 %v7490_v45  ;;  %v7582_v44 = vld [vmem:[%s11835_s2 + $0x4c0] ss:$16 sps:$4 sm:$0xff]   ;;  %v7585_v45 = vld [vmem:[%s11835_s2 + $0x4c8] ss:$16 sps:$4 sm:$0xff]  }
  0x64   :  { %2559 = vmatprep.subr.bf16.mxu0 %v7495_v46  ;;  %2985 = vmatprep.subr.bf16.mxu1 %v7498_v47  ;;  %v7590_v46 = vld [vmem:[%s11835_s2 + $0x4e4] ss:$16 sps:$4 sm:$0xff]   ;;  %v7593_v47 = vld [vmem:[%s11835_s2 + $0x4ec] ss:$16 sps:$4 sm:$0xff]  }
  0x67   :  { %2560 = vmatpush1.bf16.msra.mxu0 %v7493_v48  ;;  %2986 = vmatpush1.bf16.msra.mxu1 %v7496_v49  ;;  %v7652_v48 = vld [vmem:[%s11836_s0 + $0x14] ss:$48 sps:$4 sm:$0xff]   ;;  %v7588_v49 = vld [vmem:[%s11835_s2 + $0x4e0] ss:$16 sps:$4 sm:$0xff]  }
  0x68   :  { %2561 = vmatprep.subr.bf16.mxu0 %v7503_v50  ;;  %2987 = vmatprep.subr.bf16.mxu1 %v7506_v51  ;;  %v7591_v50 = vld [vmem:[%s11835_s2 + $0x4e8] ss:$16 sps:$4 sm:$0xff]   ;;  %v7596_v51 = vld [vmem:[%s11835_s2 + $0x504] ss:$16 sps:$4 sm:$0xff]  }
  0x6b   :  { %2562 = vmatpush1.bf16.msra.mxu0 %v7501_v52  ;;  %2988 = vmatpush1.bf16.msra.mxu1 %v7504_v53  ;;  %v7599_v52 = vld [vmem:[%s11835_s2 + $0x50c] ss:$16 sps:$4 sm:$0xff]   ;;  %v7594_v53 = vld [vmem:[%s11835_s2 + $0x500] ss:$16 sps:$4 sm:$0xff]  }
  0x6c   :  { %2563 = vmatprep.subr.bf16.mxu0 %v7510_v54  ;;  %2989 = vmatprep.subr.bf16.mxu1 %v7513_v55  ;;  %v7597_v54 = vld [vmem:[%s11835_s2 + $0x508] ss:$16 sps:$4 sm:$0xff]   ;;  %v7602_v55 = vld [vmem:[%s11835_s2 + $0x524] ss:$16 sps:$4 sm:$0xff]  }
  0x6f   :  { %2564 = vmatpush1.bf16.msra.mxu0 %v7508_v56  ;;  %2990 = vmatpush1.bf16.msra.mxu1 %v7511_v57  ;;  %v7605_v56 = vld [vmem:[%s11835_s2 + $0x52c] ss:$16 sps:$4 sm:$0xff]   ;;  %v7600_v57 = vld [vmem:[%s11835_s2 + $0x520] ss:$16 sps:$4 sm:$0xff]  }
  0x70   :  { %2565 = vmatprep.subr.bf16.mxu0 %v7518_v58  ;;  %2991 = vmatprep.subr.bf16.mxu1 %v7521_v59  ;;  %v7603_v58 = vld [vmem:[%s11835_s2 + $0x528] ss:$16 sps:$4 sm:$0xff]   ;;  %v7610_v59 = vld [vmem:[%s11835_s2 + $0x544] ss:$16 sps:$4 sm:$0xff]  }
  0x73   :  { %2566 = vmatpush1.bf16.msra.mxu0 %v7516_v60  ;;  %2992 = vmatpush1.bf16.msra.mxu1 %v7519_v61  ;;  %v7613_v60 = vld [vmem:[%s11835_s2 + $0x54c] ss:$16 sps:$4 sm:$0xff]   ;;  %v7608_v61 = vld [vmem:[%s11835_s2 + $0x540] ss:$16 sps:$4 sm:$0xff]  }
  0x74   :  { %2567 = vmatprep.subr.bf16.mxu0 %v7525_v62  ;;  %2993 = vmatprep.subr.bf16.mxu1 %v7528_v63  ;;  %v7611_v62 = vld [vmem:[%s11835_s2 + $0x548] ss:$16 sps:$4 sm:$0xff]   ;;  %v7617_v63 = vld [vmem:[%s11835_s2 + $0x564] ss:$16 sps:$4 sm:$0xff]  }
  0x77   :  { %2568 = vmatpush1.bf16.msra.mxu0 %v7523_v0  ;;  %2994 = vmatpush1.bf16.msra.mxu1 %v7526_v1  ;;  %v7620_v0 = vld [vmem:[%s11835_s2 + $0x56c] ss:$16 sps:$4 sm:$0xff]   ;;  %v7615_v1 = vld [vmem:[%s11835_s2 + $0x560] ss:$16 sps:$4 sm:$0xff]  }
  0x78   :  { %2569 = vmatprep.subr.bf16.mxu0 %v7532_v2  ;;  %2995 = vmatprep.subr.bf16.mxu1 %v7535_v3  ;;  %v7618_v2 = vld [vmem:[%s11835_s2 + $0x568] ss:$16 sps:$4 sm:$0xff]   ;;  %v7625_v3 = vld [vmem:[%s11835_s2 + $0x584] ss:$16 sps:$4 sm:$0xff]  }
  0x7b   :  { %2570 = vmatpush1.bf16.msra.mxu0 %v7530_v4  ;;  %2996 = vmatpush1.bf16.msra.mxu1 %v7533_v5  ;;  %v7628_v4 = vld [vmem:[%s11835_s2 + $0x58c] ss:$16 sps:$4 sm:$0xff]   ;;  %v7623_v5 = vld [vmem:[%s11835_s2 + $0x580] ss:$16 sps:$4 sm:$0xff]  }
  0x7c   :  { %2571 = vmatprep.subr.bf16.mxu0 %v7539_v6  ;;  %2997 = vmatprep.subr.bf16.mxu1 %v7542_v7  ;;  %v7626_v6 = vld [vmem:[%s11835_s2 + $0x588] ss:$16 sps:$4 sm:$0xff]   ;;  %v7632_v7 = vld [vmem:[%s11835_s2 + $0x5a4] ss:$16 sps:$4 sm:$0xff]  }
  0x7f   :  { %2572 = vmatpush1.bf16.msra.mxu0 %v7537_v8  ;;  %2998 = vmatpush1.bf16.msra.mxu1 %v7540_v9  ;;  %v7635_v8 = vld [vmem:[%s11835_s2 + $0x5ac] ss:$16 sps:$4 sm:$0xff]   ;;  %v7630_v9 = vld [vmem:[%s11835_s2 + $0x5a0] ss:$16 sps:$4 sm:$0xff]  }
  0x80   :  { %2612 = vmatprep.subr.bf16.mxu0 %v7548_v10  ;;  %3038 = vmatprep.subr.bf16.mxu1 %v7551_v11  ;;  %v7633_v10 = vld [vmem:[%s11835_s2 + $0x5a8] ss:$16 sps:$4 sm:$0xff]   ;;  %v7639_v11 = vld [vmem:[%s11835_s2 + $0x5c4] ss:$16 sps:$4 sm:$0xff]  }
  0x82   :  { %2574 = vmatmul.mubr.bf16.vlgmr.msra.gmra.mrb[0].mxu0 %v7543_v12  ;;  %3000 = vmatmul.mubr.bf16.vlgmr.msra.gmra.mrb[0].mxu1 %v7543_v12  ;;  %v7642_v12 = vld [vmem:[%s11835_s2 + $0x5cc] ss:$16 sps:$4 sm:$0xff]  }
  0x83   :  { %2613 = vmatpush1.bf16.msra.mxu0 %v7546_v13  ;;  %3039 = vmatpush1.bf16.msra.mxu1 %v7549_v14  ;;  %v7637_v13 = vld [vmem:[%s11835_s2 + $0x5c0] ss:$16 sps:$4 sm:$0xff]   ;;  %v7640_v14 = vld [vmem:[%s11835_s2 + $0x5c8] ss:$16 sps:$4 sm:$0xff]  }
  0x84   :  { %2614 = vmatprep.subr.bf16.mxu0 %v7554_v15  ;;  %3040 = vmatprep.subr.bf16.mxu1 %v7557_v16  ;;  %v7646_v15 = vld [vmem:[%s11835_s2 + $0x5e4] ss:$16 sps:$4 sm:$0xff]   ;;  %v7649_v16 = vld [vmem:[%s11835_s2 + $0x5ec] ss:$16 sps:$4 sm:$0xff]  }
  0x85   :  { %2583 = vmatprep.mubr.bf16.mxu0 %v7606_v17  ;;  %3009 = vmatprep.mubr.bf16.mxu1 %v7606_v17  ;;  %v7644_v17 = vld [vmem:[%s11835_s2 + $0x5e0] ss:$16 sps:$4 sm:$0xff]  }
  0x87   :  { %2615 = vmatpush1.bf16.msra.mxu0 %v7552_v18  ;;  %3041 = vmatpush1.bf16.msra.mxu1 %v7555_v19  ;;  %v7647_v18 = vld [vmem:[%s11835_s2 + $0x5e8] ss:$16 sps:$4 sm:$0xff]   ;;  %v7655_v19 = vld [vmem:[%s11835_s2 + $0x604] ss:$16 sps:$4 sm:$0xff]  }
  0x88   :  { %2616 = vmatprep.subr.bf16.mxu0 %v7560_v20  ;;  %3042 = vmatprep.subr.bf16.mxu1 %v7563_v21  ;;  %v7658_v20 = vld [vmem:[%s11835_s2 + $0x60c] ss:$16 sps:$4 sm:$0xff]   ;;  %v7650_v21 = vld [vmem:[%s11836_s0 + $0x10] ss:$48 sps:$4 sm:$0xff]  }
  0x8a   :  { %2584 = vmatmul.mubr.bf16.gmra.mrb[4].mxu0 %v7614_v22  ;;  %3010 = vmatmul.mubr.bf16.gmra.mrb[4].mxu1 %v7614_v22  ;;  %v7653_v22 = vld [vmem:[%s11835_s2 + $0x600] ss:$16 sps:$4 sm:$0xff]  }
  0x8b   :  { %2617 = vmatpush1.bf16.msra.mxu0 %v7558_v23  ;;  %3043 = vmatpush1.bf16.msra.mxu1 %v7561_v24  ;;  %v7656_v23 = vld [vmem:[%s11835_s2 + $0x608] ss:$16 sps:$4 sm:$0xff]   ;;  %v7661_v24 = vld [vmem:[%s11835_s2 + $0x624] ss:$16 sps:$4 sm:$0xff]  }
  0x8c   :  { %2618 = vmatprep.subr.bf16.mxu0 %v7566_v25  ;;  %3044 = vmatprep.subr.bf16.mxu1 %v7569_v26  ;;  %v7664_v25 = vld [vmem:[%s11835_s2 + $0x62c] ss:$16 sps:$4 sm:$0xff]   ;;  %v7713_v26 = vld [vmem:[%s11836_s0 + $0x74] ss:$48 sps:$4 sm:$0xff]  }
  0x8d   :  { %2593 = vmatprep.mubr.bf16.mxu0 %v7621_v27  ;;  %3019 = vmatprep.mubr.bf16.mxu1 %v7621_v27  ;;  %v7659_v27 = vld [vmem:[%s11835_s2 + $0x620] ss:$16 sps:$4 sm:$0xff]  }
  0x8f   :  { %2619 = vmatpush1.bf16.msra.mxu0 %v7564_v28  ;;  %3045 = vmatpush1.bf16.msra.mxu1 %v7567_v29  ;;  %v7662_v28 = vld [vmem:[%s11835_s2 + $0x628] ss:$16 sps:$4 sm:$0xff]   ;;  %v7667_v29 = vld [vmem:[%s11835_s2 + $0x644] ss:$16 sps:$4 sm:$0xff]  }
  0x90   :  { %2620 = vmatprep.subr.bf16.mxu0 %v7572_v30  ;;  %3046 = vmatprep.subr.bf16.mxu1 %v7575_v31  ;;  %v7670_v30 = vld [vmem:[%s11835_s2 + $0x64c] ss:$16 sps:$4 sm:$0xff]   ;;  %v7665_v31 = vld [vmem:[%s11835_s2 + $0x640] ss:$16 sps:$4 sm:$0xff]  }
  0x92   :  { %2594 = vmatmul.mubr.bf16.gmra.mrb[8].mxu0 %v7629_v32  ;;  %3020 = vmatmul.mubr.bf16.gmra.mrb[8].mxu1 %v7629_v32  ;;  %v7721_v32 = vld [vmem:[%s11836_s0 + $0x70] ss:$48 sps:$4 sm:$0xff]  }
  0x93   :  { %2621 = vmatpush1.bf16.msra.mxu0 %v7570_v34  ;;  %3047 = vmatpush1.bf16.msra.mxu1 %v7573_v35  ;;  %v7673_v34 = vld [vmem:[%s11835_s2 + $0x664] ss:$16 sps:$4 sm:$0xff]   ;;  %v7676_v35 = vld [vmem:[%s11835_s2 + $0x66c] ss:$16 sps:$4 sm:$0xff]  }
  0x94   :  { %2622 = vmatprep.subr.bf16.mxu0 %v7578_v36  ;;  %3048 = vmatprep.subr.bf16.mxu1 %v7581_v37  ;;  %v7728_v36 = vld [vmem:[%s11836_s0 + $0xd4] ss:$48 sps:$4 sm:$0xff]   ;;  %v7671_v37 = vld [vmem:[%s11835_s2 + $0x660] ss:$16 sps:$4 sm:$0xff]  }
  0x95   :  { %2603 = vmatprep.mubr.bf16.mxu0 %v6166_v38  ;;  %3029 = vmatprep.mubr.bf16.mxu1 %v6166_v38  ;;  %v7674_v38 = vld [vmem:[%s11835_s2 + $0x668] ss:$16 sps:$4 sm:$0xff]  }
  0x97   :  { %2623 = vmatpush1.bf16.msra.mxu0 %v7576_v39  ;;  %3049 = vmatpush1.bf16.msra.mxu1 %v7579_v40  ;;  %v7679_v39 = vld [vmem:[%s11835_s2 + $0x684] ss:$16 sps:$4 sm:$0xff]   ;;  %v7682_v40 = vld [vmem:[%s11835_s2 + $0x68c] ss:$16 sps:$4 sm:$0xff]  }
  0x98   :  { %2624 = vmatprep.subr.bf16.mxu0 %v7584_v41  ;;  %3050 = vmatprep.subr.bf16.mxu1 %v7587_v42  ;;  %v7677_v41 = vld [vmem:[%s11835_s2 + $0x680] ss:$16 sps:$4 sm:$0xff]  }
  0x99   :  { %v7736_v42 = vld [vmem:[%s11836_s0 + $0xd0] ss:$48 sps:$4 sm:$0xff]  }
  0x9a   :  { %2604 = vmatmul.mubr.bf16.gmra.mrb[12].mxu0 %v6165_v43  ;;  %3030 = vmatmul.mubr.bf16.gmra.mrb[12].mxu1 %v6165_v43  ;;  %v435_v43 = vld [vmem:[%s11836_s0 + $0x130] sm:$0xff] }
  0x9b   :  { %2625 = vmatpush1.bf16.msra.mxu0 %v7582_v44  ;;  %3051 = vmatpush1.bf16.msra.mxu1 %v7585_v45  ;;  %v7680_v44 = vld [vmem:[%s11835_s2 + $0x688] ss:$16 sps:$4 sm:$0xff]   ;;  %v7685_v45 = vld [vmem:[%s11835_s2 + $0x6a4] ss:$16 sps:$4 sm:$0xff]  }
  0x9c   :  { %2626 = vmatprep.subr.bf16.mxu0 %v7590_v46  ;;  %3052 = vmatprep.subr.bf16.mxu1 %v7593_v47  ;;  %v7688_v46 = vld [vmem:[%s11835_s2 + $0x6ac] ss:$16 sps:$4 sm:$0xff]   ;;  %v6168_v47 = vcombine.high %v435_v43, %v435_v43 }
  0x9d   :  { %2644 = vmatprep.mubr.bf16.mxu0 %v7652_v48  ;;  %3070 = vmatprep.mubr.bf16.mxu1 %v7652_v48  ;;  %v7683_v48 = vld [vmem:[%s11835_s2 + $0x6a0] ss:$16 sps:$4 sm:$0xff]  }
  0x9f   :  { %2627 = vmatpush1.bf16.msra.mxu0 %v7588_v49  ;;  %3053 = vmatpush1.bf16.msra.mxu1 %v7591_v50  ;;  %v7686_v49 = vld [vmem:[%s11835_s2 + $0x6a8] ss:$16 sps:$4 sm:$0xff]   ;;  %v7691_v50 = vld [vmem:[%s11835_s2 + $0x6c4] ss:$16 sps:$4 sm:$0xff]  }
  0xa0   :  { %2628 = vmatprep.subr.bf16.mxu0 %v7596_v51  ;;  %3054 = vmatprep.subr.bf16.mxu1 %v7599_v52  ;;  %v7694_v51 = vld [vmem:[%s11835_s2 + $0x6cc] ss:$16 sps:$4 sm:$0xff]   ;;  %v7689_v52 = vld [vmem:[%s11835_s2 + $0x6c0] ss:$16 sps:$4 sm:$0xff]  }
  0xa3   :  { %2629 = vmatpush1.bf16.msra.mxu0 %v7594_v53  ;;  %3055 = vmatpush1.bf16.msra.mxu1 %v7597_v54  ;;  %v6167_v53 = vcombine.low %v435_v43, %v435_v43  ;;  %v7692_v54 = vld [vmem:[%s11835_s2 + $0x6c8] ss:$16 sps:$4 sm:$0xff]   ;;  %v7780_v43 = vld [vmem:[%s11835_s2 + $0x864] ss:$16 sps:$4 sm:$0xff]  }
  0xa4   :  { %2630 = vmatprep.subr.bf16.mxu0 %v7602_v55  ;;  %3056 = vmatprep.subr.bf16.mxu1 %v7605_v56  ;;  %v7697_v55 = vld [vmem:[%s11835_s2 + $0x6e4] ss:$16 sps:$4 sm:$0xff]   ;;  %v7700_v56 = vld [vmem:[%s11835_s2 + $0x6ec] ss:$16 sps:$4 sm:$0xff]  }
  0xa7   :  { %2631 = vmatpush1.bf16.msra.mxu0 %v7600_v57  ;;  %3057 = vmatpush1.bf16.msra.mxu1 %v7603_v58  ;;  %v7759_v57 = vld [vmem:[%s11836_s0 + $0x1c] ss:$48 sps:$4 sm:$0xff]   ;;  %v7695_v58 = vld [vmem:[%s11835_s2 + $0x6e0] ss:$16 sps:$4 sm:$0xff]  }
  0xa8   :  { %2632 = vmatprep.subr.bf16.mxu0 %v7610_v59  ;;  %3058 = vmatprep.subr.bf16.mxu1 %v7613_v60  ;;  %v7698_v59 = vld [vmem:[%s11835_s2 + $0x6e8] ss:$16 sps:$4 sm:$0xff]   ;;  %v7703_v60 = vld [vmem:[%s11835_s2 + $0x704] ss:$16 sps:$4 sm:$0xff]  }
  0xab   :  { %2633 = vmatpush1.bf16.msra.mxu0 %v7608_v61  ;;  %3059 = vmatpush1.bf16.msra.mxu1 %v7611_v62  ;;  %v7706_v61 = vld [vmem:[%s11835_s2 + $0x70c] ss:$16 sps:$4 sm:$0xff]   ;;  %v7701_v62 = vld [vmem:[%s11835_s2 + $0x700] ss:$16 sps:$4 sm:$0xff]  }
  0xac   :  { %2634 = vmatprep.subr.bf16.mxu0 %v7617_v63  ;;  %3060 = vmatprep.subr.bf16.mxu1 %v7620_v0  ;;  %v7704_v63 = vld [vmem:[%s11835_s2 + $0x708] ss:$16 sps:$4 sm:$0xff]   ;;  %v7709_v0 = vld [vmem:[%s11835_s2 + $0x724] ss:$16 sps:$4 sm:$0xff]  }
  0xaf   :  { %2635 = vmatpush1.bf16.msra.mxu0 %v7615_v1  ;;  %3061 = vmatpush1.bf16.msra.mxu1 %v7618_v2  ;;  %v7712_v1 = vld [vmem:[%s11835_s2 + $0x72c] ss:$16 sps:$4 sm:$0xff]   ;;  %v7707_v2 = vld [vmem:[%s11835_s2 + $0x720] ss:$16 sps:$4 sm:$0xff]  }
  0xb0   :  { %2636 = vmatprep.subr.bf16.mxu0 %v7625_v3  ;;  %3062 = vmatprep.subr.bf16.mxu1 %v7628_v4  ;;  %v7710_v3 = vld [vmem:[%s11835_s2 + $0x728] ss:$16 sps:$4 sm:$0xff]   ;;  %v7717_v4 = vld [vmem:[%s11835_s2 + $0x744] ss:$16 sps:$4 sm:$0xff]  }
  0xb3   :  { %2637 = vmatpush1.bf16.msra.mxu0 %v7623_v5  ;;  %3063 = vmatpush1.bf16.msra.mxu1 %v7626_v6  ;;  %v7720_v5 = vld [vmem:[%s11835_s2 + $0x74c] ss:$16 sps:$4 sm:$0xff]   ;;  %v7715_v6 = vld [vmem:[%s11835_s2 + $0x740] ss:$16 sps:$4 sm:$0xff]  }
  0xb4   :  { %2638 = vmatprep.subr.bf16.mxu0 %v7632_v7  ;;  %3064 = vmatprep.subr.bf16.mxu1 %v7635_v8  ;;  %v7718_v7 = vld [vmem:[%s11835_s2 + $0x748] ss:$16 sps:$4 sm:$0xff]   ;;  %v7724_v8 = vld [vmem:[%s11835_s2 + $0x764] ss:$16 sps:$4 sm:$0xff]  }
  0xb7   :  { %2639 = vmatpush1.bf16.msra.mxu0 %v7630_v9  ;;  %3065 = vmatpush1.bf16.msra.mxu1 %v7633_v10  ;;  %v7727_v9 = vld [vmem:[%s11835_s2 + $0x76c] ss:$16 sps:$4 sm:$0xff]   ;;  %v7722_v10 = vld [vmem:[%s11835_s2 + $0x760] ss:$16 sps:$4 sm:$0xff]  }
  0xb8   :  { %2640 = vmatprep.subr.bf16.mxu0 %v7639_v11  ;;  %3066 = vmatprep.subr.bf16.mxu1 %v7642_v12  ;;  %v7725_v11 = vld [vmem:[%s11835_s2 + $0x768] ss:$16 sps:$4 sm:$0xff]   ;;  %v7732_v12 = vld [vmem:[%s11835_s2 + $0x784] ss:$16 sps:$4 sm:$0xff]  }
  0xbb   :  { %2641 = vmatpush1.bf16.msra.mxu0 %v7637_v13  ;;  %3067 = vmatpush1.bf16.msra.mxu1 %v7640_v14  ;;  %v7735_v13 = vld [vmem:[%s11835_s2 + $0x78c] ss:$16 sps:$4 sm:$0xff]   ;;  %v7730_v14 = vld [vmem:[%s11835_s2 + $0x780] ss:$16 sps:$4 sm:$0xff]  }
  0xbc   :  { %2642 = vmatprep.subr.bf16.mxu0 %v7646_v15  ;;  %3068 = vmatprep.subr.bf16.mxu1 %v7649_v16  ;;  %v7733_v15 = vld [vmem:[%s11835_s2 + $0x788] ss:$16 sps:$4 sm:$0xff]   ;;  %v7739_v16 = vld [vmem:[%s11835_s2 + $0x7a4] ss:$16 sps:$4 sm:$0xff]  }
  0xbf   :  { %2643 = vmatpush1.bf16.msra.mxu0 %v7644_v17  ;;  %3069 = vmatpush1.bf16.msra.mxu1 %v7647_v18  ;;  %v7742_v17 = vld [vmem:[%s11835_s2 + $0x7ac] ss:$16 sps:$4 sm:$0xff]   ;;  %v7737_v18 = vld [vmem:[%s11835_s2 + $0x7a0] ss:$16 sps:$4 sm:$0xff]  }
  0xc0   :  { %2683 = vmatprep.subr.bf16.mxu0 %v7655_v19  ;;  %3109 = vmatprep.subr.bf16.mxu1 %v7658_v20  ;;  %v7740_v19 = vld [vmem:[%s11835_s2 + $0x7a8] ss:$16 sps:$4 sm:$0xff]   ;;  %v7746_v20 = vld [vmem:[%s11835_s2 + $0x7c4] ss:$16 sps:$4 sm:$0xff]  }
  0xc2   :  { %2645 = vmatmul.mubr.bf16.vlgmr.msra.gmra.mrb[0].mxu0 %v7650_v21  ;;  %3071 = vmatmul.mubr.bf16.vlgmr.msra.gmra.mrb[0].mxu1 %v7650_v21  ;;  %v7749_v21 = vld [vmem:[%s11835_s2 + $0x7cc] ss:$16 sps:$4 sm:$0xff]  }
  0xc3   :  { %2684 = vmatpush1.bf16.msra.mxu0 %v7653_v22  ;;  %3110 = vmatpush1.bf16.msra.mxu1 %v7656_v23  ;;  %v7744_v22 = vld [vmem:[%s11835_s2 + $0x7c0] ss:$16 sps:$4 sm:$0xff]   ;;  %v7747_v23 = vld [vmem:[%s11835_s2 + $0x7c8] ss:$16 sps:$4 sm:$0xff]  }
  0xc4   :  { %2685 = vmatprep.subr.bf16.mxu0 %v7661_v24  ;;  %3111 = vmatprep.subr.bf16.mxu1 %v7664_v25  ;;  %v7753_v24 = vld [vmem:[%s11835_s2 + $0x7e4] ss:$16 sps:$4 sm:$0xff]   ;;  %v7756_v25 = vld [vmem:[%s11835_s2 + $0x7ec] ss:$16 sps:$4 sm:$0xff]  }
  0xc5   :  { %2654 = vmatprep.mubr.bf16.mxu0 %v7713_v26  ;;  %3080 = vmatprep.mubr.bf16.mxu1 %v7713_v26  ;;  %v7751_v26 = vld [vmem:[%s11835_s2 + $0x7e0] ss:$16 sps:$4 sm:$0xff]  }
  0xc7   :  { %2686 = vmatpush1.bf16.msra.mxu0 %v7659_v27  ;;  %3112 = vmatpush1.bf16.msra.mxu1 %v7662_v28  ;;  %v7754_v27 = vld [vmem:[%s11835_s2 + $0x7e8] ss:$16 sps:$4 sm:$0xff]   ;;  %v7762_v28 = vld [vmem:[%s11835_s2 + $0x804] ss:$16 sps:$4 sm:$0xff]  }
  0xc8   :  { %2687 = vmatprep.subr.bf16.mxu0 %v7667_v29  ;;  %3113 = vmatprep.subr.bf16.mxu1 %v7670_v30  ;;  %v7765_v29 = vld [vmem:[%s11835_s2 + $0x80c] ss:$16 sps:$4 sm:$0xff]   ;;  %v7757_v30 = vld [vmem:[%s11836_s0 + $0x18] ss:$48 sps:$4 sm:$0xff]  }
  0xca   :  { %2655 = vmatmul.mubr.bf16.gmra.mrb[4].mxu0 %v7721_v32  ;;  %3081 = vmatmul.mubr.bf16.gmra.mrb[4].mxu1 %v7721_v32  ;;  %v7763_v32 = vld [vmem:[%s11835_s2 + $0x808] ss:$16 sps:$4 sm:$0xff]  }
  0xcb   :  { %2688 = vmatpush1.bf16.msra.mxu0 %v7665_v31  ;;  %3114 = vmatpush1.bf16.msra.mxu1 %v7668_v33  ;;  %v7760_v31 = vld [vmem:[%s11835_s2 + $0x800] ss:$16 sps:$4 sm:$0xff]   ;;  %v7768_v33 = vld [vmem:[%s11835_s2 + $0x824] ss:$16 sps:$4 sm:$0xff]  }
  0xcc   :  { %2689 = vmatprep.subr.bf16.mxu0 %v7673_v34  ;;  %3115 = vmatprep.subr.bf16.mxu1 %v7676_v35  ;;  %v7771_v34 = vld [vmem:[%s11835_s2 + $0x82c] ss:$16 sps:$4 sm:$0xff]  }
  0xcd   :  { %2664 = vmatprep.mubr.bf16.mxu0 %v7728_v36  ;;  %3090 = vmatprep.mubr.bf16.mxu1 %v7728_v36  ;;  %v7820_v35 = vld [vmem:[%s11836_s0 + $0x7c] ss:$48 sps:$4 sm:$0xff]   ;;  %v7766_v36 = vld [vmem:[%s11835_s2 + $0x820] ss:$16 sps:$4 sm:$0xff]  }
  0xcf   :  { %2690 = vmatpush1.bf16.msra.mxu0 %v7671_v37  ;;  %3116 = vmatpush1.bf16.msra.mxu1 %v7674_v38  ;;  %v7769_v37 = vld [vmem:[%s11835_s2 + $0x828] ss:$16 sps:$4 sm:$0xff]   ;;  %v7774_v38 = vld [vmem:[%s11835_s2 + $0x844] ss:$16 sps:$4 sm:$0xff]  }
  0xd0   :  { %2691 = vmatprep.subr.bf16.mxu0 %v7679_v39  ;;  %3117 = vmatprep.subr.bf16.mxu1 %v7682_v40  ;;  %v7777_v39 = vld [vmem:[%s11835_s2 + $0x84c] ss:$16 sps:$4 sm:$0xff]   ;;  %v7772_v40 = vld [vmem:[%s11835_s2 + $0x840] ss:$16 sps:$4 sm:$0xff]  }
  0xd2   :  { %2665 = vmatmul.mubr.bf16.gmra.mrb[8].mxu0 %v7736_v42  ;;  %3091 = vmatmul.mubr.bf16.gmra.mrb[8].mxu1 %v7736_v42  ;;  %v7775_v42 = vld [vmem:[%s11835_s2 + $0x848] ss:$16 sps:$4 sm:$0xff]  }
  0xd3   :  { %2692 = vmatpush1.bf16.msra.mxu0 %v7677_v41  ;;  %3118 = vmatpush1.bf16.msra.mxu1 %v7680_v44  ;;  %v7828_v41 = vld [vmem:[%s11836_s0 + $0x78] ss:$48 sps:$4 sm:$0xff]   ;;  %v7783_v44 = vld [vmem:[%s11835_s2 + $0x86c] ss:$16 sps:$4 sm:$0xff]  }
  0xd4   :  { %2693 = vmatprep.subr.bf16.mxu0 %v7685_v45  ;;  %3119 = vmatprep.subr.bf16.mxu1 %v7688_v46  ;;  %v7835_v45 = vld [vmem:[%s11836_s0 + $0xdc] ss:$48 sps:$4 sm:$0xff]   ;;  %v7778_v46 = vld [vmem:[%s11835_s2 + $0x860] ss:$16 sps:$4 sm:$0xff]  }
  0xd5   :  { %2674 = vmatprep.mubr.bf16.mxu0 %v6168_v47  ;;  %3100 = vmatprep.mubr.bf16.mxu1 %v6168_v47  ;;  %v7781_v47 = vld [vmem:[%s11835_s2 + $0x868] ss:$16 sps:$4 sm:$0xff]  }
  0xd7   :  { %2694 = vmatpush1.bf16.msra.mxu0 %v7683_v48  ;;  %3120 = vmatpush1.bf16.msra.mxu1 %v7686_v49  ;;  %v7786_v48 = vld [vmem:[%s11835_s2 + $0x884] ss:$16 sps:$4 sm:$0xff]   ;;  %v7789_v49 = vld [vmem:[%s11835_s2 + $0x88c] ss:$16 sps:$4 sm:$0xff]  }
  0xd8   :  { %2695 = vmatprep.subr.bf16.mxu0 %v7691_v50  ;;  %3121 = vmatprep.subr.bf16.mxu1 %v7694_v51  ;;  %v7843_v50 = vld [vmem:[%s11836_s0 + $0xd8] ss:$48 sps:$4 sm:$0xff]  }
  0xd9   :  { %v436_v51 = vld [vmem:[%s11836_s0 + $0x138] sm:$0xff] }
  0xda   :  { %2675 = vmatmul.mubr.bf16.gmra.mrb[12].mxu0 %v6167_v53  ;;  %3101 = vmatmul.mubr.bf16.gmra.mrb[12].mxu1 %v6167_v53  ;;  %v7787_v53 = vld [vmem:[%s11835_s2 + $0x888] ss:$16 sps:$4 sm:$0xff]  }
  0xdb   :  { %2696 = vmatpush1.bf16.msra.mxu0 %v7689_v52  ;;  %3122 = vmatpush1.bf16.msra.mxu1 %v7692_v54  ;;  %v7784_v52 = vld [vmem:[%s11835_s2 + $0x880] ss:$16 sps:$4 sm:$0xff]   ;;  %v7792_v54 = vld [vmem:[%s11835_s2 + $0x8a4] ss:$16 sps:$4 sm:$0xff]  }
  0xdc   :  { %2697 = vmatprep.subr.bf16.mxu0 %v7697_v55  ;;  %3123 = vmatprep.subr.bf16.mxu1 %v7700_v56  ;;  %v7795_v55 = vld [vmem:[%s11835_s2 + $0x8ac] ss:$16 sps:$4 sm:$0xff]   ;;  %v6170_v56 = vcombine.high %v436_v51, %v436_v51 }
  0xdd   :  { %2715 = vmatprep.mubr.bf16.mxu0 %v7759_v57  ;;  %3141 = vmatprep.mubr.bf16.mxu1 %v7759_v57  ;;  %v7790_v57 = vld [vmem:[%s11835_s2 + $0x8a0] ss:$16 sps:$4 sm:$0xff]  }
  0xdf   :  { %2698 = vmatpush1.bf16.msra.mxu0 %v7695_v58  ;;  %3124 = vmatpush1.bf16.msra.mxu1 %v7698_v59  ;;  %v7793_v58 = vld [vmem:[%s11835_s2 + $0x8a8] ss:$16 sps:$4 sm:$0xff]   ;;  %v7798_v59 = vld [vmem:[%s11835_s2 + $0x8c4] ss:$16 sps:$4 sm:$0xff]  }
  0xe0   :  { %2699 = vmatprep.subr.bf16.mxu0 %v7703_v60  ;;  %3125 = vmatprep.subr.bf16.mxu1 %v7706_v61  ;;  %v7801_v60 = vld [vmem:[%s11835_s2 + $0x8cc] ss:$16 sps:$4 sm:$0xff]   ;;  %v6169_v61 = vcombine.low %v436_v51, %v436_v51  ;;  %v7882_v51 = vld [vmem:[%s11835_s2 + $0xa48] ss:$16 sps:$4 sm:$0xff]  }
  0xe3   :  { %2700 = vmatpush1.bf16.msra.mxu0 %v7701_v62  ;;  %3126 = vmatpush1.bf16.msra.mxu1 %v7704_v63  ;;  %v7796_v62 = vld [vmem:[%s11835_s2 + $0x8c0] ss:$16 sps:$4 sm:$0xff]   ;;  %v7799_v63 = vld [vmem:[%s11835_s2 + $0x8c8] ss:$16 sps:$4 sm:$0xff]  }
  0xe4   :  { %2701 = vmatprep.subr.bf16.mxu0 %v7709_v0  ;;  %3127 = vmatprep.subr.bf16.mxu1 %v7712_v1  ;;  %v7804_v0 = vld [vmem:[%s11835_s2 + $0x8e4] ss:$16 sps:$4 sm:$0xff]   ;;  %v7807_v1 = vld [vmem:[%s11835_s2 + $0x8ec] ss:$16 sps:$4 sm:$0xff]  }
  0xe7   :  { %2702 = vmatpush1.bf16.msra.mxu0 %v7707_v2  ;;  %3128 = vmatpush1.bf16.msra.mxu1 %v7710_v3  ;;  %v7866_v2 = vld [vmem:[%s11836_s0 + $0x24] ss:$48 sps:$4 sm:$0xff]   ;;  %v7802_v3 = vld [vmem:[%s11835_s2 + $0x8e0] ss:$16 sps:$4 sm:$0xff]  }
  0xe8   :  { %2703 = vmatprep.subr.bf16.mxu0 %v7717_v4  ;;  %3129 = vmatprep.subr.bf16.mxu1 %v7720_v5  ;;  %v7805_v4 = vld [vmem:[%s11835_s2 + $0x8e8] ss:$16 sps:$4 sm:$0xff]   ;;  %v7810_v5 = vld [vmem:[%s11835_s2 + $0x904] ss:$16 sps:$4 sm:$0xff]  }
  0xeb   :  { %2704 = vmatpush1.bf16.msra.mxu0 %v7715_v6  ;;  %3130 = vmatpush1.bf16.msra.mxu1 %v7718_v7  ;;  %v7813_v6 = vld [vmem:[%s11835_s2 + $0x90c] ss:$16 sps:$4 sm:$0xff]   ;;  %v7808_v7 = vld [vmem:[%s11835_s2 + $0x900] ss:$16 sps:$4 sm:$0xff]  }
  0xec   :  { %2705 = vmatprep.subr.bf16.mxu0 %v7724_v8  ;;  %3131 = vmatprep.subr.bf16.mxu1 %v7727_v9  ;;  %v7811_v8 = vld [vmem:[%s11835_s2 + $0x908] ss:$16 sps:$4 sm:$0xff]   ;;  %v7816_v9 = vld [vmem:[%s11835_s2 + $0x924] ss:$16 sps:$4 sm:$0xff]  }
  0xef   :  { %2706 = vmatpush1.bf16.msra.mxu0 %v7722_v10  ;;  %3132 = vmatpush1.bf16.msra.mxu1 %v7725_v11  ;;  %v7819_v10 = vld [vmem:[%s11835_s2 + $0x92c] ss:$16 sps:$4 sm:$0xff]   ;;  %v7814_v11 = vld [vmem:[%s11835_s2 + $0x920] ss:$16 sps:$4 sm:$0xff]  }
  0xf0   :  { %2707 = vmatprep.subr.bf16.mxu0 %v7732_v12  ;;  %3133 = vmatprep.subr.bf16.mxu1 %v7735_v13  ;;  %v7817_v12 = vld [vmem:[%s11835_s2 + $0x928] ss:$16 sps:$4 sm:$0xff]   ;;  %v7824_v13 = vld [vmem:[%s11835_s2 + $0x944] ss:$16 sps:$4 sm:$0xff]  }
  0xf3   :  { %2708 = vmatpush1.bf16.msra.mxu0 %v7730_v14  ;;  %3134 = vmatpush1.bf16.msra.mxu1 %v7733_v15  ;;  %v7827_v14 = vld [vmem:[%s11835_s2 + $0x94c] ss:$16 sps:$4 sm:$0xff]   ;;  %v7822_v15 = vld [vmem:[%s11835_s2 + $0x940] ss:$16 sps:$4 sm:$0xff]  }
  0xf4   :  { %2709 = vmatprep.subr.bf16.mxu0 %v7739_v16  ;;  %3135 = vmatprep.subr.bf16.mxu1 %v7742_v17  ;;  %v7825_v16 = vld [vmem:[%s11835_s2 + $0x948] ss:$16 sps:$4 sm:$0xff]   ;;  %v7831_v17 = vld [vmem:[%s11835_s2 + $0x964] ss:$16 sps:$4 sm:$0xff]  }
  0xf7   :  { %2710 = vmatpush1.bf16.msra.mxu0 %v7737_v18  ;;  %3136 = vmatpush1.bf16.msra.mxu1 %v7740_v19  ;;  %v7834_v18 = vld [vmem:[%s11835_s2 + $0x96c] ss:$16 sps:$4 sm:$0xff]   ;;  %v7829_v19 = vld [vmem:[%s11835_s2 + $0x960] ss:$16 sps:$4 sm:$0xff]  }
  0xf8   :  { %2711 = vmatprep.subr.bf16.mxu0 %v7746_v20  ;;  %3137 = vmatprep.subr.bf16.mxu1 %v7749_v21  ;;  %v7832_v20 = vld [vmem:[%s11835_s2 + $0x968] ss:$16 sps:$4 sm:$0xff]   ;;  %v7839_v21 = vld [vmem:[%s11835_s2 + $0x984] ss:$16 sps:$4 sm:$0xff]  }
  0xfb   :  { %2712 = vmatpush1.bf16.msra.mxu0 %v7744_v22  ;;  %3138 = vmatpush1.bf16.msra.mxu1 %v7747_v23  ;;  %v7842_v22 = vld [vmem:[%s11835_s2 + $0x98c] ss:$16 sps:$4 sm:$0xff]   ;;  %v7837_v23 = vld [vmem:[%s11835_s2 + $0x980] ss:$16 sps:$4 sm:$0xff]  }
  0xfc   :  { %2713 = vmatprep.subr.bf16.mxu0 %v7753_v24  ;;  %3139 = vmatprep.subr.bf16.mxu1 %v7756_v25  ;;  %v7840_v24 = vld [vmem:[%s11835_s2 + $0x988] ss:$16 sps:$4 sm:$0xff]   ;;  %v7846_v25 = vld [vmem:[%s11835_s2 + $0x9a4] ss:$16 sps:$4 sm:$0xff]  }
  0xff   :  { %2714 = vmatpush1.bf16.msra.mxu0 %v7751_v26  ;;  %3140 = vmatpush1.bf16.msra.mxu1 %v7754_v27  ;;  %v7849_v26 = vld [vmem:[%s11835_s2 + $0x9ac] ss:$16 sps:$4 sm:$0xff]   ;;  %v7844_v27 = vld [vmem:[%s11835_s2 + $0x9a0] ss:$16 sps:$4 sm:$0xff]  }
 0x100   :  { %2754 = vmatprep.subr.bf16.mxu0 %v7762_v28  ;;  %3180 = vmatprep.subr.bf16.mxu1 %v7765_v29  ;;  %v7847_v28 = vld [vmem:[%s11835_s2 + $0x9a8] ss:$16 sps:$4 sm:$0xff]   ;;  %v7853_v29 = vld [vmem:[%s11835_s2 + $0x9c4] ss:$16 sps:$4 sm:$0xff]  }
 0x102   :  { %2716 = vmatmul.mubr.bf16.vlgmr.msra.gmra.mrb[0].mxu0 %v7757_v30  ;;  %3142 = vmatmul.mubr.bf16.vlgmr.msra.gmra.mrb[0].mxu1 %v7757_v30  ;;  %v7856_v30 = vld [vmem:[%s11835_s2 + $0x9cc] ss:$16 sps:$4 sm:$0xff]  }
 0x103   :  { %2755 = vmatpush1.bf16.msra.mxu0 %v7760_v31  ;;  %3181 = vmatpush1.bf16.msra.mxu1 %v7763_v32  ;;  %v7851_v31 = vld [vmem:[%s11835_s2 + $0x9c0] ss:$16 sps:$4 sm:$0xff]   ;;  %v7854_v32 = vld [vmem:[%s11835_s2 + $0x9c8] ss:$16 sps:$4 sm:$0xff]  }
 0x104   :  { %2756 = vmatprep.subr.bf16.mxu0 %v7768_v33  ;;  %3182 = vmatprep.subr.bf16.mxu1 %v7771_v34  ;;  %v7860_v33 = vld [vmem:[%s11835_s2 + $0x9e4] ss:$16 sps:$4 sm:$0xff]   ;;  %v7863_v34 = vld [vmem:[%s11835_s2 + $0x9ec] ss:$16 sps:$4 sm:$0xff]  }
 0x105   :  { %2725 = vmatprep.mubr.bf16.mxu0 %v7820_v35  ;;  %3151 = vmatprep.mubr.bf16.mxu1 %v7820_v35  ;;  %v7858_v35 = vld [vmem:[%s11835_s2 + $0x9e0] ss:$16 sps:$4 sm:$0xff]  }
 0x107   :  { %2757 = vmatpush1.bf16.msra.mxu0 %v7766_v36  ;;  %3183 = vmatpush1.bf16.msra.mxu1 %v7769_v37  ;;  %v7861_v36 = vld [vmem:[%s11835_s2 + $0x9e8] ss:$16 sps:$4 sm:$0xff]   ;;  %v7869_v37 = vld [vmem:[%s11835_s2 + $0xa04] ss:$16 sps:$4 sm:$0xff]  }
 0x108   :  { %2758 = vmatprep.subr.bf16.mxu0 %v7774_v38  ;;  %3184 = vmatprep.subr.bf16.mxu1 %v7777_v39  ;;  %v7872_v38 = vld [vmem:[%s11835_s2 + $0xa0c] ss:$16 sps:$4 sm:$0xff]   ;;  %v7864_v39 = vld [vmem:[%s11836_s0 + $0x20] ss:$48 sps:$4 sm:$0xff]  }
 0x10a   :  { %2726 = vmatmul.mubr.bf16.gmra.mrb[4].mxu0 %v7828_v41  ;;  %3152 = vmatmul.mubr.bf16.gmra.mrb[4].mxu1 %v7828_v41  ;;  %v7870_v41 = vld [vmem:[%s11835_s2 + $0xa08] ss:$16 sps:$4 sm:$0xff]  }
 0x10b   :  { %2759 = vmatpush1.bf16.msra.mxu0 %v7772_v40  ;;  %3185 = vmatpush1.bf16.msra.mxu1 %v7775_v42  ;;  %v7867_v40 = vld [vmem:[%s11835_s2 + $0xa00] ss:$16 sps:$4 sm:$0xff]   ;;  %v7875_v42 = vld [vmem:[%s11835_s2 + $0xa24] ss:$16 sps:$4 sm:$0xff]  }
 0x10c   :  { %2760 = vmatprep.subr.bf16.mxu0 %v7780_v43  ;;  %3186 = vmatprep.subr.bf16.mxu1 %v7783_v44  ;;  %v7878_v43 = vld [vmem:[%s11835_s2 + $0xa2c] ss:$16 sps:$4 sm:$0xff]   ;;  %v7891_v44 = vld [vmem:[%s11836_s0 + $0x84] ss:$48 sps:$4 sm:$0xff]  }
 0x10d   :  { %2735 = vmatprep.mubr.bf16.mxu0 %v7835_v45  ;;  %3161 = vmatprep.mubr.bf16.mxu1 %v7835_v45  ;;  %v7873_v45 = vld [vmem:[%s11835_s2 + $0xa20] ss:$16 sps:$4 sm:$0xff]  }
 0x10f   :  { %2761 = vmatpush1.bf16.msra.mxu0 %v7778_v46  ;;  %3187 = vmatpush1.bf16.msra.mxu1 %v7781_v47  ;;  %v7876_v46 = vld [vmem:[%s11835_s2 + $0xa28] ss:$16 sps:$4 sm:$0xff]   ;;  %v7881_v47 = vld [vmem:[%s11835_s2 + $0xa44] ss:$16 sps:$4 sm:$0xff]  }
 0x110   :  { %2762 = vmatprep.subr.bf16.mxu0 %v7786_v48  ;;  %3188 = vmatprep.subr.bf16.mxu1 %v7789_v49  ;;  %v7884_v48 = vld [vmem:[%s11835_s2 + $0xa4c] ss:$16 sps:$4 sm:$0xff]   ;;  %v7893_v49 = vld [vmem:[%s11836_s0 + $0x80] ss:$48 sps:$4 sm:$0xff]  }
 0x112   :  { %2736 = vmatmul.mubr.bf16.gmra.mrb[8].mxu0 %v7843_v50  ;;  %3162 = vmatmul.mubr.bf16.gmra.mrb[8].mxu1 %v7843_v50  ;;  %v7879_v50 = vld [vmem:[%s11835_s2 + $0xa40] ss:$16 sps:$4 sm:$0xff]  }
 0x113   :  { %2763 = vmatpush1.bf16.msra.mxu0 %v7784_v52  ;;  %3189 = vmatpush1.bf16.msra.mxu1 %v7787_v53  ;;  %v7887_v52 = vld [vmem:[%s11835_s2 + $0xa64] ss:$16 sps:$4 sm:$0xff]   ;;  %v7890_v53 = vld [vmem:[%s11835_s2 + $0xa6c] ss:$16 sps:$4 sm:$0xff]  }
 0x114   :  { %2764 = vmatprep.subr.bf16.mxu0 %v7792_v54  ;;  %3190 = vmatprep.subr.bf16.mxu1 %v7795_v55  ;;  %v7906_v54 = vld [vmem:[%s11836_s0 + $0xe4] ss:$48 sps:$4 sm:$0xff]   ;;  %v7885_v55 = vld [vmem:[%s11835_s2 + $0xa60] ss:$16 sps:$4 sm:$0xff]  }
 0x115   :  { %2745 = vmatprep.mubr.bf16.mxu0 %v6170_v56  ;;  %3171 = vmatprep.mubr.bf16.mxu1 %v6170_v56  ;;  %v7888_v56 = vld [vmem:[%s11835_s2 + $0xa68] ss:$16 sps:$4 sm:$0xff]  }
 0x117   :  { %2765 = vmatpush1.bf16.msra.mxu0 %v7790_v57  ;;  %3191 = vmatpush1.bf16.msra.mxu1 %v7793_v58  ;;  %v7896_v57 = vld [vmem:[%s11835_s2 + $0xa84] ss:$16 sps:$4 sm:$0xff]   ;;  %v7899_v58 = vld [vmem:[%s11835_s2 + $0xa8c] ss:$16 sps:$4 sm:$0xff]  }
 0x118   :  { %2766 = vmatprep.subr.bf16.mxu0 %v7798_v59  ;;  %3192 = vmatprep.subr.bf16.mxu1 %v7801_v60  ;;  %v7908_v59 = vld [vmem:[%s11836_s0 + $0xe0] ss:$48 sps:$4 sm:$0xff]  }
 0x119   :  { %v437_v60 = vld [vmem:[%s11836_s0 + $0x140] sm:$0xff] }
 0x11a   :  { %2746 = vmatmul.mubr.bf16.gmra.mrb[12].mxu0 %v6169_v61  ;;  %3172 = vmatmul.mubr.bf16.gmra.mrb[12].mxu1 %v6169_v61  ;;  %v7894_v61 = vld [vmem:[%s11835_s2 + $0xa80] ss:$16 sps:$4 sm:$0xff]  }
 0x11b   :  { %2767 = vmatpush1.bf16.msra.mxu0 %v7796_v62  ;;  %3193 = vmatpush1.bf16.msra.mxu1 %v7799_v63  ;;  %v7897_v62 = vld [vmem:[%s11835_s2 + $0xa88] ss:$16 sps:$4 sm:$0xff]   ;;  %v7902_v63 = vld [vmem:[%s11835_s2 + $0xaa4] ss:$16 sps:$4 sm:$0xff]  }
 0x11c   :  { %2768 = vmatprep.subr.bf16.mxu0 %v7804_v0  ;;  %3194 = vmatprep.subr.bf16.mxu1 %v7807_v1  ;;  %v7905_v0 = vld [vmem:[%s11835_s2 + $0xaac] ss:$16 sps:$4 sm:$0xff]   ;;  %v6172_v1 = vcombine.high %v437_v60, %v437_v60 }
 0x11d   :  { %2786 = vmatprep.mubr.bf16.mxu0 %v7866_v2  ;;  %3212 = vmatprep.mubr.bf16.mxu1 %v7866_v2  ;;  %v7900_v2 = vld [vmem:[%s11835_s2 + $0xaa0] ss:$16 sps:$4 sm:$0xff]  }
 0x11f   :  { %2769 = vmatpush1.bf16.msra.mxu0 %v7802_v3  ;;  %3195 = vmatpush1.bf16.msra.mxu1 %v7805_v4  ;;  %v7903_v3 = vld [vmem:[%s11835_s2 + $0xaa8] ss:$16 sps:$4 sm:$0xff]   ;;  %v7911_v4 = vld [vmem:[%s11835_s2 + $0xac4] ss:$16 sps:$4 sm:$0xff]  }
 0x120   :  { %2770 = vmatprep.subr.bf16.mxu0 %v7810_v5  ;;  %3196 = vmatprep.subr.bf16.mxu1 %v7813_v6  ;;  %v7914_v5 = vld [vmem:[%s11835_s2 + $0xacc] ss:$16 sps:$4 sm:$0xff]   ;;  %v6171_v6 = vcombine.low %v437_v60, %v437_v60 }
 0x121   :  { %v8149_v60 = vld [vmem:[%s11835_s2 + $0xec] ss:$16 sps:$4 sm:$0xff]  }
 0x123   :  { %2771 = vmatpush1.bf16.msra.mxu0 %v7808_v7  ;;  %3197 = vmatpush1.bf16.msra.mxu1 %v7811_v8  ;;  %v7909_v7 = vld [vmem:[%s11835_s2 + $0xac0] ss:$16 sps:$4 sm:$0xff]   ;;  %v7912_v8 = vld [vmem:[%s11835_s2 + $0xac8] ss:$16 sps:$4 sm:$0xff]  }
 0x124   :  { %2772 = vmatprep.subr.bf16.mxu0 %v7816_v9  ;;  %3198 = vmatprep.subr.bf16.mxu1 %v7819_v10  ;;  %v7917_v9 = vld [vmem:[%s11835_s2 + $0xae4] ss:$16 sps:$4 sm:$0xff]   ;;  %v7920_v10 = vld [vmem:[%s11835_s2 + $0xaec] ss:$16 sps:$4 sm:$0xff]  }
 0x127   :  { %2773 = vmatpush1.bf16.msra.mxu0 %v7814_v11  ;;  %3199 = vmatpush1.bf16.msra.mxu1 %v7817_v12  ;;  %v7937_v11 = vld [vmem:[%s11836_s0 + $0x2c] ss:$48 sps:$4 sm:$0xff]   ;;  %v7915_v12 = vld [vmem:[%s11835_s2 + $0xae0] ss:$16 sps:$4 sm:$0xff]  }
 0x128   :  { %2774 = vmatprep.subr.bf16.mxu0 %v7824_v13  ;;  %3200 = vmatprep.subr.bf16.mxu1 %v7827_v14  ;;  %v7918_v13 = vld [vmem:[%s11835_s2 + $0xae8] ss:$16 sps:$4 sm:$0xff]   ;;  %v7925_v14 = vld [vmem:[%s11835_s2 + $0xb04] ss:$16 sps:$4 sm:$0xff]  }
 0x12b   :  { %2775 = vmatpush1.bf16.msra.mxu0 %v7822_v15  ;;  %3201 = vmatpush1.bf16.msra.mxu1 %v7825_v16  ;;  %v7928_v15 = vld [vmem:[%s11835_s2 + $0xb0c] ss:$16 sps:$4 sm:$0xff]   ;;  %v7923_v16 = vld [vmem:[%s11835_s2 + $0xb00] ss:$16 sps:$4 sm:$0xff]  }
 0x12c   :  { %2776 = vmatprep.subr.bf16.mxu0 %v7831_v17  ;;  %3202 = vmatprep.subr.bf16.mxu1 %v7834_v18  ;;  %v7926_v17 = vld [vmem:[%s11835_s2 + $0xb08] ss:$16 sps:$4 sm:$0xff]   ;;  %v7931_v18 = vld [vmem:[%s11835_s2 + $0xb24] ss:$16 sps:$4 sm:$0xff]  }
 0x12f   :  { %2777 = vmatpush1.bf16.msra.mxu0 %v7829_v19  ;;  %3203 = vmatpush1.bf16.msra.mxu1 %v7832_v20  ;;  %v7934_v19 = vld [vmem:[%s11835_s2 + $0xb2c] ss:$16 sps:$4 sm:$0xff]   ;;  %v7929_v20 = vld [vmem:[%s11835_s2 + $0xb20] ss:$16 sps:$4 sm:$0xff]  }
 0x130   :  { %2778 = vmatprep.subr.bf16.mxu0 %v7839_v21  ;;  %3204 = vmatprep.subr.bf16.mxu1 %v7842_v22  ;;  %v7932_v21 = vld [vmem:[%s11835_s2 + $0xb28] ss:$16 sps:$4 sm:$0xff]  }
 0x131   :  { %v7935_v22 = vld [vmem:[%s11836_s0 + $0x28] ss:$48 sps:$4 sm:$0xff]  }
 0x133   :  { %2779 = vmatpush1.bf16.msra.mxu0 %v7837_v23  ;;  %3205 = vmatpush1.bf16.msra.mxu1 %v7840_v24  ;;  %v8120_v23 = vld [vmem:[%s11835_s2 + $0x4] ss:$16 sps:$4 sm:$0xff]   ;;  %v8121_v24 = vld [vmem:[%s11835_s2 + $0xc] ss:$16 sps:$4 sm:$0xff]  }
 0x134   :  { %2780 = vmatprep.subr.bf16.mxu0 %v7846_v25  ;;  %3206 = vmatprep.subr.bf16.mxu1 %v7849_v26  ;;  %v7938_v25 = vld [vmem:[%s11836_s0 + $0x8c] ss:$48 sps:$4 sm:$0xff]   ;;  %v8122_v26 = vld [vmem:[%s11835_s2] ss:$16 sps:$4 sm:$0xff]  }
 0x137   :  { %2781 = vmatpush1.bf16.msra.mxu0 %v7844_v27  ;;  %3207 = vmatpush1.bf16.msra.mxu1 %v7847_v28  ;;  %v8123_v27 = vld [vmem:[%s11835_s2 + $0x8] ss:$16 sps:$4 sm:$0xff]   ;;  %v8124_v28 = vld [vmem:[%s11835_s2 + $0x24] ss:$16 sps:$4 sm:$0xff]  }
 0x138   :  { %2782 = vmatprep.subr.bf16.mxu0 %v7853_v29  ;;  %3208 = vmatprep.subr.bf16.mxu1 %v7856_v30  ;;  %v8125_v29 = vld [vmem:[%s11835_s2 + $0x2c] ss:$16 sps:$4 sm:$0xff]   ;;  %v7940_v30 = vld [vmem:[%s11836_s0 + $0x88] ss:$48 sps:$4 sm:$0xff]  }
 0x13b   :  { %2783 = vmatpush1.bf16.msra.mxu0 %v7851_v31  ;;  %3209 = vmatpush1.bf16.msra.mxu1 %v7854_v32  ;;  %v8126_v31 = vld [vmem:[%s11835_s2 + $0x20] ss:$16 sps:$4 sm:$0xff]   ;;  %v8127_v32 = vld [vmem:[%s11835_s2 + $0x28] ss:$16 sps:$4 sm:$0xff]  }
 0x13c   :  { %2784 = vmatprep.subr.bf16.mxu0 %v7860_v33  ;;  %3210 = vmatprep.subr.bf16.mxu1 %v7863_v34  ;;  %v8128_v33 = vld [vmem:[%s11835_s2 + $0x44] ss:$16 sps:$4 sm:$0xff]   ;;  %v8129_v34 = vld [vmem:[%s11835_s2 + $0x4c] ss:$16 sps:$4 sm:$0xff]  }
 0x13f   :  { %2785 = vmatpush1.bf16.msra.mxu0 %v7858_v35  ;;  %3211 = vmatpush1.bf16.msra.mxu1 %v7861_v36  ;;  %v7941_v35 = vld [vmem:[%s11836_s0 + $0xec] ss:$48 sps:$4 sm:$0xff]   ;;  %v8130_v36 = vld [vmem:[%s11835_s2 + $0x40] ss:$16 sps:$4 sm:$0xff]  }
 0x140   :  { %2825 = vmatprep.subr.bf16.mxu0 %v7869_v37  ;;  %3251 = vmatprep.subr.bf16.mxu1 %v7872_v38  ;;  %v8131_v37 = vld [vmem:[%s11835_s2 + $0x48] ss:$16 sps:$4 sm:$0xff]   ;;  %v8132_v38 = vld [vmem:[%s11835_s2 + $0x64] ss:$16 sps:$4 sm:$0xff]  }
 0x142   :  { %2787 = vmatmul.mubr.bf16.vlgmr.msra.gmra.mrb[0].mxu0 %v7864_v39  ;;  %3213 = vmatmul.mubr.bf16.vlgmr.msra.gmra.mrb[0].mxu1 %v7864_v39  ;;  %v8133_v39 = vld [vmem:[%s11835_s2 + $0x6c] ss:$16 sps:$4 sm:$0xff]  }
 0x143   :  { %2826 = vmatpush1.bf16.msra.mxu0 %v7867_v40  ;;  %3252 = vmatpush1.bf16.msra.mxu1 %v7870_v41  ;;  %v7943_v40 = vld [vmem:[%s11836_s0 + $0xe8] ss:$48 sps:$4 sm:$0xff]  }
 0x144   :  { %2827 = vmatprep.subr.bf16.mxu0 %v7875_v42  ;;  %3253 = vmatprep.subr.bf16.mxu1 %v7878_v43  ;;  %v438_v41 = vld [vmem:[%s11836_s0 + $0x148] sm:$0xff]  ;;  %v8134_v42 = vld [vmem:[%s11835_s2 + $0x60] ss:$16 sps:$4 sm:$0xff]  }
 0x145   :  { %2796 = vmatprep.mubr.bf16.mxu0 %v7891_v44  ;;  %3222 = vmatprep.mubr.bf16.mxu1 %v7891_v44  ;;  %v8135_v43 = vld [vmem:[%s11835_s2 + $0x68] ss:$16 sps:$4 sm:$0xff]   ;;  %v8136_v44 = vld [vmem:[%s11835_s2 + $0x84] ss:$16 sps:$4 sm:$0xff]  }
 0x147   :  { %2828 = vmatpush1.bf16.msra.mxu0 %v7873_v45  ;;  %3254 = vmatpush1.bf16.msra.mxu1 %v7876_v46  ;;  %v8137_v45 = vld [vmem:[%s11835_s2 + $0x8c] ss:$16 sps:$4 sm:$0xff]   ;;  %v6174_v46 = vcombine.high %v438_v41, %v438_v41 }
 0x148   :  { %2829 = vmatprep.subr.bf16.mxu0 %v7881_v47  ;;  %3255 = vmatprep.subr.bf16.mxu1 %v7884_v48  ;;  %v8138_v47 = vld [vmem:[%s11835_s2 + $0x80] ss:$16 sps:$4 sm:$0xff]   ;;  %v8139_v48 = vld [vmem:[%s11835_s2 + $0x88] ss:$16 sps:$4 sm:$0xff]  }
 0x14a   :  { %2797 = vmatmul.mubr.bf16.gmra.mrb[4].mxu0 %v7893_v49  ;;  %3223 = vmatmul.mubr.bf16.gmra.mrb[4].mxu1 %v7893_v49  ;;  %v8140_v49 = vld [vmem:[%s11835_s2 + $0xa4] ss:$16 sps:$4 sm:$0xff]  }
 0x14b   :  { %2830 = vmatpush1.bf16.msra.mxu0 %v7879_v50  ;;  %3256 = vmatpush1.bf16.msra.mxu1 %v7882_v51  ;;  %v8141_v50 = vld [vmem:[%s11835_s2 + $0xac] ss:$16 sps:$4 sm:$0xff]   ;;  %v6173_v51 = vcombine.low %v438_v41, %v438_v41  ;;  %v8191_v41 = vld [vmem:[%s11835_s2 + $0x228] ss:$16 sps:$4 sm:$0xff]  }
 0x14c   :  { %2831 = vmatprep.subr.bf16.mxu0 %v7887_v52  ;;  %3257 = vmatprep.subr.bf16.mxu1 %v7890_v53  ;;  %v8142_v52 = vld [vmem:[%s11835_s2 + $0xa0] ss:$16 sps:$4 sm:$0xff]   ;;  %v8143_v53 = vld [vmem:[%s11835_s2 + $0xa8] ss:$16 sps:$4 sm:$0xff]  }
 0x14d   :  { %2806 = vmatprep.mubr.bf16.mxu0 %v7906_v54  ;;  %3232 = vmatprep.mubr.bf16.mxu1 %v7906_v54  ;;  %v8144_v54 = vld [vmem:[%s11835_s2 + $0xc4] ss:$16 sps:$4 sm:$0xff]  }
 0x14f   :  { %2832 = vmatpush1.bf16.msra.mxu0 %v7885_v55  ;;  %3258 = vmatpush1.bf16.msra.mxu1 %v7888_v56  ;;  %v8145_v55 = vld [vmem:[%s11835_s2 + $0xcc] ss:$16 sps:$4 sm:$0xff]   ;;  %v7948_v56 = vld [vmem:[%s11837_s1 + $0x4] ss:$48 sps:$4 sm:$0xff]  }
 0x150   :  { %2833 = vmatprep.subr.bf16.mxu0 %v7896_v57  ;;  %3259 = vmatprep.subr.bf16.mxu1 %v7899_v58  ;;  %v8146_v57 = vld [vmem:[%s11835_s2 + $0xc0] ss:$16 sps:$4 sm:$0xff]   ;;  %v8147_v58 = vld [vmem:[%s11835_s2 + $0xc8] ss:$16 sps:$4 sm:$0xff]  }
 0x152   :  { %2807 = vmatmul.mubr.bf16.gmra.mrb[8].mxu0 %v7908_v59  ;;  %3233 = vmatmul.mubr.bf16.gmra.mrb[8].mxu1 %v7908_v59  ;;  %v8148_v59 = vld [vmem:[%s11835_s2 + $0xe4] ss:$16 sps:$4 sm:$0xff]  }
 0x153   :  { %2834 = vmatpush1.bf16.msra.mxu0 %v7894_v61  ;;  %3260 = vmatpush1.bf16.msra.mxu1 %v7897_v62  ;;  %v8150_v61 = vld [vmem:[%s11835_s2 + $0xe0] ss:$16 sps:$4 sm:$0xff]   ;;  %v8151_v62 = vld [vmem:[%s11835_s2 + $0xe8] ss:$16 sps:$4 sm:$0xff]  }
 0x154   :  { %2835 = vmatprep.subr.bf16.mxu0 %v7902_v63  ;;  %3261 = vmatprep.subr.bf16.mxu1 %v7905_v0  ;;  %v8152_v63 = vld [vmem:[%s11835_s2 + $0x104] ss:$16 sps:$4 sm:$0xff]   ;;  %v8153_v0 = vld [vmem:[%s11835_s2 + $0x10c] ss:$16 sps:$4 sm:$0xff]  }
 0x155   :  { %2816 = vmatprep.mubr.bf16.mxu0 %v6172_v1  ;;  %3242 = vmatprep.mubr.bf16.mxu1 %v6172_v1  ;;  %v8154_v1 = vld [vmem:[%s11835_s2 + $0x100] ss:$16 sps:$4 sm:$0xff]  }
 0x157   :  { %2836 = vmatpush1.bf16.msra.mxu0 %v7900_v2  ;;  %3262 = vmatpush1.bf16.msra.mxu1 %v7903_v3  ;;  %v8155_v2 = vld [vmem:[%s11835_s2 + $0x108] ss:$16 sps:$4 sm:$0xff]   ;;  %v8156_v3 = vld [vmem:[%s11835_s2 + $0x124] ss:$16 sps:$4 sm:$0xff]  }
 0x158   :  { %2837 = vmatprep.subr.bf16.mxu0 %v7911_v4  ;;  %3263 = vmatprep.subr.bf16.mxu1 %v7914_v5  ;;  %v8157_v4 = vld [vmem:[%s11835_s2 + $0x12c] ss:$16 sps:$4 sm:$0xff]   ;;  %v8158_v5 = vld [vmem:[%s11835_s2 + $0x120] ss:$16 sps:$4 sm:$0xff]  }
 0x15a   :  { %2817 = vmatmul.mubr.bf16.gmra.mrb[12].mxu0 %v6171_v6  ;;  %3243 = vmatmul.mubr.bf16.gmra.mrb[12].mxu1 %v6171_v6  ;;  %v8159_v6 = vld [vmem:[%s11835_s2 + $0x128] ss:$16 sps:$4 sm:$0xff]  }
 0x15b   :  { %2838 = vmatpush1.bf16.msra.mxu0 %v7909_v7  ;;  %3264 = vmatpush1.bf16.msra.mxu1 %v7912_v8  ;;  %v8160_v7 = vld [vmem:[%s11835_s2 + $0x144] ss:$16 sps:$4 sm:$0xff]   ;;  %v8161_v8 = vld [vmem:[%s11835_s2 + $0x14c] ss:$16 sps:$4 sm:$0xff]  }
 0x15c   :  { %2839 = vmatprep.subr.bf16.mxu0 %v7917_v9  ;;  %3265 = vmatprep.subr.bf16.mxu1 %v7920_v10  ;;  %v8162_v9 = vld [vmem:[%s11835_s2 + $0x140] ss:$16 sps:$4 sm:$0xff]   ;;  %v8163_v10 = vld [vmem:[%s11835_s2 + $0x148] ss:$16 sps:$4 sm:$0xff]  }
 0x15d   :  { %6535 = vmatprep.mubr.msk.bf16.mxu0 %vm2457_vm0, %v7937_v11  ;;  %6539 = vmatprep.mubr.msk.bf16.mxu1 %vm2457_vm0, %v7937_v11  ;;  %v8164_v11 = vld [vmem:[%s11835_s2 + $0x164] ss:$16 sps:$4 sm:$0xff]  }
 0x15f   :  { %2840 = vmatpush1.bf16.msra.mxu0 %v7915_v12  ;;  %3266 = vmatpush1.bf16.msra.mxu1 %v7918_v13  ;;  %v8165_v12 = vld [vmem:[%s11835_s2 + $0x16c] ss:$16 sps:$4 sm:$0xff]   ;;  %v8166_v13 = vld [vmem:[%s11835_s2 + $0x160] ss:$16 sps:$4 sm:$0xff]  }
 0x160   :  { %2841 = vmatprep.subr.bf16.mxu0 %v7925_v14  ;;  %3267 = vmatprep.subr.bf16.mxu1 %v7928_v15  ;;  %v8167_v14 = vld [vmem:[%s11835_s2 + $0x168] ss:$16 sps:$4 sm:$0xff]   ;;  %v8168_v15 = vld [vmem:[%s11835_s2 + $0x184] ss:$16 sps:$4 sm:$0xff]  }
 0x163   :  { %2842 = vmatpush1.bf16.msra.mxu0 %v7923_v16  ;;  %3268 = vmatpush1.bf16.msra.mxu1 %v7926_v17  ;;  %v8169_v16 = vld [vmem:[%s11835_s2 + $0x18c] ss:$16 sps:$4 sm:$0xff]   ;;  %v8170_v17 = vld [vmem:[%s11835_s2 + $0x180] ss:$16 sps:$4 sm:$0xff]  }
 0x164   :  { %2843 = vmatprep.subr.bf16.mxu0 %v7931_v18  ;;  %3269 = vmatprep.subr.bf16.mxu1 %v7934_v19  ;;  %v8171_v18 = vld [vmem:[%s11835_s2 + $0x188] ss:$16 sps:$4 sm:$0xff]   ;;  %v8172_v19 = vld [vmem:[%s11835_s2 + $0x1a4] ss:$16 sps:$4 sm:$0xff]  }
 0x167   :  { %2844 = vmatpush1.bf16.msra.mxu0 %v7929_v20  ;;  %3270 = vmatpush1.bf16.msra.mxu1 %v7932_v21  ;;  %v8173_v20 = vld [vmem:[%s11835_s2 + $0x1ac] ss:$16 sps:$4 sm:$0xff]   ;;  %v8174_v21 = vld [vmem:[%s11835_s2 + $0x1a0] ss:$16 sps:$4 sm:$0xff]  }
 0x168   :  { %3825 = vmatprep.subr.bf16.mxu0 %v8120_v23  ;;  %4251 = vmatprep.subr.bf16.mxu1 %v8121_v24  ;;  %v8176_v23 = vld [vmem:[%s11835_s2 + $0x1c4] ss:$16 sps:$4 sm:$0xff]   ;;  %v8177_v24 = vld [vmem:[%s11835_s2 + $0x1cc] ss:$16 sps:$4 sm:$0xff]  }
 0x16a   :  { %2858 = vmatmul.mubr.bf16.vlgmr.msra.gmra.mrb[0].mxu0 %v7935_v22  ;;  %3284 = vmatmul.mubr.bf16.vlgmr.msra.gmra.mrb[0].mxu1 %v7935_v22  ;;  %v8175_v22 = vld [vmem:[%s11835_s2 + $0x1a8] ss:$16 sps:$4 sm:$0xff]  }
 0x16b   :  { %3826 = vmatpush1.bf16.msra.mxu0 %v8122_v26  ;;  %4252 = vmatpush1.bf16.msra.mxu1 %v8123_v27  ;;  %v8179_v26 = vld [vmem:[%s11835_s2 + $0x1c8] ss:$16 sps:$4 sm:$0xff]   ;;  %v8180_v27 = vld [vmem:[%s11835_s2 + $0x1e4] ss:$16 sps:$4 sm:$0xff]  }
 0x16c   :  { %3827 = vmatprep.subr.bf16.mxu0 %v8124_v28  ;;  %4253 = vmatprep.subr.bf16.mxu1 %v8125_v29  ;;  %v8181_v28 = vld [vmem:[%s11835_s2 + $0x1ec] ss:$16 sps:$4 sm:$0xff]   ;;  %v7946_v29 = vld [vmem:[%s11837_s1] ss:$48 sps:$4 sm:$0xff]  }
 0x16d   :  { %6536 = vmatprep.mubr.msk.bf16.mxu0 %vm2457_vm0, %v7938_v25  ;;  %6540 = vmatprep.mubr.msk.bf16.mxu1 %vm2457_vm0, %v7938_v25  ;;  %v8178_v25 = vld [vmem:[%s11835_s2 + $0x1c0] ss:$16 sps:$4 sm:$0xff]  }
 0x16f   :  { %3828 = vmatpush1.bf16.msra.mxu0 %v8126_v31  ;;  %4254 = vmatpush1.bf16.msra.mxu1 %v8127_v32  ;;  %v8183_v31 = vld [vmem:[%s11835_s2 + $0x1e8] ss:$16 sps:$4 sm:$0xff]   ;;  %v8184_v32 = vld [vmem:[%s11835_s2 + $0x204] ss:$16 sps:$4 sm:$0xff]  }
 0x170   :  { %3829 = vmatprep.subr.bf16.mxu0 %v8128_v33  ;;  %4255 = vmatprep.subr.bf16.mxu1 %v8129_v34  ;;  %v8185_v33 = vld [vmem:[%s11835_s2 + $0x20c] ss:$16 sps:$4 sm:$0xff]   ;;  %v7949_v34 = vld [vmem:[%s11837_s1 + $0x64] ss:$48 sps:$4 sm:$0xff]  }
 0x172   :  { %2868 = vmatmul.mubr.bf16.gmra.mrb[4].mxu0 %v7940_v30  ;;  %3294 = vmatmul.mubr.bf16.gmra.mrb[4].mxu1 %v7940_v30  ;;  %v8182_v30 = vld [vmem:[%s11835_s2 + $0x1e0] ss:$16 sps:$4 sm:$0xff]  }
 0x173   :  { %3830 = vmatpush1.bf16.msra.mxu0 %v8130_v36  ;;  %4256 = vmatpush1.bf16.msra.mxu1 %v8131_v37  ;;  %v8187_v36 = vld [vmem:[%s11835_s2 + $0x208] ss:$16 sps:$4 sm:$0xff]   ;;  %v8188_v37 = vld [vmem:[%s11835_s2 + $0x224] ss:$16 sps:$4 sm:$0xff]  }
 0x174   :  { %3831 = vmatprep.subr.bf16.mxu0 %v8132_v38  ;;  %4257 = vmatprep.subr.bf16.mxu1 %v8133_v39  ;;  %v8189_v38 = vld [vmem:[%s11835_s2 + $0x22c] ss:$16 sps:$4 sm:$0xff]   ;;  %v7951_v39 = vld [vmem:[%s11837_s1 + $0x60] ss:$48 sps:$4 sm:$0xff]  }
 0x175   :  { %6537 = vmatprep.mubr.msk.bf16.mxu0 %vm2457_vm0, %v7941_v35  ;;  %6541 = vmatprep.mubr.msk.bf16.mxu1 %vm2457_vm0, %v7941_v35  ;;  %v8186_v35 = vld [vmem:[%s11835_s2 + $0x200] ss:$16 sps:$4 sm:$0xff]  }
 0x177   :  { %3832 = vmatpush1.bf16.msra.mxu0 %v8134_v42  ;;  %4258 = vmatpush1.bf16.msra.mxu1 %v8135_v43  ;;  %v8192_v42 = vld [vmem:[%s11835_s2 + $0x244] ss:$16 sps:$4 sm:$0xff]   ;;  %v8193_v43 = vld [vmem:[%s11835_s2 + $0x24c] ss:$16 sps:$4 sm:$0xff]  }
 0x178   :  { %3833 = vmatprep.subr.bf16.mxu0 %v8136_v44  ;;  %4259 = vmatprep.subr.bf16.mxu1 %v8137_v45  ;;  %v7952_v44 = vld [vmem:[%s11837_s1 + $0xc4] ss:$48 sps:$4 sm:$0xff]   ;;  %v8194_v45 = vld [vmem:[%s11835_s2 + $0x240] ss:$16 sps:$4 sm:$0xff]  }
 0x17a   :  { %2878 = vmatmul.mubr.bf16.gmra.mrb[8].mxu0 %v7943_v40  ;;  %3304 = vmatmul.mubr.bf16.gmra.mrb[8].mxu1 %v7943_v40  ;;  %v8190_v40 = vld [vmem:[%s11835_s2 + $0x220] ss:$16 sps:$4 sm:$0xff]  }
 0x17b   :  { %3834 = vmatpush1.bf16.msra.mxu0 %v8138_v47  ;;  %4260 = vmatpush1.bf16.msra.mxu1 %v8139_v48  ;;  %v8196_v47 = vld [vmem:[%s11835_s2 + $0x264] ss:$16 sps:$4 sm:$0xff]   ;;  %v8197_v48 = vld [vmem:[%s11835_s2 + $0x26c] ss:$16 sps:$4 sm:$0xff]  }
 0x17c   :  { %3835 = vmatprep.subr.bf16.mxu0 %v8140_v49  ;;  %4261 = vmatprep.subr.bf16.mxu1 %v8141_v50  ;;  %v7954_v49 = vld [vmem:[%s11837_s1 + $0xc0] ss:$48 sps:$4 sm:$0xff]  }
 0x17d   :  { %6538 = vmatprep.mubr.msk.bf16.mxu0 %vm2457_vm0, %v6174_v46  ;;  %6542 = vmatprep.mubr.msk.bf16.mxu1 %vm2457_vm0, %v6174_v46  ;;  %v8195_v46 = vld [vmem:[%s11835_s2 + $0x248] ss:$16 sps:$4 sm:$0xff]   ;;  %v3589_v50 = vld [vmem:[%s11837_s1 + $0x120] sm:$0xff] }
 0x17f   :  { %3836 = vmatpush1.bf16.msra.mxu0 %v8142_v52  ;;  %4262 = vmatpush1.bf16.msra.mxu1 %v8143_v53  ;;  %v8198_v52 = vld [vmem:[%s11835_s2 + $0x260] ss:$16 sps:$4 sm:$0xff]   ;;  %v8199_v53 = vld [vmem:[%s11835_s2 + $0x268] ss:$16 sps:$4 sm:$0xff]  }
 0x180   :  { %3837 = vmatprep.subr.bf16.mxu0 %v8144_v54  ;;  %4263 = vmatprep.subr.bf16.mxu1 %v8145_v55  ;;  %v8200_v54 = vld [vmem:[%s11835_s2 + $0x284] ss:$16 sps:$4 sm:$0xff]   ;;  %v8201_v55 = vld [vmem:[%s11835_s2 + $0x28c] ss:$16 sps:$4 sm:$0xff]  }
 0x182   :  { %2888 = vmatmul.mubr.bf16.gmra.mrb[12].mxu0 %v6173_v51  ;;  %3314 = vmatmul.mubr.bf16.gmra.mrb[12].mxu1 %v6173_v51  ;;  %v3323_v51 = vlaneseq }
 0x183   :  { %3838 = vmatpush1.bf16.msra.mxu0 %v8146_v57  ;;  %4264 = vmatpush1.bf16.msra.mxu1 %v8147_v58  ;;  %v6580_v57 = vcombine.high %v3589_v50, %v3589_v50 }
 0x184   :  { %3839 = vmatprep.subr.bf16.mxu0 %v8148_v59  ;;  %4265 = vmatprep.subr.bf16.mxu1 %v8149_v60  ;;  %v8202_v59 = vld [vmem:[%s11835_s2 + $0x280] ss:$16 sps:$4 sm:$0xff]   ;;  %v8203_v60 = vld [vmem:[%s11835_s2 + $0x288] ss:$16 sps:$4 sm:$0xff]  }
 0x185   :  { %3857 = vmatprep.mubr.bf16.mxu0 %v7948_v56  ;;  %4283 = vmatprep.mubr.bf16.mxu1 %v7948_v56  ;;  %v10020_v56 = vshrl.u32 %v3323_v51, 7  ;;  %v8248_v51 = vld [vmem:[%s11835_s2 + $0x404] ss:$16 sps:$4 sm:$0xff]  }
 0x187   :  { %3840 = vmatpush1.bf16.msra.mxu0 %v8150_v61  ;;  %4266 = vmatpush1.bf16.msra.mxu1 %v8151_v62  ;;  %v3325_v58 = vsub.s32 0, %v10020_v56  ;;  %v10032_v61 = vld [vmem:[%s11838_s3] sm:$0xf]  ;;  %v3329_v62 = vsub.s32 1, %v10020_v56 }
 0x188   :  { %3841 = vmatprep.subr.bf16.mxu0 %v8152_v63  ;;  %4267 = vmatprep.subr.bf16.mxu1 %v8153_v0  ;;  %v8204_v63 = vld [vmem:[%s11835_s2 + $0x2a4] ss:$16 sps:$4 sm:$0xff]   ;;  %v8205_v0 = vld [vmem:[%s11835_s2 + $0x2ac] ss:$16 sps:$4 sm:$0xff]  }
 0x18b   :  { %3842 = vmatpush1.bf16.msra.mxu0 %v8154_v1  ;;  %4268 = vmatpush1.bf16.msra.mxu1 %v8155_v2  ;;  %v10044_v1 = vld [vmem:[%s11839_s4] sm:$0xf]  ;;  %v10047_v2 = vrot.slane %v10032_v61, %v3325_v58 }
 0x18c   :  { %3843 = vmatprep.subr.bf16.mxu0 %v8156_v3  ;;  %4269 = vmatprep.subr.bf16.mxu1 %v8157_v4  ;;  %v10050_v3 = vrot.slane %v10032_v61, %v3329_v62  ;;  %v6579_v4 = vcombine.low %v3589_v50, %v3589_v50  ;;  %v8247_v50 = vld [vmem:[%s11835_s2 + $0x3e8] ss:$16 sps:$4 sm:$0xff]  }
 0x18f   :  { %3844 = vmatpush1.bf16.msra.mxu0 %v8158_v5  ;;  %4270 = vmatpush1.bf16.msra.mxu1 %v8159_v6  ;;  %v10053_v5 = vrot.slane %v10044_v1, %v3325_v58  ;;  %v8206_v6 = vld [vmem:[%s11835_s2 + $0x2a0] ss:$16 sps:$4 sm:$0xff]   ;;  %v8253_v58 = vld [vmem:[%s11835_s2 + $0x42c] ss:$16 sps:$4 sm:$0xff]  }
 0x190   :  { %3845 = vmatprep.subr.bf16.mxu0 %v8160_v7  ;;  %4271 = vmatprep.subr.bf16.mxu1 %v8161_v8  ;;  %v8207_v7 = vld [vmem:[%s11835_s2 + $0x2a8] ss:$16 sps:$4 sm:$0xff]   ;;  %v10062_v8 = vrot.slane %v10044_v1, %v3329_v62 }
 0x191   :  { %v8255_v62 = vld [vmem:[%s11835_s2 + $0x428] ss:$16 sps:$4 sm:$0xff]  }
 0x193   :  { %3846 = vmatpush1.bf16.msra.mxu0 %v8162_v9  ;;  %4272 = vmatpush1.bf16.msra.mxu1 %v8163_v10  ;;  %v8208_v9 = vld [vmem:[%s11835_s2 + $0x2c4] ss:$16 sps:$4 sm:$0xff]   ;;  %v8209_v10 = vld [vmem:[%s11835_s2 + $0x2cc] ss:$16 sps:$4 sm:$0xff]  }
 0x194   :  { %3847 = vmatprep.subr.bf16.mxu0 %v8164_v11  ;;  %4273 = vmatprep.subr.bf16.mxu1 %v8165_v12  ;;  %v7959_v11 = vld [vmem:[%s11837_s1 + $0xc] ss:$48 sps:$4 sm:$0xff]   ;;  %v8210_v12 = vld [vmem:[%s11835_s2 + $0x2c0] ss:$16 sps:$4 sm:$0xff]  }
 0x197   :  { %3848 = vmatpush1.bf16.msra.mxu0 %v8166_v13  ;;  %4274 = vmatpush1.bf16.msra.mxu1 %v8167_v14  ;;  %v8211_v13 = vld [vmem:[%s11835_s2 + $0x2c8] ss:$16 sps:$4 sm:$0xff]   ;;  %v8212_v14 = vld [vmem:[%s11835_s2 + $0x2e4] ss:$16 sps:$4 sm:$0xff]  }
 0x198   :  { %3849 = vmatprep.subr.bf16.mxu0 %v8168_v15  ;;  %4275 = vmatprep.subr.bf16.mxu1 %v8169_v16  ;;  %v8213_v15 = vld [vmem:[%s11835_s2 + $0x2ec] ss:$16 sps:$4 sm:$0xff]   ;;  %v8214_v16 = vld [vmem:[%s11835_s2 + $0x2e0] ss:$16 sps:$4 sm:$0xff]  }
 0x19b   :  { %3850 = vmatpush1.bf16.msra.mxu0 %v8170_v17  ;;  %4276 = vmatpush1.bf16.msra.mxu1 %v8171_v18  ;;  %v8215_v17 = vld [vmem:[%s11835_s2 + $0x2e8] ss:$16 sps:$4 sm:$0xff]   ;;  %v8216_v18 = vld [vmem:[%s11835_s2 + $0x304] ss:$16 sps:$4 sm:$0xff]  }
 0x19c   :  { %3851 = vmatprep.subr.bf16.mxu0 %v8172_v19  ;;  %4277 = vmatprep.subr.bf16.mxu1 %v8173_v20  ;;  %v8217_v19 = vld [vmem:[%s11835_s2 + $0x30c] ss:$16 sps:$4 sm:$0xff]   ;;  %v8218_v20 = vld [vmem:[%s11835_s2 + $0x300] ss:$16 sps:$4 sm:$0xff]  }
 0x19f   :  { %3852 = vmatpush1.bf16.msra.mxu0 %v8174_v21  ;;  %4278 = vmatpush1.bf16.msra.mxu1 %v8175_v22  ;;  %v8219_v21 = vld [vmem:[%s11835_s2 + $0x308] ss:$16 sps:$4 sm:$0xff]   ;;  %v8220_v22 = vld [vmem:[%s11835_s2 + $0x324] ss:$16 sps:$4 sm:$0xff]  }
 0x1a0   :  { %3853 = vmatprep.subr.bf16.mxu0 %v8176_v23  ;;  %4279 = vmatprep.subr.bf16.mxu1 %v8177_v24  ;;  %v8221_v23 = vld [vmem:[%s11835_s2 + $0x32c] ss:$16 sps:$4 sm:$0xff]   ;;  %v8222_v24 = vld [vmem:[%s11835_s2 + $0x320] ss:$16 sps:$4 sm:$0xff]  }
 0x1a3   :  { %3854 = vmatpush1.bf16.msra.mxu0 %v8178_v25  ;;  %4280 = vmatpush1.bf16.msra.mxu1 %v8179_v26  ;;  %v8223_v25 = vld [vmem:[%s11835_s2 + $0x328] ss:$16 sps:$4 sm:$0xff]   ;;  %v8224_v26 = vld [vmem:[%s11835_s2 + $0x344] ss:$16 sps:$4 sm:$0xff]  }
 0x1a4   :  { %3855 = vmatprep.subr.bf16.mxu0 %v8180_v27  ;;  %4281 = vmatprep.subr.bf16.mxu1 %v8181_v28  ;;  %v8225_v27 = vld [vmem:[%s11835_s2 + $0x34c] ss:$16 sps:$4 sm:$0xff]   ;;  %v8226_v28 = vld [vmem:[%s11835_s2 + $0x340] ss:$16 sps:$4 sm:$0xff]  }
 0x1a7   :  { %3856 = vmatpush1.bf16.msra.mxu0 %v8182_v30  ;;  %4282 = vmatpush1.bf16.msra.mxu1 %v8183_v31  ;;  %v8228_v30 = vld [vmem:[%s11835_s2 + $0x364] ss:$16 sps:$4 sm:$0xff]   ;;  %v8229_v31 = vld [vmem:[%s11835_s2 + $0x36c] ss:$16 sps:$4 sm:$0xff]  }
 0x1a8   :  { %3896 = vmatprep.subr.bf16.mxu0 %v8184_v32  ;;  %4322 = vmatprep.subr.bf16.mxu1 %v8185_v33  ;;  %v8230_v32 = vld [vmem:[%s11835_s2 + $0x360] ss:$16 sps:$4 sm:$0xff]   ;;  %v8231_v33 = vld [vmem:[%s11835_s2 + $0x368] ss:$16 sps:$4 sm:$0xff]  }
 0x1aa   :  { %3858 = vmatmul.mubr.bf16.vlgmr.msra.gmra.mrb[16].mxu0 %v7946_v29  ;;  %4284 = vmatmul.mubr.bf16.vlgmr.msra.gmra.mrb[16].mxu1 %v7946_v29  ;;  %v8227_v29 = vld [vmem:[%s11835_s2 + $0x348] ss:$16 sps:$4 sm:$0xff]  }
 0x1ab   :  { %3897 = vmatpush1.bf16.msra.mxu0 %v8186_v35  ;;  %4323 = vmatpush1.bf16.msra.mxu1 %v8187_v36  ;;  %v8233_v35 = vld [vmem:[%s11835_s2 + $0x38c] ss:$16 sps:$4 sm:$0xff]   ;;  %v8234_v36 = vld [vmem:[%s11835_s2 + $0x380] ss:$16 sps:$4 sm:$0xff]  }
 0x1ac   :  { %3898 = vmatprep.subr.bf16.mxu0 %v8188_v37  ;;  %4324 = vmatprep.subr.bf16.mxu1 %v8189_v38  ;;  %v8235_v37 = vld [vmem:[%s11835_s2 + $0x388] ss:$16 sps:$4 sm:$0xff]   ;;  %v8236_v38 = vld [vmem:[%s11835_s2 + $0x3a4] ss:$16 sps:$4 sm:$0xff]  }
 0x1ad   :  { %3867 = vmatprep.mubr.bf16.mxu0 %v7949_v34  ;;  %4293 = vmatprep.mubr.bf16.mxu1 %v7949_v34  ;;  %v8232_v34 = vld [vmem:[%s11835_s2 + $0x384] ss:$16 sps:$4 sm:$0xff]  }
 0x1af   :  { %3899 = vmatpush1.bf16.msra.mxu0 %v8190_v40  ;;  %4325 = vmatpush1.bf16.msra.mxu1 %v8191_v41  ;;  %v8238_v40 = vld [vmem:[%s11835_s2 + $0x3a0] ss:$16 sps:$4 sm:$0xff]   ;;  %v8239_v41 = vld [vmem:[%s11835_s2 + $0x3a8] ss:$16 sps:$4 sm:$0xff]  }
 0x1b0   :  { %3900 = vmatprep.subr.bf16.mxu0 %v8192_v42  ;;  %4326 = vmatprep.subr.bf16.mxu1 %v8193_v43  ;;  %v8240_v42 = vld [vmem:[%s11835_s2 + $0x3c4] ss:$16 sps:$4 sm:$0xff]   ;;  %v8241_v43 = vld [vmem:[%s11835_s2 + $0x3cc] ss:$16 sps:$4 sm:$0xff]  }
 0x1b2   :  { %3868 = vmatmul.mubr.bf16.gmra.mrb[20].mxu0 %v7951_v39  ;;  %4294 = vmatmul.mubr.bf16.gmra.mrb[20].mxu1 %v7951_v39  ;;  %v8237_v39 = vld [vmem:[%s11835_s2 + $0x3ac] ss:$16 sps:$4 sm:$0xff]  }
 0x1b3   :  { %3901 = vmatpush1.bf16.msra.mxu0 %v8194_v45  ;;  %4327 = vmatpush1.bf16.msra.mxu1 %v8195_v46  ;;  %v8243_v45 = vld [vmem:[%s11835_s2 + $0x3c8] ss:$16 sps:$4 sm:$0xff]   ;;  %v8244_v46 = vld [vmem:[%s11835_s2 + $0x3e4] ss:$16 sps:$4 sm:$0xff]  }
 0x1b4   :  { %3902 = vmatprep.subr.bf16.mxu0 %v8196_v47  ;;  %4328 = vmatprep.subr.bf16.mxu1 %v8197_v48  ;;  %v8245_v47 = vld [vmem:[%s11835_s2 + $0x3ec] ss:$16 sps:$4 sm:$0xff]   ;;  %v7957_v48 = vld [vmem:[%s11837_s1 + $0x8] ss:$48 sps:$4 sm:$0xff]  }
 0x1b5   :  { %3877 = vmatprep.mubr.bf16.mxu0 %v7952_v44  ;;  %4303 = vmatprep.mubr.bf16.mxu1 %v7952_v44  ;;  %v8242_v44 = vld [vmem:[%s11835_s2 + $0x3c0] ss:$16 sps:$4 sm:$0xff]  }
 0x1b7   :  { %3903 = vmatpush1.bf16.msra.mxu0 %v8198_v52  ;;  %4329 = vmatpush1.bf16.msra.mxu1 %v8199_v53  ;;  %v8249_v52 = vld [vmem:[%s11835_s2 + $0x40c] ss:$16 sps:$4 sm:$0xff]  }
 0x1b8   :  { %3904 = vmatprep.subr.bf16.mxu0 %v8200_v54  ;;  %4330 = vmatprep.subr.bf16.mxu1 %v8201_v55  ;;  %v7960_v53 = vld [vmem:[%s11837_s1 + $0x6c] ss:$48 sps:$4 sm:$0xff]   ;;  %v8250_v54 = vld [vmem:[%s11835_s2 + $0x400] ss:$16 sps:$4 sm:$0xff]   ;;  %v8251_v55 = vld [vmem:[%s11835_s2 + $0x408] ss:$16 sps:$4 sm:$0xff]  }
 0x1ba   :  { %3878 = vmatmul.mubr.bf16.gmra.mrb[24].mxu0 %v7954_v49  ;;  %4304 = vmatmul.mubr.bf16.gmra.mrb[24].mxu1 %v7954_v49  ;;  %v8246_v49 = vld [vmem:[%s11835_s2 + $0x3e0] ss:$16 sps:$4 sm:$0xff]  }
 0x1bb   :  { %3905 = vmatpush1.bf16.msra.mxu0 %v8202_v59  ;;  %4331 = vmatpush1.bf16.msra.mxu1 %v8203_v60  ;;  %v7962_v59 = vld [vmem:[%s11837_s1 + $0x68] ss:$48 sps:$4 sm:$0xff]   ;;  %v8254_v60 = vld [vmem:[%s11835_s2 + $0x420] ss:$16 sps:$4 sm:$0xff]  }
 0x1bc   :  { %3906 = vmatprep.subr.bf16.mxu0 %v8204_v63  ;;  %4332 = vmatprep.subr.bf16.mxu1 %v8205_v0  ;;  %v8256_v63 = vld [vmem:[%s11835_s2 + $0x444] ss:$16 sps:$4 sm:$0xff]   ;;  %v8257_v0 = vld [vmem:[%s11835_s2 + $0x44c] ss:$16 sps:$4 sm:$0xff]  }
 0x1bd   :  { %3887 = vmatprep.mubr.bf16.mxu0 %v6580_v57  ;;  %4313 = vmatprep.mubr.bf16.mxu1 %v6580_v57  ;;  %v8252_v57 = vld [vmem:[%s11835_s2 + $0x424] ss:$16 sps:$4 sm:$0xff]  }
 0x1bf   :  { %3907 = vmatpush1.bf16.msra.mxu0 %v8206_v6  ;;  %4333 = vmatpush1.bf16.msra.mxu1 %v8207_v7  ;;  %v8258_v6 = vld [vmem:[%s11835_s2 + $0x440] ss:$16 sps:$4 sm:$0xff]   ;;  %v8259_v7 = vld [vmem:[%s11835_s2 + $0x448] ss:$16 sps:$4 sm:$0xff]  }
 0x1c0   :  { %3908 = vmatprep.subr.bf16.mxu0 %v8208_v9  ;;  %4334 = vmatprep.subr.bf16.mxu1 %v8209_v10  ;;  %v8260_v9 = vld [vmem:[%s11835_s2 + $0x464] ss:$16 sps:$4 sm:$0xff]   ;;  %v8261_v10 = vld [vmem:[%s11835_s2 + $0x46c] ss:$16 sps:$4 sm:$0xff]  }
 0x1c2   :  { %3888 = vmatmul.mubr.bf16.gmra.mrb[28].mxu0 %v6579_v4  ;;  %4314 = vmatmul.mubr.bf16.gmra.mrb[28].mxu1 %v6579_v4  ;;  %v7963_v4 = vld [vmem:[%s11837_s1 + $0xcc] ss:$48 sps:$4 sm:$0xff]  }
 0x1c3   :  { %3909 = vmatpush1.bf16.msra.mxu0 %v8210_v12  ;;  %4335 = vmatpush1.bf16.msra.mxu1 %v8211_v13  ;;  %v3590_v12 = vld [vmem:[%s11837_s1 + $0x128] sm:$0xff]  ;;  %v8262_v13 = vld [vmem:[%s11835_s2 + $0x460] ss:$16 sps:$4 sm:$0xff]  }
 0x1c4   :  { %3910 = vmatprep.subr.bf16.mxu0 %v8212_v14  ;;  %4336 = vmatprep.subr.bf16.mxu1 %v8213_v15  ;;  %v8263_v14 = vld [vmem:[%s11835_s2 + $0x468] ss:$16 sps:$4 sm:$0xff]   ;;  %v8264_v15 = vld [vmem:[%s11835_s2 + $0x484] ss:$16 sps:$4 sm:$0xff]  }
 0x1c5   :  { %3928 = vmatprep.mubr.bf16.mxu0 %v7959_v11  ;;  %4354 = vmatprep.mubr.bf16.mxu1 %v7959_v11  ;;  %v7965_v11 = vld [vmem:[%s11837_s1 + $0xc8] ss:$48 sps:$4 sm:$0xff]  }
 0x1c7   :  { %3911 = vmatpush1.bf16.msra.mxu0 %v8214_v16  ;;  %4337 = vmatpush1.bf16.msra.mxu1 %v8215_v17  ;;  %v8265_v16 = vld [vmem:[%s11835_s2 + $0x48c] ss:$16 sps:$4 sm:$0xff]   ;;  %v6582_v17 = vcombine.high %v3590_v12, %v3590_v12 }
 0x1c8   :  { %3912 = vmatprep.subr.bf16.mxu0 %v8216_v18  ;;  %4338 = vmatprep.subr.bf16.mxu1 %v8217_v19  ;;  %v8266_v18 = vld [vmem:[%s11835_s2 + $0x480] ss:$16 sps:$4 sm:$0xff]   ;;  %v8267_v19 = vld [vmem:[%s11835_s2 + $0x488] ss:$16 sps:$4 sm:$0xff]  }
 0x1cb   :  { %3913 = vmatpush1.bf16.msra.mxu0 %v8218_v20  ;;  %4339 = vmatpush1.bf16.msra.mxu1 %v8219_v21  ;;  %v8268_v20 = vld [vmem:[%s11835_s2 + $0x4a4] ss:$16 sps:$4 sm:$0xff]   ;;  %v8269_v21 = vld [vmem:[%s11835_s2 + $0x4ac] ss:$16 sps:$4 sm:$0xff]  }
 0x1cc   :  { %3914 = vmatprep.subr.bf16.mxu0 %v8220_v22  ;;  %4340 = vmatprep.subr.bf16.mxu1 %v8221_v23  ;;  %v6581_v22 = vcombine.low %v3590_v12, %v3590_v12  ;;  %v8270_v23 = vld [vmem:[%s11835_s2 + $0x4a0] ss:$16 sps:$4 sm:$0xff]   ;;  %v7971_v12 = vld [vmem:[%s11837_s1 + $0x74] ss:$48 sps:$4 sm:$0xff]  }
 0x1cf   :  { %3915 = vmatpush1.bf16.msra.mxu0 %v8222_v24  ;;  %4341 = vmatpush1.bf16.msra.mxu1 %v8223_v25  ;;  %v8271_v24 = vld [vmem:[%s11835_s2 + $0x4a8] ss:$16 sps:$4 sm:$0xff]   ;;  %v8272_v25 = vld [vmem:[%s11835_s2 + $0x4c4] ss:$16 sps:$4 sm:$0xff]  }
 0x1d0   :  { %3916 = vmatprep.subr.bf16.mxu0 %v8224_v26  ;;  %4342 = vmatprep.subr.bf16.mxu1 %v8225_v27  ;;  %v8273_v26 = vld [vmem:[%s11835_s2 + $0x4cc] ss:$16 sps:$4 sm:$0xff]   ;;  %v7970_v27 = vld [vmem:[%s11837_s1 + $0x14] ss:$48 sps:$4 sm:$0xff]  }
 0x1d3   :  { %3917 = vmatpush1.bf16.msra.mxu0 %v8226_v28  ;;  %4343 = vmatpush1.bf16.msra.mxu1 %v8227_v29  ;;  %v8274_v28 = vld [vmem:[%s11835_s2 + $0x4c0] ss:$16 sps:$4 sm:$0xff]   ;;  %v8275_v29 = vld [vmem:[%s11835_s2 + $0x4c8] ss:$16 sps:$4 sm:$0xff]  }
 0x1d4   :  { %3918 = vmatprep.subr.bf16.mxu0 %v8228_v30  ;;  %4344 = vmatprep.subr.bf16.mxu1 %v8229_v31  ;;  %v8276_v30 = vld [vmem:[%s11835_s2 + $0x4e4] ss:$16 sps:$4 sm:$0xff]   ;;  %v8277_v31 = vld [vmem:[%s11835_s2 + $0x4ec] ss:$16 sps:$4 sm:$0xff]  }
 0x1d7   :  { %3919 = vmatpush1.bf16.msra.mxu0 %v8230_v32  ;;  %4345 = vmatpush1.bf16.msra.mxu1 %v8231_v33  ;;  %v8278_v32 = vld [vmem:[%s11835_s2 + $0x4e0] ss:$16 sps:$4 sm:$0xff]   ;;  %v8279_v33 = vld [vmem:[%s11835_s2 + $0x4e8] ss:$16 sps:$4 sm:$0xff]  }
 0x1d8   :  { %3920 = vmatprep.subr.bf16.mxu0 %v8232_v34  ;;  %4346 = vmatprep.subr.bf16.mxu1 %v8233_v35  ;;  %v8280_v34 = vld [vmem:[%s11835_s2 + $0x504] ss:$16 sps:$4 sm:$0xff]   ;;  %v8281_v35 = vld [vmem:[%s11835_s2 + $0x50c] ss:$16 sps:$4 sm:$0xff]  }
 0x1db   :  { %3921 = vmatpush1.bf16.msra.mxu0 %v8234_v36  ;;  %4347 = vmatpush1.bf16.msra.mxu1 %v8235_v37  ;;  %v8282_v36 = vld [vmem:[%s11835_s2 + $0x500] ss:$16 sps:$4 sm:$0xff]   ;;  %v8283_v37 = vld [vmem:[%s11835_s2 + $0x508] ss:$16 sps:$4 sm:$0xff]  }
 0x1dc   :  { %3922 = vmatprep.subr.bf16.mxu0 %v8236_v38  ;;  %4348 = vmatprep.subr.bf16.mxu1 %v8237_v39  ;;  %v8284_v38 = vld [vmem:[%s11835_s2 + $0x524] ss:$16 sps:$4 sm:$0xff]   ;;  %v8285_v39 = vld [vmem:[%s11835_s2 + $0x52c] ss:$16 sps:$4 sm:$0xff]  }
 0x1df   :  { %3923 = vmatpush1.bf16.msra.mxu0 %v8238_v40  ;;  %4349 = vmatpush1.bf16.msra.mxu1 %v8239_v41  ;;  %v8286_v40 = vld [vmem:[%s11835_s2 + $0x520] ss:$16 sps:$4 sm:$0xff]   ;;  %v8287_v41 = vld [vmem:[%s11835_s2 + $0x528] ss:$16 sps:$4 sm:$0xff]  }
 0x1e0   :  { %3924 = vmatprep.subr.bf16.mxu0 %v8240_v42  ;;  %4350 = vmatprep.subr.bf16.mxu1 %v8241_v43  ;;  %v8288_v42 = vld [vmem:[%s11835_s2 + $0x544] ss:$16 sps:$4 sm:$0xff]   ;;  %v8289_v43 = vld [vmem:[%s11835_s2 + $0x54c] ss:$16 sps:$4 sm:$0xff]  }
 0x1e3   :  { %3925 = vmatpush1.bf16.msra.mxu0 %v8242_v44  ;;  %4351 = vmatpush1.bf16.msra.mxu1 %v8243_v45  ;;  %v8290_v44 = vld [vmem:[%s11835_s2 + $0x540] ss:$16 sps:$4 sm:$0xff]   ;;  %v8291_v45 = vld [vmem:[%s11835_s2 + $0x548] ss:$16 sps:$4 sm:$0xff]  }
 0x1e4   :  { %3926 = vmatprep.subr.bf16.mxu0 %v8244_v46  ;;  %4352 = vmatprep.subr.bf16.mxu1 %v8245_v47  ;;  %v8292_v46 = vld [vmem:[%s11835_s2 + $0x564] ss:$16 sps:$4 sm:$0xff]   ;;  %v8293_v47 = vld [vmem:[%s11835_s2 + $0x56c] ss:$16 sps:$4 sm:$0xff]  }
 0x1e7   :  { %3927 = vmatpush1.bf16.msra.mxu0 %v8246_v49  ;;  %4353 = vmatpush1.bf16.msra.mxu1 %v8247_v50  ;;  %v8295_v49 = vld [vmem:[%s11835_s2 + $0x568] ss:$16 sps:$4 sm:$0xff]   ;;  %v8296_v50 = vld [vmem:[%s11835_s2 + $0x584] ss:$16 sps:$4 sm:$0xff]  }
 0x1e8   :  { %3967 = vmatprep.subr.bf16.mxu0 %v8248_v51  ;;  %4393 = vmatprep.subr.bf16.mxu1 %v8249_v52  ;;  %v8297_v51 = vld [vmem:[%s11835_s2 + $0x58c] ss:$16 sps:$4 sm:$0xff]   ;;  %v8298_v52 = vld [vmem:[%s11835_s2 + $0x580] ss:$16 sps:$4 sm:$0xff]  }
 0x1ea   :  { %3929 = vmatmul.mubr.bf16.vlgmr.msra.gmra.mrb[16].mxu0 %v7957_v48  ;;  %4355 = vmatmul.mubr.bf16.vlgmr.msra.gmra.mrb[16].mxu1 %v7957_v48  ;;  %v8294_v48 = vld [vmem:[%s11835_s2 + $0x560] ss:$16 sps:$4 sm:$0xff]  }
 0x1eb   :  { %3968 = vmatpush1.bf16.msra.mxu0 %v8250_v54  ;;  %4394 = vmatpush1.bf16.msra.mxu1 %v8251_v55  ;;  %v8300_v54 = vld [vmem:[%s11835_s2 + $0x5a4] ss:$16 sps:$4 sm:$0xff]   ;;  %v8301_v55 = vld [vmem:[%s11835_s2 + $0x5ac] ss:$16 sps:$4 sm:$0xff]  }
 0x1ec   :  { %3969 = vmatprep.subr.bf16.mxu0 %v8252_v57  ;;  %4395 = vmatprep.subr.bf16.mxu1 %v8253_v58  ;;  %v8302_v57 = vld [vmem:[%s11835_s2 + $0x5a0] ss:$16 sps:$4 sm:$0xff]   ;;  %v8303_v58 = vld [vmem:[%s11835_s2 + $0x5a8] ss:$16 sps:$4 sm:$0xff]  }
 0x1ed   :  { %3938 = vmatprep.mubr.bf16.mxu0 %v7960_v53  ;;  %4364 = vmatprep.mubr.bf16.mxu1 %v7960_v53  ;;  %v8299_v53 = vld [vmem:[%s11835_s2 + $0x588] ss:$16 sps:$4 sm:$0xff]  }
 0x1ef   :  { %3970 = vmatpush1.bf16.msra.mxu0 %v8254_v60  ;;  %4396 = vmatpush1.bf16.msra.mxu1 %v8255_v62  ;;  %v8305_v60 = vld [vmem:[%s11835_s2 + $0x5cc] ss:$16 sps:$4 sm:$0xff]   ;;  %v8306_v62 = vld [vmem:[%s11835_s2 + $0x5c0] ss:$16 sps:$4 sm:$0xff]  }
 0x1f0   :  { %3971 = vmatprep.subr.bf16.mxu0 %v8256_v63  ;;  %4397 = vmatprep.subr.bf16.mxu1 %v8257_v0  ;;  %v8307_v63 = vld [vmem:[%s11835_s2 + $0x5c8] ss:$16 sps:$4 sm:$0xff]   ;;  %v8308_v0 = vld [vmem:[%s11835_s2 + $0x5e4] ss:$16 sps:$4 sm:$0xff]  }
 0x1f2   :  { %3939 = vmatmul.mubr.bf16.gmra.mrb[20].mxu0 %v7962_v59  ;;  %4365 = vmatmul.mubr.bf16.gmra.mrb[20].mxu1 %v7962_v59  ;;  %v8304_v59 = vld [vmem:[%s11835_s2 + $0x5c4] ss:$16 sps:$4 sm:$0xff]  }
 0x1f3   :  { %3972 = vmatpush1.bf16.msra.mxu0 %v8258_v6  ;;  %4398 = vmatpush1.bf16.msra.mxu1 %v8259_v7  ;;  %v7968_v6 = vld [vmem:[%s11837_s1 + $0x10] ss:$48 sps:$4 sm:$0xff]  }
 0x1f4   :  { %3973 = vmatprep.subr.bf16.mxu0 %v8260_v9  ;;  %4399 = vmatprep.subr.bf16.mxu1 %v8261_v10  ;;  %v8310_v7 = vld [vmem:[%s11835_s2 + $0x5e0] ss:$16 sps:$4 sm:$0xff]   ;;  %v8311_v9 = vld [vmem:[%s11835_s2 + $0x5e8] ss:$16 sps:$4 sm:$0xff]   ;;  %v8312_v10 = vld [vmem:[%s11835_s2 + $0x604] ss:$16 sps:$4 sm:$0xff]  }
 0x1f5   :  { %3948 = vmatprep.mubr.bf16.mxu0 %v7963_v4  ;;  %4374 = vmatprep.mubr.bf16.mxu1 %v7963_v4  ;;  %v8309_v4 = vld [vmem:[%s11835_s2 + $0x5ec] ss:$16 sps:$4 sm:$0xff]  }
 0x1f7   :  { %3974 = vmatpush1.bf16.msra.mxu0 %v8262_v13  ;;  %4400 = vmatpush1.bf16.msra.mxu1 %v8263_v14  ;;  %v8314_v13 = vld [vmem:[%s11835_s2 + $0x600] ss:$16 sps:$4 sm:$0xff]   ;;  %v8315_v14 = vld [vmem:[%s11835_s2 + $0x608] ss:$16 sps:$4 sm:$0xff]  }
 0x1f8   :  { %3975 = vmatprep.subr.bf16.mxu0 %v8264_v15  ;;  %4401 = vmatprep.subr.bf16.mxu1 %v8265_v16  ;;  %v8316_v15 = vld [vmem:[%s11835_s2 + $0x624] ss:$16 sps:$4 sm:$0xff]   ;;  %v8317_v16 = vld [vmem:[%s11835_s2 + $0x62c] ss:$16 sps:$4 sm:$0xff]  }
 0x1fa   :  { %3949 = vmatmul.mubr.bf16.gmra.mrb[24].mxu0 %v7965_v11  ;;  %4375 = vmatmul.mubr.bf16.gmra.mrb[24].mxu1 %v7965_v11  ;;  %v8313_v11 = vld [vmem:[%s11835_s2 + $0x60c] ss:$16 sps:$4 sm:$0xff]  }
 0x1fb   :  { %3976 = vmatpush1.bf16.msra.mxu0 %v8266_v18  ;;  %4402 = vmatpush1.bf16.msra.mxu1 %v8267_v19  ;;  %v8318_v18 = vld [vmem:[%s11835_s2 + $0x620] ss:$16 sps:$4 sm:$0xff]   ;;  %v8319_v19 = vld [vmem:[%s11835_s2 + $0x628] ss:$16 sps:$4 sm:$0xff]  }
 0x1fc   :  { %3977 = vmatprep.subr.bf16.mxu0 %v8268_v20  ;;  %4403 = vmatprep.subr.bf16.mxu1 %v8269_v21  ;;  %v8320_v20 = vld [vmem:[%s11835_s2 + $0x644] ss:$16 sps:$4 sm:$0xff]   ;;  %v8321_v21 = vld [vmem:[%s11835_s2 + $0x64c] ss:$16 sps:$4 sm:$0xff]  }
 0x1fd   :  { %3958 = vmatprep.mubr.bf16.mxu0 %v6582_v17  ;;  %4384 = vmatprep.mubr.bf16.mxu1 %v6582_v17  ;;  %v7973_v17 = vld [vmem:[%s11837_s1 + $0x70] ss:$48 sps:$4 sm:$0xff]  }
 0x1ff   :  { %3978 = vmatpush1.bf16.msra.mxu0 %v8270_v23  ;;  %4404 = vmatpush1.bf16.msra.mxu1 %v8271_v24  ;;  %v8322_v23 = vld [vmem:[%s11835_s2 + $0x640] ss:$16 sps:$4 sm:$0xff]   ;;  %v8323_v24 = vld [vmem:[%s11835_s2 + $0x648] ss:$16 sps:$4 sm:$0xff]  }
 0x200   :  { %3979 = vmatprep.subr.bf16.mxu0 %v8272_v25  ;;  %4405 = vmatprep.subr.bf16.mxu1 %v8273_v26  ;;  %v8324_v25 = vld [vmem:[%s11835_s2 + $0x664] ss:$16 sps:$4 sm:$0xff]   ;;  %v8325_v26 = vld [vmem:[%s11835_s2 + $0x66c] ss:$16 sps:$4 sm:$0xff]  }
 0x202   :  { %3959 = vmatmul.mubr.bf16.gmra.mrb[28].mxu0 %v6581_v22  ;;  %4385 = vmatmul.mubr.bf16.gmra.mrb[28].mxu1 %v6581_v22  ;;  %v7974_v22 = vld [vmem:[%s11837_s1 + $0xd4] ss:$48 sps:$4 sm:$0xff]  }
 0x203   :  { %3980 = vmatpush1.bf16.msra.mxu0 %v8274_v28  ;;  %4406 = vmatpush1.bf16.msra.mxu1 %v8275_v29  ;;  %v7976_v28 = vld [vmem:[%s11837_s1 + $0xd0] ss:$48 sps:$4 sm:$0xff]  }
 0x204   :  { %3981 = vmatprep.subr.bf16.mxu0 %v8276_v30  ;;  %4407 = vmatprep.subr.bf16.mxu1 %v8277_v31  ;;  %v3591_v29 = vld [vmem:[%s11837_s1 + $0x130] sm:$0xff]  ;;  %v8327_v31 = vld [vmem:[%s11835_s2 + $0x668] ss:$16 sps:$4 sm:$0xff]  }
 0x205   :  { %3999 = vmatprep.mubr.bf16.mxu0 %v7970_v27  ;;  %4425 = vmatprep.mubr.bf16.mxu1 %v7970_v27  ;;  %v3333_v27 = vsub.s32 2, %v10020_v56  ;;  %v8326_v30 = vld [vmem:[%s11835_s2 + $0x660] ss:$16 sps:$4 sm:$0xff]  }
 0x207   :  { %3982 = vmatpush1.bf16.msra.mxu0 %v8278_v32  ;;  %4408 = vmatpush1.bf16.msra.mxu1 %v8279_v33  ;;  %v3337_v32 = vsub.s32 3, %v10020_v56  ;;  %v8328_v33 = vld [vmem:[%s11835_s2 + $0x684] ss:$16 sps:$4 sm:$0xff]   ;;  %v8330_v56 = vld [vmem:[%s11835_s2 + $0x680] ss:$16 sps:$4 sm:$0xff]  }
 0x208   :  { %3983 = vmatprep.subr.bf16.mxu0 %v8280_v34  ;;  %4409 = vmatprep.subr.bf16.mxu1 %v8281_v35  ;;  %v8329_v34 = vld [vmem:[%s11835_s2 + $0x68c] ss:$16 sps:$4 sm:$0xff]   ;;  %v6584_v35 = vcombine.high %v3591_v29, %v3591_v29 }
 0x20b   :  { %3984 = vmatpush1.bf16.msra.mxu0 %v8282_v36  ;;  %4410 = vmatpush1.bf16.msra.mxu1 %v8283_v37  ;;  %v10475_v36 = vrot.slane %v10032_v61, %v3333_v27  ;;  %v8331_v37 = vld [vmem:[%s11835_s2 + $0x688] ss:$16 sps:$4 sm:$0xff]  }
 0x20c   :  { %3985 = vmatprep.subr.bf16.mxu0 %v8284_v38  ;;  %4411 = vmatprep.subr.bf16.mxu1 %v8285_v39  ;;  %v10484_v38 = vrot.slane %v10032_v61, %v3337_v32  ;;  %v10487_v39 = vrot.slane %v10044_v1, %v3333_v27 }
 0x20f   :  { %3986 = vmatpush1.bf16.msra.mxu0 %v8286_v40  ;;  %4412 = vmatpush1.bf16.msra.mxu1 %v8287_v41  ;;  %v8332_v40 = vld [vmem:[%s11835_s2 + $0x6a4] ss:$16 sps:$4 sm:$0xff]   ;;  %v8333_v41 = vld [vmem:[%s11835_s2 + $0x6ac] ss:$16 sps:$4 sm:$0xff]  }
 0x210   :  { %3987 = vmatprep.subr.bf16.mxu0 %v8288_v42  ;;  %4413 = vmatprep.subr.bf16.mxu1 %v8289_v43 }
 0x213   :  { %3988 = vmatpush1.bf16.msra.mxu0 %v8290_v44  ;;  %4414 = vmatpush1.bf16.msra.mxu1 %v8291_v45  ;;  %v10498_v44 = vrot.slane %v10044_v1, %v3337_v32  ;;  %v8335_v1 = vld [vmem:[%s11835_s2 + $0x6a8] ss:$16 sps:$4 sm:$0xff]  }
 0x214   :  { %3989 = vmatprep.subr.bf16.mxu0 %v8292_v46  ;;  %4415 = vmatprep.subr.bf16.mxu1 %v8293_v47  ;;  %v6583_v47 = vcombine.low %v3591_v29, %v3591_v29  ;;  %v8343_v29 = vld [vmem:[%s11835_s2 + $0x6e8] ss:$16 sps:$4 sm:$0xff]  }
 0x217   :  { %3990 = vmatpush1.bf16.msra.mxu0 %v8294_v48  ;;  %4416 = vmatpush1.bf16.msra.mxu1 %v8295_v49 }
 0x218   :  { %3991 = vmatprep.subr.bf16.mxu0 %v8296_v50  ;;  %4417 = vmatprep.subr.bf16.mxu1 %v8297_v51 }
 0x21b   :  { %3992 = vmatpush1.bf16.msra.mxu0 %v8298_v52  ;;  %4418 = vmatpush1.bf16.msra.mxu1 %v8299_v53  ;;  %v8334_v52 = vld [vmem:[%s11835_s2 + $0x6a0] ss:$16 sps:$4 sm:$0xff]  }
 0x21c   :  { %3993 = vmatprep.subr.bf16.mxu0 %v8300_v54  ;;  %4419 = vmatprep.subr.bf16.mxu1 %v8301_v55 }
 0x21f   :  { %3994 = vmatpush1.bf16.msra.mxu0 %v8302_v57  ;;  %4420 = vmatpush1.bf16.msra.mxu1 %v8303_v58  ;;  %v8336_v58 = vld [vmem:[%s11835_s2 + $0x6c4] ss:$16 sps:$4 sm:$0xff]  }
 0x220   :  { %3995 = vmatprep.subr.bf16.mxu0 %v8304_v59  ;;  %4421 = vmatprep.subr.bf16.mxu1 %v8305_v60 }
 0x223   :  { %3996 = vmatpush1.bf16.msra.mxu0 %v8306_v62  ;;  %4422 = vmatpush1.bf16.msra.mxu1 %v8307_v63 }
 0x224   :  { %3997 = vmatprep.subr.bf16.mxu0 %v8308_v0  ;;  %4423 = vmatprep.subr.bf16.mxu1 %v8309_v4  ;;  %v8337_v0 = vld [vmem:[%s11835_s2 + $0x6cc] ss:$16 sps:$4 sm:$0xff]  }
 0x225   :  { %v7981_v4 = vld [vmem:[%s11837_s1 + $0x1c] ss:$48 sps:$4 sm:$0xff]  }
 0x227   :  { %3998 = vmatpush1.bf16.msra.mxu0 %v8310_v7  ;;  %4424 = vmatpush1.bf16.msra.mxu1 %v8311_v9 }
 0x228   :  { %4038 = vmatprep.subr.bf16.mxu0 %v8312_v10  ;;  %4464 = vmatprep.subr.bf16.mxu1 %v8313_v11 }
 0x22a   :  { %4000 = vmatmul.mubr.bf16.vlgmr.msra.gmra.mrb[16].mxu0 %v7968_v6  ;;  %4426 = vmatmul.mubr.bf16.vlgmr.msra.gmra.mrb[16].mxu1 %v7968_v6 }
 0x22b   :  { %4039 = vmatpush1.bf16.msra.mxu0 %v8314_v13  ;;  %4465 = vmatpush1.bf16.msra.mxu1 %v8315_v14  ;;  %v8339_v13 = vld [vmem:[%s11835_s2 + $0x6c8] ss:$16 sps:$4 sm:$0xff]  }
 0x22c   :  { %4040 = vmatprep.subr.bf16.mxu0 %v8316_v15  ;;  %4466 = vmatprep.subr.bf16.mxu1 %v8317_v16  ;;  %v8340_v15 = vld [vmem:[%s11835_s2 + $0x6e4] ss:$16 sps:$4 sm:$0xff]   ;;  %v8341_v16 = vld [vmem:[%s11835_s2 + $0x6ec] ss:$16 sps:$4 sm:$0xff]  }
 0x22d   :  { %4009 = vmatprep.mubr.bf16.mxu0 %v7971_v12  ;;  %4435 = vmatprep.mubr.bf16.mxu1 %v7971_v12  ;;  %v8338_v12 = vld [vmem:[%s11835_s2 + $0x6c0] ss:$16 sps:$4 sm:$0xff]  }
 0x22f   :  { %4041 = vmatpush1.bf16.msra.mxu0 %v8318_v18  ;;  %4467 = vmatpush1.bf16.msra.mxu1 %v8319_v19 }
 0x230   :  { %4042 = vmatprep.subr.bf16.mxu0 %v8320_v20  ;;  %4468 = vmatprep.subr.bf16.mxu1 %v8321_v21 }
 0x232   :  { %4010 = vmatmul.mubr.bf16.gmra.mrb[20].mxu0 %v7973_v17  ;;  %4436 = vmatmul.mubr.bf16.gmra.mrb[20].mxu1 %v7973_v17 }
 0x233   :  { %4043 = vmatpush1.bf16.msra.mxu0 %v8322_v23  ;;  %4469 = vmatpush1.bf16.msra.mxu1 %v8323_v24 }
 0x234   :  { %4044 = vmatprep.subr.bf16.mxu0 %v8324_v25  ;;  %4470 = vmatprep.subr.bf16.mxu1 %v8325_v26 }
 0x235   :  { %4019 = vmatprep.mubr.bf16.mxu0 %v7974_v22  ;;  %4445 = vmatprep.mubr.bf16.mxu1 %v7974_v22 }
 0x237   :  { %4045 = vmatpush1.bf16.msra.mxu0 %v8326_v30  ;;  %4471 = vmatpush1.bf16.msra.mxu1 %v8327_v31 }
 0x238   :  { %4046 = vmatprep.subr.bf16.mxu0 %v8328_v33  ;;  %4472 = vmatprep.subr.bf16.mxu1 %v8329_v34 }
 0x23a   :  { %4020 = vmatmul.mubr.bf16.gmra.mrb[24].mxu0 %v7976_v28  ;;  %4446 = vmatmul.mubr.bf16.gmra.mrb[24].mxu1 %v7976_v28  ;;  %v8342_v28 = vld [vmem:[%s11835_s2 + $0x6e0] ss:$16 sps:$4 sm:$0xff]  }
 0x23b   :  { %4047 = vmatpush1.bf16.msra.mxu0 %v8330_v56  ;;  %4473 = vmatpush1.bf16.msra.mxu1 %v8331_v37 }
 0x23c   :  { %4048 = vmatprep.subr.bf16.mxu0 %v8332_v40  ;;  %4474 = vmatprep.subr.bf16.mxu1 %v8333_v41 }
 0x23d   :  { %v10495_v42 = vpop.f32.mrb[0].mxu0  ;;  %v3285_v43 = vpop.f32.mrb[0].mxu1  ;;  %4029 = vmatprep.mubr.bf16.mxu0 %v6584_v35  ;;  %4455 = vmatprep.mubr.bf16.mxu1 %v6584_v35  ;;  %v8344_v35 = vld [vmem:[%s11835_s2 + $0x704] ss:$16 sps:$4 sm:$0xff]  }
 0x23e   :  { %v3345_v61 = vmul.f32 %v10475_v36, %v3285_v43  ;;  %v2861_v45 = vpop.f32.mrb[1].mxu0  ;;  %v3287_v46 = vpop.f32.mrb[1].mxu1 }
 0x23f   :  { %v3344_v48 = vmul.f32 %v10050_v3, %v2861_v45  ;;  %v3346_v49 = vmul.f32 %v10484_v38, %v3287_v46  ;;  %v10503_v50 = vpop.f32.mrb[2].mxu0  ;;  %v3289_v51 = vpop.f32.mrb[2].mxu1  ;;  %4049 = vmatpush1.bf16.msra.mxu0 %v8334_v52  ;;  %4475 = vmatpush1.bf16.msra.mxu1 %v8335_v1  ;;  %v8345_v45 = vld [vmem:[%s11835_s2 + $0x70c] ss:$16 sps:$4 sm:$0xff]   ;;  %v8348_v1 = vld [vmem:[%s11835_s2 + $0x724] ss:$16 sps:$4 sm:$0xff]  }
 0x240   :  { %v3394_v53 = vadd.f32 %v10487_v39, %v3345_v61  ;;  %v3349_v54 = vmul.f32 %v10475_v36, %v3289_v51  ;;  %v2865_v55 = vpop.f32.mrb[3].mxu0  ;;  %v3291_v57 = vpop.f32.mrb[3].mxu1  ;;  %4050 = vmatprep.subr.bf16.mxu0 %v8336_v58  ;;  %4476 = vmatprep.subr.bf16.mxu1 %v8337_v0  ;;  %v8347_v51 = vld [vmem:[%s11835_s2 + $0x708] ss:$16 sps:$4 sm:$0xff]  }
 0x241   :  { %v10517_v59 = vadd.f32 %v10062_v8, %v3344_v48  ;;  %v3395_v60 = vadd.f32 %v10498_v44, %v3346_v49  ;;  %v3348_v62 = vmul.f32 %v10050_v3, %v2865_v55  ;;  %v3350_v63 = vmul.f32 %v10484_v38, %v3291_v57  ;;  %v8346_v49 = vld [vmem:[%s11835_s2 + $0x700] ss:$16 sps:$4 sm:$0xff]  }
 0x242   :  { %v3422_v6 = vmax.f32 %v3394_v53, 0.0  ;;  %v3398_v7 = vadd.f32 %v10487_v39, %v3349_v54  ;;  %4030 = vmatmul.mubr.bf16.gmra.mrb[28].mxu0 %v6583_v47  ;;  %4456 = vmatmul.mubr.bf16.gmra.mrb[28].mxu1 %v6583_v47  ;;  %v8349_v53 = vld [vmem:[%s11835_s2 + $0x72c] ss:$16 sps:$4 sm:$0xff]  }
 0x243   :  { %v3423_v9 = vmax.f32 %v3395_v60, 0.0  ;;  %v10530_v10 = vadd.f32 %v10062_v8, %v3348_v62  ;;  %v3399_v11 = vadd.f32 %v10498_v44, %v3350_v63  ;;  %4051 = vmatpush1.bf16.msra.mxu0 %v8338_v12  ;;  %4477 = vmatpush1.bf16.msra.mxu1 %v8339_v13 }
 0x244   :  { %v3426_v14 = vmax.f32 %v3398_v7, 0.0  ;;  %4052 = vmatprep.subr.bf16.mxu0 %v8340_v15  ;;  %4478 = vmatprep.subr.bf16.mxu1 %v8341_v16 }
 0x245   :  { %v3427_v17 = vmax.f32 %v3399_v11, 0.0  ;;  %v10545_v18 = vpop.f32.mrb[4].mxu0  ;;  %v3295_v19 = vpop.f32.mrb[4].mxu1  ;;  %4070 = vmatprep.mubr.bf16.mxu0 %v7981_v4  ;;  %4496 = vmatprep.mubr.bf16.mxu1 %v7981_v4  ;;  %v10547_v20 = vpack.i.bf16 %v3423_v9, %v3422_v6  ;;  %v8350_v9 = vld [vmem:[%s11835_s2 + $0x720] ss:$16 sps:$4 sm:$0xff]  }
 0x246   :  { %v3353_v21 = vmul.f32 %v10475_v36, %v3295_v19  ;;  %v2871_v22 = vpop.f32.mrb[5].mxu0  ;;  %v3297_v23 = vpop.f32.mrb[5].mxu1  ;;  %v8351_v11 = vld [vmem:[%s11835_s2 + $0x728] ss:$16 sps:$4 sm:$0xff]  }
 0x247   :  { %v3352_v24 = vmul.f32 %v10050_v3, %v2871_v22  ;;  %v3354_v25 = vmul.f32 %v10484_v38, %v3297_v23  ;;  %v10552_v26 = vpop.f32.mrb[6].mxu0  ;;  %v3299_v27 = vpop.f32.mrb[6].mxu1  ;;  %4053 = vmatpush1.bf16.msra.mxu0 %v8342_v28  ;;  %4479 = vmatpush1.bf16.msra.mxu1 %v8343_v29  ;;  %v7235_v30 = vpack.i.bf16 %v3427_v17, %v3426_v14  ;;  %v8352_v17 = vld [vmem:[%s11835_s2 + $0x744] ss:$16 sps:$4 sm:$0xff]  }
 0x248   :  { %v3402_v31 = vadd.f32 %v10487_v39, %v3353_v21  ;;  %v3357_v32 = vmul.f32 %v10475_v36, %v3299_v27  ;;  %v2875_v33 = vpop.f32.mrb[7].mxu0  ;;  %v3301_v34 = vpop.f32.mrb[7].mxu1  ;;  %4054 = vmatprep.subr.bf16.mxu0 %v8344_v35  ;;  %4480 = vmatprep.subr.bf16.mxu1 %v8345_v45  ;;  %v8357_v35 = vld [vmem:[%s11835_s2 + $0x76c] ss:$16 sps:$4 sm:$0xff]  }
 0x249   :  { %v10566_v56 = vadd.f32 %v10062_v8, %v3352_v24  ;;  %v3403_v37 = vadd.f32 %v10498_v44, %v3354_v25  ;;  %v3356_v40 = vmul.f32 %v10050_v3, %v2875_v33  ;;  %v3358_v41 = vmul.f32 %v10484_v38, %v3301_v34  ;;  %7236 = vrot.lane.b32.xlu0 %v7235_v30, %s8480_s26  ;;  %v8353_v24 = vld [vmem:[%s11835_s2 + $0x74c] ss:$16 sps:$4 sm:$0xff]   ;;  %v8356_v34 = vld [vmem:[%s11835_s2 + $0x764] ss:$16 sps:$4 sm:$0xff]  }
 0x24a   :  { %v3430_v43 = vmax.f32 %v3402_v31, 0.0  ;;  %v3406_v61 = vadd.f32 %v10487_v39, %v3357_v32  ;;  %v8354_v31 = vld [vmem:[%s11835_s2 + $0x740] ss:$16 sps:$4 sm:$0xff]   ;;  %v8355_v32 = vld [vmem:[%s11835_s2 + $0x748] ss:$16 sps:$4 sm:$0xff]  }
 0x24b   :  { %v3431_v46 = vmax.f32 %v3403_v37, 0.0  ;;  %v10577_v47 = vadd.f32 %v10062_v8, %v3356_v40  ;;  %v3407_v48 = vadd.f32 %v10498_v44, %v3358_v41  ;;  %4055 = vmatpush1.bf16.msra.mxu0 %v8346_v49  ;;  %4481 = vmatpush1.bf16.msra.mxu1 %v8347_v51 }
 0x24c   :  { %v3434_v52 = vmax.f32 %v3406_v61, 0.0  ;;  %4056 = vmatprep.subr.bf16.mxu0 %v8348_v1  ;;  %4482 = vmatprep.subr.bf16.mxu1 %v8349_v53  ;;  %v8358_v1 = vld [vmem:[%s11835_s2 + $0x760] ss:$16 sps:$4 sm:$0xff]   ;;  %v8359_v53 = vld [vmem:[%s11835_s2 + $0x768] ss:$16 sps:$4 sm:$0xff]  }
 0x24d   :  { %v3435_v54 = vmax.f32 %v3407_v48, 0.0  ;;  %v10592_v55 = vpop.f32.mrb[8].mxu0  ;;  %v3305_v57 = vpop.f32.mrb[8].mxu1  ;;  %v10594_v58 = vpack.i.bf16 %v3431_v46, %v3430_v43 }
 0x24e   :  { %v3361_v60 = vmul.f32 %v10475_v36, %v3305_v57  ;;  %v2881_v62 = vpop.f32.mrb[9].mxu0  ;;  %v3307_v63 = vpop.f32.mrb[9].mxu1 }
 0x24f   :  { %v3360_v0 = vmul.f32 %v10050_v3, %v2881_v62  ;;  %v3362_v4 = vmul.f32 %v10484_v38, %v3307_v63  ;;  %v10599_v6 = vpop.f32.mrb[10].mxu0  ;;  %v3309_v7 = vpop.f32.mrb[10].mxu1  ;;  %4057 = vmatpush1.bf16.msra.mxu0 %v8350_v9  ;;  %4483 = vmatpush1.bf16.msra.mxu1 %v8351_v11  ;;  %v10607_v12 = vpack.i.bf16 %v3435_v54, %v3434_v52  ;;  %v8360_v63 = vld [vmem:[%s11835_s2 + $0x784] ss:$16 sps:$4 sm:$0xff]  }
 0x250   :  { %v3410_v13 = vadd.f32 %v10487_v39, %v3361_v60  ;;  %v3365_v14 = vmul.f32 %v10475_v36, %v3309_v7  ;;  %v2885_v15 = vpop.f32.mrb[11].mxu0  ;;  %v3311_v16 = vpop.f32.mrb[11].mxu1  ;;  %4058 = vmatprep.subr.bf16.mxu0 %v8352_v17  ;;  %4484 = vmatprep.subr.bf16.mxu1 %v8353_v24  ;;  %v8369_v24 = vld [vmem:[%s11835_s2 + $0x7cc] ss:$16 sps:$4 sm:$0xff]  }
 0x251   :  { %v10615_v19 = vadd.f32 %v10062_v8, %v3360_v0  ;;  %v3411_v21 = vadd.f32 %v10498_v44, %v3362_v4  ;;  %v3364_v22 = vmul.f32 %v10050_v3, %v2885_v15  ;;  %v3366_v23 = vmul.f32 %v10484_v38, %v3311_v16  ;;  %v8361_v0 = vld [vmem:[%s11835_s2 + $0x78c] ss:$16 sps:$4 sm:$0xff]   ;;  %v8364_v15 = vld [vmem:[%s11835_s2 + $0x7a4] ss:$16 sps:$4 sm:$0xff]  }
 0x252   :  { %v3438_v25 = vmax.f32 %v3410_v13, 0.0  ;;  %v3414_v27 = vadd.f32 %v10487_v39, %v3365_v14  ;;  %v8362_v13 = vld [vmem:[%s11835_s2 + $0x780] ss:$16 sps:$4 sm:$0xff]   ;;  %v8363_v14 = vld [vmem:[%s11835_s2 + $0x788] ss:$16 sps:$4 sm:$0xff]  }
 0x253   :  { %v3439_v28 = vmax.f32 %v3411_v21, 0.0  ;;  %v10625_v29 = vadd.f32 %v10062_v8, %v3364_v22  ;;  %v3415_v30 = vadd.f32 %v10498_v44, %v3366_v23  ;;  %4059 = vmatpush1.bf16.msra.mxu0 %v8354_v31  ;;  %4485 = vmatpush1.bf16.msra.mxu1 %v8355_v32  ;;  %v8365_v16 = vld [vmem:[%s11835_s2 + $0x7ac] ss:$16 sps:$4 sm:$0xff]   ;;  %v8366_v21 = vld [vmem:[%s11835_s2 + $0x7a0] ss:$16 sps:$4 sm:$0xff]  }
 0x254   :  { %v3442_v33 = vmax.f32 %v3414_v27, 0.0  ;;  %4060 = vmatprep.subr.bf16.mxu0 %v8356_v34  ;;  %4486 = vmatprep.subr.bf16.mxu1 %v8357_v35  ;;  %v8367_v22 = vld [vmem:[%s11835_s2 + $0x7a8] ss:$16 sps:$4 sm:$0xff]   ;;  %v8368_v23 = vld [vmem:[%s11835_s2 + $0x7c4] ss:$16 sps:$4 sm:$0xff]  }
 0x255   :  { %v3443_v37 = vmax.f32 %v3415_v30, 0.0  ;;  %v10640_v40 = vpop.f32.mrb[12].mxu0  ;;  %v3315_v41 = vpop.f32.mrb[12].mxu1  ;;  %v10642_v43 = vpack.i.bf16 %v3439_v28, %v3438_v25  ;;  %v8370_v25 = vld [vmem:[%s11835_s2 + $0x7c0] ss:$16 sps:$4 sm:$0xff]  }
 0x256   :  { %v3369_v61 = vmul.f32 %v10475_v36, %v3315_v41  ;;  %v2891_v45 = vpop.f32.mrb[13].mxu0  ;;  %v3317_v46 = vpop.f32.mrb[13].mxu1  ;;  %v8371_v27 = vld [vmem:[%s11835_s2 + $0x7c8] ss:$16 sps:$4 sm:$0xff]   ;;  %v8372_v28 = vld [vmem:[%s11835_s2 + $0x7e4] ss:$16 sps:$4 sm:$0xff]  }
 0x257   :  { %v3368_v48 = vmul.f32 %v10050_v3, %v2891_v45  ;;  %v3370_v49 = vmul.f32 %v10484_v38, %v3317_v46  ;;  %v2893_v51 = vpop.f32.mrb[14].mxu0  ;;  %v3319_v52 = vpop.f32.mrb[14].mxu1  ;;  %4061 = vmatpush1.bf16.msra.mxu0 %v8358_v1  ;;  %4487 = vmatpush1.bf16.msra.mxu1 %v8359_v53  ;;  %v10653_v54 = vpack.i.bf16 %v3443_v37, %v3442_v33  ;;  %v8373_v30 = vld [vmem:[%s11835_s2 + $0x7ec] ss:$16 sps:$4 sm:$0xff]   ;;  %v7979_v31 = vld [vmem:[%s11837_s1 + $0x18] ss:$48 sps:$4 sm:$0xff]  }
 0x258   :  { %v3418_v57 = vadd.f32 %v10487_v39, %v3369_v61  ;;  %v2894_v60 = vpop.f32.mrb[15].mxu0  ;;  %v3320_v62 = vpop.f32.mrb[15].mxu1  ;;  %4062 = vmatprep.subr.bf16.mxu0 %v8360_v63  ;;  %4488 = vmatprep.subr.bf16.mxu1 %v8361_v0  ;;  %v8374_v32 = vld [vmem:[%s11835_s2 + $0x7e0] ss:$16 sps:$4 sm:$0xff]   ;;  %v8375_v33 = vld [vmem:[%s11835_s2 + $0x7e8] ss:$16 sps:$4 sm:$0xff]  }
 0x259   :  { %v10663_v4 = vadd.f32 %v10062_v8, %v3368_v48  ;;  %v3419_v7 = vadd.f32 %v10498_v44, %v3370_v49  ;;  %v8376_v34 = vld [vmem:[%s11835_s2 + $0x804] ss:$16 sps:$4 sm:$0xff]   ;;  %v8377_v35 = vld [vmem:[%s11835_s2 + $0x80c] ss:$16 sps:$4 sm:$0xff]   ;;  %v8378_v41 = vld [vmem:[%s11835_s2 + $0x800] ss:$16 sps:$4 sm:$0xff]  }
 0x25a   :  { %v3446_v9 = vmax.f32 %v3418_v57, 0.0  ;;  %v7982_v37 = vld [vmem:[%s11837_s1 + $0x7c] ss:$48 sps:$4 sm:$0xff]   ;;  %v8379_v61 = vld [vmem:[%s11835_s2 + $0x808] ss:$16 sps:$4 sm:$0xff]  }
 0x25b   :  { %v3447_v11 = vmax.f32 %v3419_v7, 0.0  ;;  %4063 = vmatpush1.bf16.msra.mxu0 %v8362_v13  ;;  %4489 = vmatpush1.bf16.msra.mxu1 %v8363_v14  ;;  %v8380_v45 = vld [vmem:[%s11835_s2 + $0x824] ss:$16 sps:$4 sm:$0xff]   ;;  %v8381_v46 = vld [vmem:[%s11835_s2 + $0x82c] ss:$16 sps:$4 sm:$0xff]  }
 0x25c   :  { %4064 = vmatprep.subr.bf16.mxu0 %v8364_v15  ;;  %4490 = vmatprep.subr.bf16.mxu1 %v8365_v16  ;;  %v7984_v48 = vld [vmem:[%s11837_s1 + $0x78] ss:$48 sps:$4 sm:$0xff]   ;;  %v8382_v49 = vld [vmem:[%s11835_s2 + $0x820] ss:$16 sps:$4 sm:$0xff]   ;;  %v8384_v52 = vld [vmem:[%s11835_s2 + $0x844] ss:$16 sps:$4 sm:$0xff]  }
 0x25d   :  { %v10678_v17 = vpack.i.bf16 %v3447_v11, %v3446_v9  ;;  %v8383_v51 = vld [vmem:[%s11835_s2 + $0x828] ss:$16 sps:$4 sm:$0xff]   ;;  %v8385_v1 = vld [vmem:[%s11835_s2 + $0x84c] ss:$16 sps:$4 sm:$0xff]   ;;  %v8386_v57 = vld [vmem:[%s11835_s2 + $0x840] ss:$16 sps:$4 sm:$0xff]  }
 0x25e   :  { %v7985_v53 = vld [vmem:[%s11837_s1 + $0xdc] ss:$48 sps:$4 sm:$0xff]   ;;  %v8387_v60 = vld [vmem:[%s11835_s2 + $0x848] ss:$16 sps:$4 sm:$0xff]   ;;  %v8388_v62 = vld [vmem:[%s11835_s2 + $0x864] ss:$16 sps:$4 sm:$0xff]  }
 0x25f   :  { %4065 = vmatpush1.bf16.msra.mxu0 %v8366_v21  ;;  %4491 = vmatpush1.bf16.msra.mxu1 %v8367_v22  ;;  %v8389_v63 = vld [vmem:[%s11835_s2 + $0x86c] ss:$16 sps:$4 sm:$0xff]   ;;  %v7987_v0 = vld [vmem:[%s11837_s1 + $0xd8] ss:$48 sps:$4 sm:$0xff]   ;;  %v8390_v9 = vld [vmem:[%s11835_s2 + $0x860] ss:$16 sps:$4 sm:$0xff]  }
 0x260   :  { %4066 = vmatprep.subr.bf16.mxu0 %v8368_v23  ;;  %4492 = vmatprep.subr.bf16.mxu1 %v8369_v24  ;;  %v3592_v7 = vld [vmem:[%s11837_s1 + $0x138] sm:$0xff]  ;;  %v8392_v13 = vld [vmem:[%s11835_s2 + $0x884] ss:$16 sps:$4 sm:$0xff]   ;;  %v8394_v16 = vld [vmem:[%s11835_s2 + $0x880] ss:$16 sps:$4 sm:$0xff]  }
 0x261   :  { %v8391_v11 = vld [vmem:[%s11835_s2 + $0x868] ss:$16 sps:$4 sm:$0xff]   ;;  %v8393_v14 = vld [vmem:[%s11835_s2 + $0x88c] ss:$16 sps:$4 sm:$0xff]   ;;  %v6586_v15 = vcombine.high %v3592_v7, %v3592_v7  ;;  %v8396_v22 = vld [vmem:[%s11835_s2 + $0x8a4] ss:$16 sps:$4 sm:$0xff]   ;;  %v6585_v24 = vcombine.low %v3592_v7, %v3592_v7 }
 0x262   :  { %v8395_v21 = vld [vmem:[%s11835_s2 + $0x888] ss:$16 sps:$4 sm:$0xff]   ;;  %v8397_v23 = vld [vmem:[%s11835_s2 + $0x8ac] ss:$16 sps:$4 sm:$0xff]   ;;  %v8422_v7 = vld [vmem:[%s11835_s2 + $0x960] ss:$16 sps:$4 sm:$0xff]  }
 0x263   :  { %4067 = vmatpush1.bf16.msra.mxu0 %v8370_v25  ;;  %4493 = vmatpush1.bf16.msra.mxu1 %v8371_v27  ;;  %v8398_v25 = vld [vmem:[%s11835_s2 + $0x8a0] ss:$16 sps:$4 sm:$0xff]   ;;  %v8399_v27 = vld [vmem:[%s11835_s2 + $0x8a8] ss:$16 sps:$4 sm:$0xff]  }
 0x264   :  { %4068 = vmatprep.subr.bf16.mxu0 %v8372_v28  ;;  %4494 = vmatprep.subr.bf16.mxu1 %v8373_v30  ;;  %v8400_v28 = vld [vmem:[%s11835_s2 + $0x8c4] ss:$16 sps:$4 sm:$0xff]   ;;  %v8401_v30 = vld [vmem:[%s11835_s2 + $0x8cc] ss:$16 sps:$4 sm:$0xff]  }
 0x267   :  { %4069 = vmatpush1.bf16.msra.mxu0 %v8374_v32  ;;  %4495 = vmatpush1.bf16.msra.mxu1 %v8375_v33  ;;  %v8402_v32 = vld [vmem:[%s11835_s2 + $0x8c0] ss:$16 sps:$4 sm:$0xff]   ;;  %v8403_v33 = vld [vmem:[%s11835_s2 + $0x8c8] ss:$16 sps:$4 sm:$0xff]  }
 0x268   :  { %4109 = vmatprep.subr.bf16.mxu0 %v8376_v34  ;;  %4535 = vmatprep.subr.bf16.mxu1 %v8377_v35  ;;  %v8404_v34 = vld [vmem:[%s11835_s2 + $0x8e4] ss:$16 sps:$4 sm:$0xff]   ;;  %v8405_v35 = vld [vmem:[%s11835_s2 + $0x8ec] ss:$16 sps:$4 sm:$0xff]  }
 0x26a   :  { %4071 = vmatmul.mubr.bf16.vlgmr.msra.gmra.mrb[16].mxu0 %v7979_v31  ;;  %4497 = vmatmul.mubr.bf16.vlgmr.msra.gmra.mrb[16].mxu1 %v7979_v31  ;;  %v7992_v31 = vld [vmem:[%s11837_s1 + $0x24] ss:$48 sps:$4 sm:$0xff]  }
 0x26b   :  { %4110 = vmatpush1.bf16.msra.mxu0 %v8378_v41  ;;  %4536 = vmatpush1.bf16.msra.mxu1 %v8379_v61  ;;  %v8407_v41 = vld [vmem:[%s11835_s2 + $0x8e8] ss:$16 sps:$4 sm:$0xff]   ;;  %v8408_v61 = vld [vmem:[%s11835_s2 + $0x904] ss:$16 sps:$4 sm:$0xff]  }
 0x26c   :  { %4111 = vmatprep.subr.bf16.mxu0 %v8380_v45  ;;  %4537 = vmatprep.subr.bf16.mxu1 %v8381_v46  ;;  %v8409_v45 = vld [vmem:[%s11835_s2 + $0x90c] ss:$16 sps:$4 sm:$0xff]   ;;  %v8410_v46 = vld [vmem:[%s11835_s2 + $0x900] ss:$16 sps:$4 sm:$0xff]  }
 0x26d   :  { %4080 = vmatprep.mubr.bf16.mxu0 %v7982_v37  ;;  %4506 = vmatprep.mubr.bf16.mxu1 %v7982_v37  ;;  %v8406_v37 = vld [vmem:[%s11835_s2 + $0x8e0] ss:$16 sps:$4 sm:$0xff]  }
 0x26f   :  { %4112 = vmatpush1.bf16.msra.mxu0 %v8382_v49  ;;  %4538 = vmatpush1.bf16.msra.mxu1 %v8383_v51  ;;  %v8412_v49 = vld [vmem:[%s11835_s2 + $0x924] ss:$16 sps:$4 sm:$0xff]   ;;  %v8413_v51 = vld [vmem:[%s11835_s2 + $0x92c] ss:$16 sps:$4 sm:$0xff]  }
 0x270   :  { %4113 = vmatprep.subr.bf16.mxu0 %v8384_v52  ;;  %4539 = vmatprep.subr.bf16.mxu1 %v8385_v1  ;;  %v8414_v52 = vld [vmem:[%s11835_s2 + $0x920] ss:$16 sps:$4 sm:$0xff]   ;;  %v8415_v1 = vld [vmem:[%s11835_s2 + $0x928] ss:$16 sps:$4 sm:$0xff]  }
 0x272   :  { %4081 = vmatmul.mubr.bf16.gmra.mrb[20].mxu0 %v7984_v48  ;;  %4507 = vmatmul.mubr.bf16.gmra.mrb[20].mxu1 %v7984_v48  ;;  %v8411_v48 = vld [vmem:[%s11835_s2 + $0x908] ss:$16 sps:$4 sm:$0xff]  }
 0x273   :  { %4114 = vmatpush1.bf16.msra.mxu0 %v8386_v57  ;;  %4540 = vmatpush1.bf16.msra.mxu1 %v8387_v60  ;;  %v8417_v57 = vld [vmem:[%s11835_s2 + $0x94c] ss:$16 sps:$4 sm:$0xff]   ;;  %v8418_v60 = vld [vmem:[%s11835_s2 + $0x940] ss:$16 sps:$4 sm:$0xff]  }
 0x274   :  { %4115 = vmatprep.subr.bf16.mxu0 %v8388_v62  ;;  %4541 = vmatprep.subr.bf16.mxu1 %v8389_v63  ;;  %v8419_v62 = vld [vmem:[%s11835_s2 + $0x948] ss:$16 sps:$4 sm:$0xff]   ;;  %v8420_v63 = vld [vmem:[%s11835_s2 + $0x964] ss:$16 sps:$4 sm:$0xff]  }
 0x275   :  { %4090 = vmatprep.mubr.bf16.mxu0 %v7985_v53  ;;  %4516 = vmatprep.mubr.bf16.mxu1 %v7985_v53  ;;  %v8416_v53 = vld [vmem:[%s11835_s2 + $0x944] ss:$16 sps:$4 sm:$0xff]  }
 0x277   :  { %4116 = vmatpush1.bf16.msra.mxu0 %v8390_v9  ;;  %4542 = vmatpush1.bf16.msra.mxu1 %v8391_v11  ;;  %v8423_v9 = vld [vmem:[%s11835_s2 + $0x968] ss:$16 sps:$4 sm:$0xff]   ;;  %v8424_v11 = vld [vmem:[%s11835_s2 + $0x984] ss:$16 sps:$4 sm:$0xff]  }
 0x278   :  { %4117 = vmatprep.subr.bf16.mxu0 %v8392_v13  ;;  %4543 = vmatprep.subr.bf16.mxu1 %v8393_v14  ;;  %v8425_v13 = vld [vmem:[%s11835_s2 + $0x98c] ss:$16 sps:$4 sm:$0xff]   ;;  %v8426_v14 = vld [vmem:[%s11835_s2 + $0x980] ss:$16 sps:$4 sm:$0xff]  }
 0x27a   :  { %4091 = vmatmul.mubr.bf16.gmra.mrb[24].mxu0 %v7987_v0  ;;  %4517 = vmatmul.mubr.bf16.gmra.mrb[24].mxu1 %v7987_v0  ;;  %v8421_v0 = vld [vmem:[%s11835_s2 + $0x96c] ss:$16 sps:$4 sm:$0xff]  }
 0x27b   :  { %4118 = vmatpush1.bf16.msra.mxu0 %v8394_v16  ;;  %4544 = vmatpush1.bf16.msra.mxu1 %v8395_v21  ;;  %v8428_v16 = vld [vmem:[%s11835_s2 + $0x9a4] ss:$16 sps:$4 sm:$0xff]   ;;  %v8429_v21 = vld [vmem:[%s11835_s2 + $0x9ac] ss:$16 sps:$4 sm:$0xff]  }
 0x27c   :  { %4119 = vmatprep.subr.bf16.mxu0 %v8396_v22  ;;  %4545 = vmatprep.subr.bf16.mxu1 %v8397_v23  ;;  %v8430_v22 = vld [vmem:[%s11835_s2 + $0x9a0] ss:$16 sps:$4 sm:$0xff]   ;;  %v8431_v23 = vld [vmem:[%s11835_s2 + $0x9a8] ss:$16 sps:$4 sm:$0xff]  }
 0x27d   :  { %4100 = vmatprep.mubr.bf16.mxu0 %v6586_v15  ;;  %4526 = vmatprep.mubr.bf16.mxu1 %v6586_v15  ;;  %v8427_v15 = vld [vmem:[%s11835_s2 + $0x988] ss:$16 sps:$4 sm:$0xff]  }
 0x27f   :  { %4120 = vmatpush1.bf16.msra.mxu0 %v8398_v25  ;;  %4546 = vmatpush1.bf16.msra.mxu1 %v8399_v27  ;;  %v8433_v25 = vld [vmem:[%s11835_s2 + $0x9cc] ss:$16 sps:$4 sm:$0xff]   ;;  %v8434_v27 = vld [vmem:[%s11835_s2 + $0x9c0] ss:$16 sps:$4 sm:$0xff]  }
 0x280   :  { %4121 = vmatprep.subr.bf16.mxu0 %v8400_v28  ;;  %4547 = vmatprep.subr.bf16.mxu1 %v8401_v30  ;;  %v8435_v28 = vld [vmem:[%s11835_s2 + $0x9c8] ss:$16 sps:$4 sm:$0xff]   ;;  %v8436_v30 = vld [vmem:[%s11835_s2 + $0x9e4] ss:$16 sps:$4 sm:$0xff]  }
 0x282   :  { %4101 = vmatmul.mubr.bf16.gmra.mrb[28].mxu0 %v6585_v24  ;;  %4527 = vmatmul.mubr.bf16.gmra.mrb[28].mxu1 %v6585_v24  ;;  %v8432_v24 = vld [vmem:[%s11835_s2 + $0x9c4] ss:$16 sps:$4 sm:$0xff]  }
 0x283   :  { %4122 = vmatpush1.bf16.msra.mxu0 %v8402_v32  ;;  %4548 = vmatpush1.bf16.msra.mxu1 %v8403_v33  ;;  %v7990_v32 = vld [vmem:[%s11837_s1 + $0x20] ss:$48 sps:$4 sm:$0xff]  }
 0x284   :  { %4123 = vmatprep.subr.bf16.mxu0 %v8404_v34  ;;  %4549 = vmatprep.subr.bf16.mxu1 %v8405_v35  ;;  %v8438_v33 = vld [vmem:[%s11835_s2 + $0x9e0] ss:$16 sps:$4 sm:$0xff]   ;;  %v8439_v34 = vld [vmem:[%s11835_s2 + $0x9e8] ss:$16 sps:$4 sm:$0xff]   ;;  %v8440_v35 = vld [vmem:[%s11835_s2 + $0xa04] ss:$16 sps:$4 sm:$0xff]  }
 0x285   :  { %4141 = vmatprep.mubr.bf16.mxu0 %v7992_v31  ;;  %4567 = vmatprep.mubr.bf16.mxu1 %v7992_v31  ;;  %v8437_v31 = vld [vmem:[%s11835_s2 + $0x9ec] ss:$16 sps:$4 sm:$0xff]  }
 0x287   :  { %4124 = vmatpush1.bf16.msra.mxu0 %v8406_v37  ;;  %4550 = vmatpush1.bf16.msra.mxu1 %v8407_v41  ;;  %v8441_v37 = vld [vmem:[%s11835_s2 + $0xa0c] ss:$16 sps:$4 sm:$0xff]   ;;  %v7993_v41 = vld [vmem:[%s11837_s1 + $0x84] ss:$48 sps:$4 sm:$0xff]  }
 0x288   :  { %4125 = vmatprep.subr.bf16.mxu0 %v8408_v61  ;;  %4551 = vmatprep.subr.bf16.mxu1 %v8409_v45  ;;  %v8442_v61 = vld [vmem:[%s11835_s2 + $0xa00] ss:$16 sps:$4 sm:$0xff]   ;;  %v8443_v45 = vld [vmem:[%s11835_s2 + $0xa08] ss:$16 sps:$4 sm:$0xff]  }
 0x28b   :  { %4126 = vmatpush1.bf16.msra.mxu0 %v8410_v46  ;;  %4552 = vmatpush1.bf16.msra.mxu1 %v8411_v48  ;;  %v8444_v46 = vld [vmem:[%s11835_s2 + $0xa24] ss:$16 sps:$4 sm:$0xff]   ;;  %v8445_v48 = vld [vmem:[%s11835_s2 + $0xa2c] ss:$16 sps:$4 sm:$0xff]  }
 0x28c   :  { %4127 = vmatprep.subr.bf16.mxu0 %v8412_v49  ;;  %4553 = vmatprep.subr.bf16.mxu1 %v8413_v51  ;;  %v7995_v49 = vld [vmem:[%s11837_s1 + $0x80] ss:$48 sps:$4 sm:$0xff]  }
 0x28d   :  { %v8446_v51 = vld [vmem:[%s11835_s2 + $0xa20] ss:$16 sps:$4 sm:$0xff]  }
 0x28f   :  { %4128 = vmatpush1.bf16.msra.mxu0 %v8414_v52  ;;  %4554 = vmatpush1.bf16.msra.mxu1 %v8415_v1  ;;  %v8447_v52 = vld [vmem:[%s11835_s2 + $0xa28] ss:$16 sps:$4 sm:$0xff]   ;;  %v8448_v1 = vld [vmem:[%s11835_s2 + $0xa44] ss:$16 sps:$4 sm:$0xff]  }
 0x290   :  { %4129 = vmatprep.subr.bf16.mxu0 %v8416_v53  ;;  %4555 = vmatprep.subr.bf16.mxu1 %v8417_v57  ;;  %v8449_v53 = vld [vmem:[%s11835_s2 + $0xa4c] ss:$16 sps:$4 sm:$0xff]   ;;  %v7996_v57 = vld [vmem:[%s11837_s1 + $0xe4] ss:$48 sps:$4 sm:$0xff]  }
 0x293   :  { %4130 = vmatpush1.bf16.msra.mxu0 %v8418_v60  ;;  %4556 = vmatpush1.bf16.msra.mxu1 %v8419_v62  ;;  %v8450_v60 = vld [vmem:[%s11835_s2 + $0xa40] ss:$16 sps:$4 sm:$0xff]   ;;  %v8451_v62 = vld [vmem:[%s11835_s2 + $0xa48] ss:$16 sps:$4 sm:$0xff]  }
 0x294   :  { %4131 = vmatprep.subr.bf16.mxu0 %v8420_v63  ;;  %4557 = vmatprep.subr.bf16.mxu1 %v8421_v0  ;;  %v8452_v63 = vld [vmem:[%s11835_s2 + $0xa64] ss:$16 sps:$4 sm:$0xff]   ;;  %v8453_v0 = vld [vmem:[%s11835_s2 + $0xa6c] ss:$16 sps:$4 sm:$0xff]  }
 0x297   :  { %4132 = vmatpush1.bf16.msra.mxu0 %v8422_v7  ;;  %4558 = vmatpush1.bf16.msra.mxu1 %v8423_v9  ;;  %v7998_v7 = vld [vmem:[%s11837_s1 + $0xe0] ss:$48 sps:$4 sm:$0xff]  }
 0x298   :  { %4133 = vmatprep.subr.bf16.mxu0 %v8424_v11  ;;  %4559 = vmatprep.subr.bf16.mxu1 %v8425_v13  ;;  %v3593_v9 = vld [vmem:[%s11837_s1 + $0x140] sm:$0xff]  ;;  %v8455_v13 = vld [vmem:[%s11835_s2 + $0xa68] ss:$16 sps:$4 sm:$0xff]  }
 0x299   :  { %v8454_v11 = vld [vmem:[%s11835_s2 + $0xa60] ss:$16 sps:$4 sm:$0xff]  }
 0x29b   :  { %4134 = vmatpush1.bf16.msra.mxu0 %v8426_v14  ;;  %4560 = vmatpush1.bf16.msra.mxu1 %v8427_v15  ;;  %v8456_v14 = vld [vmem:[%s11835_s2 + $0xa84] ss:$16 sps:$4 sm:$0xff]   ;;  %v8457_v15 = vld [vmem:[%s11835_s2 + $0xa8c] ss:$16 sps:$4 sm:$0xff]  }
 0x29c   :  { %4135 = vmatprep.subr.bf16.mxu0 %v8428_v16  ;;  %4561 = vmatprep.subr.bf16.mxu1 %v8429_v21  ;;  %v6588_v16 = vcombine.high %v3593_v9, %v3593_v9  ;;  %v8458_v21 = vld [vmem:[%s11835_s2 + $0xa88] ss:$16 sps:$4 sm:$0xff]  }
 0x29f   :  { %4136 = vmatpush1.bf16.msra.mxu0 %v8430_v22  ;;  %4562 = vmatpush1.bf16.msra.mxu1 %v8431_v23  ;;  %v8459_v22 = vld [vmem:[%s11835_s2 + $0xa80] ss:$16 sps:$4 sm:$0xff]   ;;  %v8460_v23 = vld [vmem:[%s11835_s2 + $0xaa4] ss:$16 sps:$4 sm:$0xff]  }
 0x2a0   :  { %4137 = vmatprep.subr.bf16.mxu0 %v8432_v24  ;;  %4563 = vmatprep.subr.bf16.mxu1 %v8433_v25  ;;  %v8461_v24 = vld [vmem:[%s11835_s2 + $0xaac] ss:$16 sps:$4 sm:$0xff]   ;;  %v6587_v25 = vcombine.low %v3593_v9, %v3593_v9 }
 0x2a3   :  { %4138 = vmatpush1.bf16.msra.mxu0 %v8434_v27  ;;  %4564 = vmatpush1.bf16.msra.mxu1 %v8435_v28  ;;  %v8462_v27 = vld [vmem:[%s11835_s2 + $0xaa0] ss:$16 sps:$4 sm:$0xff]   ;;  %v8463_v28 = vld [vmem:[%s11835_s2 + $0xaa8] ss:$16 sps:$4 sm:$0xff]  }
 0x2a4   :  { %4139 = vmatprep.subr.bf16.mxu0 %v8436_v30  ;;  %4565 = vmatprep.subr.bf16.mxu1 %v8437_v31  ;;  %v8464_v30 = vld [vmem:[%s11835_s2 + $0xac4] ss:$16 sps:$4 sm:$0xff]   ;;  %v8465_v31 = vld [vmem:[%s11835_s2 + $0xacc] ss:$16 sps:$4 sm:$0xff]  }
 0x2a7   :  { %4140 = vmatpush1.bf16.msra.mxu0 %v8438_v33  ;;  %4566 = vmatpush1.bf16.msra.mxu1 %v8439_v34  ;;  %v8466_v33 = vld [vmem:[%s11835_s2 + $0xac0] ss:$16 sps:$4 sm:$0xff]   ;;  %v8467_v34 = vld [vmem:[%s11835_s2 + $0xac8] ss:$16 sps:$4 sm:$0xff]  }
 0x2a8   :  { %4180 = vmatprep.subr.bf16.mxu0 %v8440_v35  ;;  %4606 = vmatprep.subr.bf16.mxu1 %v8441_v37  ;;  %v8468_v35 = vld [vmem:[%s11835_s2 + $0xae4] ss:$16 sps:$4 sm:$0xff]   ;;  %v8469_v37 = vld [vmem:[%s11835_s2 + $0xaec] ss:$16 sps:$4 sm:$0xff]  }
 0x2aa   :  { %4142 = vmatmul.mubr.bf16.vlgmr.msra.gmra.mrb[16].mxu0 %v7990_v32  ;;  %4568 = vmatmul.mubr.bf16.vlgmr.msra.gmra.mrb[16].mxu1 %v7990_v32  ;;  %v8003_v32 = vld [vmem:[%s11837_s1 + $0x2c] ss:$48 sps:$4 sm:$0xff]  }
 0x2ab   :  { %4181 = vmatpush1.bf16.msra.mxu0 %v8442_v61  ;;  %4607 = vmatpush1.bf16.msra.mxu1 %v8443_v45  ;;  %v8471_v61 = vld [vmem:[%s11835_s2 + $0xae8] ss:$16 sps:$4 sm:$0xff]   ;;  %v8472_v45 = vld [vmem:[%s11835_s2 + $0xb04] ss:$16 sps:$4 sm:$0xff]  }
 0x2ac   :  { %4182 = vmatprep.subr.bf16.mxu0 %v8444_v46  ;;  %4608 = vmatprep.subr.bf16.mxu1 %v8445_v48  ;;  %v8473_v46 = vld [vmem:[%s11835_s2 + $0xb0c] ss:$16 sps:$4 sm:$0xff]   ;;  %v8474_v48 = vld [vmem:[%s11835_s2 + $0xb00] ss:$16 sps:$4 sm:$0xff]  }
 0x2ad   :  { %4151 = vmatprep.mubr.bf16.mxu0 %v7993_v41  ;;  %4577 = vmatprep.mubr.bf16.mxu1 %v7993_v41  ;;  %v8470_v41 = vld [vmem:[%s11835_s2 + $0xae0] ss:$16 sps:$4 sm:$0xff]  }
 0x2af   :  { %4183 = vmatpush1.bf16.msra.mxu0 %v8446_v51  ;;  %4609 = vmatpush1.bf16.msra.mxu1 %v8447_v52  ;;  %v8476_v51 = vld [vmem:[%s11835_s2 + $0xb24] ss:$16 sps:$4 sm:$0xff]   ;;  %v8477_v52 = vld [vmem:[%s11835_s2 + $0xb2c] ss:$16 sps:$4 sm:$0xff]  }
 0x2b0   :  { %4184 = vmatprep.subr.bf16.mxu0 %v8448_v1  ;;  %4610 = vmatprep.subr.bf16.mxu1 %v8449_v53  ;;  %v8001_v1 = vld [vmem:[%s11837_s1 + $0x28] ss:$48 sps:$4 sm:$0xff]   ;;  %v8478_v53 = vld [vmem:[%s11835_s2 + $0xb20] ss:$16 sps:$4 sm:$0xff]  }
 0x2b2   :  { %4152 = vmatmul.mubr.bf16.gmra.mrb[20].mxu0 %v7995_v49  ;;  %4578 = vmatmul.mubr.bf16.gmra.mrb[20].mxu1 %v7995_v49  ;;  %v8475_v49 = vld [vmem:[%s11835_s2 + $0xb08] ss:$16 sps:$4 sm:$0xff]  }
 0x2b3   :  { %4185 = vmatpush1.bf16.msra.mxu0 %v8450_v60  ;;  %4611 = vmatpush1.bf16.msra.mxu1 %v8451_v62  ;;  %v8004_v60 = vld [vmem:[%s11837_s1 + $0x8c] ss:$48 sps:$4 sm:$0xff]   ;;  %v8006_v62 = vld [vmem:[%s11837_s1 + $0x88] ss:$48 sps:$4 sm:$0xff]  }
 0x2b4   :  { %4186 = vmatprep.subr.bf16.mxu0 %v8452_v63  ;;  %4612 = vmatprep.subr.bf16.mxu1 %v8453_v0  ;;  %v8007_v63 = vld [vmem:[%s11837_s1 + $0xec] ss:$48 sps:$4 sm:$0xff]  }
 0x2b5   :  { %4161 = vmatprep.mubr.bf16.mxu0 %v7996_v57  ;;  %4587 = vmatprep.mubr.bf16.mxu1 %v7996_v57  ;;  %v8479_v57 = vld [vmem:[%s11835_s2 + $0xb28] ss:$16 sps:$4 sm:$0xff]  }
 0x2b6   :  { %v3594_v0 = vld [vmem:[%s11837_s1 + $0x148] sm:$0xff] }
 0x2b7   :  { %4187 = vmatpush1.bf16.msra.mxu0 %v8454_v11  ;;  %4613 = vmatpush1.bf16.msra.mxu1 %v8455_v13  ;;  %v6590_v9 = vcombine.high %v3594_v0, %v3594_v0  ;;  %v6589_v11 = vcombine.low %v3594_v0, %v3594_v0  ;;  %v8481_v13 = vmov 0  }
 0x2b8   :  { %4188 = vmatprep.subr.bf16.mxu0 %v8456_v14  ;;  %4614 = vmatprep.subr.bf16.mxu1 %v8457_v15  ;;  %v8012_v14 = vld [vmem:[%s11840_s5 + $0x70] sm:$0xff]   ;;  %v8013_v15 = vld [vmem:[%s11840_s5 + $0x78] sm:$0xff]  }
 0x2ba   :  { %4162 = vmatmul.mubr.bf16.gmra.mrb[24].mxu0 %v7998_v7  ;;  %4588 = vmatmul.mubr.bf16.gmra.mrb[24].mxu1 %v7998_v7  ;;  %v8009_v7 = vld [vmem:[%s11837_s1 + $0xe8] ss:$48 sps:$4 sm:$0xff]  }
 0x2bb   :  { %4615 = vmatpush1.bf16.msra.mxu1 %v8458_v21  ;;  %4189 = vmatpush1.bf16.msra.mxu0 %v8459_v22  ;;  %v8016_v21 = vld [vmem:[%s11840_s5 + $0x8] sm:$0xff]   ;;  %v8015_v22 = vld [vmem:[%s11840_s5 + $0x80] sm:$0xff]  }
 0x2bc   :  { %4190 = vmatprep.subr.bf16.mxu0 %v8460_v23  ;;  %4616 = vmatprep.subr.bf16.mxu1 %v8461_v24  ;;  %v8018_v23 = vld [vmem:[%s11840_s5 + $0x10] sm:$0xff]   ;;  %v8017_v24 = vld [vmem:[%s11840_s5 + $0x88] sm:$0xff]  }
 0x2bd   :  { %4171 = vmatprep.mubr.bf16.mxu0 %v6588_v16  ;;  %4597 = vmatprep.mubr.bf16.mxu1 %v6588_v16  ;;  %v8014_v16 = vld [vmem:[%s11840_s5] sm:$0xff]  }
 0x2bf   :  { %4191 = vmatpush1.bf16.msra.mxu0 %v8462_v27  ;;  %4617 = vmatpush1.bf16.msra.mxu1 %v8463_v28  ;;  %v8019_v27 = vld [vmem:[%s11840_s5 + $0x90] sm:$0xff]   ;;  %v8022_v28 = vld [vmem:[%s11840_s5 + $0x20] sm:$0xff]  }
 0x2c0   :  { %4192 = vmatprep.subr.bf16.mxu0 %v8464_v30  ;;  %4618 = vmatprep.subr.bf16.mxu1 %v8465_v31  ;;  %v8021_v30 = vld [vmem:[%s11840_s5 + $0x98] sm:$0xff]   ;;  %v8024_v31 = vld [vmem:[%s11840_s5 + $0x28] sm:$0xff]  }
 0x2c2   :  { %4172 = vmatmul.mubr.bf16.gmra.mrb[28].mxu0 %v6587_v25  ;;  %4598 = vmatmul.mubr.bf16.gmra.mrb[28].mxu1 %v6587_v25  ;;  %v8020_v25 = vld [vmem:[%s11840_s5 + $0x18] sm:$0xff]  }
 0x2c3   :  { %4193 = vmatpush1.bf16.msra.mxu0 %v8466_v33  ;;  %4619 = vmatpush1.bf16.msra.mxu1 %v8467_v34  ;;  %v8026_v33 = vld [vmem:[%s11840_s5 + $0x30] sm:$0xff]   ;;  %v8025_v34 = vld [vmem:[%s11840_s5 + $0xa8] sm:$0xff]  }
 0x2c4   :  { %4194 = vmatprep.subr.bf16.mxu0 %v8468_v35  ;;  %4620 = vmatprep.subr.bf16.mxu1 %v8469_v37  ;;  %v8028_v35 = vld [vmem:[%s11840_s5 + $0x38] sm:$0xff]   ;;  %v8027_v37 = vld [vmem:[%s11840_s5 + $0xb0] sm:$0xff]  }
 0x2c5   :  { %6591 = vmatprep.mubr.msk.bf16.mxu0 %vm2457_vm0, %v8003_v32  ;;  %6595 = vmatprep.mubr.msk.bf16.mxu1 %vm2457_vm0, %v8003_v32  ;;  %v8023_v32 = vld [vmem:[%s11840_s5 + $0xa0] sm:$0xff]  }
 0x2c7   :  { %4195 = vmatpush1.bf16.msra.mxu0 %v8470_v41  ;;  %4621 = vmatpush1.bf16.msra.mxu1 %v8471_v61  ;;  %v8030_v41 = vld [vmem:[%s11840_s5 + $0x40] sm:$0xff]   ;;  %v8029_v61 = vld [vmem:[%s11840_s5 + $0xb8] sm:$0xff]  }
 0x2c8   :  { %4196 = vmatprep.subr.bf16.mxu0 %v8472_v45  ;;  %4622 = vmatprep.subr.bf16.mxu1 %v8473_v46  ;;  %v8032_v45 = vld [vmem:[%s11840_s5 + $0x48] sm:$0xff]   ;;  %v8031_v46 = vld [vmem:[%s11840_s5 + $0xc0] sm:$0xff]  }
 0x2cb   :  { %4197 = vmatpush1.bf16.msra.mxu0 %v8474_v48  ;;  %4623 = vmatpush1.bf16.msra.mxu1 %v8475_v49  ;;  %v8033_v48 = vld [vmem:[%s11840_s5 + $0xc8] sm:$0xff]   ;;  %v8034_v49 = vld [vmem:[%s11840_s5 + $0x50] sm:$0xff]  }
 0x2cc   :  { %4198 = vmatprep.subr.bf16.mxu0 %v8476_v51  ;;  %4624 = vmatprep.subr.bf16.mxu1 %v8477_v52 }
 0x2cf   :  { %4199 = vmatpush1.bf16.msra.mxu0 %v8478_v53  ;;  %4625 = vmatpush1.bf16.msra.mxu1 %v8479_v57 }
 0x2d0   :  { %5029 = vmatprep.subr.bf16.mxu0 %v8481_v13  ;;  %5156 = vmatprep.subr.bf16.mxu1 %v8481_v13 }
 0x2d2   :  { %4213 = vmatmul.mubr.bf16.vlgmr.msra.gmra.mrb[16].mxu0 %v8001_v1  ;;  %4639 = vmatmul.mubr.bf16.vlgmr.msra.gmra.mrb[16].mxu1 %v8001_v1  ;;  %v8035_v1 = vld [vmem:[%s11840_s5 + $0xd0] sm:$0xff]  }
 0x2d3   :  { %6592 = vmatprep.mubr.msk.bf16.mxu0 %vm2457_vm0, %v8004_v60  ;;  %6596 = vmatprep.mubr.msk.bf16.mxu1 %vm2457_vm0, %v8004_v60 }
 0x2d4   :  { %5030 = vmatpush1.bf16.msra.mxu0 %v8012_v14  ;;  %5157 = vmatpush1.bf16.msra.mxu1 %v8014_v16  ;;  %v8036_v16 = vld [vmem:[%s11840_s5 + $0x58] sm:$0xff]  }
 0x2d5   :  { %5031 = vmatprep.subr.bf16.mxu0 %v8481_v13  ;;  %5158 = vmatprep.subr.bf16.mxu1 %v8481_v13 }
 0x2d8   :  { %5032 = vmatpush1.bf16.msra.mxu0 %v8013_v15  ;;  %5159 = vmatpush1.bf16.msra.mxu1 %v8016_v21 }
 0x2d9   :  { %5033 = vmatprep.subr.bf16.mxu0 %v8481_v13  ;;  %5160 = vmatprep.subr.bf16.mxu1 %v8481_v13 }
 0x2da   :  { %4223 = vmatmul.mubr.bf16.gmra.mrb[20].mxu0 %v8006_v62  ;;  %4649 = vmatmul.mubr.bf16.gmra.mrb[20].mxu1 %v8006_v62 }
 0x2db   :  { %6593 = vmatprep.mubr.msk.bf16.mxu0 %vm2457_vm0, %v8007_v63  ;;  %6597 = vmatprep.mubr.msk.bf16.mxu1 %vm2457_vm0, %v8007_v63 }
 0x2dc   :  { %5034 = vmatpush1.bf16.msra.mxu0 %v8015_v22  ;;  %5161 = vmatpush1.bf16.msra.mxu1 %v8018_v23 }
 0x2dd   :  { %5035 = vmatprep.subr.bf16.mxu0 %v8481_v13  ;;  %5162 = vmatprep.subr.bf16.mxu1 %v8481_v13 }
 0x2e0   :  { %5036 = vmatpush1.bf16.msra.mxu0 %v8017_v24  ;;  %5163 = vmatpush1.bf16.msra.mxu1 %v8020_v25  ;;  %v8037_v25 = vld [vmem:[%s11840_s5 + $0xd8] sm:$0xff]  }
 0x2e1   :  { %5037 = vmatprep.subr.bf16.mxu0 %v8481_v13  ;;  %5164 = vmatprep.subr.bf16.mxu1 %v8481_v13 }
 0x2e2   :  { %4233 = vmatmul.mubr.bf16.gmra.mrb[24].mxu0 %v8009_v7  ;;  %4659 = vmatmul.mubr.bf16.gmra.mrb[24].mxu1 %v8009_v7 }
 0x2e3   :  { %6594 = vmatprep.mubr.msk.bf16.mxu0 %vm2457_vm0, %v6590_v9  ;;  %6598 = vmatprep.mubr.msk.bf16.mxu1 %vm2457_vm0, %v6590_v9 }
 0x2e4   :  { %5038 = vmatpush1.bf16.msra.mxu0 %v8019_v27  ;;  %5165 = vmatpush1.bf16.msra.mxu1 %v8022_v28 }
 0x2e5   :  { %5039 = vmatprep.subr.bf16.mxu0 %v8481_v13  ;;  %5166 = vmatprep.subr.bf16.mxu1 %v8481_v13 }
 0x2e8   :  { %5040 = vmatpush1.bf16.msra.mxu0 %v8021_v30  ;;  %5167 = vmatpush1.bf16.msra.mxu1 %v8024_v31 }
 0x2e9   :  { %5041 = vmatprep.subr.bf16.mxu0 %v8481_v13  ;;  %5168 = vmatprep.subr.bf16.mxu1 %v8481_v13 }
 0x2ea   :  { %4243 = vmatmul.mubr.bf16.gmra.mrb[28].mxu0 %v6589_v11  ;;  %4669 = vmatmul.mubr.bf16.gmra.mrb[28].mxu1 %v6589_v11 }
 0x2ec   :  { %5042 = vmatpush1.bf16.msra.mxu0 %v8023_v32  ;;  %5169 = vmatpush1.bf16.msra.mxu1 %v8026_v33 }
 0x2ed   :  { %5043 = vmatprep.subr.bf16.mxu0 %v8481_v13  ;;  %5170 = vmatprep.subr.bf16.mxu1 %v8481_v13 }
 0x2f0   :  { %5044 = vmatpush1.bf16.msra.mxu0 %v8025_v34  ;;  %5171 = vmatpush1.bf16.msra.mxu1 %v8028_v35  ;;  %v8038_v34 = vld [vmem:[%s11840_s5 + $0x60] sm:$0xff]   ;;  %v3425_v35 = vmax.f32 %v10530_v10, 0.0 }
 0x2f1   :  { %5045 = vmatprep.subr.bf16.mxu0 %v8481_v13  ;;  %5172 = vmatprep.subr.bf16.mxu1 %v8481_v13 }
 0x2f4   :  { %5046 = vmatpush1.bf16.msra.mxu0 %v8027_v37  ;;  %5173 = vmatpush1.bf16.msra.mxu1 %v8030_v41 }
 0x2f5   :  { %5047 = vmatprep.subr.bf16.mxu0 %v8481_v13  ;;  %5174 = vmatprep.subr.bf16.mxu1 %v8481_v13 }
 0x2f8   :  { %5048 = vmatpush1.bf16.msra.mxu0 %v8029_v61  ;;  %5175 = vmatpush1.bf16.msra.mxu1 %v8032_v45 }
 0x2f9   :  { %5049 = vmatprep.subr.bf16.mxu0 %v8481_v13  ;;  %5176 = vmatprep.subr.bf16.mxu1 %v8481_v13 }
 0x2fc   :  { %5050 = vmatpush1.bf16.msra.mxu0 %v8031_v46  ;;  %5177 = vmatpush1.bf16.msra.mxu1 %v8034_v49 }
 0x2fd   :  { %5051 = vmatprep.subr.bf16.mxu0 %v8481_v13  ;;  %5178 = vmatprep.subr.bf16.mxu1 %v8481_v13 }
 0x300   :  { %5052 = vmatpush1.bf16.msra.mxu0 %v8033_v48  ;;  %5179 = vmatpush1.bf16.msra.mxu1 %v8036_v16 }
 0x301   :  { %5053 = vmatprep.subr.bf16.mxu0 %v8481_v13  ;;  %5180 = vmatprep.subr.bf16.mxu1 %v8481_v13 }
 0x304   :  { %5054 = vmatpush1.bf16.msra.mxu0 %v8035_v1  ;;  %5181 = vmatpush1.bf16.msra.mxu1 %v8038_v34 }
 0x305   :  { %5055 = vmatprep.subr.bf16.mxu0 %v8481_v13  ;;  %5182 = vmatprep.subr.bf16.mxu1 %v8481_v13 }
 0x308   :  { %5056 = vmatpush1.bf16.msra.mxu0 %v8037_v25 }
 0x309   :  { %5314 = vmatprep.subr.bf16.mxu0 %v8481_v13 }
 0x3a5   :  { %v11183_v51 = vpop.f32.mrb[16].mxu0  ;;  %v4640_v52 = vpop.f32.mrb[16].mxu1 }
 0x3a6   :  { %v4679_v53 = vmul.f32 %v4640_v52, %v10475_v36  ;;  %v4216_v57 = vpop.f32.mrb[17].mxu0  ;;  %v4642_v60 = vpop.f32.mrb[17].mxu1 }
 0x3a7   :  { %v4678_v62 = vmul.f32 %v4216_v57, %v10050_v3  ;;  %v4680_v63 = vmul.f32 %v4642_v60, %v10484_v38  ;;  %v11191_v0 = vpop.f32.mrb[18].mxu0  ;;  %v4644_v7 = vpop.f32.mrb[18].mxu1 }
 0x3a8   :  { %v4707_v9 = vadd.f32 %v4679_v53, %v10487_v39  ;;  %v4683_v11 = vmul.f32 %v4644_v7, %v10475_v36  ;;  %v4220_v14 = vpop.f32.mrb[19].mxu0  ;;  %v4646_v15 = vpop.f32.mrb[19].mxu1 }
 0x3a9   :  { %v11201_v21 = vadd.f32 %v4678_v62, %v10062_v8  ;;  %v4708_v22 = vadd.f32 %v4680_v63, %v10498_v44  ;;  %v4682_v23 = vmul.f32 %v4220_v14, %v10050_v3  ;;  %v4684_v24 = vmul.f32 %v4646_v15, %v10484_v38  ;;  %v8040_v15 = vld [vmem:[%s11840_s5 + $0x68] sm:$0xff]  }
 0x3aa   :  { %v4735_v27 = vmax.f32 %v4707_v9, 0.0  ;;  %v4711_v28 = vadd.f32 %v4683_v11, %v10487_v39  ;;  %5183 = vmatpush1.bf16.msra.mxu1 %v8040_v15 }
 0x3ab   :  { %v4736_v30 = vmax.f32 %v4708_v22, 0.0  ;;  %v11211_v31 = vadd.f32 %v4682_v23, %v10062_v8  ;;  %v4712_v32 = vadd.f32 %v4684_v24, %v10498_v44  ;;  %5473 = vmatprep.subr.bf16.mxu1 %v8481_v13 }
 0x3ac   :  { %v4739_v33 = vmax.f32 %v4711_v28, 0.0 }
 0x3ad   :  { %v4738_v37 = vmax.f32 %v11211_v31, 0.0  ;;  %v4740_v41 = vmax.f32 %v4712_v32, 0.0  ;;  %v11221_v61 = vpop.f32.mrb[20].mxu0  ;;  %v4650_v45 = vpop.f32.mrb[20].mxu1  ;;  %v7255_v46 = vpack.i.bf16 %v4736_v30, %v4735_v27 }
 0x3ae   :  { %v4687_v48 = vmul.f32 %v4650_v45, %v10475_v36  ;;  %v4226_v49 = vpop.f32.mrb[21].mxu0  ;;  %v4652_v52 = vpop.f32.mrb[21].mxu1  ;;  %v4685_v10 = vmul.f32 %v11221_v61, %v10047_v2 }
 0x3af   :  { %v4686_v1 = vmul.f32 %v4226_v49, %v10050_v3  ;;  %v4688_v53 = vmul.f32 %v4652_v52, %v10484_v38  ;;  %v11226_v57 = vpop.f32.mrb[22].mxu0  ;;  %v4654_v60 = vpop.f32.mrb[22].mxu1  ;;  %v7240_v62 = vpack.i.bf16 %v4740_v41, %v4739_v33  ;;  %v7245_v63 = vpack.i.bf16 %v4738_v37, %v3425_v35 }
 0x3b0   :  { %v4715_v7 = vadd.f32 %v4687_v48, %v10487_v39  ;;  %v4691_v9 = vmul.f32 %v4654_v60, %v10475_v36  ;;  %v4230_v11 = vpop.f32.mrb[23].mxu0  ;;  %v4656_v14 = vpop.f32.mrb[23].mxu1  ;;  %v4734_v33 = vmax.f32 %v11201_v21, 0.0  ;;  %v3421_v52 = vmax.f32 %v10517_v59, 0.0 }
 0x3b1   :  { %v11239_v16 = vadd.f32 %v4686_v1, %v10062_v8  ;;  %v4716_v22 = vadd.f32 %v4688_v53, %v10498_v44  ;;  %v4690_v23 = vmul.f32 %v4230_v11, %v10050_v3  ;;  %v4692_v24 = vmul.f32 %v4656_v14, %v10484_v38  ;;  %7241 = vrot.lane.b32.xlu0 %v7240_v62, %s8480_s26 }
 0x3b2   :  { %v4743_v25 = vmax.f32 %v4715_v7, 0.0  ;;  %v4719_v27 = vadd.f32 %v4691_v9, %v10487_v39  ;;  %7246 = vrot.lane.b32.xlu1 %v7245_v63, %s8480_s26  ;;  %v11847_v14 = vmax.f32 %v10566_v56, 0.0 }
 0x3b3   :  { %v4744_v28 = vmax.f32 %v4716_v22, 0.0  ;;  %v11248_v30 = vadd.f32 %v4690_v23, %v10062_v8  ;;  %v4720_v32 = vadd.f32 %v4692_v24, %v10498_v44  ;;  %v11846_v62 = vmax.f32 %v11239_v16, 0.0 }
 0x3b4   :  { %v4747_v34 = vmax.f32 %v4719_v27, 0.0  ;;  %v7260_v24 = vpack.i.bf16 %v4734_v33, %v3421_v52 }
 0x3b5   :  { %v4748_v41 = vmax.f32 %v4720_v32, 0.0  ;;  %7256 = vrot.lane.b32.xlu0 %v7255_v46, %s8480_s26  ;;  %v4660_v45 = vpop.f32.mrb[24].mxu1  ;;  %v11254_v48 = vpop.f32.mrb[24].mxu0  ;;  %v7270_v49 = vpack.i.bf16 %v4744_v28, %v4743_v25 }
 0x3b6   :  { %v4695_v1 = vmul.f32 %v4660_v45, %v10475_v36  ;;  %7251 = vrot.lane.b32.xlu1 %v10547_v20, %s8480_s26  ;;  %v4236_v53 = vpop.f32.mrb[25].mxu0  ;;  %v4662_v60 = vpop.f32.mrb[25].mxu1 }
 0x3b7   :  { %v4694_v63 = vmul.f32 %v4236_v53, %v10050_v3  ;;  %v4696_v7 = vmul.f32 %v4662_v60, %v10484_v38  ;;  %v11263_v46 = vpop.f32.mrb[26].mxu0  ;;  %v4664_v9 = vpop.f32.mrb[26].mxu1  ;;  %v7290_v11 = vpack.i.bf16 %v4748_v41, %v4747_v34  ;;  %v7275_v60 = vpack.i.bf16 %v11846_v62, %v11847_v14 }
 0x3b8   :  { %v4723_v15 = vadd.f32 %v4695_v1, %v10487_v39  ;;  %v4699_v22 = vmul.f32 %v4664_v9, %v10475_v36  ;;  %v4240_v23 = vpop.f32.mrb[27].mxu0  ;;  %v4666_v20 = vpop.f32.mrb[27].mxu1 }
 0x3b9   :  { %v11273_v25 = vadd.f32 %v4694_v63, %v10062_v8  ;;  %v4724_v27 = vadd.f32 %v4696_v7, %v10498_v44  ;;  %v4698_v28 = vmul.f32 %v4240_v23, %v10050_v3  ;;  %v4700_v32 = vmul.f32 %v4666_v20, %v10484_v38  ;;  %7266 = vrot.lane.b32.xlu0 %v10594_v58, %s8480_s26 }
 0x3ba   :  { %v4751_v34 = vmax.f32 %v4723_v15, 0.0  ;;  %v4727_v41 = vadd.f32 %v4699_v22, %v10487_v39  ;;  %7261 = vrot.lane.b32.xlu1 %v7260_v24, %s8480_s26 }
 0x3bb   :  { %v4752_v45 = vmax.f32 %v4724_v27, 0.0  ;;  %v11283_v1 = vadd.f32 %v4698_v28, %v10062_v8  ;;  %v4728_v53 = vadd.f32 %v4700_v32, %v10498_v44 }
 0x3bc   :  { %v4755_v63 = vmax.f32 %v4727_v41, 0.0 }
 0x3bd   :  { %v4756_v7 = vmax.f32 %v4728_v53, 0.0  ;;  %v4670_v9 = vpop.f32.mrb[28].mxu1  ;;  %7276 = vrot.lane.b32.xlu0 %v7275_v60, %s8480_s26  ;;  %v11291_v58 = vpop.f32.mrb[28].mxu0  ;;  %v7300_v15 = vpack.i.bf16 %v4752_v45, %v4751_v34  ;;  %v4746_v53 = vmax.f32 %v11248_v30, 0.0 }
 0x3be   :  { %v4703_v22 = vmul.f32 %v4670_v9, %v10475_v36  ;;  %7271 = vrot.lane.b32.xlu1 %v7270_v49, %s8480_s26  ;;  %v4246_v23 = vpop.f32.mrb[29].mxu0  ;;  %v4672_v20 = vpop.f32.mrb[29].mxu1  ;;  %v4750_v49 = vmax.f32 %v11273_v25, 0.0  ;;  %v4681_v9 = vmul.f32 %v11191_v0, %v10047_v2  ;;  %v8065_v25 = vld [vmem:[%s11840_s5 + $0x148] sm:$0xff]  }
 0x3bf   :  { %v4702_v24 = vmul.f32 %v4246_v23, %v10050_v3  ;;  %v4704_v27 = vmul.f32 %v4672_v20, %v10484_v38  ;;  %v4248_v28 = vpop.f32.mrb[30].mxu0  ;;  %v4674_v32 = vpop.f32.mrb[30].mxu1  ;;  %v7320_v41 = vpack.i.bf16 %v4756_v7, %v4755_v63  ;;  %v3433_v3 = vmax.f32 %v10577_v47, 0.0  ;;  %v8046_v47 = vld [vmem:[%s11840_s5 + $0x160] sm:$0xff]  }
 0x3c0   :  { %v4731_v60 = vadd.f32 %v4703_v22, %v10487_v39  ;;  %v4249_v62 = vpop.f32.mrb[31].mxu0  ;;  %v4675_v14 = vpop.f32.mrb[31].mxu1  ;;  %v3437_v39 = vmax.f32 %v10615_v19, 0.0  ;;  %v3445_v63 = vmax.f32 %v10663_v4, 0.0  ;;  %v3347_v7 = vmul.f32 %v10047_v2, %v10503_v50  ;;  %v8066_v19 = vld [vmem:[%s11840_s5 + $0x1b0] sm:$0xff]   ;;  %v8095_v4 = vld [vmem:[%s11840_s5 + $0x2a0] sm:$0xff]  }
 0x3c1   :  { %v11300_v34 = vadd.f32 %v4702_v24, %v10062_v8  ;;  %v4732_v36 = vadd.f32 %v4704_v27, %v10498_v44  ;;  %7286 = vrot.lane.b32.xlu0 %v10642_v43, %s8480_s26  ;;  %v7295_v8 = vpack.i.bf16 %v4746_v53, %v3433_v3  ;;  %v4754_v43 = vmax.f32 %v11283_v1, 0.0  ;;  %v8069_v1 = vld [vmem:[%s11840_s5 + $0x1c8] sm:$0xff]  }
 0x3c2   :  { %v4759_v38 = vmax.f32 %v4731_v60, 0.0  ;;  %7281 = vrot.lane.b32.xlu1 %v10607_v12, %s8480_s26  ;;  %v7305_v12 = vpack.i.bf16 %v4750_v49, %v3437_v39  ;;  %v3441_v62 = vmax.f32 %v10625_v29, 0.0  ;;  %v3343_v23 = vmul.f32 %v10047_v2, %v10495_v42  ;;  %v8070_v29 = vld [vmem:[%s11840_s5 + $0x230] sm:$0xff]  }
 0x3c3   :  { %v4760_v45 = vmax.f32 %v4732_v36, 0.0  ;;  %v3396_v20 = vadd.f32 %v10053_v5, %v3347_v7  ;;  %v3351_v24 = vmul.f32 %v10047_v2, %v10545_v18  ;;  %v4709_v27 = vadd.f32 %v4681_v9, %v10053_v5 }
 0x3c4   :  { %v7325_v14 = vpack.i.bf16 %v4754_v43, %v3441_v62  ;;  %v3392_v0 = vadd.f32 %v10053_v5, %v3343_v23  ;;  %v4677_v36 = vmul.f32 %v11183_v51, %v10047_v2 }
 0x3c5   :  { %7291 = vrot.lane.b32.xlu0 %v7290_v11, %s8480_s26  ;;  %v7330_v44 = vpack.i.bf16 %v4760_v45, %v4759_v38  ;;  %v4758_v11 = vmax.f32 %v11300_v34, 0.0  ;;  %v3424_v45 = vmax.f32 %v3396_v20, 0.0  ;;  %v4737_v18 = vmax.f32 %v4709_v27, 0.0  ;;  %v8094_v34 = vld [vmem:[%s11840_s5 + $0x290] sm:$0xff]  }
 0x3c6   :  { %7296 = vrot.lane.b32.xlu1 %v7295_v8, %s8480_s26  ;;  %v11357_v8 = vadd.f32 %v10053_v5, %v3351_v24  ;;  %v4705_v24 = vadd.f32 %v4677_v36, %v10053_v5  ;;  %v8039_v36 = vld [vmem:[%s11840_s5 + $0xe0] sm:$0xff]   ;;  %v3420_v21 = vmax.f32 %v3392_v0, 0.0  ;;  %v8041_v0 = vld [vmem:[%s11840_s5 + $0xe8] sm:$0xff]  }
 0x3c9   :  { %7306 = vrot.lane.b32.xlu0 %v7305_v12, %s8480_s26 }
 0x3ca   :  { %7301 = vrot.lane.b32.xlu1 %v7300_v15, %s8480_s26 }
 0x3cd   :  { %7316 = vrot.lane.b32.xlu0 %v10678_v17, %s8480_s26  ;;  %v7335_v17 = vpack.i.bf16 %v4758_v11, %v3445_v63 }
 0x3ce   :  { %7311 = vrot.lane.b32.xlu1 %v10653_v54, %s8480_s26  ;;  %v7237_v54 = vpop.permute.xlu0 %7236 }
 0x3cf   :  { %v7239_v15 = vunpack.i.h.bf16 %v7237_v54  ;;  %v7238_v22 = vunpack.i.l.bf16 %v7237_v54 }
 0x3d1   :  { %7321 = vrot.lane.b32.xlu0 %v7320_v41, %s8480_s26  ;;  %v3514_v32 = vsel %vm2457_vm0, %v7238_v22, %v7239_v15 }
 0x3d2   :  { %7326 = vrot.lane.b32.xlu1 %v7325_v14, %s8480_s26  ;;  %v3542_v12 = vmax.f32 %v3425_v35, %v3514_v32 }
 0x3d5   :  { %7336 = vrot.lane.b32.xlu0 %v7335_v17, %s8480_s26 }
 0x3d6   :  { %7331 = vrot.lane.b32.xlu1 %v7330_v44, %s8480_s26 }
 0x423   :  { %v7242_v28 = vpop.permute.xlu0 %7241 }
 0x424   :  { %v7244_v41 = vunpack.i.h.bf16 %v7242_v28  ;;  %v7243_v50 = vunpack.i.l.bf16 %v7242_v28  ;;  %v7247_v60 = vpop.permute.xlu1 %7246 }
 0x425   :  { %v7249_v38 = vunpack.i.h.bf16 %v7247_v60  ;;  %v7248_v42 = vunpack.i.l.bf16 %v7247_v60 }
 0x426   :  { %v4827_v44 = vsel %vm2457_vm0, %v7243_v50, %v7244_v41 }
 0x427   :  { %v4855_v14 = vmax.f32 %v4738_v37, %v4827_v44  ;;  %v4826_v17 = vsel %vm2457_vm0, %v7249_v38, %v7243_v50  ;;  %v3513_v54 = vsel %vm2457_vm0, %v7248_v42, %v7238_v22  ;;  %v7257_v51 = vpop.permute.xlu0 %7256  ;;  %v3355_v37 = vmul.f32 %v10047_v2, %v10552_v26 }
 0x428   :  { %v4854_v7 = vmax.f32 %v4737_v18, %v4826_v17  ;;  %v3541_v9 = vmax.f32 %v3424_v45, %v3513_v54  ;;  %v7259_v15 = vunpack.i.h.bf16 %v7257_v51  ;;  %v7258_v23 = vunpack.i.l.bf16 %v7257_v51  ;;  %v7252_v20 = vpop.permute.xlu1 %7251 }
 0x429   :  { %v7254_v27 = vunpack.i.h.bf16 %v7252_v20  ;;  %v7253_v28 = vunpack.i.l.bf16 %v7252_v20  ;;  %v4869_v41 = vmax.f32 %v3542_v12, %v4855_v14  ;;  %v4713_v12 = vadd.f32 %v4685_v10, %v10053_v5 }
 0x42a   :  { %v4868_v31 = vmax.f32 %v3541_v9, %v4854_v7  ;;  %v4825_v35 = vsel %vm2457_vm0, %v7258_v23, %v7259_v15  ;;  %v3428_v17 = vmax.f32 %v11357_v8, 0.0  ;;  %v11384_v54 = vadd.f32 %v10053_v5, %v3355_v37 }
 0x42b   :  { %v4853_v22 = vmax.f32 %v4734_v33, %v4825_v35  ;;  %v3512_v32 = vsel %vm2457_vm0, %v7253_v28, %v7254_v27  ;;  %v7267_v50 = vpop.permute.xlu0 %7266  ;;  %v4911_v60 = vpack.c.bf16 %v4869_v41, %v4869_v41  ;;  %v4733_v33 = vmax.f32 %v4705_v24, 0.0 }
 0x42c   :  { %v4910_v38 = vpack.c.bf16 %v4868_v31, %v4868_v31  ;;  %v3540_v61 = vmax.f32 %v3421_v52, %v3512_v32  ;;  %v7262_v42 = vpop.permute.xlu1 %7261  ;;  %v7269_v45 = vunpack.i.h.bf16 %v7267_v50  ;;  %v7268_v18 = vunpack.i.l.bf16 %v7267_v50 }
 0x42d   :  { %v7264_v44 = vunpack.i.h.bf16 %v7262_v42  ;;  %v7263_v26 = vunpack.i.l.bf16 %v7262_v42  ;;  %6641 = vmatprep.mubr.msk.bf16.mxu0 %vm5025_vm1, %v4911_v60  ;;  %v4741_v10 = vmax.f32 %v4713_v12, 0.0  ;;  %v8042_v60 = vld [vmem:[%s11840_s5 + $0x150] sm:$0xff]   ;;  %v11849_v42 = vmax.f32 %v11239_v16, 0.0 }
 0x42e   :  { %5062 = vmatmul.mubr.bf16.vlgmr.msra.gmra.mrb[32].mxu0 %v4910_v38  ;;  %v4867_v14 = vmax.f32 %v3540_v61, %v4853_v22  ;;  %v3516_v8 = vsel %vm2457_vm0, %v7268_v18, %v7269_v45 }
 0x42f   :  { %v4824_v59 = vsel %vm2457_vm0, %v7264_v44, %v7258_v23  ;;  %v3511_v52 = vsel %vm2457_vm0, %v7263_v26, %v7253_v28  ;;  %5315 = vmatpush1.bf16.msra.mxu0 %v8039_v36  ;;  %v7277_v51 = vpop.permute.xlu0 %7276  ;;  %v4689_v28 = vmul.f32 %v11226_v57, %v10047_v2  ;;  %v8043_v57 = vld [vmem:[%s11840_s5 + $0xf0] sm:$0xff]   ;;  %v11848_v36 = vmax.f32 %v10566_v56, 0.0 }
 0x430   :  { %v4852_v7 = vmax.f32 %v4733_v33, %v4824_v59  ;;  %v3539_v9 = vmax.f32 %v3420_v21, %v3511_v52  ;;  %v7272_v15 = vpop.permute.xlu1 %7271  ;;  %v7279_v20 = vunpack.i.h.bf16 %v7277_v51  ;;  %v7278_v24 = vunpack.i.l.bf16 %v7277_v51  ;;  %5316 = vmatprep.subr.bf16.mxu0 %v8481_v13 }
 0x431   :  { %v7274_v27 = vunpack.i.h.bf16 %v7272_v15  ;;  %v7273_v41 = vunpack.i.l.bf16 %v7272_v15  ;;  %v4881_v23 = vpack.c.bf16 %v4867_v14, %v4867_v14  ;;  %v3544_v38 = vmax.f32 %v11848_v36, %v3516_v8 }
 0x432   :  { %v4866_v31 = vmax.f32 %v3539_v9, %v4852_v7  ;;  %v3515_v35 = vsel %vm2457_vm0, %v7278_v24, %v7268_v18  ;;  %v3359_v26 = vmul.f32 %v10047_v2, %v10592_v55  ;;  %v4717_v12 = vadd.f32 %v4689_v28, %v10053_v5  ;;  %v8044_v55 = vld [vmem:[%s11840_s5 + $0x158] sm:$0xff]  }
 0x433   :  { %v4829_v37 = vsel %vm2457_vm0, %v7273_v41, %v7274_v27  ;;  %v4828_v22 = vsel %vm2457_vm0, %v7279_v20, %v7273_v41  ;;  %v3543_v32 = vmax.f32 %v3428_v17, %v3515_v35  ;;  %6656 = vmatprep.mubr.msk.bf16.mxu1 %vm5025_vm1, %v4881_v23  ;;  %5317 = vmatpush1.bf16.msra.mxu0 %v8041_v0  ;;  %v11399_v50 = vpop.permute.xlu0 %7286  ;;  %v3432_v52 = vmax.f32 %v11384_v54, 0.0 }
 0x434   :  { %v4880_v61 = vpack.c.bf16 %v4866_v31, %v4866_v31  ;;  %v4857_v45 = vmax.f32 %v11849_v42, %v4829_v37  ;;  %v4856_v18 = vmax.f32 %v4741_v10, %v4828_v22  ;;  %v7282_v44 = vpop.permute.xlu1 %7281  ;;  %5318 = vmatprep.subr.bf16.mxu0 %v8481_v13  ;;  %v4693_v14 = vmul.f32 %v11254_v48, %v10047_v2  ;;  %v8045_v48 = vld [vmem:[%s11840_s5 + $0xf8] sm:$0xff]  }
 0x435   :  { %v7284_v21 = vunpack.i.h.bf16 %v7282_v44  ;;  %v7283_v33 = vunpack.i.l.bf16 %v7282_v44  ;;  %v3408_v9 = vadd.f32 %v10053_v5, %v3359_v26  ;;  %v4745_v8 = vmax.f32 %v4717_v12, 0.0 }
 0x436   :  { %5189 = vmatmul.mubr.bf16.vlgmr.msra.gmra.mrb[32].mxu1 %v4880_v61  ;;  %v4871_v56 = vmax.f32 %v3544_v38, %v4857_v45  ;;  %v11417_v17 = vmax.f32 %v3543_v32, %v4856_v18  ;;  %v4721_v27 = vadd.f32 %v4693_v14, %v10053_v5  ;;  %v7288_v23 = vunpack.i.l.bf16 %v11399_v50  ;;  %v8049_v14 = vld [vmem:[%s11840_s5 + $0x108] sm:$0xff]  }
 0x437   :  { %v3518_v16 = vsel %vm2457_vm0, %v7283_v33, %v7284_v21  ;;  %5474 = vmatpush1.bf16.msra.mxu1 %v8042_v60  ;;  %5319 = vmatpush1.bf16.msra.mxu0 %v8043_v57  ;;  %v7292_v59 = vpop.permute.xlu0 %7291  ;;  %v3436_v60 = vmax.f32 %v3408_v9, 0.0  ;;  %v3363_v57 = vmul.f32 %v10047_v2, %v10599_v6  ;;  %v4697_v42 = vmul.f32 %v11263_v46, %v10047_v2  ;;  %v8048_v21 = vld [vmem:[%s11840_s5 + $0x168] sm:$0xff]  }
 0x438   :  { %v7294_v51 = vunpack.i.h.bf16 %v7292_v59  ;;  %v7293_v0 = vunpack.i.l.bf16 %v7292_v59  ;;  %v7297_v7 = vpop.permute.xlu1 %7296  ;;  %5475 = vmatprep.subr.bf16.mxu1 %v8481_v13  ;;  %5320 = vmatprep.subr.bf16.mxu0 %v8481_v13  ;;  %v5197_v24 = vpack.c.bf16 %v4871_v56, %v4871_v56  ;;  %v3546_v54 = vmax.f32 %v3433_v3, %v3518_v16 }
 0x439   :  { %v7299_v15 = vunpack.i.h.bf16 %v7297_v7  ;;  %v7298_v20 = vunpack.i.l.bf16 %v7297_v7  ;;  %v4749_v61 = vmax.f32 %v4721_v27, 0.0  ;;  %v3367_v56 = vmul.f32 %v10047_v2, %v10640_v40  ;;  %v8050_v40 = vld [vmem:[%s11840_s5 + $0x170] sm:$0xff]  }
 0x43a   :  { %v4831_v41 = vsel %vm2457_vm0, %v7293_v0, %v7294_v51  ;;  %6699 = vmatprep.mubr.msk.bf16.mxu0 %vm5025_vm1, %v5197_v24  ;;  %v3412_v16 = vadd.f32 %v10053_v5, %v3363_v57  ;;  %v4725_v59 = vadd.f32 %v4697_v42, %v10053_v5  ;;  %v8054_v42 = vld [vmem:[%s11840_s5 + $0x180] sm:$0xff]  }
 0x43b   :  { %v4859_v10 = vmax.f32 %v4746_v53, %v4831_v41  ;;  %v4830_v28 = vsel %vm2457_vm0, %v7299_v15, %v7293_v0  ;;  %v3517_v31 = vsel %vm2457_vm0, %v7298_v20, %v7283_v33  ;;  %5476 = vmatpush1.bf16.msra.mxu1 %v8044_v55  ;;  %v7307_v35 = vpop.permute.xlu0 %7306  ;;  %5321 = vmatpush1.bf16.msra.mxu0 %v8045_v48  ;;  %v8047_v53 = vld [vmem:[%s11840_s5 + $0x100] sm:$0xff]   ;;  %v8051_v48 = vld [vmem:[%s11840_s5 + $0x110] sm:$0xff]  }
 0x43c   :  { %v4858_v3 = vmax.f32 %v4745_v8, %v4830_v28  ;;  %v3545_v37 = vmax.f32 %v3432_v52, %v3517_v31  ;;  %v11443_v22 = vpop.permute.xlu1 %7301  ;;  %v7309_v32 = vunpack.i.h.bf16 %v7307_v35  ;;  %v7308_v30 = vunpack.i.l.bf16 %v7307_v35  ;;  %5477 = vmatprep.subr.bf16.mxu1 %v8481_v13  ;;  %5322 = vmatprep.subr.bf16.mxu0 %v8481_v13  ;;  %v8052_v28 = vld [vmem:[%s11840_s5 + $0x178] sm:$0xff]  }
 0x43d   :  { %v7303_v36 = vunpack.i.l.bf16 %v11443_v22  ;;  %v4873_v38 = vmax.f32 %v3546_v54, %v4859_v10  ;;  %v4701_v55 = vmul.f32 %v11291_v58, %v10047_v2  ;;  %v3416_v2 = vadd.f32 %v10053_v5, %v3367_v56 }
 0x43e   :  { %v3519_v45 = vsel %vm2457_vm0, %v7308_v30, %v7288_v23  ;;  %v11458_v18 = vmax.f32 %v3545_v37, %v4858_v3  ;;  %v3440_v20 = vmax.f32 %v3412_v16, 0.0  ;;  %v4753_v24 = vmax.f32 %v4725_v59, 0.0  ;;  %v8053_v37 = vld [vmem:[%s11840_s5 + $0x118] sm:$0xff]  }
 0x43f   :  { %v4832_v44 = vsel %vm2457_vm0, %v7309_v32, %v7303_v36  ;;  %v3547_v6 = vmax.f32 %v3436_v60, %v3519_v45  ;;  %5478 = vmatpush1.bf16.msra.mxu1 %v8046_v47  ;;  %v11463_v26 = vpop.permute.xlu0 %7316  ;;  %v5356_v33 = vpack.c.bf16 %v4873_v38, %v4873_v38  ;;  %5323 = vmatpush1.bf16.msra.mxu0 %v8047_v53  ;;  %v3444_v32 = vmax.f32 %v3416_v2, 0.0  ;;  %v8060_v16 = vld [vmem:[%s11840_s5 + $0x198] sm:$0xff]  }
 0x440   :  { %v4860_v46 = vmax.f32 %v4749_v61, %v4832_v44  ;;  %v11468_v12 = vpop.permute.xlu1 %7311  ;;  %5479 = vmatprep.subr.bf16.mxu1 %v8481_v13  ;;  %5324 = vmatprep.subr.bf16.mxu0 %v8481_v13  ;;  %v4729_v8 = vadd.f32 %v4701_v55, %v10053_v5  ;;  %v7318_v27 = vunpack.i.l.bf16 %v11463_v26  ;;  %v8055_v44 = vld [vmem:[%s11840_s5 + $0x120] sm:$0xff]   ;;  %v7304_v56 = vunpack.i.h.bf16 %v11443_v22  ;;  %v8061_v59 = vld [vmem:[%s11840_s5 + $0x138] sm:$0xff]  }
 0x441   :  { %6742 = vmatprep.mubr.msk.bf16.mxu1 %vm5025_vm1, %v5356_v33  ;;  %v7313_v58 = vunpack.i.l.bf16 %v11468_v12  ;;  %v8057_v33 = vld [vmem:[%s11840_s5 + $0x128] sm:$0xff]   ;;  %v7289_v55 = vunpack.i.h.bf16 %v11399_v50 }
 0x442   :  { %v11482_v52 = vmax.f32 %v3547_v6, %v4860_v46  ;;  %v4757_v53 = vmax.f32 %v4729_v8, 0.0  ;;  %v8058_v46 = vld [vmem:[%s11840_s5 + $0x190] sm:$0xff]  }
 0x443   :  { %5480 = vmatpush1.bf16.msra.mxu1 %v8048_v21  ;;  %v11484_v51 = vpop.permute.xlu0 %7321  ;;  %5325 = vmatpush1.bf16.msra.mxu0 %v8049_v14  ;;  %v8056_v21 = vld [vmem:[%s11840_s5 + $0x188] sm:$0xff]   ;;  %v8059_v14 = vld [vmem:[%s11840_s5 + $0x130] sm:$0xff]   ;;  %v3520_v2 = vsel %vm2457_vm0, %v7288_v23, %v7289_v55  ;;  %v8067_v23 = vld [vmem:[%s11840_s5 + $0x1c0] sm:$0xff]  }
 0x444   :  { %v7323_v0 = vunpack.i.l.bf16 %v11484_v51  ;;  %v7327_v7 = vpop.permute.xlu1 %7326  ;;  %5481 = vmatprep.subr.bf16.mxu1 %v8481_v13  ;;  %5326 = vmatprep.subr.bf16.mxu0 %v8481_v13  ;;  %v8096_v55 = vld [vmem:[%s11840_s5 + $0x298] sm:$0xff]  }
 0x445   :  { %v7329_v9 = vunpack.i.h.bf16 %v7327_v7  ;;  %v7328_v15 = vunpack.i.l.bf16 %v7327_v7  ;;  %v8062_v7 = vld [vmem:[%s11840_s5 + $0x1a0] sm:$0xff]  }
 0x447   :  { %v4834_v54 = vsel %vm2457_vm0, %v7329_v9, %v7323_v0  ;;  %v3521_v41 = vsel %vm2457_vm0, %v7328_v15, %v7313_v58  ;;  %5482 = vmatpush1.bf16.msra.mxu1 %v8050_v40  ;;  %v7337_v10 = vpop.permute.xlu0 %7336  ;;  %5327 = vmatpush1.bf16.msra.mxu0 %v8051_v48  ;;  %v4833_v40 = vsel %vm2457_vm0, %v7303_v36, %v7304_v56  ;;  %v8063_v48 = vld [vmem:[%s11840_s5 + $0x140] sm:$0xff]   ;;  %v7324_v36 = vunpack.i.h.bf16 %v11484_v51  ;;  %v8064_v9 = vld [vmem:[%s11840_s5 + $0x1a8] sm:$0xff]  }
 0x448   :  { %v4862_v31 = vmax.f32 %v4753_v24, %v4834_v54  ;;  %v3549_v35 = vmax.f32 %v3440_v20, %v3521_v41  ;;  %v11508_v5 = vpop.permute.xlu1 %7331  ;;  %v7339_v47 = vunpack.i.h.bf16 %v7337_v10  ;;  %v7338_v3 = vunpack.i.l.bf16 %v7337_v10  ;;  %5483 = vmatprep.subr.bf16.mxu1 %v8481_v13  ;;  %5328 = vmatprep.subr.bf16.mxu0 %v8481_v13  ;;  %v8072_v54 = vld [vmem:[%s11840_s5 + $0x238] sm:$0xff]   ;;  %v8074_v41 = vld [vmem:[%s11840_s5 + $0x240] sm:$0xff]  }
 0x449   :  { %v7333_v30 = vunpack.i.l.bf16 %v11508_v5  ;;  %v4861_v22 = vmax.f32 %v4750_v49, %v4833_v40  ;;  %v3548_v15 = vmax.f32 %v3437_v39, %v3520_v2  ;;  %v7314_v20 = vunpack.i.h.bf16 %v11468_v12  ;;  %v8075_v10 = vld [vmem:[%s11840_s5 + $0x1e0] sm:$0xff]   ;;  %v8097_v40 = vld [vmem:[%s11840_s5 + $0x2a8] sm:$0xff]  }
 0x44a   :  { %v3523_v60 = vsel %vm2457_vm0, %v7338_v3, %v7318_v27  ;;  %v11519_v57 = vmax.f32 %v3549_v35, %v4862_v31  ;;  %v4835_v49 = vsel %vm2457_vm0, %v7323_v0, %v7324_v36  ;;  %v5196_v0 = vpack.c.bf16 %v11417_v17, %v11417_v17  ;;  %v8071_v17 = vld [vmem:[%s11840_s5 + $0x1d0] sm:$0xff]   ;;  %v8077_v31 = vld [vmem:[%s11840_s5 + $0x1e8] sm:$0xff]   ;;  %v8080_v3 = vld [vmem:[%s11840_s5 + $0x258] sm:$0xff]  }
 0x44b   :  { %v4836_v38 = vsel %vm2457_vm0, %v7339_v47, %v7333_v30  ;;  %v3551_v61 = vmax.f32 %v3444_v32, %v3523_v60  ;;  %5484 = vmatpush1.bf16.msra.mxu1 %v8052_v28  ;;  %5329 = vmatpush1.bf16.msra.mxu0 %v8053_v37  ;;  %v4875_v50 = vmax.f32 %v3548_v15, %v4861_v22  ;;  %v8076_v28 = vld [vmem:[%s11840_s5 + $0x248] sm:$0xff]   ;;  %v8078_v35 = vld [vmem:[%s11840_s5 + $0x250] sm:$0xff]   ;;  %v8081_v37 = vld [vmem:[%s11840_s5 + $0x1f8] sm:$0xff]  }
 0x44c   :  { %v4864_v45 = vmax.f32 %v4757_v53, %v4836_v38  ;;  %5485 = vmatprep.subr.bf16.mxu1 %v8481_v13  ;;  %5330 = vmatprep.subr.bf16.mxu0 %v8481_v13  ;;  %v3522_v39 = vsel %vm2457_vm0, %v7313_v58, %v7314_v20  ;;  %v4863_v51 = vmax.f32 %v4754_v43, %v4835_v49  ;;  %v8068_v58 = vld [vmem:[%s11840_s5 + $0x1b8] sm:$0xff]   ;;  %v8079_v47 = vld [vmem:[%s11840_s5 + $0x1f0] sm:$0xff]   ;;  %v8082_v32 = vld [vmem:[%s11840_s5 + $0x260] sm:$0xff]  }
 0x44d   :  { %v5515_v24 = vpack.c.bf16 %v4875_v50, %v4875_v50  ;;  %v3550_v12 = vmax.f32 %v3441_v62, %v3522_v39  ;;  %v5355_v62 = vpack.c.bf16 %v11458_v18, %v11458_v18  ;;  %v8073_v18 = vld [vmem:[%s11840_s5 + $0x1d8] sm:$0xff]   ;;  %v8083_v53 = vld [vmem:[%s11840_s5 + $0x200] sm:$0xff]   ;;  %v8084_v60 = vld [vmem:[%s11840_s5 + $0x268] sm:$0xff]   ;;  %v8482_v39 = vmov 0.0  }
 0x44e   :  { %v11532_v6 = vmax.f32 %v3551_v61, %v4864_v45  ;;  %v8085_v38 = vld [vmem:[%s11840_s5 + $0x208] sm:$0xff]   ;;  %v8086_v61 = vld [vmem:[%s11840_s5 + $0x270] sm:$0xff]   ;;  %v7334_v45 = vunpack.i.h.bf16 %v11508_v5  ;;  %v8091_v56 = vld [vmem:[%s11840_s5 + $0x220] sm:$0xff]  }
 0x44f   :  { %5486 = vmatpush1.bf16.msra.mxu1 %v8054_v42  ;;  %5331 = vmatpush1.bf16.msra.mxu0 %v8055_v44  ;;  %v4877_v43 = vmax.f32 %v3550_v12, %v4863_v51  ;;  %v8087_v42 = vld [vmem:[%s11840_s5 + $0x210] sm:$0xff]   ;;  %v8088_v44 = vld [vmem:[%s11840_s5 + $0x278] sm:$0xff]   ;;  %v8100_v2 = vld [vmem:[%s11840_s5 + $0x2c0] sm:$0xff]  }
 0x450   :  { %5487 = vmatprep.subr.bf16.mxu1 %v8481_v13  ;;  %5332 = vmatprep.subr.bf16.mxu0 %v8481_v13  ;;  %v8102_v22 = vld [vmem:[%s11840_s5 + $0x2d0] sm:$0xff]   ;;  %v8103_v36 = vld [vmem:[%s11840_s5 + $0x2d8] sm:$0xff]   ;;  %v8105_v15 = vld [vmem:[%s11840_s5 + $0x2e8] sm:$0xff]  }
 0x451   :  { %v5674_v8 = vpack.c.bf16 %v4877_v43, %v4877_v43  ;;  %v8106_v20 = vld [vmem:[%s11840_s5 + $0x2f0] sm:$0xff]   ;;  %v8108_v49 = vld [vmem:[%s11840_s5 + $0x300] sm:$0xff]   ;;  %v8109_v50 = vld [vmem:[%s11840_s5 + $0x308] sm:$0xff]  }
 0x452   :  { %v8111_v51 = vld [vmem:[%s11841_s7 + $0x8] sm:$0xff]  }
 0x453   :  { %5488 = vmatpush1.bf16.msra.mxu1 %v8056_v21  ;;  %5333 = vmatpush1.bf16.msra.mxu0 %v8057_v33  ;;  %v8089_v21 = vld [vmem:[%s11840_s5 + $0x218] sm:$0xff]   ;;  %v7319_v33 = vunpack.i.h.bf16 %v11463_v26  ;;  %v8093_v26 = vld [vmem:[%s11840_s5 + $0x228] sm:$0xff]  }
 0x454   :  { %5489 = vmatprep.subr.bf16.mxu1 %v8481_v13  ;;  %5334 = vmatprep.subr.bf16.mxu0 %v8481_v13 }
 0x457   :  { %5490 = vmatpush1.bf16.msra.mxu1 %v8058_v46  ;;  %5335 = vmatpush1.bf16.msra.mxu0 %v8059_v14  ;;  %v4837_v46 = vsel %vm2457_vm0, %v7333_v30, %v7334_v45  ;;  %v8090_v14 = vld [vmem:[%s11840_s5 + $0x280] sm:$0xff]   ;;  %v8092_v30 = vld [vmem:[%s11840_s5 + $0x288] sm:$0xff]  }
 0x458   :  { %5491 = vmatprep.subr.bf16.mxu1 %v8481_v13  ;;  %5336 = vmatprep.subr.bf16.mxu0 %v8481_v13  ;;  %v4865_v5 = vmax.f32 %v4758_v11, %v4837_v46  ;;  %v5514_v11 = vpack.c.bf16 %v11482_v52, %v11482_v52  ;;  %v5673_v52 = vpack.c.bf16 %v11519_v57, %v11519_v57  ;;  %v8101_v57 = vld [vmem:[%s11840_s5 + $0x2c8] sm:$0xff]  }
 0x45b   :  { %5492 = vmatpush1.bf16.msra.mxu1 %v8060_v16  ;;  %5337 = vmatpush1.bf16.msra.mxu0 %v8061_v59  ;;  %v3524_v16 = vsel %vm2457_vm0, %v7318_v27, %v7319_v33 }
 0x45c   :  { %5493 = vmatprep.subr.bf16.mxu1 %v8481_v13  ;;  %5338 = vmatprep.subr.bf16.mxu0 %v8481_v13  ;;  %v3552_v59 = vmax.f32 %v3445_v63, %v3524_v16 }
 0x45e   :  { %v4879_v27 = vmax.f32 %v3552_v59, %v4865_v5  ;;  %v6872_v5 = vld [vmem:[%s11842_s6] ss:$0 sm:$0xff] }
 0x45f   :  { %5494 = vmatpush1.bf16.msra.mxu1 %v8062_v7  ;;  %5339 = vmatpush1.bf16.msra.mxu0 %v8063_v48  ;;  %v8098_v7 = vld [vmem:[%s11840_s5 + $0x2b0] sm:$0xff]   ;;  %v8099_v48 = vld [vmem:[%s11840_s5 + $0x2b8] sm:$0xff]  }
 0x460   :  { %5495 = vmatprep.subr.bf16.mxu1 %v8481_v13  ;;  %5340 = vmatprep.subr.bf16.mxu0 %v8481_v13  ;;  %v5833_v63 = vpack.c.bf16 %v4879_v27, %v4879_v27 }
 0x463   :  { %5496 = vmatpush1.bf16.msra.mxu1 %v8064_v9  ;;  %5341 = vmatpush1.bf16.msra.mxu0 %v8065_v25  ;;  %v8104_v9 = vld [vmem:[%s11840_s5 + $0x2e0] sm:$0xff]   ;;  %v8107_v25 = vld [vmem:[%s11840_s5 + $0x2f8] sm:$0xff]  }
 0x464   :  { %5497 = vmatprep.subr.bf16.mxu1 %v8481_v13  ;;  %5632 = vmatprep.subr.bf16.mxu0 %v8481_v13 }
 0x466   :  { %5347 = vmatmul.mubr.bf16.vlgmr.msra.gmra.mrb[36].mxu0 %v5196_v0 }
 0x467   :  { %5498 = vmatpush1.bf16.msra.mxu1 %v8066_v19  ;;  %5633 = vmatpush1.bf16.msra.mxu0 %v8067_v23  ;;  %v5832_v19 = vpack.c.bf16 %v11532_v6, %v11532_v6  ;;  %v8110_v23 = vld [vmem:[%s11841_s7] sm:$0xff]   ;;  %v8112_v6 = vld [vmem:[%s11841_s7 + $0x10] sm:$0xff]  }
 0x468   :  { %6785 = vmatprep.mubr.msk.bf16.mxu0 %vm5025_vm1, %v5515_v24  ;;  %5499 = vmatprep.subr.bf16.mxu1 %v8481_v13 }
 0x469   :  { %5634 = vmatprep.subr.bf16.mxu0 %v8481_v13 }
 0x46b   :  { %5500 = vmatpush1.bf16.msra.mxu1 %v8068_v58  ;;  %5635 = vmatpush1.bf16.msra.mxu0 %v8069_v1  ;;  %v8113_v58 = vld [vmem:[%s11841_s7 + $0x18] sm:$0xff]  }
 0x46c   :  { %5791 = vmatprep.subr.bf16.mxu1 %v8481_v13  ;;  %5636 = vmatprep.subr.bf16.mxu0 %v8481_v13 }
 0x46e   :  { %5506 = vmatmul.mubr.bf16.vlgmr.msra.gmra.mrb[36].mxu1 %v5355_v62 }
 0x46f   :  { %5792 = vmatpush1.bf16.msra.mxu1 %v8070_v29  ;;  %6828 = vmatprep.mubr.msk.bf16.mxu1 %vm5025_vm1, %v5674_v8 }
 0x470   :  { %5637 = vmatpush1.bf16.msra.mxu0 %v8071_v17  ;;  %5793 = vmatprep.subr.bf16.mxu1 %v8481_v13  ;;  %v8114_v17 = vld [vmem:[%s11841_s7 + $0x20] sm:$0xff]  }
 0x471   :  { %5638 = vmatprep.subr.bf16.mxu0 %v8481_v13 }
 0x473   :  { %5794 = vmatpush1.bf16.msra.mxu1 %v8072_v54  ;;  %v8115_v54 = vld [vmem:[%s11841_s7 + $0x28] sm:$0xff]  }
 0x474   :  { %5639 = vmatpush1.bf16.msra.mxu0 %v8073_v18  ;;  %5795 = vmatprep.subr.bf16.mxu1 %v8481_v13  ;;  %v8116_v18 = vld [vmem:[%s11841_s7 + $0x30] sm:$0xff]  }
 0x475   :  { %5640 = vmatprep.subr.bf16.mxu0 %v8481_v13 }
 0x477   :  { %5796 = vmatpush1.bf16.msra.mxu1 %v8074_v41  ;;  %v8117_v41 = vld [vmem:[%s11841_s7 + $0x38] sm:$0xff]  }
 0x478   :  { %5641 = vmatpush1.bf16.msra.mxu0 %v8075_v10  ;;  %5797 = vmatprep.subr.bf16.mxu1 %v8481_v13 }
 0x479   :  { %5642 = vmatprep.subr.bf16.mxu0 %v8481_v13 }
 0x47b   :  { %5798 = vmatpush1.bf16.msra.mxu1 %v8076_v28 }
 0x47c   :  { %5643 = vmatpush1.bf16.msra.mxu0 %v8077_v31  ;;  %5799 = vmatprep.subr.bf16.mxu1 %v8481_v13 }
 0x47d   :  { %5644 = vmatprep.subr.bf16.mxu0 %v8481_v13 }
 0x47f   :  { %5800 = vmatpush1.bf16.msra.mxu1 %v8078_v35 }
 0x480   :  { %5645 = vmatpush1.bf16.msra.mxu0 %v8079_v47  ;;  %5801 = vmatprep.subr.bf16.mxu1 %v8481_v13 }
 0x481   :  { %5646 = vmatprep.subr.bf16.mxu0 %v8481_v13 }
 0x483   :  { %5802 = vmatpush1.bf16.msra.mxu1 %v8080_v3 }
 0x484   :  { %5647 = vmatpush1.bf16.msra.mxu0 %v8081_v37  ;;  %5803 = vmatprep.subr.bf16.mxu1 %v8481_v13 }
 0x485   :  { %5648 = vmatprep.subr.bf16.mxu0 %v8481_v13 }
 0x487   :  { %5804 = vmatpush1.bf16.msra.mxu1 %v8082_v32 }
 0x488   :  { %5649 = vmatpush1.bf16.msra.mxu0 %v8083_v53  ;;  %5805 = vmatprep.subr.bf16.mxu1 %v8481_v13 }
 0x489   :  { %5650 = vmatprep.subr.bf16.mxu0 %v8481_v13 }
 0x48b   :  { %5806 = vmatpush1.bf16.msra.mxu1 %v8084_v60 }
 0x48c   :  { %5651 = vmatpush1.bf16.msra.mxu0 %v8085_v38  ;;  %5807 = vmatprep.subr.bf16.mxu1 %v8481_v13 }
 0x48d   :  { %5652 = vmatprep.subr.bf16.mxu0 %v8481_v13 }
 0x48f   :  { %5808 = vmatpush1.bf16.msra.mxu1 %v8086_v61 }
 0x490   :  { %5653 = vmatpush1.bf16.msra.mxu0 %v8087_v42  ;;  %5809 = vmatprep.subr.bf16.mxu1 %v8481_v13 }
 0x491   :  { %5654 = vmatprep.subr.bf16.mxu0 %v8481_v13 }
 0x493   :  { %5810 = vmatpush1.bf16.msra.mxu1 %v8088_v44 }
 0x494   :  { %5655 = vmatpush1.bf16.msra.mxu0 %v8089_v21  ;;  %5811 = vmatprep.subr.bf16.mxu1 %v8481_v13 }
 0x495   :  { %5656 = vmatprep.subr.bf16.mxu0 %v8481_v13 }
 0x497   :  { %5812 = vmatpush1.bf16.msra.mxu1 %v8090_v14 }
 0x498   :  { %5657 = vmatpush1.bf16.msra.mxu0 %v8091_v56  ;;  %5813 = vmatprep.subr.bf16.mxu1 %v8481_v13 }
 0x499   :  { %5658 = vmatprep.subr.bf16.mxu0 %v8481_v13 }
 0x49b   :  { %5814 = vmatpush1.bf16.msra.mxu1 %v8092_v30 }
 0x49c   :  { %5659 = vmatpush1.bf16.msra.mxu0 %v8093_v26  ;;  %5815 = vmatprep.subr.bf16.mxu1 %v8481_v13 }
 0x49d   :  { %5950 = vmatprep.subr.bf16.mxu0 %v8481_v13 }
 0x49f   :  { %5665 = vmatmul.mubr.bf16.vlgmr.msra.gmra.mrb[40].mxu0 %v5514_v11  ;;  %5816 = vmatpush1.bf16.msra.mxu1 %v8094_v34 }
 0x4a0   :  { %5951 = vmatpush1.bf16.msra.mxu0 %v8095_v4  ;;  %6871 = vmatprep.mubr.msk.bf16.mxu0 %vm5025_vm1, %v5833_v63 }
 0x4a1   :  { %5817 = vmatprep.subr.bf16.mxu1 %v8481_v13  ;;  %5952 = vmatprep.subr.bf16.mxu0 %v8481_v13 }
 0x4a3   :  { %5818 = vmatpush1.bf16.msra.mxu1 %v8096_v55 }
 0x4a4   :  { %5953 = vmatpush1.bf16.msra.mxu0 %v8097_v40  ;;  %6891 = vmatprep.subr.bf16.mxu1 %v8482_v39 }
 0x4a5   :  { %5954 = vmatprep.subr.bf16.mxu0 %v8481_v13 }
 0x4a6   :  { %5824 = vmatmul.mubr.bf16.vlgmr.msra.gmra.mrb[40].mxu1 %v5673_v52 }
 0x4a7   :  { %6892 = vmatpush3.bf16.msra.mxu1 %v8110_v23  ;;  %6907 = vmatprep.mubr.msk.bf16.mxu1 %vm8483_vm2, %v8482_v39 }
 0x4a8   :  { %5955 = vmatpush1.bf16.msra.mxu0 %v8098_v7  ;;  %6893 = vmatprep.subr.bf16.mxu1 %v8482_v39  ;;  %v6873_v7 = vld [vmem:[%s11844_s8] ss:$0 sm:$0xff] }
 0x4a9   :  { %5956 = vmatprep.subr.bf16.mxu0 %v8481_v13 }
 0x4ab   :  { %6894 = vmatpush3.bf16.msra.mxu1 %v8111_v51 }
 0x4ac   :  { %5957 = vmatpush1.bf16.msra.mxu0 %v8099_v48  ;;  %6895 = vmatprep.subr.bf16.mxu1 %v8482_v39 }
 0x4ad   :  { %5958 = vmatprep.subr.bf16.mxu0 %v8481_v13 }
 0x4af   :  { %6896 = vmatpush3.bf16.msra.mxu1 %v8112_v6 }
 0x4b0   :  { %5959 = vmatpush1.bf16.msra.mxu0 %v8100_v2  ;;  %6897 = vmatprep.subr.bf16.mxu1 %v8482_v39 }
 0x4b1   :  { %5960 = vmatprep.subr.bf16.mxu0 %v8481_v13 }
 0x4b3   :  { %6898 = vmatpush3.bf16.msra.mxu1 %v8113_v58 }
 0x4b4   :  { %5961 = vmatpush1.bf16.msra.mxu0 %v8101_v57  ;;  %6899 = vmatprep.subr.bf16.mxu1 %v8482_v39 }
 0x4b5   :  { %5962 = vmatprep.subr.bf16.mxu0 %v8481_v13 }
 0x4b7   :  { %6900 = vmatpush3.bf16.msra.mxu1 %v8114_v17 }
 0x4b8   :  { %5963 = vmatpush1.bf16.msra.mxu0 %v8102_v22  ;;  %6901 = vmatprep.subr.bf16.mxu1 %v8482_v39 }
 0x4b9   :  { %5964 = vmatprep.subr.bf16.mxu0 %v8481_v13 }
 0x4bb   :  { %6902 = vmatpush3.bf16.msra.mxu1 %v8115_v54 }
 0x4bc   :  { %5965 = vmatpush1.bf16.msra.mxu0 %v8103_v36  ;;  %6903 = vmatprep.subr.bf16.mxu1 %v8482_v39 }
 0x4bd   :  { %5966 = vmatprep.subr.bf16.mxu0 %v8481_v13 }
 0x4bf   :  { %6904 = vmatpush3.bf16.msra.mxu1 %v8116_v18 }
 0x4c0   :  { %5967 = vmatpush1.bf16.msra.mxu0 %v8104_v9  ;;  %6905 = vmatprep.subr.bf16.mxu1 %v8482_v39 }
 0x4c1   :  { %5968 = vmatprep.subr.bf16.mxu0 %v8481_v13 }
 0x4c3   :  { %6906 = vmatpush3.bf16.msra.mxu1 %v8117_v41 }
 0x4c4   :  { %5969 = vmatpush1.bf16.msra.mxu0 %v8105_v15 }
 0x4c5   :  { %5970 = vmatprep.subr.bf16.mxu0 %v8481_v13 }
 0x4c8   :  { %5971 = vmatpush1.bf16.msra.mxu0 %v8106_v20 }
 0x4c9   :  { %5972 = vmatprep.subr.bf16.mxu0 %v8481_v13 }
 0x4cc   :  { %5973 = vmatpush1.bf16.msra.mxu0 %v8107_v25 }
 0x4cd   :  { %5974 = vmatprep.subr.bf16.mxu0 %v8481_v13 }
 0x4d0   :  { %5975 = vmatpush1.bf16.msra.mxu0 %v8108_v49 }
 0x4d1   :  { %5976 = vmatprep.subr.bf16.mxu0 %v8481_v13 }
 0x4d4   :  { %5977 = vmatpush1.bf16.msra.mxu0 %v8109_v50 }
 0x4d7   :  { %5983 = vmatmul.mubr.bf16.vlgmr.msra.gmra.mrb[44].mxu0 %v5832_v19 }
 0x501   :  { %v5063_v0 = vpop.f32.mrb[32].mxu0 }
 0x502   :  { %v5065_v24 = vpop.f32.mrb[33].mxu0 }
 0x503   :  { %v5066_v13 = vpop.f32.mrb[34].mxu0 }
 0x504   :  { %v5067_v12 = vpop.f32.mrb[35].mxu0 }
 0x509   :  { %v5190_v1 = vpop.f32.mrb[32].mxu1 }
 0x50a   :  { %v5191_v43 = vadd.f32 %v5190_v1, %v5063_v0  ;;  %v5192_v29 = vpop.f32.mrb[33].mxu1 }
 0x50b   :  { %v5193_v62 = vpop.f32.mrb[34].mxu1 }
 0x50c   :  { %v5194_v8 = vpop.f32.mrb[35].mxu1 }
 0x539   :  { %v5348_v10 = vpop.f32.mrb[36].mxu0 }
 0x53a   :  { %v5354_v28 = vadd.f32 %v5348_v10, %v5191_v43  ;;  %v5350_v31 = vpop.f32.mrb[37].mxu0 }
 0x53b   :  { %v5351_v35 = vpop.f32.mrb[38].mxu0 }
 0x53c   :  { %v5352_v47 = vpop.f32.mrb[39].mxu0 }
 0x541   :  { %v5507_v3 = vpop.f32.mrb[36].mxu1 }
 0x542   :  { %v5513_v37 = vadd.f32 %v5507_v3, %v5354_v28  ;;  %v5509_v32 = vpop.f32.mrb[37].mxu1 }
 0x543   :  { %v5510_v53 = vpop.f32.mrb[38].mxu1 }
 0x544   :  { %v5511_v60 = vpop.f32.mrb[39].mxu1 }
 0x572   :  { %v5666_v38 = vpop.f32.mrb[40].mxu0 }
 0x573   :  { %v5672_v61 = vadd.f32 %v5666_v38, %v5513_v37  ;;  %v5668_v42 = vpop.f32.mrb[41].mxu0 }
 0x574   :  { %v5669_v45 = vpop.f32.mrb[42].mxu0 }
 0x575   :  { %v5670_v44 = vpop.f32.mrb[43].mxu0 }
 0x579   :  { %v5825_v21 = vpop.f32.mrb[40].mxu1 }
 0x57a   :  { %v5831_v33 = vadd.f32 %v5825_v21, %v5672_v61  ;;  %v5827_v46 = vpop.f32.mrb[41].mxu1 }
 0x57b   :  { %v5828_v14 = vpop.f32.mrb[42].mxu1 }
 0x57c   :  { %v5829_v56 = vpop.f32.mrb[43].mxu1 }
 0x5aa   :  { %v5984_v16 = vpop.f32.mrb[44].mxu0 }
 0x5ab   :  { %v5990_v30 = vadd.f32 %v5984_v16, %v5831_v33  ;;  %v5986_v59 = vpop.f32.mrb[45].mxu0 }
 0x5ac   :  { %v5987_v26 = vpop.f32.mrb[46].mxu0 }
 0x5ad   :  { %v5998_v27 = vadd.f32 %v6872_v5, %v5990_v30  ;;  %v5988_v34 = vpop.f32.mrb[47].mxu0 }
 0x5af   :  { %v6006_v4 = vpack.c.bf16 %v5998_v27, %v5998_v27  ;;  %v5999_v11 = vmul.f32 %v5998_v27, %v5998_v27 }
 0x5b1   :  { %6908 = vmatmul.mubr.bf16.vlgmr.msra.gmra.mrb[44].mxu1 %v6006_v4  ;;  %6000 = vadd.xlane.f32.xlu1 %v5999_v11 }
 0x63e   :  { %v6001_v63 = vpop.xlane.xlu1 %6000 }
 0x63f   :  { %v6002_v55 = vmax.f32 %v6001_v63, 1e-24 }
 0x641   :  { %8118 = vrsqrt.f32 %v6002_v55 }
 0x64b   :  { %v8119_v40 = vpop.eup %8118 }
 0x64c   :  { %v6004_v52 = vmul.f32 %v8119_v40, %v5998_v27 }
 0x64e   :  { %6005 = vst [vmem:[%s11843_s10] sm:$0xff] %v6004_v52 }
 0x684   :  { %v6112_v48 = vpop.f32.mrb[44].mxu1 }
 0x685   :  { %v6113_v2 = vadd.f32 %v6873_v7, %v6112_v48  ;;  %v6909_v57 = vpop.f32.mrb[45].mxu1 }
 0x686   :  { %v6115_v22 = vpop.f32.mrb[46].mxu1 }
 0x687   :  { %6118 = vst [vmem:[%s11845_s9] sm:$0xff] %v6113_v2  ;;  %v6910_v36 = vpop.f32.mrb[47].mxu1 }

</bundles_post_ra>
